<compile_context>
chip_gen: v7x
topology: tpu7x:2x2x1
jax: 0.10.0
libtpu: 0.0.40
codegen_flags: <defaults>
</compile_context>

<pallas_src>
import functools
import math

import jax
import jax.numpy as jnp
from jax import lax
from jax.experimental import pallas as pl
from jax.experimental.pallas import tpu as pltpu

MATMUL_DTYPE = jnp.bfloat16          # MXU input dtype; accumulation is always f32
DEFAULT_TILE_BYTES = 2 << 20         # ~2 MiB per f32 input block (fits v5e's 16 MiB scoped VMEM)
EA_SINGLE_TILE_MAX = 1024            # N up to this -> single-block EA per batch element


def _cdiv(a, b):
    return (a + b - 1) // b


def _round_up(x, m):
    return _cdiv(x, m) * m


def _lane_tile(n, rows, target_bytes=DEFAULT_TILE_BYTES, cap=4096):
    """Pick a lane tile for a [rows, n] f32 block.  Returns (n_padded, tile)."""
    if n <= 256:
        return n, n                              # single full-extent block (no 128 constraint)
    t = (target_bytes // (4 * max(rows, 1))) // 128 * 128
    t = int(max(128, min(t, cap)))
    t = min(t, _round_up(_cdiv(n, 2), 128))      # >=2 grid steps so both v7x TCs get work
    return _round_up(n, t), t


# ----------------------------------------------------------------------------
# Pallas kernels (all channel-first: channels on sublanes, points on lanes)
# ----------------------------------------------------------------------------
def fused_mlp_cf(x, layers, *, target_bytes=DEFAULT_TILE_BYTES):
    """x [B, Cin, N] -> chain of (1x1 conv + folded BN + ReLU) -> [B, Cout, N]."""
    B, Cin, N = x.shape
    Cout = layers[-1][0].shape[0]
    Npad, tn = _lane_tile(N, Cin, target_bytes)
    xp = x if Npad == N else jnp.pad(x, ((0, 0), (0, 0), (0, Npad - N)))
    n_layers = len(layers)

    def kernel(x_ref, *refs):
        o_ref = refs[-1]
        h = x_ref[0]                                              # [Cin, tn] f32
        for li in range(n_layers):
            wT = refs[2 * li][...]                                # [Cout_l, Cin_l] bf16
            b = refs[2 * li + 1][...]                             # [Cout_l, 1] f32
            h = jnp.maximum(
                jnp.dot(wT, h.astype(MATMUL_DTYPE),
                        preferred_element_type=jnp.float32) + b, 0.0)
        o_ref[0] = h

    in_specs = [pl.BlockSpec((1, Cin, tn), lambda b, t: (b, 0, t))]
    operands = [xp]
    for (wT, bias) in layers:
        co, ci = wT.shape
        in_specs.append(pl.BlockSpec((co, ci), lambda b, t: (0, 0)))
        in_specs.append(pl.BlockSpec((co, 1), lambda b, t: (0, 0)))
        operands.append(wT)
        operands.append(bias)

    out = pl.pallas_call(
        kernel,
        out_shape=jax.ShapeDtypeStruct((B, Cout, Npad), jnp.float32),
        grid=(B, Npad // tn),
        in_specs=in_specs,
        out_specs=pl.BlockSpec((1, Cout, tn), lambda b, t: (b, 0, t)),
        compiler_params=pltpu.CompilerParams(
            dimension_semantics=("parallel", "parallel")),
    )(*operands)
    return out[:, :, :N] if Npad != N else out


def sa_mlp_maxpool_cf(new_points, layers, *, target_bytes=DEFAULT_TILE_BYTES):
    """new_points [B, ns, Cin, S] -> per-point MLP(+ReLU) -> max over ns -> [B, Cout, S]."""
    B, ns, Cin, S = new_points.shape
    Cout = layers[-1][0].shape[0]
    Spad, ts = _lane_tile(S, ns * Cin, target_bytes)
    xp = (new_points if Spad == S
          else jnp.pad(new_points, ((0, 0), (0, 0), (0, 0), (0, Spad - S))))
    n_layers = len(layers)

    def kernel(x_ref, *refs):
        o_ref = refs[-1]
        acc = None
        for j in range(ns):                                       # unrolled: ns small
            h = x_ref[0, j]                                       # contiguous [Cin, ts] slice
            for li in range(n_layers):
                wT = refs[2 * li][...]
                b = refs[2 * li + 1][...]
                h = jnp.maximum(
                    jnp.dot(wT, h.astype(MATMUL_DTYPE),
                            preferred_element_type=jnp.float32) + b, 0.0)
            acc = h if acc is None else jnp.maximum(acc, h)
        o_ref[0] = acc

    in_specs = [pl.BlockSpec((1, ns, Cin, ts), lambda b, s: (b, 0, 0, s))]
    operands = [xp]
    for (wT, bias) in layers:
        co, ci = wT.shape
        in_specs.append(pl.BlockSpec((co, ci), lambda b, s: (0, 0)))
        in_specs.append(pl.BlockSpec((co, 1), lambda b, s: (0, 0)))
        operands.append(wT)
        operands.append(bias)

    out = pl.pallas_call(
        kernel,
        out_shape=jax.ShapeDtypeStruct((B, Cout, Spad), jnp.float32),
        grid=(B, Spad // ts),
        in_specs=in_specs,
        out_specs=pl.BlockSpec((1, Cout, ts), lambda b, s: (b, 0, s)),
        compiler_params=pltpu.CompilerParams(
            dimension_semantics=("parallel", "parallel")),
    )(*operands)
    return out[:, :, :S] if Spad != S else out


def external_attention_cf(x, mkT, mvT):
    """External Attention, channel-first.  x [B,C,N]; mkT [S,C] bf16; mvT [C,S] bf16 -> [B,C,N]."""
    B, C, N = x.shape
    S = mkT.shape[0]

    def _softmax_over_s(mk, xb):
        attn = jnp.dot(mk, xb, preferred_element_type=jnp.float32)        # [S, n]
        attn = attn - jnp.max(attn, axis=0, keepdims=True)
        e = jnp.exp(attn)
        return e / jnp.sum(e, axis=0, keepdims=True)                      # softmax over S

    if N <= EA_SINGLE_TILE_MAX:
        # Whole point axis in one VMEM block per batch element.
        def kernel(x_ref, mk_ref, mv_ref, o_ref):
            sm = _softmax_over_s(mk_ref[...], x_ref[0].astype(MATMUL_DTYPE))
            attn2 = sm / (1e-9 + jnp.sum(sm, axis=1, keepdims=True))      # normalize over N
            o_ref[0] = jnp.dot(mv_ref[...], attn2.astype(MATMUL_DTYPE),
                               preferred_element_type=jnp.float32)

        return pl.pallas_call(
            kernel,
            out_shape=jax.ShapeDtypeStruct((B, C, N), jnp.float32),
            grid=(B,),
            in_specs=[pl.BlockSpec((1, C, N), lambda b: (b, 0, 0)),
                      pl.BlockSpec((S, C), lambda b: (0, 0)),
                      pl.BlockSpec((C, S), lambda b: (0, 0))],
            out_specs=pl.BlockSpec((1, C, N), lambda b: (b, 0, 0)),
            compiler_params=pltpu.CompilerParams(dimension_semantics=("parallel",)),
        )(x, mkT, mvT)

    # Large N: two tiled passes so VMEM stays bounded on every TPU generation.
    Npad, tn = _lane_tile(N, C, 1 << 20)
    xp = x if Npad == N else jnp.pad(x, ((0, 0), (0, 0), (0, Npad - N)))
    nt = Npad // tn

    def colsum_kernel(x_ref, mk_ref, cs_ref):
        t = pl.program_id(1)

        @pl.when(t == 0)
        def _():
            cs_ref[0] = jnp.zeros((S, 1), jnp.float32)

        sm = _softmax_over_s(mk_ref[...], x_ref[0].astype(MATMUL_DTYPE))
        if Npad != N:
            lane = lax.broadcasted_iota(jnp.int32, sm.shape, 1)
            sm = jnp.where(t * tn + lane < N, sm, 0.0)
        cs_ref[0] += jnp.sum(sm, axis=1, keepdims=True)

    colsum = pl.pallas_call(
        colsum_kernel,
        out_shape=jax.ShapeDtypeStruct((B, S, 1), jnp.float32),
        grid=(B, nt),
        in_specs=[pl.BlockSpec((1, C, tn), lambda b, t: (b, 0, t)),
                  pl.BlockSpec((S, C), lambda b, t: (0, 0))],
        out_specs=pl.BlockSpec((1, S, 1), lambda b, t: (b, 0, 0)),
        compiler_params=pltpu.CompilerParams(
            dimension_semantics=("parallel", "arbitrary")),
    )(xp, mkT)

    def apply_kernel(x_ref, cs_ref, mk_ref, mv_ref, o_ref):
        sm = _softmax_over_s(mk_ref[...], x_ref[0].astype(MATMUL_DTYPE))
        attn2 = sm / (1e-9 + cs_ref[0])
        o_ref[0] = jnp.dot(mv_ref[...], attn2.astype(MATMUL_DTYPE),
                           preferred_element_type=jnp.float32)

    out = pl.pallas_call(
        apply_kernel,
        out_shape=jax.ShapeDtypeStruct((B, C, Npad), jnp.float32),
        grid=(B, nt),
        in_specs=[pl.BlockSpec((1, C, tn), lambda b, t: (b, 0, t)),
                  pl.BlockSpec((1, S, 1), lambda b, t: (b, 0, 0)),
                  pl.BlockSpec((S, C), lambda b, t: (0, 0)),
                  pl.BlockSpec((C, S), lambda b, t: (0, 0))],
        out_specs=pl.BlockSpec((1, C, tn), lambda b, t: (b, 0, t)),
        compiler_params=pltpu.CompilerParams(
            dimension_semantics=("parallel", "parallel")),
    )(xp, colsum, mkT, mvT)
    return out[:, :, :N] if Npad != N else out


def fused_heads_cf(feat, p11, p12, p21, p22):
    """feat [B,16,N] -> (log-softmax class scores [B,ncls,N], shift vectors [B,nsh,N])."""
    B, C, N = feat.shape
    ncls = p12[0].shape[0]
    nsh = p22[0].shape[0]
    Npad, tn = _lane_tile(N, C, DEFAULT_TILE_BYTES)
    xp = feat if Npad == N else jnp.pad(feat, ((0, 0), (0, 0), (0, Npad - N)))

    def kernel(x_ref, w11, b11, w12, b12, w21, b21, w22, b22, o1_ref, o2_ref):
        xb = x_ref[0].astype(MATMUL_DTYPE)                                   # [16, tn]
        # head 1: conv11+bn1+relu -> conv12 -> log_softmax over channels (sublanes)
        h1 = jnp.maximum(
            jnp.dot(w11[...], xb, preferred_element_type=jnp.float32) + b11[...], 0.0)
        l1 = jnp.dot(w12[...], h1.astype(MATMUL_DTYPE),
                     preferred_element_type=jnp.float32) + b12[...]
        s = l1 - jnp.max(l1, axis=0, keepdims=True)
        o1_ref[0] = s - jnp.log(jnp.sum(jnp.exp(s), axis=0, keepdims=True))
        # head 2: conv21+bn2+relu -> conv22
        h2 = jnp.maximum(
            jnp.dot(w21[...], xb, preferred_element_type=jnp.float32) + b21[...], 0.0)
        o2_ref[0] = jnp.dot(w22[...], h2.astype(MATMUL_DTYPE),
                            preferred_element_type=jnp.float32) + b22[...]

    def wspecs(p):
        co, ci = p[0].shape
        return [pl.BlockSpec((co, ci), lambda b, t: (0, 0)),
                pl.BlockSpec((co, 1), lambda b, t: (0, 0))]

    in_specs = [pl.BlockSpec((1, C, tn), lambda b, t: (b, 0, t))]
    operands = [xp]
    for p in (p11, p12, p21, p22):
        in_specs += wspecs(p)
        operands += [p[0], p[1]]

    o1, o2 = pl.pallas_call(
        kernel,
        out_shape=(jax.ShapeDtypeStruct((B, ncls, Npad), jnp.float32),
                   jax.ShapeDtypeStruct((B, nsh, Npad), jnp.float32)),
        grid=(B, Npad // tn),
        in_specs=in_specs,
        out_specs=(pl.BlockSpec((1, ncls, tn), lambda b, t: (b, 0, t)),
                   pl.BlockSpec((1, nsh, tn), lambda b, t: (b, 0, t))),
        compiler_params=pltpu.CompilerParams(
            dimension_semantics=("parallel", "parallel")),
    )(*operands)
    if Npad != N:
        o1, o2 = o1[:, :, :N], o2[:, :, :N]
    return o1, o2


# ----------------------------------------------------------------------------
# Plain-JAX glue (data-dependent sampling / grouping / interpolation)
# ----------------------------------------------------------------------------
def square_distance(src, dst):
    """src [B,n,D], dst [B,m,D] -> [B,n,m]."""
    return jnp.sum((src[:, :, None, :] - dst[:, None, :, :]) ** 2, axis=-1)


def index_points(points, idx):
    """Channel-last gather: points [B,N,D], idx [B,...] -> [B,...,D]."""
    B = points.shape[0]
    batch_idx = jnp.arange(B).reshape((B,) + (1,) * (idx.ndim - 1))
    return points[batch_idx, idx]


def farthest_point_sample(xyz_t, npoint):
    # TODO(synk): original torch impl starts from a random point; start at 0 for determinism.
    B, N, _ = xyz_t.shape

    def body(i, state):
        centroids, distance, farthest = state
        centroids = centroids.at[:, i].set(farthest)
        centroid = index_points(xyz_t, farthest[:, None])           # [B,1,D]
        dist = jnp.sum((xyz_t - centroid) ** 2, axis=-1)
        distance = jnp.minimum(distance, dist)
        farthest = jnp.argmax(distance, axis=-1).astype(jnp.int32)
        return centroids, distance, farthest

    centroids = jnp.zeros((B, npoint), jnp.int32)
    distance = jnp.full((B, N), 1e10, jnp.float32)
    farthest = jnp.zeros((B,), jnp.int32)
    centroids, _, _ = lax.fori_loop(0, npoint, body, (centroids, distance, farthest))
    return centroids


def query_ball_point(radius, nsample, xyz_t, new_xyz_t):
    B, N, _ = xyz_t.shape
    S = new_xyz_t.shape[1]
    sqr = square_distance(new_xyz_t, xyz_t)
    group_idx = jnp.broadcast_to(jnp.arange(N, dtype=jnp.int32), (B, S, N))
    group_idx = jnp.where(sqr > radius ** 2, N, group_idx)
    group_idx = jnp.sort(group_idx, axis=-1)[:, :, :nsample]
    group_first = jnp.broadcast_to(group_idx[:, :, :1], group_idx.shape)
    group_idx = jnp.where(group_idx == N, group_first, group_idx)
    return group_idx


def group_points_cf(points, idx):
    """Channel-first gather: points [B,C,N], idx [B,S,ns] -> [B,ns,C,S]."""
    B, C, _ = points.shape
    b_ix = jnp.arange(B)[:, None, None, None]
    c_ix = jnp.arange(C)[None, None, :, None]
    n_ix = jnp.transpose(idx, (0, 2, 1))[:, :, None, :]
    return points[b_ix, c_ix, n_ix]


# ----------------------------------------------------------------------------
# Module blocks (all channel-first [B, C, N])
# ----------------------------------------------------------------------------
def set_abstraction(xyz, points, npoint, radius, nsample, mlp_params):
    xyz_t = jnp.transpose(xyz, (0, 2, 1))                           # [B,N,D] (D small)
    fps_idx = farthest_point_sample(xyz_t, npoint)                  # [B,S]
    new_xyz = jnp.take_along_axis(xyz, fps_idx[:, None, :], axis=2) # [B,D,S]
    new_xyz_t = jnp.transpose(new_xyz, (0, 2, 1))
    idx = query_ball_point(radius, nsample, xyz_t, new_xyz_t)       # [B,S,ns]

    grouped_xyz_norm = group_points_cf(xyz, idx) - new_xyz[:, None, :, :]   # [B,ns,D,S]
    grouped_points = group_points_cf(points, idx)                            # [B,ns,Cp,S]
    new_points = jnp.concatenate([grouped_xyz_norm, grouped_points], axis=2)  # [B,ns,D+Cp,S]

    pooled = sa_mlp_maxpool_cf(new_points, mlp_params)              # [B,Cout,S]
    return new_xyz, pooled


def feature_propagation(xyz1, xyz2, points1, points2, mlp_params):
    """xyz1 [B,D,N], xyz2 [B,D,S], points1 [B,C1,N] or None, points2 [B,C2,S] -> [B,Cout,N]."""
    B, _, N = xyz1.shape
    S = xyz2.shape[2]
    C2 = points2.shape[1]

    if S == 1:
        interpolated = jnp.broadcast_to(points2, (B, C2, N))
    else:
        xyz1_t = jnp.transpose(xyz1, (0, 2, 1))
        xyz2_t = jnp.transpose(xyz2, (0, 2, 1))
        dists = square_distance(xyz1_t, xyz2_t)                     # [B,N,S]
        idx = jnp.argsort(dists, axis=-1)[:, :, :3]                 # [B,N,3]
        d3 = jnp.take_along_axis(dists, idx, axis=-1)
        dist_recip = 1.0 / (d3 + 1e-8)
        weight = dist_recip / jnp.sum(dist_recip, axis=2, keepdims=True)   # [B,N,3]
        b_ix = jnp.arange(B)[:, None, None, None]
        c_ix = jnp.arange(C2)[None, :, None, None]
        gathered = points2[b_ix, c_ix, idx[:, None, :, :]]          # [B,C2,N,3]
        interpolated = jnp.sum(gathered * weight[:, None, :, :], axis=-1)   # [B,C2,N]

    if points1 is not None:
        new_points = jnp.concatenate([points1, interpolated], axis=1)
    else:
        new_points = interpolated
    return fused_mlp_cf(new_points, mlp_params)


# ----------------------------------------------------------------------------
# Parameters (deterministic synthetic init; eval-mode BN folded into conv;
# weights pre-transposed to [Cout, Cin] and pre-cast to bf16, biases [Cout, 1] f32)
# ----------------------------------------------------------------------------
def _init_linear(key, cin, cout, bias=True):
    k1, k2 = jax.random.split(key)
    bound = 1.0 / math.sqrt(cin)
    w = jax.random.uniform(k1, (cin, cout), jnp.float32, -bound, bound)
    b = (jax.random.uniform(k2, (cout,), jnp.float32, -bound, bound)
         if bias else jnp.zeros((cout,), jnp.float32))
    return w, b


def _pack(w, b):
    return w.T.astype(MATMUL_DTYPE), b.reshape(-1, 1).astype(jnp.float32)


def _init_conv_bn(key, cin, cout):
    k1, k2, k3 = jax.random.split(key, 3)
    w, b = _init_linear(k1, cin, cout, bias=True)
    gamma = jax.random.uniform(k2, (cout,), jnp.float32, 0.5, 1.5)
    beta = jax.random.uniform(k3, (cout,), jnp.float32, -0.1, 0.1)
    scale = gamma / jnp.sqrt(1.0 + 1e-5)         # running_var=1, running_mean=0 (eval)
    return _pack(w * scale[None, :], b * scale + beta)


def build_params(key, dataset_D, dataset_C, num_class, ns1):
    keys = list(jax.random.split(key, 64))
    ki = iter(keys)

    def mlp(cin, widths):
        out = []
        for cout in widths:
            out.append(_init_conv_bn(next(ki), cin, cout))
            cin = cout
        return out

    def ea(c, s=64):
        mk, _ = _init_linear(next(ki), c, s, bias=False)    # [C,S]
        mv, _ = _init_linear(next(ki), s, c, bias=False)    # [S,C]
        return mk.T.astype(MATMUL_DTYPE), mv.T.astype(MATMUL_DTYPE)   # ([S,C], [C,S])

    p = {}
    p["sa1"] = mlp(dataset_C + dataset_D, [ns1, 32, 64])
    p["ea1"] = ea(64)
    p["sa2"] = mlp(64 + dataset_D, [64, 128, 256])
    p["ea2"] = ea(256)
    p["fp2"] = mlp(256 + 64, [64, 32])
    p["ea3"] = ea(32)
    p["fp1"] = mlp(32 + dataset_C, [32, 32, 16])
    p["ea4"] = ea(16)
    p["conv11"] = _init_conv_bn(next(ki), 16, 16)            # conv11 + bn1 folded
    p["conv12"] = _pack(*_init_linear(next(ki), 16, num_class))
    p["conv21"] = _init_conv_bn(next(ki), 16, 16)            # conv21 + bn2 folded
    p["conv22"] = _pack(*_init_linear(next(ki), 16, dataset_D + dataset_C))
    return p


# ----------------------------------------------------------------------------
# Full forward (dropout = identity in eval)
# ----------------------------------------------------------------------------
def model_forward(xyz, params, *, dataset_D, cfg):
    l0_points = xyz[:, dataset_D:, :]                         # [B, C, N]
    l0_xyz = xyz[:, :dataset_D, :]                            # [B, D, N]

    l1_xyz, l1_points = set_abstraction(
        l0_xyz, l0_points, cfg["np1"], cfg["r1"], cfg["ns1"], params["sa1"])
    l1_points = external_attention_cf(l1_points, *params["ea1"])

    l2_xyz, l2_points = set_abstraction(
        l1_xyz, l1_points, cfg["np2"], cfg["r2"], cfg["ns2"], params["sa2"])
    l2_points = external_attention_cf(l2_points, *params["ea2"])

    l1_points = feature_propagation(l1_xyz, l2_xyz, l1_points, l2_points, params["fp2"])
    l1_points = external_attention_cf(l1_points, *params["ea3"])

    l0_points = feature_propagation(l0_xyz, l1_xyz, l0_points, l1_points, params["fp1"])
    l0_points = external_attention_cf(l0_points, *params["ea4"])     # [B,16,N]

    sem_cf, shift_cf = fused_heads_cf(l0_points, params["conv11"], params["conv12"],
                                      params["conv21"], params["conv22"])
    pred_sem_mat = jnp.transpose(sem_cf, (0, 2, 1))                   # [B, N, num_class]
    pred_center_shift_vectors = jnp.transpose(shift_cf, (0, 2, 1))    # [B, N, D+C]
    return pred_sem_mat, pred_center_shift_vectors


# ----------------------------------------------------------------------------
if __name__ == "__main__":
    B, N = 2, 64
    dataset_D, dataset_C, num_class = 3, 2, 5
    cfg = {"np1": 16, "r1": 0.8, "ns1": 8,
           "np2": 4, "r2": 1.6, "ns2": 8}

    key = jax.random.PRNGKey(0)
    kp, kx = jax.random.split(key)
    params = build_params(kp, dataset_D, dataset_C, num_class, cfg["ns1"])
    xyz = jax.random.normal(kx, (B, dataset_D + dataset_C, N), jnp.float32)

    fwd = jax.jit(functools.partial(model_forward, dataset_D=dataset_D, cfg=cfg))
    pred_sem, pred_shift = fwd(xyz, params)
    jax.block_until_ready((pred_sem, pred_shift))

    assert pred_sem.shape == (B, N, num_class)
    assert pred_shift.shape == (B, N, dataset_D + dataset_C)
    assert bool(jnp.all(jnp.isfinite(pred_sem))) and bool(jnp.all(jnp.isfinite(pred_shift)))
    print("KERNEL_OK")
</pallas_src>

<mosaic_0001>
module attributes {stable_mosaic.version = 11 : i64} {
  func.func @kernel(%arg0: i32, %arg1: i32, %arg2: memref<1x8x5x16xf32, #tpu.memory_space<vmem>>, %arg3: memref<8x5xbf16, #tpu.memory_space<vmem>>, %arg4: memref<8x1xf32, #tpu.memory_space<vmem>>, %arg5: memref<32x8xbf16, #tpu.memory_space<vmem>>, %arg6: memref<32x1xf32, #tpu.memory_space<vmem>>, %arg7: memref<64x32xbf16, #tpu.memory_space<vmem>>, %arg8: memref<64x1xf32, #tpu.memory_space<vmem>>, %arg9: memref<1x64x16xf32, #tpu.memory_space<vmem>>) attributes {dimension_semantics = [#tpu.dimension_semantics<parallel>, #tpu.dimension_semantics<parallel>], iteration_bounds = array<i64: 2, 1>, scalar_prefetch = 0 : i64, scratch_operands = 0 : i64, tpu.core_type = #tpu.core_type<tc>, window_params = [{transform_indices = @transform_0, window_bounds = array<i64: 1, 8, 5, 16>}, {pipeline_mode = #tpu.pipeline_mode<synchronous>, transform_indices = @transform_1, window_bounds = array<i64: 8, 5>}, {pipeline_mode = #tpu.pipeline_mode<synchronous>, transform_indices = @transform_2, window_bounds = array<i64: 8, 1>}, {pipeline_mode = #tpu.pipeline_mode<synchronous>, transform_indices = @transform_3, window_bounds = array<i64: 32, 8>}, {pipeline_mode = #tpu.pipeline_mode<synchronous>, transform_indices = @transform_4, window_bounds = array<i64: 32, 1>}, {pipeline_mode = #tpu.pipeline_mode<synchronous>, transform_indices = @transform_5, window_bounds = array<i64: 64, 32>}, {pipeline_mode = #tpu.pipeline_mode<synchronous>, transform_indices = @transform_6, window_bounds = array<i64: 64, 1>}, {transform_indices = @transform_7, window_bounds = array<i64: 1, 64, 16>}]} {
    %c0 = arith.constant 0 : index
    %c0_0 = arith.constant 0 : index
    %c0_1 = arith.constant 0 : index
    %c0_2 = arith.constant 0 : index
    %0 = vector.load %arg2[%c0, %c0_0, %c0_1, %c0_2] : memref<1x8x5x16xf32, #tpu.memory_space<vmem>>, vector<1x1x5x16xf32>
    %1 = vector.shape_cast %0 : vector<1x1x5x16xf32> to vector<5x16xf32>
    %c0_3 = arith.constant 0 : index
    %c0_4 = arith.constant 0 : index
    %2 = vector.load %arg3[%c0_3, %c0_4] : memref<8x5xbf16, #tpu.memory_space<vmem>>, vector<8x5xbf16>
    %c0_5 = arith.constant 0 : index
    %c0_6 = arith.constant 0 : index
    %3 = vector.load %arg4[%c0_5, %c0_6] : memref<8x1xf32, #tpu.memory_space<vmem>>, vector<8x1xf32>
    %4 = arith.truncf %1 : vector<5x16xf32> to vector<5x16xbf16>
    %cst = arith.constant dense<0.000000e+00> : vector<8x16xf32>
    %5 = tpu.matmul %2, %4, %cst {dimension_numbers = #tpu.dot_dimension_numbers<[1], [0], [0], [1], [0, 0, 1, 1], [], []>} : vector<8x5xbf16>, vector<5x16xbf16>, vector<8x16xf32> -> vector<8x16xf32>
    %6 = vector.broadcast %3 : vector<8x1xf32> to vector<8x16xf32>
    %7 = arith.addf %5, %6 : vector<8x16xf32>
    %cst_7 = arith.constant 0.000000e+00 : f32
    %8 = vector.broadcast %cst_7 : f32 to vector<8x16xf32>
    %9 = arith.maximumf %7, %8 : vector<8x16xf32>
    %c0_8 = arith.constant 0 : index
    %c0_9 = arith.constant 0 : index
    %10 = vector.load %arg5[%c0_8, %c0_9] : memref<32x8xbf16, #tpu.memory_space<vmem>>, vector<32x8xbf16>
    %c0_10 = arith.constant 0 : index
    %c0_11 = arith.constant 0 : index
    %11 = vector.load %arg6[%c0_10, %c0_11] : memref<32x1xf32, #tpu.memory_space<vmem>>, vector<32x1xf32>
    %12 = arith.truncf %9 : vector<8x16xf32> to vector<8x16xbf16>
    %cst_12 = arith.constant dense<0.000000e+00> : vector<32x16xf32>
    %13 = tpu.matmul %10, %12, %cst_12 {dimension_numbers = #tpu.dot_dimension_numbers<[1], [0], [0], [1], [0, 0, 1, 1], [], []>} : vector<32x8xbf16>, vector<8x16xbf16>, vector<32x16xf32> -> vector<32x16xf32>
    %14 = vector.broadcast %11 : vector<32x1xf32> to vector<32x16xf32>
    %15 = arith.addf %13, %14 : vector<32x16xf32>
    %cst_13 = arith.constant 0.000000e+00 : f32
    %16 = vector.broadcast %cst_13 : f32 to vector<32x16xf32>
    %17 = arith.maximumf %15, %16 : vector<32x16xf32>
    %c0_14 = arith.constant 0 : index
    %c0_15 = arith.constant 0 : index
    %18 = vector.load %arg7[%c0_14, %c0_15] : memref<64x32xbf16, #tpu.memory_space<vmem>>, vector<64x32xbf16>
    %c0_16 = arith.constant 0 : index
    %c0_17 = arith.constant 0 : index
    %19 = vector.load %arg8[%c0_16, %c0_17] : memref<64x1xf32, #tpu.memory_space<vmem>>, vector<64x1xf32>
    %20 = arith.truncf %17 : vector<32x16xf32> to vector<32x16xbf16>
    %cst_18 = arith.constant dense<0.000000e+00> : vector<64x16xf32>
    %21 = tpu.matmul %18, %20, %cst_18 {dimension_numbers = #tpu.dot_dimension_numbers<[1], [0], [0], [1], [0, 0, 1, 1], [], []>} : vector<64x32xbf16>, vector<32x16xbf16>, vector<64x16xf32> -> vector<64x16xf32>
    %22 = vector.broadcast %19 : vector<64x1xf32> to vector<64x16xf32>
    %23 = arith.addf %21, %22 : vector<64x16xf32>
    %cst_19 = arith.constant 0.000000e+00 : f32
    %24 = vector.broadcast %cst_19 : f32 to vector<64x16xf32>
    %25 = arith.maximumf %23, %24 : vector<64x16xf32>
    %c0_20 = arith.constant 0 : index
    %c1 = arith.constant 1 : index
    %c0_21 = arith.constant 0 : index
    %c0_22 = arith.constant 0 : index
    %26 = vector.load %arg2[%c0_20, %c1, %c0_21, %c0_22] : memref<1x8x5x16xf32, #tpu.memory_space<vmem>>, vector<1x1x5x16xf32>
    %27 = vector.shape_cast %26 : vector<1x1x5x16xf32> to vector<5x16xf32>
    %c0_23 = arith.constant 0 : index
    %c0_24 = arith.constant 0 : index
    %28 = vector.load %arg3[%c0_23, %c0_24] : memref<8x5xbf16, #tpu.memory_space<vmem>>, vector<8x5xbf16>
    %c0_25 = arith.constant 0 : index
    %c0_26 = arith.constant 0 : index
    %29 = vector.load %arg4[%c0_25, %c0_26] : memref<8x1xf32, #tpu.memory_space<vmem>>, vector<8x1xf32>
    %30 = arith.truncf %27 : vector<5x16xf32> to vector<5x16xbf16>
    %cst_27 = arith.constant dense<0.000000e+00> : vector<8x16xf32>
    %31 = tpu.matmul %28, %30, %cst_27 {dimension_numbers = #tpu.dot_dimension_numbers<[1], [0], [0], [1], [0, 0, 1, 1], [], []>} : vector<8x5xbf16>, vector<5x16xbf16>, vector<8x16xf32> -> vector<8x16xf32>
    %32 = vector.broadcast %29 : vector<8x1xf32> to vector<8x16xf32>
    %33 = arith.addf %31, %32 : vector<8x16xf32>
    %cst_28 = arith.constant 0.000000e+00 : f32
    %34 = vector.broadcast %cst_28 : f32 to vector<8x16xf32>
    %35 = arith.maximumf %33, %34 : vector<8x16xf32>
    %c0_29 = arith.constant 0 : index
    %c0_30 = arith.constant 0 : index
    %36 = vector.load %arg5[%c0_29, %c0_30] : memref<32x8xbf16, #tpu.memory_space<vmem>>, vector<32x8xbf16>
    %c0_31 = arith.constant 0 : index
    %c0_32 = arith.constant 0 : index
    %37 = vector.load %arg6[%c0_31, %c0_32] : memref<32x1xf32, #tpu.memory_space<vmem>>, vector<32x1xf32>
    %38 = arith.truncf %35 : vector<8x16xf32> to vector<8x16xbf16>
    %cst_33 = arith.constant dense<0.000000e+00> : vector<32x16xf32>
    %39 = tpu.matmul %36, %38, %cst_33 {dimension_numbers = #tpu.dot_dimension_numbers<[1], [0], [0], [1], [0, 0, 1, 1], [], []>} : vector<32x8xbf16>, vector<8x16xbf16>, vector<32x16xf32> -> vector<32x16xf32>
    %40 = vector.broadcast %37 : vector<32x1xf32> to vector<32x16xf32>
    %41 = arith.addf %39, %40 : vector<32x16xf32>
    %cst_34 = arith.constant 0.000000e+00 : f32
    %42 = vector.broadcast %cst_34 : f32 to vector<32x16xf32>
    %43 = arith.maximumf %41, %42 : vector<32x16xf32>
    %c0_35 = arith.constant 0 : index
    %c0_36 = arith.constant 0 : index
    %44 = vector.load %arg7[%c0_35, %c0_36] : memref<64x32xbf16, #tpu.memory_space<vmem>>, vector<64x32xbf16>
    %c0_37 = arith.constant 0 : index
    %c0_38 = arith.constant 0 : index
    %45 = vector.load %arg8[%c0_37, %c0_38] : memref<64x1xf32, #tpu.memory_space<vmem>>, vector<64x1xf32>
    %46 = arith.truncf %43 : vector<32x16xf32> to vector<32x16xbf16>
    %cst_39 = arith.constant dense<0.000000e+00> : vector<64x16xf32>
    %47 = tpu.matmul %44, %46, %cst_39 {dimension_numbers = #tpu.dot_dimension_numbers<[1], [0], [0], [1], [0, 0, 1, 1], [], []>} : vector<64x32xbf16>, vector<32x16xbf16>, vector<64x16xf32> -> vector<64x16xf32>
    %48 = vector.broadcast %45 : vector<64x1xf32> to vector<64x16xf32>
    %49 = arith.addf %47, %48 : vector<64x16xf32>
    %cst_40 = arith.constant 0.000000e+00 : f32
    %50 = vector.broadcast %cst_40 : f32 to vector<64x16xf32>
    %51 = arith.maximumf %49, %50 : vector<64x16xf32>
    %52 = arith.maximumf %25, %51 : vector<64x16xf32>
    %c0_41 = arith.constant 0 : index
    %c2 = arith.constant 2 : index
    %c0_42 = arith.constant 0 : index
    %c0_43 = arith.constant 0 : index
    %53 = vector.load %arg2[%c0_41, %c2, %c0_42, %c0_43] : memref<1x8x5x16xf32, #tpu.memory_space<vmem>>, vector<1x1x5x16xf32>
    %54 = vector.shape_cast %53 : vector<1x1x5x16xf32> to vector<5x16xf32>
    %c0_44 = arith.constant 0 : index
    %c0_45 = arith.constant 0 : index
    %55 = vector.load %arg3[%c0_44, %c0_45] : memref<8x5xbf16, #tpu.memory_space<vmem>>, vector<8x5xbf16>
    %c0_46 = arith.constant 0 : index
    %c0_47 = arith.constant 0 : index
    %56 = vector.load %arg4[%c0_46, %c0_47] : memref<8x1xf32, #tpu.memory_space<vmem>>, vector<8x1xf32>
    %57 = arith.truncf %54 : vector<5x16xf32> to vector<5x16xbf16>
    %cst_48 = arith.constant dense<0.000000e+00> : vector<8x16xf32>
    %58 = tpu.matmul %55, %57, %cst_48 {dimension_numbers = #tpu.dot_dimension_numbers<[1], [0], [0], [1], [0, 0, 1, 1], [], []>} : vector<8x5xbf16>, vector<5x16xbf16>, vector<8x16xf32> -> vector<8x16xf32>
    %59 = vector.broadcast %56 : vector<8x1xf32> to vector<8x16xf32>
    %60 = arith.addf %58, %59 : vector<8x16xf32>
    %cst_49 = arith.constant 0.000000e+00 : f32
    %61 = vector.broadcast %cst_49 : f32 to vector<8x16xf32>
    %62 = arith.maximumf %60, %61 : vector<8x16xf32>
    %c0_50 = arith.constant 0 : index
    %c0_51 = arith.constant 0 : index
    %63 = vector.load %arg5[%c0_50, %c0_51] : memref<32x8xbf16, #tpu.memory_space<vmem>>, vector<32x8xbf16>
    %c0_52 = arith.constant 0 : index
    %c0_53 = arith.constant 0 : index
    %64 = vector.load %arg6[%c0_52, %c0_53] : memref<32x1xf32, #tpu.memory_space<vmem>>, vector<32x1xf32>
    %65 = arith.truncf %62 : vector<8x16xf32> to vector<8x16xbf16>
    %cst_54 = arith.constant dense<0.000000e+00> : vector<32x16xf32>
    %66 = tpu.matmul %63, %65, %cst_54 {dimension_numbers = #tpu.dot_dimension_numbers<[1], [0], [0], [1], [0, 0, 1, 1], [], []>} : vector<32x8xbf16>, vector<8x16xbf16>, vector<32x16xf32> -> vector<32x16xf32>
    %67 = vector.broadcast %64 : vector<32x1xf32> to vector<32x16xf32>
    %68 = arith.addf %66, %67 : vector<32x16xf32>
    %cst_55 = arith.constant 0.000000e+00 : f32
    %69 = vector.broadcast %cst_55 : f32 to vector<32x16xf32>
    %70 = arith.maximumf %68, %69 : vector<32x16xf32>
    %c0_56 = arith.constant 0 : index
    %c0_57 = arith.constant 0 : index
    %71 = vector.load %arg7[%c0_56, %c0_57] : memref<64x32xbf16, #tpu.memory_space<vmem>>, vector<64x32xbf16>
    %c0_58 = arith.constant 0 : index
    %c0_59 = arith.constant 0 : index
    %72 = vector.load %arg8[%c0_58, %c0_59] : memref<64x1xf32, #tpu.memory_space<vmem>>, vector<64x1xf32>
    %73 = arith.truncf %70 : vector<32x16xf32> to vector<32x16xbf16>
    %cst_60 = arith.constant dense<0.000000e+00> : vector<64x16xf32>
    %74 = tpu.matmul %71, %73, %cst_60 {dimension_numbers = #tpu.dot_dimension_numbers<[1], [0], [0], [1], [0, 0, 1, 1], [], []>} : vector<64x32xbf16>, vector<32x16xbf16>, vector<64x16xf32> -> vector<64x16xf32>
    %75 = vector.broadcast %72 : vector<64x1xf32> to vector<64x16xf32>
    %76 = arith.addf %74, %75 : vector<64x16xf32>
    %cst_61 = arith.constant 0.000000e+00 : f32
    %77 = vector.broadcast %cst_61 : f32 to vector<64x16xf32>
    %78 = arith.maximumf %76, %77 : vector<64x16xf32>
    %79 = arith.maximumf %52, %78 : vector<64x16xf32>
    %c0_62 = arith.constant 0 : index
    %c3 = arith.constant 3 : index
    %c0_63 = arith.constant 0 : index
    %c0_64 = arith.constant 0 : index
    %80 = vector.load %arg2[%c0_62, %c3, %c0_63, %c0_64] : memref<1x8x5x16xf32, #tpu.memory_space<vmem>>, vector<1x1x5x16xf32>
    %81 = vector.shape_cast %80 : vector<1x1x5x16xf32> to vector<5x16xf32>
    %c0_65 = arith.constant 0 : index
    %c0_66 = arith.constant 0 : index
    %82 = vector.load %arg3[%c0_65, %c0_66] : memref<8x5xbf16, #tpu.memory_space<vmem>>, vector<8x5xbf16>
    %c0_67 = arith.constant 0 : index
    %c0_68 = arith.constant 0 : index
    %83 = vector.load %arg4[%c0_67, %c0_68] : memref<8x1xf32, #tpu.memory_space<vmem>>, vector<8x1xf32>
    %84 = arith.truncf %81 : vector<5x16xf32> to vector<5x16xbf16>
    %cst_69 = arith.constant dense<0.000000e+00> : vector<8x16xf32>
    %85 = tpu.matmul %82, %84, %cst_69 {dimension_numbers = #tpu.dot_dimension_numbers<[1], [0], [0], [1], [0, 0, 1, 1], [], []>} : vector<8x5xbf16>, vector<5x16xbf16>, vector<8x16xf32> -> vector<8x16xf32>
    %86 = vector.broadcast %83 : vector<8x1xf32> to vector<8x16xf32>
    %87 = arith.addf %85, %86 : vector<8x16xf32>
    %cst_70 = arith.constant 0.000000e+00 : f32
    %88 = vector.broadcast %cst_70 : f32 to vector<8x16xf32>
    %89 = arith.maximumf %87, %88 : vector<8x16xf32>
    %c0_71 = arith.constant 0 : index
    %c0_72 = arith.constant 0 : index
    %90 = vector.load %arg5[%c0_71, %c0_72] : memref<32x8xbf16, #tpu.memory_space<vmem>>, vector<32x8xbf16>
    %c0_73 = arith.constant 0 : index
    %c0_74 = arith.constant 0 : index
    %91 = vector.load %arg6[%c0_73, %c0_74] : memref<32x1xf32, #tpu.memory_space<vmem>>, vector<32x1xf32>
    %92 = arith.truncf %89 : vector<8x16xf32> to vector<8x16xbf16>
    %cst_75 = arith.constant dense<0.000000e+00> : vector<32x16xf32>
    %93 = tpu.matmul %90, %92, %cst_75 {dimension_numbers = #tpu.dot_dimension_numbers<[1], [0], [0], [1], [0, 0, 1, 1], [], []>} : vector<32x8xbf16>, vector<8x16xbf16>, vector<32x16xf32> -> vector<32x16xf32>
    %94 = vector.broadcast %91 : vector<32x1xf32> to vector<32x16xf32>
    %95 = arith.addf %93, %94 : vector<32x16xf32>
    %cst_76 = arith.constant 0.000000e+00 : f32
    %96 = vector.broadcast %cst_76 : f32 to vector<32x16xf32>
    %97 = arith.maximumf %95, %96 : vector<32x16xf32>
    %c0_77 = arith.constant 0 : index
    %c0_78 = arith.constant 0 : index
    %98 = vector.load %arg7[%c0_77, %c0_78] : memref<64x32xbf16, #tpu.memory_space<vmem>>, vector<64x32xbf16>
    %c0_79 = arith.constant 0 : index
    %c0_80 = arith.constant 0 : index
    %99 = vector.load %arg8[%c0_79, %c0_80] : memref<64x1xf32, #tpu.memory_space<vmem>>, vector<64x1xf32>
    %100 = arith.truncf %97 : vector<32x16xf32> to vector<32x16xbf16>
    %cst_81 = arith.constant dense<0.000000e+00> : vector<64x16xf32>
    %101 = tpu.matmul %98, %100, %cst_81 {dimension_numbers = #tpu.dot_dimension_numbers<[1], [0], [0], [1], [0, 0, 1, 1], [], []>} : vector<64x32xbf16>, vector<32x16xbf16>, vector<64x16xf32> -> vector<64x16xf32>
    %102 = vector.broadcast %99 : vector<64x1xf32> to vector<64x16xf32>
    %103 = arith.addf %101, %102 : vector<64x16xf32>
    %cst_82 = arith.constant 0.000000e+00 : f32
    %104 = vector.broadcast %cst_82 : f32 to vector<64x16xf32>
    %105 = arith.maximumf %103, %104 : vector<64x16xf32>
    %106 = arith.maximumf %79, %105 : vector<64x16xf32>
    %c0_83 = arith.constant 0 : index
    %c4 = arith.constant 4 : index
    %c0_84 = arith.constant 0 : index
    %c0_85 = arith.constant 0 : index
    %107 = vector.load %arg2[%c0_83, %c4, %c0_84, %c0_85] : memref<1x8x5x16xf32, #tpu.memory_space<vmem>>, vector<1x1x5x16xf32>
    %108 = vector.shape_cast %107 : vector<1x1x5x16xf32> to vector<5x16xf32>
    %c0_86 = arith.constant 0 : index
    %c0_87 = arith.constant 0 : index
    %109 = vector.load %arg3[%c0_86, %c0_87] : memref<8x5xbf16, #tpu.memory_space<vmem>>, vector<8x5xbf16>
    %c0_88 = arith.constant 0 : index
    %c0_89 = arith.constant 0 : index
    %110 = vector.load %arg4[%c0_88, %c0_89] : memref<8x1xf32, #tpu.memory_space<vmem>>, vector<8x1xf32>
    %111 = arith.truncf %108 : vector<5x16xf32> to vector<5x16xbf16>
    %cst_90 = arith.constant dense<0.000000e+00> : vector<8x16xf32>
    %112 = tpu.matmul %109, %111, %cst_90 {dimension_numbers = #tpu.dot_dimension_numbers<[1], [0], [0], [1], [0, 0, 1, 1], [], []>} : vector<8x5xbf16>, vector<5x16xbf16>, vector<8x16xf32> -> vector<8x16xf32>
    %113 = vector.broadcast %110 : vector<8x1xf32> to vector<8x16xf32>
    %114 = arith.addf %112, %113 : vector<8x16xf32>
    %cst_91 = arith.constant 0.000000e+00 : f32
    %115 = vector.broadcast %cst_91 : f32 to vector<8x16xf32>
    %116 = arith.maximumf %114, %115 : vector<8x16xf32>
    %c0_92 = arith.constant 0 : index
    %c0_93 = arith.constant 0 : index
    %117 = vector.load %arg5[%c0_92, %c0_93] : memref<32x8xbf16, #tpu.memory_space<vmem>>, vector<32x8xbf16>
    %c0_94 = arith.constant 0 : index
    %c0_95 = arith.constant 0 : index
    %118 = vector.load %arg6[%c0_94, %c0_95] : memref<32x1xf32, #tpu.memory_space<vmem>>, vector<32x1xf32>
    %119 = arith.truncf %116 : vector<8x16xf32> to vector<8x16xbf16>
    %cst_96 = arith.constant dense<0.000000e+00> : vector<32x16xf32>
    %120 = tpu.matmul %117, %119, %cst_96 {dimension_numbers = #tpu.dot_dimension_numbers<[1], [0], [0], [1], [0, 0, 1, 1], [], []>} : vector<32x8xbf16>, vector<8x16xbf16>, vector<32x16xf32> -> vector<32x16xf32>
    %121 = vector.broadcast %118 : vector<32x1xf32> to vector<32x16xf32>
    %122 = arith.addf %120, %121 : vector<32x16xf32>
    %cst_97 = arith.constant 0.000000e+00 : f32
    %123 = vector.broadcast %cst_97 : f32 to vector<32x16xf32>
    %124 = arith.maximumf %122, %123 : vector<32x16xf32>
    %c0_98 = arith.constant 0 : index
    %c0_99 = arith.constant 0 : index
    %125 = vector.load %arg7[%c0_98, %c0_99] : memref<64x32xbf16, #tpu.memory_space<vmem>>, vector<64x32xbf16>
    %c0_100 = arith.constant 0 : index
    %c0_101 = arith.constant 0 : index
    %126 = vector.load %arg8[%c0_100, %c0_101] : memref<64x1xf32, #tpu.memory_space<vmem>>, vector<64x1xf32>
    %127 = arith.truncf %124 : vector<32x16xf32> to vector<32x16xbf16>
    %cst_102 = arith.constant dense<0.000000e+00> : vector<64x16xf32>
    %128 = tpu.matmul %125, %127, %cst_102 {dimension_numbers = #tpu.dot_dimension_numbers<[1], [0], [0], [1], [0, 0, 1, 1], [], []>} : vector<64x32xbf16>, vector<32x16xbf16>, vector<64x16xf32> -> vector<64x16xf32>
    %129 = vector.broadcast %126 : vector<64x1xf32> to vector<64x16xf32>
    %130 = arith.addf %128, %129 : vector<64x16xf32>
    %cst_103 = arith.constant 0.000000e+00 : f32
    %131 = vector.broadcast %cst_103 : f32 to vector<64x16xf32>
    %132 = arith.maximumf %130, %131 : vector<64x16xf32>
    %133 = arith.maximumf %106, %132 : vector<64x16xf32>
    %c0_104 = arith.constant 0 : index
    %c5 = arith.constant 5 : index
    %c0_105 = arith.constant 0 : index
    %c0_106 = arith.constant 0 : index
    %134 = vector.load %arg2[%c0_104, %c5, %c0_105, %c0_106] : memref<1x8x5x16xf32, #tpu.memory_space<vmem>>, vector<1x1x5x16xf32>
    %135 = vector.shape_cast %134 : vector<1x1x5x16xf32> to vector<5x16xf32>
    %c0_107 = arith.constant 0 : index
    %c0_108 = arith.constant 0 : index
    %136 = vector.load %arg3[%c0_107, %c0_108] : memref<8x5xbf16, #tpu.memory_space<vmem>>, vector<8x5xbf16>
    %c0_109 = arith.constant 0 : index
    %c0_110 = arith.constant 0 : index
    %137 = vector.load %arg4[%c0_109, %c0_110] : memref<8x1xf32, #tpu.memory_space<vmem>>, vector<8x1xf32>
    %138 = arith.truncf %135 : vector<5x16xf32> to vector<5x16xbf16>
    %cst_111 = arith.constant dense<0.000000e+00> : vector<8x16xf32>
    %139 = tpu.matmul %136, %138, %cst_111 {dimension_numbers = #tpu.dot_dimension_numbers<[1], [0], [0], [1], [0, 0, 1, 1], [], []>} : vector<8x5xbf16>, vector<5x16xbf16>, vector<8x16xf32> -> vector<8x16xf32>
    %140 = vector.broadcast %137 : vector<8x1xf32> to vector<8x16xf32>
    %141 = arith.addf %139, %140 : vector<8x16xf32>
    %cst_112 = arith.constant 0.000000e+00 : f32
    %142 = vector.broadcast %cst_112 : f32 to vector<8x16xf32>
    %143 = arith.maximumf %141, %142 : vector<8x16xf32>
    %c0_113 = arith.constant 0 : index
    %c0_114 = arith.constant 0 : index
    %144 = vector.load %arg5[%c0_113, %c0_114] : memref<32x8xbf16, #tpu.memory_space<vmem>>, vector<32x8xbf16>
    %c0_115 = arith.constant 0 : index
    %c0_116 = arith.constant 0 : index
    %145 = vector.load %arg6[%c0_115, %c0_116] : memref<32x1xf32, #tpu.memory_space<vmem>>, vector<32x1xf32>
    %146 = arith.truncf %143 : vector<8x16xf32> to vector<8x16xbf16>
    %cst_117 = arith.constant dense<0.000000e+00> : vector<32x16xf32>
    %147 = tpu.matmul %144, %146, %cst_117 {dimension_numbers = #tpu.dot_dimension_numbers<[1], [0], [0], [1], [0, 0, 1, 1], [], []>} : vector<32x8xbf16>, vector<8x16xbf16>, vector<32x16xf32> -> vector<32x16xf32>
    %148 = vector.broadcast %145 : vector<32x1xf32> to vector<32x16xf32>
    %149 = arith.addf %147, %148 : vector<32x16xf32>
    %cst_118 = arith.constant 0.000000e+00 : f32
    %150 = vector.broadcast %cst_118 : f32 to vector<32x16xf32>
    %151 = arith.maximumf %149, %150 : vector<32x16xf32>
    %c0_119 = arith.constant 0 : index
    %c0_120 = arith.constant 0 : index
    %152 = vector.load %arg7[%c0_119, %c0_120] : memref<64x32xbf16, #tpu.memory_space<vmem>>, vector<64x32xbf16>
    %c0_121 = arith.constant 0 : index
    %c0_122 = arith.constant 0 : index
    %153 = vector.load %arg8[%c0_121, %c0_122] : memref<64x1xf32, #tpu.memory_space<vmem>>, vector<64x1xf32>
    %154 = arith.truncf %151 : vector<32x16xf32> to vector<32x16xbf16>
    %cst_123 = arith.constant dense<0.000000e+00> : vector<64x16xf32>
    %155 = tpu.matmul %152, %154, %cst_123 {dimension_numbers = #tpu.dot_dimension_numbers<[1], [0], [0], [1], [0, 0, 1, 1], [], []>} : vector<64x32xbf16>, vector<32x16xbf16>, vector<64x16xf32> -> vector<64x16xf32>
    %156 = vector.broadcast %153 : vector<64x1xf32> to vector<64x16xf32>
    %157 = arith.addf %155, %156 : vector<64x16xf32>
    %cst_124 = arith.constant 0.000000e+00 : f32
    %158 = vector.broadcast %cst_124 : f32 to vector<64x16xf32>
    %159 = arith.maximumf %157, %158 : vector<64x16xf32>
    %160 = arith.maximumf %133, %159 : vector<64x16xf32>
    %c0_125 = arith.constant 0 : index
    %c6 = arith.constant 6 : index
    %c0_126 = arith.constant 0 : index
    %c0_127 = arith.constant 0 : index
    %161 = vector.load %arg2[%c0_125, %c6, %c0_126, %c0_127] : memref<1x8x5x16xf32, #tpu.memory_space<vmem>>, vector<1x1x5x16xf32>
    %162 = vector.shape_cast %161 : vector<1x1x5x16xf32> to vector<5x16xf32>
    %c0_128 = arith.constant 0 : index
    %c0_129 = arith.constant 0 : index
    %163 = vector.load %arg3[%c0_128, %c0_129] : memref<8x5xbf16, #tpu.memory_space<vmem>>, vector<8x5xbf16>
    %c0_130 = arith.constant 0 : index
    %c0_131 = arith.constant 0 : index
    %164 = vector.load %arg4[%c0_130, %c0_131] : memref<8x1xf32, #tpu.memory_space<vmem>>, vector<8x1xf32>
    %165 = arith.truncf %162 : vector<5x16xf32> to vector<5x16xbf16>
    %cst_132 = arith.constant dense<0.000000e+00> : vector<8x16xf32>
    %166 = tpu.matmul %163, %165, %cst_132 {dimension_numbers = #tpu.dot_dimension_numbers<[1], [0], [0], [1], [0, 0, 1, 1], [], []>} : vector<8x5xbf16>, vector<5x16xbf16>, vector<8x16xf32> -> vector<8x16xf32>
    %167 = vector.broadcast %164 : vector<8x1xf32> to vector<8x16xf32>
    %168 = arith.addf %166, %167 : vector<8x16xf32>
    %cst_133 = arith.constant 0.000000e+00 : f32
    %169 = vector.broadcast %cst_133 : f32 to vector<8x16xf32>
    %170 = arith.maximumf %168, %169 : vector<8x16xf32>
    %c0_134 = arith.constant 0 : index
    %c0_135 = arith.constant 0 : index
    %171 = vector.load %arg5[%c0_134, %c0_135] : memref<32x8xbf16, #tpu.memory_space<vmem>>, vector<32x8xbf16>
    %c0_136 = arith.constant 0 : index
    %c0_137 = arith.constant 0 : index
    %172 = vector.load %arg6[%c0_136, %c0_137] : memref<32x1xf32, #tpu.memory_space<vmem>>, vector<32x1xf32>
    %173 = arith.truncf %170 : vector<8x16xf32> to vector<8x16xbf16>
    %cst_138 = arith.constant dense<0.000000e+00> : vector<32x16xf32>
    %174 = tpu.matmul %171, %173, %cst_138 {dimension_numbers = #tpu.dot_dimension_numbers<[1], [0], [0], [1], [0, 0, 1, 1], [], []>} : vector<32x8xbf16>, vector<8x16xbf16>, vector<32x16xf32> -> vector<32x16xf32>
    %175 = vector.broadcast %172 : vector<32x1xf32> to vector<32x16xf32>
    %176 = arith.addf %174, %175 : vector<32x16xf32>
    %cst_139 = arith.constant 0.000000e+00 : f32
    %177 = vector.broadcast %cst_139 : f32 to vector<32x16xf32>
    %178 = arith.maximumf %176, %177 : vector<32x16xf32>
    %c0_140 = arith.constant 0 : index
    %c0_141 = arith.constant 0 : index
    %179 = vector.load %arg7[%c0_140, %c0_141] : memref<64x32xbf16, #tpu.memory_space<vmem>>, vector<64x32xbf16>
    %c0_142 = arith.constant 0 : index
    %c0_143 = arith.constant 0 : index
    %180 = vector.load %arg8[%c0_142, %c0_143] : memref<64x1xf32, #tpu.memory_space<vmem>>, vector<64x1xf32>
    %181 = arith.truncf %178 : vector<32x16xf32> to vector<32x16xbf16>
    %cst_144 = arith.constant dense<0.000000e+00> : vector<64x16xf32>
    %182 = tpu.matmul %179, %181, %cst_144 {dimension_numbers = #tpu.dot_dimension_numbers<[1], [0], [0], [1], [0, 0, 1, 1], [], []>} : vector<64x32xbf16>, vector<32x16xbf16>, vector<64x16xf32> -> vector<64x16xf32>
    %183 = vector.broadcast %180 : vector<64x1xf32> to vector<64x16xf32>
    %184 = arith.addf %182, %183 : vector<64x16xf32>
    %cst_145 = arith.constant 0.000000e+00 : f32
    %185 = vector.broadcast %cst_145 : f32 to vector<64x16xf32>
    %186 = arith.maximumf %184, %185 : vector<64x16xf32>
    %187 = arith.maximumf %160, %186 : vector<64x16xf32>
    %c0_146 = arith.constant 0 : index
    %c7 = arith.constant 7 : index
    %c0_147 = arith.constant 0 : index
    %c0_148 = arith.constant 0 : index
    %188 = vector.load %arg2[%c0_146, %c7, %c0_147, %c0_148] : memref<1x8x5x16xf32, #tpu.memory_space<vmem>>, vector<1x1x5x16xf32>
    %189 = vector.shape_cast %188 : vector<1x1x5x16xf32> to vector<5x16xf32>
    %c0_149 = arith.constant 0 : index
    %c0_150 = arith.constant 0 : index
    %190 = vector.load %arg3[%c0_149, %c0_150] : memref<8x5xbf16, #tpu.memory_space<vmem>>, vector<8x5xbf16>
    %c0_151 = arith.constant 0 : index
    %c0_152 = arith.constant 0 : index
    %191 = vector.load %arg4[%c0_151, %c0_152] : memref<8x1xf32, #tpu.memory_space<vmem>>, vector<8x1xf32>
    %192 = arith.truncf %189 : vector<5x16xf32> to vector<5x16xbf16>
    %cst_153 = arith.constant dense<0.000000e+00> : vector<8x16xf32>
    %193 = tpu.matmul %190, %192, %cst_153 {dimension_numbers = #tpu.dot_dimension_numbers<[1], [0], [0], [1], [0, 0, 1, 1], [], []>} : vector<8x5xbf16>, vector<5x16xbf16>, vector<8x16xf32> -> vector<8x16xf32>
    %194 = vector.broadcast %191 : vector<8x1xf32> to vector<8x16xf32>
    %195 = arith.addf %193, %194 : vector<8x16xf32>
    %cst_154 = arith.constant 0.000000e+00 : f32
    %196 = vector.broadcast %cst_154 : f32 to vector<8x16xf32>
    %197 = arith.maximumf %195, %196 : vector<8x16xf32>
    %c0_155 = arith.constant 0 : index
    %c0_156 = arith.constant 0 : index
    %198 = vector.load %arg5[%c0_155, %c0_156] : memref<32x8xbf16, #tpu.memory_space<vmem>>, vector<32x8xbf16>
    %c0_157 = arith.constant 0 : index
    %c0_158 = arith.constant 0 : index
    %199 = vector.load %arg6[%c0_157, %c0_158] : memref<32x1xf32, #tpu.memory_space<vmem>>, vector<32x1xf32>
    %200 = arith.truncf %197 : vector<8x16xf32> to vector<8x16xbf16>
    %cst_159 = arith.constant dense<0.000000e+00> : vector<32x16xf32>
    %201 = tpu.matmul %198, %200, %cst_159 {dimension_numbers = #tpu.dot_dimension_numbers<[1], [0], [0], [1], [0, 0, 1, 1], [], []>} : vector<32x8xbf16>, vector<8x16xbf16>, vector<32x16xf32> -> vector<32x16xf32>
    %202 = vector.broadcast %199 : vector<32x1xf32> to vector<32x16xf32>
    %203 = arith.addf %201, %202 : vector<32x16xf32>
    %cst_160 = arith.constant 0.000000e+00 : f32
    %204 = vector.broadcast %cst_160 : f32 to vector<32x16xf32>
    %205 = arith.maximumf %203, %204 : vector<32x16xf32>
    %c0_161 = arith.constant 0 : index
    %c0_162 = arith.constant 0 : index
    %206 = vector.load %arg7[%c0_161, %c0_162] : memref<64x32xbf16, #tpu.memory_space<vmem>>, vector<64x32xbf16>
    %c0_163 = arith.constant 0 : index
    %c0_164 = arith.constant 0 : index
    %207 = vector.load %arg8[%c0_163, %c0_164] : memref<64x1xf32, #tpu.memory_space<vmem>>, vector<64x1xf32>
    %208 = arith.truncf %205 : vector<32x16xf32> to vector<32x16xbf16>
    %cst_165 = arith.constant dense<0.000000e+00> : vector<64x16xf32>
    %209 = tpu.matmul %206, %208, %cst_165 {dimension_numbers = #tpu.dot_dimension_numbers<[1], [0], [0], [1], [0, 0, 1, 1], [], []>} : vector<64x32xbf16>, vector<32x16xbf16>, vector<64x16xf32> -> vector<64x16xf32>
    %210 = vector.broadcast %207 : vector<64x1xf32> to vector<64x16xf32>
    %211 = arith.addf %209, %210 : vector<64x16xf32>
    %cst_166 = arith.constant 0.000000e+00 : f32
    %212 = vector.broadcast %cst_166 : f32 to vector<64x16xf32>
    %213 = arith.maximumf %211, %212 : vector<64x16xf32>
    %214 = arith.maximumf %187, %213 : vector<64x16xf32>
    %c0_167 = arith.constant 0 : index
    %c0_168 = arith.constant 0 : index
    %c0_169 = arith.constant 0 : index
    %215 = vector.load %arg9[%c0_167, %c0_168, %c0_169] : memref<1x64x16xf32, #tpu.memory_space<vmem>>, vector<1x64x16xf32>
    %216 = vector.shape_cast %215 : vector<1x64x16xf32> to vector<64x16xf32>
    %217 = vector.shape_cast %214 : vector<64x16xf32> to vector<1x64x16xf32>
    tpu.vector_store %arg9[%c0_167, %c0_168, %c0_169], %217 {strides = array<i32>} : memref<1x64x16xf32, #tpu.memory_space<vmem>>, vector<1x64x16xf32>,
    return
  }
  func.func @transform_0(%arg0: i32, %arg1: i32) -> (i32, i32, i32, i32) {
    %c0_i32 = arith.constant 0 : i32
    %c0_i32_0 = arith.constant 0 : i32
    %c0_i32_1 = arith.constant 0 : i32
    return %arg0, %c0_i32, %c0_i32_0, %arg1 : i32, i32, i32, i32
  }
  func.func @transform_1(%arg0: i32, %arg1: i32) -> (i32, i32) {
    %c0_i32 = arith.constant 0 : i32
    %c0_i32_0 = arith.constant 0 : i32
    %c0_i32_1 = arith.constant 0 : i32
    return %c0_i32, %c0_i32_0 : i32, i32
  }
  func.func @transform_2(%arg0: i32, %arg1: i32) -> (i32, i32) {
    %c0_i32 = arith.constant 0 : i32
    %c0_i32_0 = arith.constant 0 : i32
    %c0_i32_1 = arith.constant 0 : i32
    return %c0_i32, %c0_i32_0 : i32, i32
  }
  func.func @transform_3(%arg0: i32, %arg1: i32) -> (i32, i32) {
    %c0_i32 = arith.constant 0 : i32
    %c0_i32_0 = arith.constant 0 : i32
    %c0_i32_1 = arith.constant 0 : i32
    return %c0_i32, %c0_i32_0 : i32, i32
  }
  func.func @transform_4(%arg0: i32, %arg1: i32) -> (i32, i32) {
    %c0_i32 = arith.constant 0 : i32
    %c0_i32_0 = arith.constant 0 : i32
    %c0_i32_1 = arith.constant 0 : i32
    return %c0_i32, %c0_i32_0 : i32, i32
  }
  func.func @transform_5(%arg0: i32, %arg1: i32) -> (i32, i32) {
    %c0_i32 = arith.constant 0 : i32
    %c0_i32_0 = arith.constant 0 : i32
    %c0_i32_1 = arith.constant 0 : i32
    return %c0_i32, %c0_i32_0 : i32, i32
  }
  func.func @transform_6(%arg0: i32, %arg1: i32) -> (i32, i32) {
    %c0_i32 = arith.constant 0 : i32
    %c0_i32_0 = arith.constant 0 : i32
    %c0_i32_1 = arith.constant 0 : i32
    return %c0_i32, %c0_i32_0 : i32, i32
  }
  func.func @transform_7(%arg0: i32, %arg1: i32) -> (i32, i32, i32) {
    %c0_i32 = arith.constant 0 : i32
    %c0_i32_0 = arith.constant 0 : i32
    return %arg0, %c0_i32, %arg1 : i32, i32, i32
  }
}

module attributes {stable_mosaic.version = 11 : i64} {
  func.func @kernel(%arg0: i32, %arg1: memref<1x64x16xf32, #tpu.memory_space<vmem>>, %arg2: memref<64x64xbf16, #tpu.memory_space<vmem>>, %arg3: memref<64x64xbf16, #tpu.memory_space<vmem>>, %arg4: memref<1x64x16xf32, #tpu.memory_space<vmem>>) attributes {dimension_semantics = [#tpu.dimension_semantics<parallel>], iteration_bounds = array<i64: 2>, scalar_prefetch = 0 : i64, scratch_operands = 0 : i64, tpu.core_type = #tpu.core_type<tc>, window_params = [{transform_indices = @transform_0, window_bounds = array<i64: 1, 64, 16>}, {pipeline_mode = #tpu.pipeline_mode<synchronous>, transform_indices = @transform_1, window_bounds = array<i64: 64, 64>}, {pipeline_mode = #tpu.pipeline_mode<synchronous>, transform_indices = @transform_2, window_bounds = array<i64: 64, 64>}, {transform_indices = @transform_3, window_bounds = array<i64: 1, 64, 16>}]} {
    %c0 = arith.constant 0 : index
    %c0_0 = arith.constant 0 : index
    %0 = vector.load %arg2[%c0, %c0_0] : memref<64x64xbf16, #tpu.memory_space<vmem>>, vector<64x64xbf16>
    %c0_1 = arith.constant 0 : index
    %c0_2 = arith.constant 0 : index
    %c0_3 = arith.constant 0 : index
    %1 = vector.load %arg1[%c0_1, %c0_2, %c0_3] : memref<1x64x16xf32, #tpu.memory_space<vmem>>, vector<1x64x16xf32>
    %2 = vector.shape_cast %1 : vector<1x64x16xf32> to vector<64x16xf32>
    %3 = arith.truncf %2 : vector<64x16xf32> to vector<64x16xbf16>
    %cst = arith.constant dense<0.000000e+00> : vector<64x16xf32>
    %4 = tpu.matmul %0, %3, %cst {dimension_numbers = #tpu.dot_dimension_numbers<[1], [0], [0], [1], [0, 0, 1, 1], [], []>} : vector<64x64xbf16>, vector<64x16xbf16>, vector<64x16xf32> -> vector<64x16xf32>
    %cst_4 = arith.constant dense<0xFF800000> : vector<16xf32>
    %5 = vector.multi_reduction <maximumf>, %4, %cst_4 [0] : vector<64x16xf32> to vector<16xf32>
    %6 = vector.shape_cast %5 : vector<16xf32> to vector<1x16xf32>
    %7 = vector.broadcast %6 : vector<1x16xf32> to vector<64x16xf32>
    %8 = arith.subf %4, %7 : vector<64x16xf32>
    %9 = math.exp %8 : vector<64x16xf32>
    %cst_5 = arith.constant dense<0.000000e+00> : vector<16xf32>
    %10 = vector.multi_reduction <add>, %9, %cst_5 [0] : vector<64x16xf32> to vector<16xf32>
    %11 = vector.shape_cast %10 : vector<16xf32> to vector<1x16xf32>
    %12 = vector.broadcast %11 : vector<1x16xf32> to vector<64x16xf32>
    %13 = arith.divf %9, %12 : vector<64x16xf32>
    %cst_6 = arith.constant dense<0.000000e+00> : vector<64xf32>
    %14 = vector.multi_reduction <add>, %13, %cst_6 [1] : vector<64x16xf32> to vector<64xf32>
    %15 = vector.shape_cast %14 : vector<64xf32> to vector<64x1xf32>
    %cst_7 = arith.constant 9.99999971E-10 : f32
    %16 = vector.broadcast %cst_7 : f32 to vector<64x1xf32>
    %17 = arith.addf %16, %15 : vector<64x1xf32>
    %18 = vector.broadcast %17 : vector<64x1xf32> to vector<64x16xf32>
    %19 = arith.divf %13, %18 : vector<64x16xf32>
    %c0_8 = arith.constant 0 : index
    %c0_9 = arith.constant 0 : index
    %20 = vector.load %arg3[%c0_8, %c0_9] : memref<64x64xbf16, #tpu.memory_space<vmem>>, vector<64x64xbf16>
    %21 = arith.truncf %19 : vector<64x16xf32> to vector<64x16xbf16>
    %cst_10 = arith.constant dense<0.000000e+00> : vector<64x16xf32>
    %22 = tpu.matmul %20, %21, %cst_10 {dimension_numbers = #tpu.dot_dimension_numbers<[1], [0], [0], [1], [0, 0, 1, 1], [], []>} : vector<64x64xbf16>, vector<64x16xbf16>, vector<64x16xf32> -> vector<64x16xf32>
    %c0_11 = arith.constant 0 : index
    %c0_12 = arith.constant 0 : index
    %c0_13 = arith.constant 0 : index
    %23 = vector.load %arg4[%c0_11, %c0_12, %c0_13] : memref<1x64x16xf32, #tpu.memory_space<vmem>>, vector<1x64x16xf32>
    %24 = vector.shape_cast %23 : vector<1x64x16xf32> to vector<64x16xf32>
    %25 = vector.shape_cast %22 : vector<64x16xf32> to vector<1x64x16xf32>
    tpu.vector_store %arg4[%c0_11, %c0_12, %c0_13], %25 {strides = array<i32>} : memref<1x64x16xf32, #tpu.memory_space<vmem>>, vector<1x64x16xf32>,
    return
  }
  func.func @transform_0(%arg0: i32) -> (i32, i32, i32) {
    %c0_i32 = arith.constant 0 : i32
    %c0_i32_0 = arith.constant 0 : i32
    %c0_i32_1 = arith.constant 0 : i32
    return %arg0, %c0_i32, %c0_i32_0 : i32, i32, i32
  }
  func.func @transform_1(%arg0: i32) -> (i32, i32) {
    %c0_i32 = arith.constant 0 : i32
    %c0_i32_0 = arith.constant 0 : i32
    %c0_i32_1 = arith.constant 0 : i32
    return %c0_i32, %c0_i32_0 : i32, i32
  }
  func.func @transform_2(%arg0: i32) -> (i32, i32) {
    %c0_i32 = arith.constant 0 : i32
    %c0_i32_0 = arith.constant 0 : i32
    %c0_i32_1 = arith.constant 0 : i32
    return %c0_i32, %c0_i32_0 : i32, i32
  }
  func.func @transform_3(%arg0: i32) -> (i32, i32, i32) {
    %c0_i32 = arith.constant 0 : i32
    %c0_i32_0 = arith.constant 0 : i32
    %c0_i32_1 = arith.constant 0 : i32
    return %arg0, %c0_i32, %c0_i32_0 : i32, i32, i32
  }
}

module attributes {stable_mosaic.version = 11 : i64} {
  func.func @kernel(%arg0: i32, %arg1: i32, %arg2: memref<1x8x67x4xf32, #tpu.memory_space<vmem>>, %arg3: memref<64x67xbf16, #tpu.memory_space<vmem>>, %arg4: memref<64x1xf32, #tpu.memory_space<vmem>>, %arg5: memref<128x64xbf16, #tpu.memory_space<vmem>>, %arg6: memref<128x1xf32, #tpu.memory_space<vmem>>, %arg7: memref<256x128xbf16, #tpu.memory_space<vmem>>, %arg8: memref<256x1xf32, #tpu.memory_space<vmem>>, %arg9: memref<1x256x4xf32, #tpu.memory_space<vmem>>) attributes {dimension_semantics = [#tpu.dimension_semantics<parallel>, #tpu.dimension_semantics<parallel>], iteration_bounds = array<i64: 2, 1>, scalar_prefetch = 0 : i64, scratch_operands = 0 : i64, tpu.core_type = #tpu.core_type<tc>, window_params = [{transform_indices = @transform_0, window_bounds = array<i64: 1, 8, 67, 4>}, {pipeline_mode = #tpu.pipeline_mode<synchronous>, transform_indices = @transform_1, window_bounds = array<i64: 64, 67>}, {pipeline_mode = #tpu.pipeline_mode<synchronous>, transform_indices = @transform_2, window_bounds = array<i64: 64, 1>}, {pipeline_mode = #tpu.pipeline_mode<synchronous>, transform_indices = @transform_3, window_bounds = array<i64: 128, 64>}, {pipeline_mode = #tpu.pipeline_mode<synchronous>, transform_indices = @transform_4, window_bounds = array<i64: 128, 1>}, {pipeline_mode = #tpu.pipeline_mode<synchronous>, transform_indices = @transform_5, window_bounds = array<i64: 256, 128>}, {pipeline_mode = #tpu.pipeline_mode<synchronous>, transform_indices = @transform_6, window_bounds = array<i64: 256, 1>}, {transform_indices = @transform_7, window_bounds = array<i64: 1, 256, 4>}]} {
    %c0 = arith.constant 0 : index
    %c0_0 = arith.constant 0 : index
    %c0_1 = arith.constant 0 : index
    %c0_2 = arith.constant 0 : index
    %0 = vector.load %arg2[%c0, %c0_0, %c0_1, %c0_2] : memref<1x8x67x4xf32, #tpu.memory_space<vmem>>, vector<1x1x67x4xf32>
    %1 = vector.shape_cast %0 : vector<1x1x67x4xf32> to vector<67x4xf32>
    %c0_3 = arith.constant 0 : index
    %c0_4 = arith.constant 0 : index
    %2 = vector.load %arg3[%c0_3, %c0_4] : memref<64x67xbf16, #tpu.memory_space<vmem>>, vector<64x67xbf16>
    %c0_5 = arith.constant 0 : index
    %c0_6 = arith.constant 0 : index
    %3 = vector.load %arg4[%c0_5, %c0_6] : memref<64x1xf32, #tpu.memory_space<vmem>>, vector<64x1xf32>
    %4 = arith.truncf %1 : vector<67x4xf32> to vector<67x4xbf16>
    %cst = arith.constant dense<0.000000e+00> : vector<64x4xf32>
    %5 = tpu.matmul %2, %4, %cst {dimension_numbers = #tpu.dot_dimension_numbers<[1], [0], [0], [1], [0, 0, 1, 1], [], []>} : vector<64x67xbf16>, vector<67x4xbf16>, vector<64x4xf32> -> vector<64x4xf32>
    %6 = vector.broadcast %3 : vector<64x1xf32> to vector<64x4xf32>
    %7 = arith.addf %5, %6 : vector<64x4xf32>
    %cst_7 = arith.constant 0.000000e+00 : f32
    %8 = vector.broadcast %cst_7 : f32 to vector<64x4xf32>
    %9 = arith.maximumf %7, %8 : vector<64x4xf32>
    %c0_8 = arith.constant 0 : index
    %c0_9 = arith.constant 0 : index
    %10 = vector.load %arg5[%c0_8, %c0_9] : memref<128x64xbf16, #tpu.memory_space<vmem>>, vector<128x64xbf16>
    %c0_10 = arith.constant 0 : index
    %c0_11 = arith.constant 0 : index
    %11 = vector.load %arg6[%c0_10, %c0_11] : memref<128x1xf32, #tpu.memory_space<vmem>>, vector<128x1xf32>
    %12 = arith.truncf %9 : vector<64x4xf32> to vector<64x4xbf16>
    %cst_12 = arith.constant dense<0.000000e+00> : vector<128x4xf32>
    %13 = tpu.matmul %10, %12, %cst_12 {dimension_numbers = #tpu.dot_dimension_numbers<[1], [0], [0], [1], [0, 0, 1, 1], [], []>} : vector<128x64xbf16>, vector<64x4xbf16>, vector<128x4xf32> -> vector<128x4xf32>
    %14 = vector.broadcast %11 : vector<128x1xf32> to vector<128x4xf32>
    %15 = arith.addf %13, %14 : vector<128x4xf32>
    %cst_13 = arith.constant 0.000000e+00 : f32
    %16 = vector.broadcast %cst_13 : f32 to vector<128x4xf32>
    %17 = arith.maximumf %15, %16 : vector<128x4xf32>
    %c0_14 = arith.constant 0 : index
    %c0_15 = arith.constant 0 : index
    %18 = vector.load %arg7[%c0_14, %c0_15] : memref<256x128xbf16, #tpu.memory_space<vmem>>, vector<256x128xbf16>
    %c0_16 = arith.constant 0 : index
    %c0_17 = arith.constant 0 : index
    %19 = vector.load %arg8[%c0_16, %c0_17] : memref<256x1xf32, #tpu.memory_space<vmem>>, vector<256x1xf32>
    %20 = arith.truncf %17 : vector<128x4xf32> to vector<128x4xbf16>
    %cst_18 = arith.constant dense<0.000000e+00> : vector<256x4xf32>
    %21 = tpu.matmul %18, %20, %cst_18 {dimension_numbers = #tpu.dot_dimension_numbers<[1], [0], [0], [1], [0, 0, 1, 1], [], []>} : vector<256x128xbf16>, vector<128x4xbf16>, vector<256x4xf32> -> vector<256x4xf32>
    %22 = vector.broadcast %19 : vector<256x1xf32> to vector<256x4xf32>
    %23 = arith.addf %21, %22 : vector<256x4xf32>
    %cst_19 = arith.constant 0.000000e+00 : f32
    %24 = vector.broadcast %cst_19 : f32 to vector<256x4xf32>
    %25 = arith.maximumf %23, %24 : vector<256x4xf32>
    %c0_20 = arith.constant 0 : index
    %c1 = arith.constant 1 : index
    %c0_21 = arith.constant 0 : index
    %c0_22 = arith.constant 0 : index
    %26 = vector.load %arg2[%c0_20, %c1, %c0_21, %c0_22] : memref<1x8x67x4xf32, #tpu.memory_space<vmem>>, vector<1x1x67x4xf32>
    %27 = vector.shape_cast %26 : vector<1x1x67x4xf32> to vector<67x4xf32>
    %c0_23 = arith.constant 0 : index
    %c0_24 = arith.constant 0 : index
    %28 = vector.load %arg3[%c0_23, %c0_24] : memref<64x67xbf16, #tpu.memory_space<vmem>>, vector<64x67xbf16>
    %c0_25 = arith.constant 0 : index
    %c0_26 = arith.constant 0 : index
    %29 = vector.load %arg4[%c0_25, %c0_26] : memref<64x1xf32, #tpu.memory_space<vmem>>, vector<64x1xf32>
    %30 = arith.truncf %27 : vector<67x4xf32> to vector<67x4xbf16>
    %cst_27 = arith.constant dense<0.000000e+00> : vector<64x4xf32>
    %31 = tpu.matmul %28, %30, %cst_27 {dimension_numbers = #tpu.dot_dimension_numbers<[1], [0], [0], [1], [0, 0, 1, 1], [], []>} : vector<64x67xbf16>, vector<67x4xbf16>, vector<64x4xf32> -> vector<64x4xf32>
    %32 = vector.broadcast %29 : vector<64x1xf32> to vector<64x4xf32>
    %33 = arith.addf %31, %32 : vector<64x4xf32>
    %cst_28 = arith.constant 0.000000e+00 : f32
    %34 = vector.broadcast %cst_28 : f32 to vector<64x4xf32>
    %35 = arith.maximumf %33, %34 : vector<64x4xf32>
    %c0_29 = arith.constant 0 : index
    %c0_30 = arith.constant 0 : index
    %36 = vector.load %arg5[%c0_29, %c0_30] : memref<128x64xbf16, #tpu.memory_space<vmem>>, vector<128x64xbf16>
    %c0_31 = arith.constant 0 : index
    %c0_32 = arith.constant 0 : index
    %37 = vector.load %arg6[%c0_31, %c0_32] : memref<128x1xf32, #tpu.memory_space<vmem>>, vector<128x1xf32>
    %38 = arith.truncf %35 : vector<64x4xf32> to vector<64x4xbf16>
    %cst_33 = arith.constant dense<0.000000e+00> : vector<128x4xf32>
    %39 = tpu.matmul %36, %38, %cst_33 {dimension_numbers = #tpu.dot_dimension_numbers<[1], [0], [0], [1], [0, 0, 1, 1], [], []>} : vector<128x64xbf16>, vector<64x4xbf16>, vector<128x4xf32> -> vector<128x4xf32>
    %40 = vector.broadcast %37 : vector<128x1xf32> to vector<128x4xf32>
    %41 = arith.addf %39, %40 : vector<128x4xf32>
    %cst_34 = arith.constant 0.000000e+00 : f32
    %42 = vector.broadcast %cst_34 : f32 to vector<128x4xf32>
    %43 = arith.maximumf %41, %42 : vector<128x4xf32>
    %c0_35 = arith.constant 0 : index
    %c0_36 = arith.constant 0 : index
    %44 = vector.load %arg7[%c0_35, %c0_36] : memref<256x128xbf16, #tpu.memory_space<vmem>>, vector<256x128xbf16>
    %c0_37 = arith.constant 0 : index
    %c0_38 = arith.constant 0 : index
    %45 = vector.load %arg8[%c0_37, %c0_38] : memref<256x1xf32, #tpu.memory_space<vmem>>, vector<256x1xf32>
    %46 = arith.truncf %43 : vector<128x4xf32> to vector<128x4xbf16>
    %cst_39 = arith.constant dense<0.000000e+00> : vector<256x4xf32>
    %47 = tpu.matmul %44, %46, %cst_39 {dimension_numbers = #tpu.dot_dimension_numbers<[1], [0], [0], [1], [0, 0, 1, 1], [], []>} : vector<256x128xbf16>, vector<128x4xbf16>, vector<256x4xf32> -> vector<256x4xf32>
    %48 = vector.broadcast %45 : vector<256x1xf32> to vector<256x4xf32>
    %49 = arith.addf %47, %48 : vector<256x4xf32>
    %cst_40 = arith.constant 0.000000e+00 : f32
    %50 = vector.broadcast %cst_40 : f32 to vector<256x4xf32>
    %51 = arith.maximumf %49, %50 : vector<256x4xf32>
    %52 = arith.maximumf %25, %51 : vector<256x4xf32>
    %c0_41 = arith.constant 0 : index
    %c2 = arith.constant 2 : index
    %c0_42 = arith.constant 0 : index
    %c0_43 = arith.constant 0 : index
    %53 = vector.load %arg2[%c0_41, %c2, %c0_42, %c0_43] : memref<1x8x67x4xf32, #tpu.memory_space<vmem>>, vector<1x1x67x4xf32>
    %54 = vector.shape_cast %53 : vector<1x1x67x4xf32> to vector<67x4xf32>
    %c0_44 = arith.constant 0 : index
    %c0_45 = arith.constant 0 : index
    %55 = vector.load %arg3[%c0_44, %c0_45] : memref<64x67xbf16, #tpu.memory_space<vmem>>, vector<64x67xbf16>
    %c0_46 = arith.constant 0 : index
    %c0_47 = arith.constant 0 : index
    %56 = vector.load %arg4[%c0_46, %c0_47] : memref<64x1xf32, #tpu.memory_space<vmem>>, vector<64x1xf32>
    %57 = arith.truncf %54 : vector<67x4xf32> to vector<67x4xbf16>
    %cst_48 = arith.constant dense<0.000000e+00> : vector<64x4xf32>
    %58 = tpu.matmul %55, %57, %cst_48 {dimension_numbers = #tpu.dot_dimension_numbers<[1], [0], [0], [1], [0, 0, 1, 1], [], []>} : vector<64x67xbf16>, vector<67x4xbf16>, vector<64x4xf32> -> vector<64x4xf32>
    %59 = vector.broadcast %56 : vector<64x1xf32> to vector<64x4xf32>
    %60 = arith.addf %58, %59 : vector<64x4xf32>
    %cst_49 = arith.constant 0.000000e+00 : f32
    %61 = vector.broadcast %cst_49 : f32 to vector<64x4xf32>
    %62 = arith.maximumf %60, %61 : vector<64x4xf32>
    %c0_50 = arith.constant 0 : index
    %c0_51 = arith.constant 0 : index
    %63 = vector.load %arg5[%c0_50, %c0_51] : memref<128x64xbf16, #tpu.memory_space<vmem>>, vector<128x64xbf16>
    %c0_52 = arith.constant 0 : index
    %c0_53 = arith.constant 0 : index
    %64 = vector.load %arg6[%c0_52, %c0_53] : memref<128x1xf32, #tpu.memory_space<vmem>>, vector<128x1xf32>
    %65 = arith.truncf %62 : vector<64x4xf32> to vector<64x4xbf16>
    %cst_54 = arith.constant dense<0.000000e+00> : vector<128x4xf32>
    %66 = tpu.matmul %63, %65, %cst_54 {dimension_numbers = #tpu.dot_dimension_numbers<[1], [0], [0], [1], [0, 0, 1, 1], [], []>} : vector<128x64xbf16>, vector<64x4xbf16>, vector<128x4xf32> -> vector<128x4xf32>
    %67 = vector.broadcast %64 : vector<128x1xf32> to vector<128x4xf32>
    %68 = arith.addf %66, %67 : vector<128x4xf32>
    %cst_55 = arith.constant 0.000000e+00 : f32
    %69 = vector.broadcast %cst_55 : f32 to vector<128x4xf32>
    %70 = arith.maximumf %68, %69 : vector<128x4xf32>
    %c0_56 = arith.constant 0 : index
    %c0_57 = arith.constant 0 : index
    %71 = vector.load %arg7[%c0_56, %c0_57] : memref<256x128xbf16, #tpu.memory_space<vmem>>, vector<256x128xbf16>
    %c0_58 = arith.constant 0 : index
    %c0_59 = arith.constant 0 : index
    %72 = vector.load %arg8[%c0_58, %c0_59] : memref<256x1xf32, #tpu.memory_space<vmem>>, vector<256x1xf32>
    %73 = arith.truncf %70 : vector<128x4xf32> to vector<128x4xbf16>
    %cst_60 = arith.constant dense<0.000000e+00> : vector<256x4xf32>
    %74 = tpu.matmul %71, %73, %cst_60 {dimension_numbers = #tpu.dot_dimension_numbers<[1], [0], [0], [1], [0, 0, 1, 1], [], []>} : vector<256x128xbf16>, vector<128x4xbf16>, vector<256x4xf32> -> vector<256x4xf32>
    %75 = vector.broadcast %72 : vector<256x1xf32> to vector<256x4xf32>
    %76 = arith.addf %74, %75 : vector<256x4xf32>
    %cst_61 = arith.constant 0.000000e+00 : f32
    %77 = vector.broadcast %cst_61 : f32 to vector<256x4xf32>
    %78 = arith.maximumf %76, %77 : vector<256x4xf32>
    %79 = arith.maximumf %52, %78 : vector<256x4xf32>
    %c0_62 = arith.constant 0 : index
    %c3 = arith.constant 3 : index
    %c0_63 = arith.constant 0 : index
    %c0_64 = arith.constant 0 : index
    %80 = vector.load %arg2[%c0_62, %c3, %c0_63, %c0_64] : memref<1x8x67x4xf32, #tpu.memory_space<vmem>>, vector<1x1x67x4xf32>
    %81 = vector.shape_cast %80 : vector<1x1x67x4xf32> to vector<67x4xf32>
    %c0_65 = arith.constant 0 : index
    %c0_66 = arith.constant 0 : index
    %82 = vector.load %arg3[%c0_65, %c0_66] : memref<64x67xbf16, #tpu.memory_space<vmem>>, vector<64x67xbf16>
    %c0_67 = arith.constant 0 : index
    %c0_68 = arith.constant 0 : index
    %83 = vector.load %arg4[%c0_67, %c0_68] : memref<64x1xf32, #tpu.memory_space<vmem>>, vector<64x1xf32>
    %84 = arith.truncf %81 : vector<67x4xf32> to vector<67x4xbf16>
    %cst_69 = arith.constant dense<0.000000e+00> : vector<64x4xf32>
    %85 = tpu.matmul %82, %84, %cst_69 {dimension_numbers = #tpu.dot_dimension_numbers<[1], [0], [0], [1], [0, 0, 1, 1], [], []>} : vector<64x67xbf16>, vector<67x4xbf16>, vector<64x4xf32> -> vector<64x4xf32>
    %86 = vector.broadcast %83 : vector<64x1xf32> to vector<64x4xf32>
    %87 = arith.addf %85, %86 : vector<64x4xf32>
    %cst_70 = arith.constant 0.000000e+00 : f32
    %88 = vector.broadcast %cst_70 : f32 to vector<64x4xf32>
    %89 = arith.maximumf %87, %88 : vector<64x4xf32>
    %c0_71 = arith.constant 0 : index
    %c0_72 = arith.constant 0 : index
    %90 = vector.load %arg5[%c0_71, %c0_72] : memref<128x64xbf16, #tpu.memory_space<vmem>>, vector<128x64xbf16>
    %c0_73 = arith.constant 0 : index
    %c0_74 = arith.constant 0 : index
    %91 = vector.load %arg6[%c0_73, %c0_74] : memref<128x1xf32, #tpu.memory_space<vmem>>, vector<128x1xf32>
    %92 = arith.truncf %89 : vector<64x4xf32> to vector<64x4xbf16>
    %cst_75 = arith.constant dense<0.000000e+00> : vector<128x4xf32>
    %93 = tpu.matmul %90, %92, %cst_75 {dimension_numbers = #tpu.dot_dimension_numbers<[1], [0], [0], [1], [0, 0, 1, 1], [], []>} : vector<128x64xbf16>, vector<64x4xbf16>, vector<128x4xf32> -> vector<128x4xf32>
    %94 = vector.broadcast %91 : vector<128x1xf32> to vector<128x4xf32>
    %95 = arith.addf %93, %94 : vector<128x4xf32>
    %cst_76 = arith.constant 0.000000e+00 : f32
    %96 = vector.broadcast %cst_76 : f32 to vector<128x4xf32>
    %97 = arith.maximumf %95, %96 : vector<128x4xf32>
    %c0_77 = arith.constant 0 : index
    %c0_78 = arith.constant 0 : index
    %98 = vector.load %arg7[%c0_77, %c0_78] : memref<256x128xbf16, #tpu.memory_space<vmem>>, vector<256x128xbf16>
    %c0_79 = arith.constant 0 : index
    %c0_80 = arith.constant 0 : index
    %99 = vector.load %arg8[%c0_79, %c0_80] : memref<256x1xf32, #tpu.memory_space<vmem>>, vector<256x1xf32>
    %100 = arith.truncf %97 : vector<128x4xf32> to vector<128x4xbf16>
    %cst_81 = arith.constant dense<0.000000e+00> : vector<256x4xf32>
    %101 = tpu.matmul %98, %100, %cst_81 {dimension_numbers = #tpu.dot_dimension_numbers<[1], [0], [0], [1], [0, 0, 1, 1], [], []>} : vector<256x128xbf16>, vector<128x4xbf16>, vector<256x4xf32> -> vector<256x4xf32>
    %102 = vector.broadcast %99 : vector<256x1xf32> to vector<256x4xf32>
    %103 = arith.addf %101, %102 : vector<256x4xf32>
    %cst_82 = arith.constant 0.000000e+00 : f32
    %104 = vector.broadcast %cst_82 : f32 to vector<256x4xf32>
    %105 = arith.maximumf %103, %104 : vector<256x4xf32>
    %106 = arith.maximumf %79, %105 : vector<256x4xf32>
    %c0_83 = arith.constant 0 : index
    %c4 = arith.constant 4 : index
    %c0_84 = arith.constant 0 : index
    %c0_85 = arith.constant 0 : index
    %107 = vector.load %arg2[%c0_83, %c4, %c0_84, %c0_85] : memref<1x8x67x4xf32, #tpu.memory_space<vmem>>, vector<1x1x67x4xf32>
    %108 = vector.shape_cast %107 : vector<1x1x67x4xf32> to vector<67x4xf32>
    %c0_86 = arith.constant 0 : index
    %c0_87 = arith.constant 0 : index
    %109 = vector.load %arg3[%c0_86, %c0_87] : memref<64x67xbf16, #tpu.memory_space<vmem>>, vector<64x67xbf16>
    %c0_88 = arith.constant 0 : index
    %c0_89 = arith.constant 0 : index
    %110 = vector.load %arg4[%c0_88, %c0_89] : memref<64x1xf32, #tpu.memory_space<vmem>>, vector<64x1xf32>
    %111 = arith.truncf %108 : vector<67x4xf32> to vector<67x4xbf16>
    %cst_90 = arith.constant dense<0.000000e+00> : vector<64x4xf32>
    %112 = tpu.matmul %109, %111, %cst_90 {dimension_numbers = #tpu.dot_dimension_numbers<[1], [0], [0], [1], [0, 0, 1, 1], [], []>} : vector<64x67xbf16>, vector<67x4xbf16>, vector<64x4xf32> -> vector<64x4xf32>
    %113 = vector.broadcast %110 : vector<64x1xf32> to vector<64x4xf32>
    %114 = arith.addf %112, %113 : vector<64x4xf32>
    %cst_91 = arith.constant 0.000000e+00 : f32
    %115 = vector.broadcast %cst_91 : f32 to vector<64x4xf32>
    %116 = arith.maximumf %114, %115 : vector<64x4xf32>
    %c0_92 = arith.constant 0 : index
    %c0_93 = arith.constant 0 : index
    %117 = vector.load %arg5[%c0_92, %c0_93] : memref<128x64xbf16, #tpu.memory_space<vmem>>, vector<128x64xbf16>
    %c0_94 = arith.constant 0 : index
    %c0_95 = arith.constant 0 : index
    %118 = vector.load %arg6[%c0_94, %c0_95] : memref<128x1xf32, #tpu.memory_space<vmem>>, vector<128x1xf32>
    %119 = arith.truncf %116 : vector<64x4xf32> to vector<64x4xbf16>
    %cst_96 = arith.constant dense<0.000000e+00> : vector<128x4xf32>
    %120 = tpu.matmul %117, %119, %cst_96 {dimension_numbers = #tpu.dot_dimension_numbers<[1], [0], [0], [1], [0, 0, 1, 1], [], []>} : vector<128x64xbf16>, vector<64x4xbf16>, vector<128x4xf32> -> vector<128x4xf32>
    %121 = vector.broadcast %118 : vector<128x1xf32> to vector<128x4xf32>
    %122 = arith.addf %120, %121 : vector<128x4xf32>
    %cst_97 = arith.constant 0.000000e+00 : f32
    %123 = vector.broadcast %cst_97 : f32 to vector<128x4xf32>
    %124 = arith.maximumf %122, %123 : vector<128x4xf32>
    %c0_98 = arith.constant 0 : index
    %c0_99 = arith.constant 0 : index
    %125 = vector.load %arg7[%c0_98, %c0_99] : memref<256x128xbf16, #tpu.memory_space<vmem>>, vector<256x128xbf16>
    %c0_100 = arith.constant 0 : index
    %c0_101 = arith.constant 0 : index
    %126 = vector.load %arg8[%c0_100, %c0_101] : memref<256x1xf32, #tpu.memory_space<vmem>>, vector<256x1xf32>
    %127 = arith.truncf %124 : vector<128x4xf32> to vector<128x4xbf16>
    %cst_102 = arith.constant dense<0.000000e+00> : vector<256x4xf32>
    %128 = tpu.matmul %125, %127, %cst_102 {dimension_numbers = #tpu.dot_dimension_numbers<[1], [0], [0], [1], [0, 0, 1, 1], [], []>} : vector<256x128xbf16>, vector<128x4xbf16>, vector<256x4xf32> -> vector<256x4xf32>
    %129 = vector.broadcast %126 : vector<256x1xf32> to vector<256x4xf32>
    %130 = arith.addf %128, %129 : vector<256x4xf32>
    %cst_103 = arith.constant 0.000000e+00 : f32
    %131 = vector.broadcast %cst_103 : f32 to vector<256x4xf32>
    %132 = arith.maximumf %130, %131 : vector<256x4xf32>
    %133 = arith.maximumf %106, %132 : vector<256x4xf32>
    %c0_104 = arith.constant 0 : index
    %c5 = arith.constant 5 : index
    %c0_105 = arith.constant 0 : index
    %c0_106 = arith.constant 0 : index
    %134 = vector.load %arg2[%c0_104, %c5, %c0_105, %c0_106] : memref<1x8x67x4xf32, #tpu.memory_space<vmem>>, vector<1x1x67x4xf32>
    %135 = vector.shape_cast %134 : vector<1x1x67x4xf32> to vector<67x4xf32>
    %c0_107 = arith.constant 0 : index
    %c0_108 = arith.constant 0 : index
    %136 = vector.load %arg3[%c0_107, %c0_108] : memref<64x67xbf16, #tpu.memory_space<vmem>>, vector<64x67xbf16>
    %c0_109 = arith.constant 0 : index
    %c0_110 = arith.constant 0 : index
    %137 = vector.load %arg4[%c0_109, %c0_110] : memref<64x1xf32, #tpu.memory_space<vmem>>, vector<64x1xf32>
    %138 = arith.truncf %135 : vector<67x4xf32> to vector<67x4xbf16>
    %cst_111 = arith.constant dense<0.000000e+00> : vector<64x4xf32>
    %139 = tpu.matmul %136, %138, %cst_111 {dimension_numbers = #tpu.dot_dimension_numbers<[1], [0], [0], [1], [0, 0, 1, 1], [], []>} : vector<64x67xbf16>, vector<67x4xbf16>, vector<64x4xf32> -> vector<64x4xf32>
    %140 = vector.broadcast %137 : vector<64x1xf32> to vector<64x4xf32>
    %141 = arith.addf %139, %140 : vector<64x4xf32>
    %cst_112 = arith.constant 0.000000e+00 : f32
    %142 = vector.broadcast %cst_112 : f32 to vector<64x4xf32>
    %143 = arith.maximumf %141, %142 : vector<64x4xf32>
    %c0_113 = arith.constant 0 : index
    %c0_114 = arith.constant 0 : index
    %144 = vector.load %arg5[%c0_113, %c0_114] : memref<128x64xbf16, #tpu.memory_space<vmem>>, vector<128x64xbf16>
    %c0_115 = arith.constant 0 : index
    %c0_116 = arith.constant 0 : index
    %145 = vector.load %arg6[%c0_115, %c0_116] : memref<128x1xf32, #tpu.memory_space<vmem>>, vector<128x1xf32>
    %146 = arith.truncf %143 : vector<64x4xf32> to vector<64x4xbf16>
    %cst_117 = arith.constant dense<0.000000e+00> : vector<128x4xf32>
    %147 = tpu.matmul %144, %146, %cst_117 {dimension_numbers = #tpu.dot_dimension_numbers<[1], [0], [0], [1], [0, 0, 1, 1], [], []>} : vector<128x64xbf16>, vector<64x4xbf16>, vector<128x4xf32> -> vector<128x4xf32>
    %148 = vector.broadcast %145 : vector<128x1xf32> to vector<128x4xf32>
    %149 = arith.addf %147, %148 : vector<128x4xf32>
    %cst_118 = arith.constant 0.000000e+00 : f32
    %150 = vector.broadcast %cst_118 : f32 to vector<128x4xf32>
    %151 = arith.maximumf %149, %150 : vector<128x4xf32>
    %c0_119 = arith.constant 0 : index
    %c0_120 = arith.constant 0 : index
    %152 = vector.load %arg7[%c0_119, %c0_120] : memref<256x128xbf16, #tpu.memory_space<vmem>>, vector<256x128xbf16>
    %c0_121 = arith.constant 0 : index
    %c0_122 = arith.constant 0 : index
    %153 = vector.load %arg8[%c0_121, %c0_122] : memref<256x1xf32, #tpu.memory_space<vmem>>, vector<256x1xf32>
    %154 = arith.truncf %151 : vector<128x4xf32> to vector<128x4xbf16>
    %cst_123 = arith.constant dense<0.000000e+00> : vector<256x4xf32>
    %155 = tpu.matmul %152, %154, %cst_123 {dimension_numbers = #tpu.dot_dimension_numbers<[1], [0], [0], [1], [0, 0, 1, 1], [], []>} : vector<256x128xbf16>, vector<128x4xbf16>, vector<256x4xf32> -> vector<256x4xf32>
    %156 = vector.broadcast %153 : vector<256x1xf32> to vector<256x4xf32>
    %157 = arith.addf %155, %156 : vector<256x4xf32>
    %cst_124 = arith.constant 0.000000e+00 : f32
    %158 = vector.broadcast %cst_124 : f32 to vector<256x4xf32>
    %159 = arith.maximumf %157, %158 : vector<256x4xf32>
    %160 = arith.maximumf %133, %159 : vector<256x4xf32>
    %c0_125 = arith.constant 0 : index
    %c6 = arith.constant 6 : index
    %c0_126 = arith.constant 0 : index
    %c0_127 = arith.constant 0 : index
    %161 = vector.load %arg2[%c0_125, %c6, %c0_126, %c0_127] : memref<1x8x67x4xf32, #tpu.memory_space<vmem>>, vector<1x1x67x4xf32>
    %162 = vector.shape_cast %161 : vector<1x1x67x4xf32> to vector<67x4xf32>
    %c0_128 = arith.constant 0 : index
    %c0_129 = arith.constant 0 : index
    %163 = vector.load %arg3[%c0_128, %c0_129] : memref<64x67xbf16, #tpu.memory_space<vmem>>, vector<64x67xbf16>
    %c0_130 = arith.constant 0 : index
    %c0_131 = arith.constant 0 : index
    %164 = vector.load %arg4[%c0_130, %c0_131] : memref<64x1xf32, #tpu.memory_space<vmem>>, vector<64x1xf32>
    %165 = arith.truncf %162 : vector<67x4xf32> to vector<67x4xbf16>
    %cst_132 = arith.constant dense<0.000000e+00> : vector<64x4xf32>
    %166 = tpu.matmul %163, %165, %cst_132 {dimension_numbers = #tpu.dot_dimension_numbers<[1], [0], [0], [1], [0, 0, 1, 1], [], []>} : vector<64x67xbf16>, vector<67x4xbf16>, vector<64x4xf32> -> vector<64x4xf32>
    %167 = vector.broadcast %164 : vector<64x1xf32> to vector<64x4xf32>
    %168 = arith.addf %166, %167 : vector<64x4xf32>
    %cst_133 = arith.constant 0.000000e+00 : f32
    %169 = vector.broadcast %cst_133 : f32 to vector<64x4xf32>
    %170 = arith.maximumf %168, %169 : vector<64x4xf32>
    %c0_134 = arith.constant 0 : index
    %c0_135 = arith.constant 0 : index
    %171 = vector.load %arg5[%c0_134, %c0_135] : memref<128x64xbf16, #tpu.memory_space<vmem>>, vector<128x64xbf16>
    %c0_136 = arith.constant 0 : index
    %c0_137 = arith.constant 0 : index
    %172 = vector.load %arg6[%c0_136, %c0_137] : memref<128x1xf32, #tpu.memory_space<vmem>>, vector<128x1xf32>
    %173 = arith.truncf %170 : vector<64x4xf32> to vector<64x4xbf16>
    %cst_138 = arith.constant dense<0.000000e+00> : vector<128x4xf32>
    %174 = tpu.matmul %171, %173, %cst_138 {dimension_numbers = #tpu.dot_dimension_numbers<[1], [0], [0], [1], [0, 0, 1, 1], [], []>} : vector<128x64xbf16>, vector<64x4xbf16>, vector<128x4xf32> -> vector<128x4xf32>
    %175 = vector.broadcast %172 : vector<128x1xf32> to vector<128x4xf32>
    %176 = arith.addf %174, %175 : vector<128x4xf32>
    %cst_139 = arith.constant 0.000000e+00 : f32
    %177 = vector.broadcast %cst_139 : f32 to vector<128x4xf32>
    %178 = arith.maximumf %176, %177 : vector<128x4xf32>
    %c0_140 = arith.constant 0 : index
    %c0_141 = arith.constant 0 : index
    %179 = vector.load %arg7[%c0_140, %c0_141] : memref<256x128xbf16, #tpu.memory_space<vmem>>, vector<256x128xbf16>
    %c0_142 = arith.constant 0 : index
    %c0_143 = arith.constant 0 : index
    %180 = vector.load %arg8[%c0_142, %c0_143] : memref<256x1xf32, #tpu.memory_space<vmem>>, vector<256x1xf32>
    %181 = arith.truncf %178 : vector<128x4xf32> to vector<128x4xbf16>
    %cst_144 = arith.constant dense<0.000000e+00> : vector<256x4xf32>
    %182 = tpu.matmul %179, %181, %cst_144 {dimension_numbers = #tpu.dot_dimension_numbers<[1], [0], [0], [1], [0, 0, 1, 1], [], []>} : vector<256x128xbf16>, vector<128x4xbf16>, vector<256x4xf32> -> vector<256x4xf32>
    %183 = vector.broadcast %180 : vector<256x1xf32> to vector<256x4xf32>
    %184 = arith.addf %182, %183 : vector<256x4xf32>
    %cst_145 = arith.constant 0.000000e+00 : f32
    %185 = vector.broadcast %cst_145 : f32 to vector<256x4xf32>
    %186 = arith.maximumf %184, %185 : vector<256x4xf32>
    %187 = arith.maximumf %160, %186 : vector<256x4xf32>
    %c0_146 = arith.constant 0 : index
    %c7 = arith.constant 7 : index
    %c0_147 = arith.constant 0 : index
    %c0_148 = arith.constant 0 : index
    %188 = vector.load %arg2[%c0_146, %c7, %c0_147, %c0_148] : memref<1x8x67x4xf32, #tpu.memory_space<vmem>>, vector<1x1x67x4xf32>
    %189 = vector.shape_cast %188 : vector<1x1x67x4xf32> to vector<67x4xf32>
    %c0_149 = arith.constant 0 : index
    %c0_150 = arith.constant 0 : index
    %190 = vector.load %arg3[%c0_149, %c0_150] : memref<64x67xbf16, #tpu.memory_space<vmem>>, vector<64x67xbf16>
    %c0_151 = arith.constant 0 : index
    %c0_152 = arith.constant 0 : index
    %191 = vector.load %arg4[%c0_151, %c0_152] : memref<64x1xf32, #tpu.memory_space<vmem>>, vector<64x1xf32>
    %192 = arith.truncf %189 : vector<67x4xf32> to vector<67x4xbf16>
    %cst_153 = arith.constant dense<0.000000e+00> : vector<64x4xf32>
    %193 = tpu.matmul %190, %192, %cst_153 {dimension_numbers = #tpu.dot_dimension_numbers<[1], [0], [0], [1], [0, 0, 1, 1], [], []>} : vector<64x67xbf16>, vector<67x4xbf16>, vector<64x4xf32> -> vector<64x4xf32>
    %194 = vector.broadcast %191 : vector<64x1xf32> to vector<64x4xf32>
    %195 = arith.addf %193, %194 : vector<64x4xf32>
    %cst_154 = arith.constant 0.000000e+00 : f32
    %196 = vector.broadcast %cst_154 : f32 to vector<64x4xf32>
    %197 = arith.maximumf %195, %196 : vector<64x4xf32>
    %c0_155 = arith.constant 0 : index
    %c0_156 = arith.constant 0 : index
    %198 = vector.load %arg5[%c0_155, %c0_156] : memref<128x64xbf16, #tpu.memory_space<vmem>>, vector<128x64xbf16>
    %c0_157 = arith.constant 0 : index
    %c0_158 = arith.constant 0 : index
    %199 = vector.load %arg6[%c0_157, %c0_158] : memref<128x1xf32, #tpu.memory_space<vmem>>, vector<128x1xf32>
    %200 = arith.truncf %197 : vector<64x4xf32> to vector<64x4xbf16>
    %cst_159 = arith.constant dense<0.000000e+00> : vector<128x4xf32>
    %201 = tpu.matmul %198, %200, %cst_159 {dimension_numbers = #tpu.dot_dimension_numbers<[1], [0], [0], [1], [0, 0, 1, 1], [], []>} : vector<128x64xbf16>, vector<64x4xbf16>, vector<128x4xf32> -> vector<128x4xf32>
    %202 = vector.broadcast %199 : vector<128x1xf32> to vector<128x4xf32>
    %203 = arith.addf %201, %202 : vector<128x4xf32>
    %cst_160 = arith.constant 0.000000e+00 : f32
    %204 = vector.broadcast %cst_160 : f32 to vector<128x4xf32>
    %205 = arith.maximumf %203, %204 : vector<128x4xf32>
    %c0_161 = arith.constant 0 : index
    %c0_162 = arith.constant 0 : index
    %206 = vector.load %arg7[%c0_161, %c0_162] : memref<256x128xbf16, #tpu.memory_space<vmem>>, vector<256x128xbf16>
    %c0_163 = arith.constant 0 : index
    %c0_164 = arith.constant 0 : index
    %207 = vector.load %arg8[%c0_163, %c0_164] : memref<256x1xf32, #tpu.memory_space<vmem>>, vector<256x1xf32>
    %208 = arith.truncf %205 : vector<128x4xf32> to vector<128x4xbf16>
    %cst_165 = arith.constant dense<0.000000e+00> : vector<256x4xf32>
    %209 = tpu.matmul %206, %208, %cst_165 {dimension_numbers = #tpu.dot_dimension_numbers<[1], [0], [0], [1], [0, 0, 1, 1], [], []>} : vector<256x128xbf16>, vector<128x4xbf16>, vector<256x4xf32> -> vector<256x4xf32>
    %210 = vector.broadcast %207 : vector<256x1xf32> to vector<256x4xf32>
    %211 = arith.addf %209, %210 : vector<256x4xf32>
    %cst_166 = arith.constant 0.000000e+00 : f32
    %212 = vector.broadcast %cst_166 : f32 to vector<256x4xf32>
    %213 = arith.maximumf %211, %212 : vector<256x4xf32>
    %214 = arith.maximumf %187, %213 : vector<256x4xf32>
    %c0_167 = arith.constant 0 : index
    %c0_168 = arith.constant 0 : index
    %c0_169 = arith.constant 0 : index
    %215 = vector.load %arg9[%c0_167, %c0_168, %c0_169] : memref<1x256x4xf32, #tpu.memory_space<vmem>>, vector<1x256x4xf32>
    %216 = vector.shape_cast %215 : vector<1x256x4xf32> to vector<256x4xf32>
    %217 = vector.shape_cast %214 : vector<256x4xf32> to vector<1x256x4xf32>
    tpu.vector_store %arg9[%c0_167, %c0_168, %c0_169], %217 {strides = array<i32>} : memref<1x256x4xf32, #tpu.memory_space<vmem>>, vector<1x256x4xf32>,
    return
  }
  func.func @transform_0(%arg0: i32, %arg1: i32) -> (i32, i32, i32, i32) {
    %c0_i32 = arith.constant 0 : i32
    %c0_i32_0 = arith.constant 0 : i32
    %c0_i32_1 = arith.constant 0 : i32
    return %arg0, %c0_i32, %c0_i32_0, %arg1 : i32, i32, i32, i32
  }
  func.func @transform_1(%arg0: i32, %arg1: i32) -> (i32, i32) {
    %c0_i32 = arith.constant 0 : i32
    %c0_i32_0 = arith.constant 0 : i32
    %c0_i32_1 = arith.constant 0 : i32
    return %c0_i32, %c0_i32_0 : i32, i32
  }
  func.func @transform_2(%arg0: i32, %arg1: i32) -> (i32, i32) {
    %c0_i32 = arith.constant 0 : i32
    %c0_i32_0 = arith.constant 0 : i32
    %c0_i32_1 = arith.constant 0 : i32
    return %c0_i32, %c0_i32_0 : i32, i32
  }
  func.func @transform_3(%arg0: i32, %arg1: i32) -> (i32, i32) {
    %c0_i32 = arith.constant 0 : i32
    %c0_i32_0 = arith.constant 0 : i32
    %c0_i32_1 = arith.constant 0 : i32
    return %c0_i32, %c0_i32_0 : i32, i32
  }
  func.func @transform_4(%arg0: i32, %arg1: i32) -> (i32, i32) {
    %c0_i32 = arith.constant 0 : i32
    %c0_i32_0 = arith.constant 0 : i32
    %c0_i32_1 = arith.constant 0 : i32
    return %c0_i32, %c0_i32_0 : i32, i32
  }
  func.func @transform_5(%arg0: i32, %arg1: i32) -> (i32, i32) {
    %c0_i32 = arith.constant 0 : i32
    %c0_i32_0 = arith.constant 0 : i32
    %c0_i32_1 = arith.constant 0 : i32
    return %c0_i32, %c0_i32_0 : i32, i32
  }
  func.func @transform_6(%arg0: i32, %arg1: i32) -> (i32, i32) {
    %c0_i32 = arith.constant 0 : i32
    %c0_i32_0 = arith.constant 0 : i32
    %c0_i32_1 = arith.constant 0 : i32
    return %c0_i32, %c0_i32_0 : i32, i32
  }
  func.func @transform_7(%arg0: i32, %arg1: i32) -> (i32, i32, i32) {
    %c0_i32 = arith.constant 0 : i32
    %c0_i32_0 = arith.constant 0 : i32
    return %arg0, %c0_i32, %arg1 : i32, i32, i32
  }
}

module attributes {stable_mosaic.version = 11 : i64} {
  func.func @kernel(%arg0: i32, %arg1: memref<1x256x4xf32, #tpu.memory_space<vmem>>, %arg2: memref<64x256xbf16, #tpu.memory_space<vmem>>, %arg3: memref<256x64xbf16, #tpu.memory_space<vmem>>, %arg4: memref<1x256x4xf32, #tpu.memory_space<vmem>>) attributes {dimension_semantics = [#tpu.dimension_semantics<parallel>], iteration_bounds = array<i64: 2>, scalar_prefetch = 0 : i64, scratch_operands = 0 : i64, tpu.core_type = #tpu.core_type<tc>, window_params = [{transform_indices = @transform_0, window_bounds = array<i64: 1, 256, 4>}, {pipeline_mode = #tpu.pipeline_mode<synchronous>, transform_indices = @transform_1, window_bounds = array<i64: 64, 256>}, {pipeline_mode = #tpu.pipeline_mode<synchronous>, transform_indices = @transform_2, window_bounds = array<i64: 256, 64>}, {transform_indices = @transform_3, window_bounds = array<i64: 1, 256, 4>}]} {
    %c0 = arith.constant 0 : index
    %c0_0 = arith.constant 0 : index
    %0 = vector.load %arg2[%c0, %c0_0] : memref<64x256xbf16, #tpu.memory_space<vmem>>, vector<64x256xbf16>
    %c0_1 = arith.constant 0 : index
    %c0_2 = arith.constant 0 : index
    %c0_3 = arith.constant 0 : index
    %1 = vector.load %arg1[%c0_1, %c0_2, %c0_3] : memref<1x256x4xf32, #tpu.memory_space<vmem>>, vector<1x256x4xf32>
    %2 = vector.shape_cast %1 : vector<1x256x4xf32> to vector<256x4xf32>
    %3 = arith.truncf %2 : vector<256x4xf32> to vector<256x4xbf16>
    %cst = arith.constant dense<0.000000e+00> : vector<64x4xf32>
    %4 = tpu.matmul %0, %3, %cst {dimension_numbers = #tpu.dot_dimension_numbers<[1], [0], [0], [1], [0, 0, 1, 1], [], []>} : vector<64x256xbf16>, vector<256x4xbf16>, vector<64x4xf32> -> vector<64x4xf32>
    %cst_4 = arith.constant dense<0xFF800000> : vector<4xf32>
    %5 = vector.multi_reduction <maximumf>, %4, %cst_4 [0] : vector<64x4xf32> to vector<4xf32>
    %6 = vector.shape_cast %5 : vector<4xf32> to vector<1x4xf32>
    %7 = vector.broadcast %6 : vector<1x4xf32> to vector<64x4xf32>
    %8 = arith.subf %4, %7 : vector<64x4xf32>
    %9 = math.exp %8 : vector<64x4xf32>
    %cst_5 = arith.constant dense<0.000000e+00> : vector<4xf32>
    %10 = vector.multi_reduction <add>, %9, %cst_5 [0] : vector<64x4xf32> to vector<4xf32>
    %11 = vector.shape_cast %10 : vector<4xf32> to vector<1x4xf32>
    %12 = vector.broadcast %11 : vector<1x4xf32> to vector<64x4xf32>
    %13 = arith.divf %9, %12 : vector<64x4xf32>
    %cst_6 = arith.constant dense<0.000000e+00> : vector<64xf32>
    %14 = vector.multi_reduction <add>, %13, %cst_6 [1] : vector<64x4xf32> to vector<64xf32>
    %15 = vector.shape_cast %14 : vector<64xf32> to vector<64x1xf32>
    %cst_7 = arith.constant 9.99999971E-10 : f32
    %16 = vector.broadcast %cst_7 : f32 to vector<64x1xf32>
    %17 = arith.addf %16, %15 : vector<64x1xf32>
    %18 = vector.broadcast %17 : vector<64x1xf32> to vector<64x4xf32>
    %19 = arith.divf %13, %18 : vector<64x4xf32>
    %c0_8 = arith.constant 0 : index
    %c0_9 = arith.constant 0 : index
    %20 = vector.load %arg3[%c0_8, %c0_9] : memref<256x64xbf16, #tpu.memory_space<vmem>>, vector<256x64xbf16>
    %21 = arith.truncf %19 : vector<64x4xf32> to vector<64x4xbf16>
    %cst_10 = arith.constant dense<0.000000e+00> : vector<256x4xf32>
    %22 = tpu.matmul %20, %21, %cst_10 {dimension_numbers = #tpu.dot_dimension_numbers<[1], [0], [0], [1], [0, 0, 1, 1], [], []>} : vector<256x64xbf16>, vector<64x4xbf16>, vector<256x4xf32> -> vector<256x4xf32>
    %c0_11 = arith.constant 0 : index
    %c0_12 = arith.constant 0 : index
    %c0_13 = arith.constant 0 : index
    %23 = vector.load %arg4[%c0_11, %c0_12, %c0_13] : memref<1x256x4xf32, #tpu.memory_space<vmem>>, vector<1x256x4xf32>
    %24 = vector.shape_cast %23 : vector<1x256x4xf32> to vector<256x4xf32>
    %25 = vector.shape_cast %22 : vector<256x4xf32> to vector<1x256x4xf32>
    tpu.vector_store %arg4[%c0_11, %c0_12, %c0_13], %25 {strides = array<i32>} : memref<1x256x4xf32, #tpu.memory_space<vmem>>, vector<1x256x4xf32>,
    return
  }
  func.func @transform_0(%arg0: i32) -> (i32, i32, i32) {
    %c0_i32 = arith.constant 0 : i32
    %c0_i32_0 = arith.constant 0 : i32
    %c0_i32_1 = arith.constant 0 : i32
    return %arg0, %c0_i32, %c0_i32_0 : i32, i32, i32
  }
  func.func @transform_1(%arg0: i32) -> (i32, i32) {
    %c0_i32 = arith.constant 0 : i32
    %c0_i32_0 = arith.constant 0 : i32
    %c0_i32_1 = arith.constant 0 : i32
    return %c0_i32, %c0_i32_0 : i32, i32
  }
  func.func @transform_2(%arg0: i32) -> (i32, i32) {
    %c0_i32 = arith.constant 0 : i32
    %c0_i32_0 = arith.constant 0 : i32
    %c0_i32_1 = arith.constant 0 : i32
    return %c0_i32, %c0_i32_0 : i32, i32
  }
  func.func @transform_3(%arg0: i32) -> (i32, i32, i32) {
    %c0_i32 = arith.constant 0 : i32
    %c0_i32_0 = arith.constant 0 : i32
    %c0_i32_1 = arith.constant 0 : i32
    return %arg0, %c0_i32, %c0_i32_0 : i32, i32, i32
  }
}

module attributes {stable_mosaic.version = 11 : i64} {
  func.func @kernel(%arg0: i32, %arg1: i32, %arg2: memref<1x320x16xf32, #tpu.memory_space<vmem>>, %arg3: memref<64x320xbf16, #tpu.memory_space<vmem>>, %arg4: memref<64x1xf32, #tpu.memory_space<vmem>>, %arg5: memref<32x64xbf16, #tpu.memory_space<vmem>>, %arg6: memref<32x1xf32, #tpu.memory_space<vmem>>, %arg7: memref<1x32x16xf32, #tpu.memory_space<vmem>>) attributes {dimension_semantics = [#tpu.dimension_semantics<parallel>, #tpu.dimension_semantics<parallel>], iteration_bounds = array<i64: 2, 1>, scalar_prefetch = 0 : i64, scratch_operands = 0 : i64, tpu.core_type = #tpu.core_type<tc>, window_params = [{transform_indices = @transform_0, window_bounds = array<i64: 1, 320, 16>}, {pipeline_mode = #tpu.pipeline_mode<synchronous>, transform_indices = @transform_1, window_bounds = array<i64: 64, 320>}, {pipeline_mode = #tpu.pipeline_mode<synchronous>, transform_indices = @transform_2, window_bounds = array<i64: 64, 1>}, {pipeline_mode = #tpu.pipeline_mode<synchronous>, transform_indices = @transform_3, window_bounds = array<i64: 32, 64>}, {pipeline_mode = #tpu.pipeline_mode<synchronous>, transform_indices = @transform_4, window_bounds = array<i64: 32, 1>}, {transform_indices = @transform_5, window_bounds = array<i64: 1, 32, 16>}]} {
    %c0 = arith.constant 0 : index
    %c0_0 = arith.constant 0 : index
    %c0_1 = arith.constant 0 : index
    %0 = vector.load %arg2[%c0, %c0_0, %c0_1] : memref<1x320x16xf32, #tpu.memory_space<vmem>>, vector<1x320x16xf32>
    %1 = vector.shape_cast %0 : vector<1x320x16xf32> to vector<320x16xf32>
    %c0_2 = arith.constant 0 : index
    %c0_3 = arith.constant 0 : index
    %2 = vector.load %arg3[%c0_2, %c0_3] : memref<64x320xbf16, #tpu.memory_space<vmem>>, vector<64x320xbf16>
    %c0_4 = arith.constant 0 : index
    %c0_5 = arith.constant 0 : index
    %3 = vector.load %arg4[%c0_4, %c0_5] : memref<64x1xf32, #tpu.memory_space<vmem>>, vector<64x1xf32>
    %4 = arith.truncf %1 : vector<320x16xf32> to vector<320x16xbf16>
    %cst = arith.constant dense<0.000000e+00> : vector<64x16xf32>
    %5 = tpu.matmul %2, %4, %cst {dimension_numbers = #tpu.dot_dimension_numbers<[1], [0], [0], [1], [0, 0, 1, 1], [], []>} : vector<64x320xbf16>, vector<320x16xbf16>, vector<64x16xf32> -> vector<64x16xf32>
    %6 = vector.broadcast %3 : vector<64x1xf32> to vector<64x16xf32>
    %7 = arith.addf %5, %6 : vector<64x16xf32>
    %cst_6 = arith.constant 0.000000e+00 : f32
    %8 = vector.broadcast %cst_6 : f32 to vector<64x16xf32>
    %9 = arith.maximumf %7, %8 : vector<64x16xf32>
    %c0_7 = arith.constant 0 : index
    %c0_8 = arith.constant 0 : index
    %10 = vector.load %arg5[%c0_7, %c0_8] : memref<32x64xbf16, #tpu.memory_space<vmem>>, vector<32x64xbf16>
    %c0_9 = arith.constant 0 : index
    %c0_10 = arith.constant 0 : index
    %11 = vector.load %arg6[%c0_9, %c0_10] : memref<32x1xf32, #tpu.memory_space<vmem>>, vector<32x1xf32>
    %12 = arith.truncf %9 : vector<64x16xf32> to vector<64x16xbf16>
    %cst_11 = arith.constant dense<0.000000e+00> : vector<32x16xf32>
    %13 = tpu.matmul %10, %12, %cst_11 {dimension_numbers = #tpu.dot_dimension_numbers<[1], [0], [0], [1], [0, 0, 1, 1], [], []>} : vector<32x64xbf16>, vector<64x16xbf16>, vector<32x16xf32> -> vector<32x16xf32>
    %14 = vector.broadcast %11 : vector<32x1xf32> to vector<32x16xf32>
    %15 = arith.addf %13, %14 : vector<32x16xf32>
    %cst_12 = arith.constant 0.000000e+00 : f32
    %16 = vector.broadcast %cst_12 : f32 to vector<32x16xf32>
    %17 = arith.maximumf %15, %16 : vector<32x16xf32>
    %c0_13 = arith.constant 0 : index
    %c0_14 = arith.constant 0 : index
    %c0_15 = arith.constant 0 : index
    %18 = vector.load %arg7[%c0_13, %c0_14, %c0_15] : memref<1x32x16xf32, #tpu.memory_space<vmem>>, vector<1x32x16xf32>
    %19 = vector.shape_cast %18 : vector<1x32x16xf32> to vector<32x16xf32>
    %20 = vector.shape_cast %17 : vector<32x16xf32> to vector<1x32x16xf32>
    tpu.vector_store %arg7[%c0_13, %c0_14, %c0_15], %20 {strides = array<i32>} : memref<1x32x16xf32, #tpu.memory_space<vmem>>, vector<1x32x16xf32>,
    return
  }
  func.func @transform_0(%arg0: i32, %arg1: i32) -> (i32, i32, i32) {
    %c0_i32 = arith.constant 0 : i32
    %c0_i32_0 = arith.constant 0 : i32
    return %arg0, %c0_i32, %arg1 : i32, i32, i32
  }
  func.func @transform_1(%arg0: i32, %arg1: i32) -> (i32, i32) {
    %c0_i32 = arith.constant 0 : i32
    %c0_i32_0 = arith.constant 0 : i32
    %c0_i32_1 = arith.constant 0 : i32
    return %c0_i32, %c0_i32_0 : i32, i32
  }
  func.func @transform_2(%arg0: i32, %arg1: i32) -> (i32, i32) {
    %c0_i32 = arith.constant 0 : i32
    %c0_i32_0 = arith.constant 0 : i32
    %c0_i32_1 = arith.constant 0 : i32
    return %c0_i32, %c0_i32_0 : i32, i32
  }
  func.func @transform_3(%arg0: i32, %arg1: i32) -> (i32, i32) {
    %c0_i32 = arith.constant 0 : i32
    %c0_i32_0 = arith.constant 0 : i32
    %c0_i32_1 = arith.constant 0 : i32
    return %c0_i32, %c0_i32_0 : i32, i32
  }
  func.func @transform_4(%arg0: i32, %arg1: i32) -> (i32, i32) {
    %c0_i32 = arith.constant 0 : i32
    %c0_i32_0 = arith.constant 0 : i32
    %c0_i32_1 = arith.constant 0 : i32
    return %c0_i32, %c0_i32_0 : i32, i32
  }
  func.func @transform_5(%arg0: i32, %arg1: i32) -> (i32, i32, i32) {
    %c0_i32 = arith.constant 0 : i32
    %c0_i32_0 = arith.constant 0 : i32
    return %arg0, %c0_i32, %arg1 : i32, i32, i32
  }
}

module attributes {stable_mosaic.version = 11 : i64} {
  func.func @kernel(%arg0: i32, %arg1: memref<1x32x16xf32, #tpu.memory_space<vmem>>, %arg2: memref<64x32xbf16, #tpu.memory_space<vmem>>, %arg3: memref<32x64xbf16, #tpu.memory_space<vmem>>, %arg4: memref<1x32x16xf32, #tpu.memory_space<vmem>>) attributes {dimension_semantics = [#tpu.dimension_semantics<parallel>], iteration_bounds = array<i64: 2>, scalar_prefetch = 0 : i64, scratch_operands = 0 : i64, tpu.core_type = #tpu.core_type<tc>, window_params = [{transform_indices = @transform_0, window_bounds = array<i64: 1, 32, 16>}, {pipeline_mode = #tpu.pipeline_mode<synchronous>, transform_indices = @transform_1, window_bounds = array<i64: 64, 32>}, {pipeline_mode = #tpu.pipeline_mode<synchronous>, transform_indices = @transform_2, window_bounds = array<i64: 32, 64>}, {transform_indices = @transform_3, window_bounds = array<i64: 1, 32, 16>}]} {
    %c0 = arith.constant 0 : index
    %c0_0 = arith.constant 0 : index
    %0 = vector.load %arg2[%c0, %c0_0] : memref<64x32xbf16, #tpu.memory_space<vmem>>, vector<64x32xbf16>
    %c0_1 = arith.constant 0 : index
    %c0_2 = arith.constant 0 : index
    %c0_3 = arith.constant 0 : index
    %1 = vector.load %arg1[%c0_1, %c0_2, %c0_3] : memref<1x32x16xf32, #tpu.memory_space<vmem>>, vector<1x32x16xf32>
    %2 = vector.shape_cast %1 : vector<1x32x16xf32> to vector<32x16xf32>
    %3 = arith.truncf %2 : vector<32x16xf32> to vector<32x16xbf16>
    %cst = arith.constant dense<0.000000e+00> : vector<64x16xf32>
    %4 = tpu.matmul %0, %3, %cst {dimension_numbers = #tpu.dot_dimension_numbers<[1], [0], [0], [1], [0, 0, 1, 1], [], []>} : vector<64x32xbf16>, vector<32x16xbf16>, vector<64x16xf32> -> vector<64x16xf32>
    %cst_4 = arith.constant dense<0xFF800000> : vector<16xf32>
    %5 = vector.multi_reduction <maximumf>, %4, %cst_4 [0] : vector<64x16xf32> to vector<16xf32>
    %6 = vector.shape_cast %5 : vector<16xf32> to vector<1x16xf32>
    %7 = vector.broadcast %6 : vector<1x16xf32> to vector<64x16xf32>
    %8 = arith.subf %4, %7 : vector<64x16xf32>
    %9 = math.exp %8 : vector<64x16xf32>
    %cst_5 = arith.constant dense<0.000000e+00> : vector<16xf32>
    %10 = vector.multi_reduction <add>, %9, %cst_5 [0] : vector<64x16xf32> to vector<16xf32>
    %11 = vector.shape_cast %10 : vector<16xf32> to vector<1x16xf32>
    %12 = vector.broadcast %11 : vector<1x16xf32> to vector<64x16xf32>
    %13 = arith.divf %9, %12 : vector<64x16xf32>
    %cst_6 = arith.constant dense<0.000000e+00> : vector<64xf32>
    %14 = vector.multi_reduction <add>, %13, %cst_6 [1] : vector<64x16xf32> to vector<64xf32>
    %15 = vector.shape_cast %14 : vector<64xf32> to vector<64x1xf32>
    %cst_7 = arith.constant 9.99999971E-10 : f32
    %16 = vector.broadcast %cst_7 : f32 to vector<64x1xf32>
    %17 = arith.addf %16, %15 : vector<64x1xf32>
    %18 = vector.broadcast %17 : vector<64x1xf32> to vector<64x16xf32>
    %19 = arith.divf %13, %18 : vector<64x16xf32>
    %c0_8 = arith.constant 0 : index
    %c0_9 = arith.constant 0 : index
    %20 = vector.load %arg3[%c0_8, %c0_9] : memref<32x64xbf16, #tpu.memory_space<vmem>>, vector<32x64xbf16>
    %21 = arith.truncf %19 : vector<64x16xf32> to vector<64x16xbf16>
    %cst_10 = arith.constant dense<0.000000e+00> : vector<32x16xf32>
    %22 = tpu.matmul %20, %21, %cst_10 {dimension_numbers = #tpu.dot_dimension_numbers<[1], [0], [0], [1], [0, 0, 1, 1], [], []>} : vector<32x64xbf16>, vector<64x16xbf16>, vector<32x16xf32> -> vector<32x16xf32>
    %c0_11 = arith.constant 0 : index
    %c0_12 = arith.constant 0 : index
    %c0_13 = arith.constant 0 : index
    %23 = vector.load %arg4[%c0_11, %c0_12, %c0_13] : memref<1x32x16xf32, #tpu.memory_space<vmem>>, vector<1x32x16xf32>
    %24 = vector.shape_cast %23 : vector<1x32x16xf32> to vector<32x16xf32>
    %25 = vector.shape_cast %22 : vector<32x16xf32> to vector<1x32x16xf32>
    tpu.vector_store %arg4[%c0_11, %c0_12, %c0_13], %25 {strides = array<i32>} : memref<1x32x16xf32, #tpu.memory_space<vmem>>, vector<1x32x16xf32>,
    return
  }
  func.func @transform_0(%arg0: i32) -> (i32, i32, i32) {
    %c0_i32 = arith.constant 0 : i32
    %c0_i32_0 = arith.constant 0 : i32
    %c0_i32_1 = arith.constant 0 : i32
    return %arg0, %c0_i32, %c0_i32_0 : i32, i32, i32
  }
  func.func @transform_1(%arg0: i32) -> (i32, i32) {
    %c0_i32 = arith.constant 0 : i32
    %c0_i32_0 = arith.constant 0 : i32
    %c0_i32_1 = arith.constant 0 : i32
    return %c0_i32, %c0_i32_0 : i32, i32
  }
  func.func @transform_2(%arg0: i32) -> (i32, i32) {
    %c0_i32 = arith.constant 0 : i32
    %c0_i32_0 = arith.constant 0 : i32
    %c0_i32_1 = arith.constant 0 : i32
    return %c0_i32, %c0_i32_0 : i32, i32
  }
  func.func @transform_3(%arg0: i32) -> (i32, i32, i32) {
    %c0_i32 = arith.constant 0 : i32
    %c0_i32_0 = arith.constant 0 : i32
    %c0_i32_1 = arith.constant 0 : i32
    return %arg0, %c0_i32, %c0_i32_0 : i32, i32, i32
  }
}

module attributes {stable_mosaic.version = 11 : i64} {
  func.func @kernel(%arg0: i32, %arg1: i32, %arg2: memref<1x34x64xf32, #tpu.memory_space<vmem>>, %arg3: memref<32x34xbf16, #tpu.memory_space<vmem>>, %arg4: memref<32x1xf32, #tpu.memory_space<vmem>>, %arg5: memref<32x32xbf16, #tpu.memory_space<vmem>>, %arg6: memref<32x1xf32, #tpu.memory_space<vmem>>, %arg7: memref<16x32xbf16, #tpu.memory_space<vmem>>, %arg8: memref<16x1xf32, #tpu.memory_space<vmem>>, %arg9: memref<1x16x64xf32, #tpu.memory_space<vmem>>) attributes {dimension_semantics = [#tpu.dimension_semantics<parallel>, #tpu.dimension_semantics<parallel>], iteration_bounds = array<i64: 2, 1>, scalar_prefetch = 0 : i64, scratch_operands = 0 : i64, tpu.core_type = #tpu.core_type<tc>, window_params = [{transform_indices = @transform_0, window_bounds = array<i64: 1, 34, 64>}, {pipeline_mode = #tpu.pipeline_mode<synchronous>, transform_indices = @transform_1, window_bounds = array<i64: 32, 34>}, {pipeline_mode = #tpu.pipeline_mode<synchronous>, transform_indices = @transform_2, window_bounds = array<i64: 32, 1>}, {pipeline_mode = #tpu.pipeline_mode<synchronous>, transform_indices = @transform_3, window_bounds = array<i64: 32, 32>}, {pipeline_mode = #tpu.pipeline_mode<synchronous>, transform_indices = @transform_4, window_bounds = array<i64: 32, 1>}, {pipeline_mode = #tpu.pipeline_mode<synchronous>, transform_indices = @transform_5, window_bounds = array<i64: 16, 32>}, {pipeline_mode = #tpu.pipeline_mode<synchronous>, transform_indices = @transform_6, window_bounds = array<i64: 16, 1>}, {transform_indices = @transform_7, window_bounds = array<i64: 1, 16, 64>}]} {
    %c0 = arith.constant 0 : index
    %c0_0 = arith.constant 0 : index
    %c0_1 = arith.constant 0 : index
    %0 = vector.load %arg2[%c0, %c0_0, %c0_1] : memref<1x34x64xf32, #tpu.memory_space<vmem>>, vector<1x34x64xf32>
    %1 = vector.shape_cast %0 : vector<1x34x64xf32> to vector<34x64xf32>
    %c0_2 = arith.constant 0 : index
    %c0_3 = arith.constant 0 : index
    %2 = vector.load %arg3[%c0_2, %c0_3] : memref<32x34xbf16, #tpu.memory_space<vmem>>, vector<32x34xbf16>
    %c0_4 = arith.constant 0 : index
    %c0_5 = arith.constant 0 : index
    %3 = vector.load %arg4[%c0_4, %c0_5] : memref<32x1xf32, #tpu.memory_space<vmem>>, vector<32x1xf32>
    %4 = arith.truncf %1 : vector<34x64xf32> to vector<34x64xbf16>
    %cst = arith.constant dense<0.000000e+00> : vector<32x64xf32>
    %5 = tpu.matmul %2, %4, %cst {dimension_numbers = #tpu.dot_dimension_numbers<[1], [0], [0], [1], [0, 0, 1, 1], [], []>} : vector<32x34xbf16>, vector<34x64xbf16>, vector<32x64xf32> -> vector<32x64xf32>
    %6 = vector.broadcast %3 : vector<32x1xf32> to vector<32x64xf32>
    %7 = arith.addf %5, %6 : vector<32x64xf32>
    %cst_6 = arith.constant 0.000000e+00 : f32
    %8 = vector.broadcast %cst_6 : f32 to vector<32x64xf32>
    %9 = arith.maximumf %7, %8 : vector<32x64xf32>
    %c0_7 = arith.constant 0 : index
    %c0_8 = arith.constant 0 : index
    %10 = vector.load %arg5[%c0_7, %c0_8] : memref<32x32xbf16, #tpu.memory_space<vmem>>, vector<32x32xbf16>
    %c0_9 = arith.constant 0 : index
    %c0_10 = arith.constant 0 : index
    %11 = vector.load %arg6[%c0_9, %c0_10] : memref<32x1xf32, #tpu.memory_space<vmem>>, vector<32x1xf32>
    %12 = arith.truncf %9 : vector<32x64xf32> to vector<32x64xbf16>
    %cst_11 = arith.constant dense<0.000000e+00> : vector<32x64xf32>
    %13 = tpu.matmul %10, %12, %cst_11 {dimension_numbers = #tpu.dot_dimension_numbers<[1], [0], [0], [1], [0, 0, 1, 1], [], []>} : vector<32x32xbf16>, vector<32x64xbf16>, vector<32x64xf32> -> vector<32x64xf32>
    %14 = vector.broadcast %11 : vector<32x1xf32> to vector<32x64xf32>
    %15 = arith.addf %13, %14 : vector<32x64xf32>
    %cst_12 = arith.constant 0.000000e+00 : f32
    %16 = vector.broadcast %cst_12 : f32 to vector<32x64xf32>
    %17 = arith.maximumf %15, %16 : vector<32x64xf32>
    %c0_13 = arith.constant 0 : index
    %c0_14 = arith.constant 0 : index
    %18 = vector.load %arg7[%c0_13, %c0_14] : memref<16x32xbf16, #tpu.memory_space<vmem>>, vector<16x32xbf16>
    %c0_15 = arith.constant 0 : index
    %c0_16 = arith.constant 0 : index
    %19 = vector.load %arg8[%c0_15, %c0_16] : memref<16x1xf32, #tpu.memory_space<vmem>>, vector<16x1xf32>
    %20 = arith.truncf %17 : vector<32x64xf32> to vector<32x64xbf16>
    %cst_17 = arith.constant dense<0.000000e+00> : vector<16x64xf32>
    %21 = tpu.matmul %18, %20, %cst_17 {dimension_numbers = #tpu.dot_dimension_numbers<[1], [0], [0], [1], [0, 0, 1, 1], [], []>} : vector<16x32xbf16>, vector<32x64xbf16>, vector<16x64xf32> -> vector<16x64xf32>
    %22 = vector.broadcast %19 : vector<16x1xf32> to vector<16x64xf32>
    %23 = arith.addf %21, %22 : vector<16x64xf32>
    %cst_18 = arith.constant 0.000000e+00 : f32
    %24 = vector.broadcast %cst_18 : f32 to vector<16x64xf32>
    %25 = arith.maximumf %23, %24 : vector<16x64xf32>
    %c0_19 = arith.constant 0 : index
    %c0_20 = arith.constant 0 : index
    %c0_21 = arith.constant 0 : index
    %26 = vector.load %arg9[%c0_19, %c0_20, %c0_21] : memref<1x16x64xf32, #tpu.memory_space<vmem>>, vector<1x16x64xf32>
    %27 = vector.shape_cast %26 : vector<1x16x64xf32> to vector<16x64xf32>
    %28 = vector.shape_cast %25 : vector<16x64xf32> to vector<1x16x64xf32>
    tpu.vector_store %arg9[%c0_19, %c0_20, %c0_21], %28 {strides = array<i32>} : memref<1x16x64xf32, #tpu.memory_space<vmem>>, vector<1x16x64xf32>,
    return
  }
  func.func @transform_0(%arg0: i32, %arg1: i32) -> (i32, i32, i32) {
    %c0_i32 = arith.constant 0 : i32
    %c0_i32_0 = arith.constant 0 : i32
    return %arg0, %c0_i32, %arg1 : i32, i32, i32
  }
  func.func @transform_1(%arg0: i32, %arg1: i32) -> (i32, i32) {
    %c0_i32 = arith.constant 0 : i32
    %c0_i32_0 = arith.constant 0 : i32
    %c0_i32_1 = arith.constant 0 : i32
    return %c0_i32, %c0_i32_0 : i32, i32
  }
  func.func @transform_2(%arg0: i32, %arg1: i32) -> (i32, i32) {
    %c0_i32 = arith.constant 0 : i32
    %c0_i32_0 = arith.constant 0 : i32
    %c0_i32_1 = arith.constant 0 : i32
    return %c0_i32, %c0_i32_0 : i32, i32
  }
  func.func @transform_3(%arg0: i32, %arg1: i32) -> (i32, i32) {
    %c0_i32 = arith.constant 0 : i32
    %c0_i32_0 = arith.constant 0 : i32
    %c0_i32_1 = arith.constant 0 : i32
    return %c0_i32, %c0_i32_0 : i32, i32
  }
  func.func @transform_4(%arg0: i32, %arg1: i32) -> (i32, i32) {
    %c0_i32 = arith.constant 0 : i32
    %c0_i32_0 = arith.constant 0 : i32
    %c0_i32_1 = arith.constant 0 : i32
    return %c0_i32, %c0_i32_0 : i32, i32
  }
  func.func @transform_5(%arg0: i32, %arg1: i32) -> (i32, i32) {
    %c0_i32 = arith.constant 0 : i32
    %c0_i32_0 = arith.constant 0 : i32
    %c0_i32_1 = arith.constant 0 : i32
    return %c0_i32, %c0_i32_0 : i32, i32
  }
  func.func @transform_6(%arg0: i32, %arg1: i32) -> (i32, i32) {
    %c0_i32 = arith.constant 0 : i32
    %c0_i32_0 = arith.constant 0 : i32
    %c0_i32_1 = arith.constant 0 : i32
    return %c0_i32, %c0_i32_0 : i32, i32
  }
  func.func @transform_7(%arg0: i32, %arg1: i32) -> (i32, i32, i32) {
    %c0_i32 = arith.constant 0 : i32
    %c0_i32_0 = arith.constant 0 : i32
    return %arg0, %c0_i32, %arg1 : i32, i32, i32
  }
}

module attributes {stable_mosaic.version = 11 : i64} {
  func.func @kernel(%arg0: i32, %arg1: memref<1x16x64xf32, #tpu.memory_space<vmem>>, %arg2: memref<64x16xbf16, #tpu.memory_space<vmem>>, %arg3: memref<16x64xbf16, #tpu.memory_space<vmem>>, %arg4: memref<1x16x64xf32, #tpu.memory_space<vmem>>) attributes {dimension_semantics = [#tpu.dimension_semantics<parallel>], iteration_bounds = array<i64: 2>, scalar_prefetch = 0 : i64, scratch_operands = 0 : i64, tpu.core_type = #tpu.core_type<tc>, window_params = [{transform_indices = @transform_0, window_bounds = array<i64: 1, 16, 64>}, {pipeline_mode = #tpu.pipeline_mode<synchronous>, transform_indices = @transform_1, window_bounds = array<i64: 64, 16>}, {pipeline_mode = #tpu.pipeline_mode<synchronous>, transform_indices = @transform_2, window_bounds = array<i64: 16, 64>}, {transform_indices = @transform_3, window_bounds = array<i64: 1, 16, 64>}]} {
    %c0 = arith.constant 0 : index
    %c0_0 = arith.constant 0 : index
    %0 = vector.load %arg2[%c0, %c0_0] : memref<64x16xbf16, #tpu.memory_space<vmem>>, vector<64x16xbf16>
    %c0_1 = arith.constant 0 : index
    %c0_2 = arith.constant 0 : index
    %c0_3 = arith.constant 0 : index
    %1 = vector.load %arg1[%c0_1, %c0_2, %c0_3] : memref<1x16x64xf32, #tpu.memory_space<vmem>>, vector<1x16x64xf32>
    %2 = vector.shape_cast %1 : vector<1x16x64xf32> to vector<16x64xf32>
    %3 = arith.truncf %2 : vector<16x64xf32> to vector<16x64xbf16>
    %cst = arith.constant dense<0.000000e+00> : vector<64x64xf32>
    %4 = tpu.matmul %0, %3, %cst {dimension_numbers = #tpu.dot_dimension_numbers<[1], [0], [0], [1], [0, 0, 1, 1], [], []>} : vector<64x16xbf16>, vector<16x64xbf16>, vector<64x64xf32> -> vector<64x64xf32>
    %cst_4 = arith.constant dense<0xFF800000> : vector<64xf32>
    %5 = vector.multi_reduction <maximumf>, %4, %cst_4 [0] : vector<64x64xf32> to vector<64xf32>
    %6 = vector.shape_cast %5 : vector<64xf32> to vector<1x64xf32>
    %7 = vector.broadcast %6 : vector<1x64xf32> to vector<64x64xf32>
    %8 = arith.subf %4, %7 : vector<64x64xf32>
    %9 = math.exp %8 : vector<64x64xf32>
    %cst_5 = arith.constant dense<0.000000e+00> : vector<64xf32>
    %10 = vector.multi_reduction <add>, %9, %cst_5 [0] : vector<64x64xf32> to vector<64xf32>
    %11 = vector.shape_cast %10 : vector<64xf32> to vector<1x64xf32>
    %12 = vector.broadcast %11 : vector<1x64xf32> to vector<64x64xf32>
    %13 = arith.divf %9, %12 : vector<64x64xf32>
    %cst_6 = arith.constant dense<0.000000e+00> : vector<64xf32>
    %14 = vector.multi_reduction <add>, %13, %cst_6 [1] : vector<64x64xf32> to vector<64xf32>
    %15 = vector.shape_cast %14 : vector<64xf32> to vector<64x1xf32>
    %cst_7 = arith.constant 9.99999971E-10 : f32
    %16 = vector.broadcast %cst_7 : f32 to vector<64x1xf32>
    %17 = arith.addf %16, %15 : vector<64x1xf32>
    %18 = vector.broadcast %17 : vector<64x1xf32> to vector<64x64xf32>
    %19 = arith.divf %13, %18 : vector<64x64xf32>
    %c0_8 = arith.constant 0 : index
    %c0_9 = arith.constant 0 : index
    %20 = vector.load %arg3[%c0_8, %c0_9] : memref<16x64xbf16, #tpu.memory_space<vmem>>, vector<16x64xbf16>
    %21 = arith.truncf %19 : vector<64x64xf32> to vector<64x64xbf16>
    %cst_10 = arith.constant dense<0.000000e+00> : vector<16x64xf32>
    %22 = tpu.matmul %20, %21, %cst_10 {dimension_numbers = #tpu.dot_dimension_numbers<[1], [0], [0], [1], [0, 0, 1, 1], [], []>} : vector<16x64xbf16>, vector<64x64xbf16>, vector<16x64xf32> -> vector<16x64xf32>
    %c0_11 = arith.constant 0 : index
    %c0_12 = arith.constant 0 : index
    %c0_13 = arith.constant 0 : index
    %23 = vector.load %arg4[%c0_11, %c0_12, %c0_13] : memref<1x16x64xf32, #tpu.memory_space<vmem>>, vector<1x16x64xf32>
    %24 = vector.shape_cast %23 : vector<1x16x64xf32> to vector<16x64xf32>
    %25 = vector.shape_cast %22 : vector<16x64xf32> to vector<1x16x64xf32>
    tpu.vector_store %arg4[%c0_11, %c0_12, %c0_13], %25 {strides = array<i32>} : memref<1x16x64xf32, #tpu.memory_space<vmem>>, vector<1x16x64xf32>,
    return
  }
  func.func @transform_0(%arg0: i32) -> (i32, i32, i32) {
    %c0_i32 = arith.constant 0 : i32
    %c0_i32_0 = arith.constant 0 : i32
    %c0_i32_1 = arith.constant 0 : i32
    return %arg0, %c0_i32, %c0_i32_0 : i32, i32, i32
  }
  func.func @transform_1(%arg0: i32) -> (i32, i32) {
    %c0_i32 = arith.constant 0 : i32
    %c0_i32_0 = arith.constant 0 : i32
    %c0_i32_1 = arith.constant 0 : i32
    return %c0_i32, %c0_i32_0 : i32, i32
  }
  func.func @transform_2(%arg0: i32) -> (i32, i32) {
    %c0_i32 = arith.constant 0 : i32
    %c0_i32_0 = arith.constant 0 : i32
    %c0_i32_1 = arith.constant 0 : i32
    return %c0_i32, %c0_i32_0 : i32, i32
  }
  func.func @transform_3(%arg0: i32) -> (i32, i32, i32) {
    %c0_i32 = arith.constant 0 : i32
    %c0_i32_0 = arith.constant 0 : i32
    %c0_i32_1 = arith.constant 0 : i32
    return %arg0, %c0_i32, %c0_i32_0 : i32, i32, i32
  }
}

module attributes {stable_mosaic.version = 11 : i64} {
  func.func @kernel(%arg0: i32, %arg1: i32, %arg2: memref<1x16x64xf32, #tpu.memory_space<vmem>>, %arg3: memref<16x16xbf16, #tpu.memory_space<vmem>>, %arg4: memref<16x1xf32, #tpu.memory_space<vmem>>, %arg5: memref<5x16xbf16, #tpu.memory_space<vmem>>, %arg6: memref<5x1xf32, #tpu.memory_space<vmem>>, %arg7: memref<16x16xbf16, #tpu.memory_space<vmem>>, %arg8: memref<16x1xf32, #tpu.memory_space<vmem>>, %arg9: memref<5x16xbf16, #tpu.memory_space<vmem>>, %arg10: memref<5x1xf32, #tpu.memory_space<vmem>>, %arg11: memref<1x5x64xf32, #tpu.memory_space<vmem>>, %arg12: memref<1x5x64xf32, #tpu.memory_space<vmem>>) attributes {dimension_semantics = [#tpu.dimension_semantics<parallel>, #tpu.dimension_semantics<parallel>], iteration_bounds = array<i64: 2, 1>, scalar_prefetch = 0 : i64, scratch_operands = 0 : i64, tpu.core_type = #tpu.core_type<tc>, window_params = [{transform_indices = @transform_0, window_bounds = array<i64: 1, 16, 64>}, {pipeline_mode = #tpu.pipeline_mode<synchronous>, transform_indices = @transform_1, window_bounds = array<i64: 16, 16>}, {pipeline_mode = #tpu.pipeline_mode<synchronous>, transform_indices = @transform_2, window_bounds = array<i64: 16, 1>}, {pipeline_mode = #tpu.pipeline_mode<synchronous>, transform_indices = @transform_3, window_bounds = array<i64: 5, 16>}, {pipeline_mode = #tpu.pipeline_mode<synchronous>, transform_indices = @transform_4, window_bounds = array<i64: 5, 1>}, {pipeline_mode = #tpu.pipeline_mode<synchronous>, transform_indices = @transform_5, window_bounds = array<i64: 16, 16>}, {pipeline_mode = #tpu.pipeline_mode<synchronous>, transform_indices = @transform_6, window_bounds = array<i64: 16, 1>}, {pipeline_mode = #tpu.pipeline_mode<synchronous>, transform_indices = @transform_7, window_bounds = array<i64: 5, 16>}, {pipeline_mode = #tpu.pipeline_mode<synchronous>, transform_indices = @transform_8, window_bounds = array<i64: 5, 1>}, {transform_indices = @transform_9, window_bounds = array<i64: 1, 5, 64>}, {transform_indices = @transform_10, window_bounds = array<i64: 1, 5, 64>}]} {
    %c0 = arith.constant 0 : index
    %c0_0 = arith.constant 0 : index
    %c0_1 = arith.constant 0 : index
    %0 = vector.load %arg2[%c0, %c0_0, %c0_1] : memref<1x16x64xf32, #tpu.memory_space<vmem>>, vector<1x16x64xf32>
    %1 = vector.shape_cast %0 : vector<1x16x64xf32> to vector<16x64xf32>
    %2 = arith.truncf %1 : vector<16x64xf32> to vector<16x64xbf16>
    %c0_2 = arith.constant 0 : index
    %c0_3 = arith.constant 0 : index
    %3 = vector.load %arg3[%c0_2, %c0_3] : memref<16x16xbf16, #tpu.memory_space<vmem>>, vector<16x16xbf16>
    %cst = arith.constant dense<0.000000e+00> : vector<16x64xf32>
    %4 = tpu.matmul %3, %2, %cst {dimension_numbers = #tpu.dot_dimension_numbers<[1], [0], [0], [1], [0, 0, 1, 1], [], []>} : vector<16x16xbf16>, vector<16x64xbf16>, vector<16x64xf32> -> vector<16x64xf32>
    %c0_4 = arith.constant 0 : index
    %c0_5 = arith.constant 0 : index
    %5 = vector.load %arg4[%c0_4, %c0_5] : memref<16x1xf32, #tpu.memory_space<vmem>>, vector<16x1xf32>
    %6 = vector.broadcast %5 : vector<16x1xf32> to vector<16x64xf32>
    %7 = arith.addf %4, %6 : vector<16x64xf32>
    %cst_6 = arith.constant 0.000000e+00 : f32
    %8 = vector.broadcast %cst_6 : f32 to vector<16x64xf32>
    %9 = arith.maximumf %7, %8 : vector<16x64xf32>
    %c0_7 = arith.constant 0 : index
    %c0_8 = arith.constant 0 : index
    %10 = vector.load %arg5[%c0_7, %c0_8] : memref<5x16xbf16, #tpu.memory_space<vmem>>, vector<5x16xbf16>
    %11 = arith.truncf %9 : vector<16x64xf32> to vector<16x64xbf16>
    %cst_9 = arith.constant dense<0.000000e+00> : vector<5x64xf32>
    %12 = tpu.matmul %10, %11, %cst_9 {dimension_numbers = #tpu.dot_dimension_numbers<[1], [0], [0], [1], [0, 0, 1, 1], [], []>} : vector<5x16xbf16>, vector<16x64xbf16>, vector<5x64xf32> -> vector<5x64xf32>
    %c0_10 = arith.constant 0 : index
    %c0_11 = arith.constant 0 : index
    %13 = vector.load %arg6[%c0_10, %c0_11] : memref<5x1xf32, #tpu.memory_space<vmem>>, vector<5x1xf32>
    %14 = vector.broadcast %13 : vector<5x1xf32> to vector<5x64xf32>
    %15 = arith.addf %12, %14 : vector<5x64xf32>
    %cst_12 = arith.constant dense<0xFF800000> : vector<64xf32>
    %16 = vector.multi_reduction <maximumf>, %15, %cst_12 [0] : vector<5x64xf32> to vector<64xf32>
    %17 = vector.shape_cast %16 : vector<64xf32> to vector<1x64xf32>
    %18 = vector.broadcast %17 : vector<1x64xf32> to vector<5x64xf32>
    %19 = arith.subf %15, %18 : vector<5x64xf32>
    %20 = math.exp %19 : vector<5x64xf32>
    %cst_13 = arith.constant dense<0.000000e+00> : vector<64xf32>
    %21 = vector.multi_reduction <add>, %20, %cst_13 [0] : vector<5x64xf32> to vector<64xf32>
    %22 = vector.shape_cast %21 : vector<64xf32> to vector<1x64xf32>
    %23 = math.log %22 : vector<1x64xf32>
    %24 = vector.broadcast %23 : vector<1x64xf32> to vector<5x64xf32>
    %25 = arith.subf %19, %24 : vector<5x64xf32>
    %c0_14 = arith.constant 0 : index
    %c0_15 = arith.constant 0 : index
    %c0_16 = arith.constant 0 : index
    %26 = vector.load %arg11[%c0_14, %c0_15, %c0_16] : memref<1x5x64xf32, #tpu.memory_space<vmem>>, vector<1x5x64xf32>
    %27 = vector.shape_cast %26 : vector<1x5x64xf32> to vector<5x64xf32>
    %28 = vector.shape_cast %25 : vector<5x64xf32> to vector<1x5x64xf32>
    tpu.vector_store %arg11[%c0_14, %c0_15, %c0_16], %28 {strides = array<i32>} : memref<1x5x64xf32, #tpu.memory_space<vmem>>, vector<1x5x64xf32>,
    %c0_17 = arith.constant 0 : index
    %c0_18 = arith.constant 0 : index
    %29 = vector.load %arg7[%c0_17, %c0_18] : memref<16x16xbf16, #tpu.memory_space<vmem>>, vector<16x16xbf16>
    %cst_19 = arith.constant dense<0.000000e+00> : vector<16x64xf32>
    %30 = tpu.matmul %29, %2, %cst_19 {dimension_numbers = #tpu.dot_dimension_numbers<[1], [0], [0], [1], [0, 0, 1, 1], [], []>} : vector<16x16xbf16>, vector<16x64xbf16>, vector<16x64xf32> -> vector<16x64xf32>
    %c0_20 = arith.constant 0 : index
    %c0_21 = arith.constant 0 : index
    %31 = vector.load %arg8[%c0_20, %c0_21] : memref<16x1xf32, #tpu.memory_space<vmem>>, vector<16x1xf32>
    %32 = vector.broadcast %31 : vector<16x1xf32> to vector<16x64xf32>
    %33 = arith.addf %30, %32 : vector<16x64xf32>
    %cst_22 = arith.constant 0.000000e+00 : f32
    %34 = vector.broadcast %cst_22 : f32 to vector<16x64xf32>
    %35 = arith.maximumf %33, %34 : vector<16x64xf32>
    %c0_23 = arith.constant 0 : index
    %c0_24 = arith.constant 0 : index
    %36 = vector.load %arg9[%c0_23, %c0_24] : memref<5x16xbf16, #tpu.memory_space<vmem>>, vector<5x16xbf16>
    %37 = arith.truncf %35 : vector<16x64xf32> to vector<16x64xbf16>
    %cst_25 = arith.constant dense<0.000000e+00> : vector<5x64xf32>
    %38 = tpu.matmul %36, %37, %cst_25 {dimension_numbers = #tpu.dot_dimension_numbers<[1], [0], [0], [1], [0, 0, 1, 1], [], []>} : vector<5x16xbf16>, vector<16x64xbf16>, vector<5x64xf32> -> vector<5x64xf32>
    %c0_26 = arith.constant 0 : index
    %c0_27 = arith.constant 0 : index
    %39 = vector.load %arg10[%c0_26, %c0_27] : memref<5x1xf32, #tpu.memory_space<vmem>>, vector<5x1xf32>
    %40 = vector.broadcast %39 : vector<5x1xf32> to vector<5x64xf32>
    %41 = arith.addf %38, %40 : vector<5x64xf32>
    %c0_28 = arith.constant 0 : index
    %c0_29 = arith.constant 0 : index
    %c0_30 = arith.constant 0 : index
    %42 = vector.load %arg12[%c0_28, %c0_29, %c0_30] : memref<1x5x64xf32, #tpu.memory_space<vmem>>, vector<1x5x64xf32>
    %43 = vector.shape_cast %42 : vector<1x5x64xf32> to vector<5x64xf32>
    %44 = vector.shape_cast %41 : vector<5x64xf32> to vector<1x5x64xf32>
    tpu.vector_store %arg12[%c0_28, %c0_29, %c0_30], %44 {strides = array<i32>} : memref<1x5x64xf32, #tpu.memory_space<vmem>>, vector<1x5x64xf32>,
    return
  }
  func.func @transform_0(%arg0: i32, %arg1: i32) -> (i32, i32, i32) {
    %c0_i32 = arith.constant 0 : i32
    %c0_i32_0 = arith.constant 0 : i32
    return %arg0, %c0_i32, %arg1 : i32, i32, i32
  }
  func.func @transform_1(%arg0: i32, %arg1: i32) -> (i32, i32) {
    %c0_i32 = arith.constant 0 : i32
    %c0_i32_0 = arith.constant 0 : i32
    %c0_i32_1 = arith.constant 0 : i32
    return %c0_i32, %c0_i32_0 : i32, i32
  }
  func.func @transform_2(%arg0: i32, %arg1: i32) -> (i32, i32) {
    %c0_i32 = arith.constant 0 : i32
    %c0_i32_0 = arith.constant 0 : i32
    %c0_i32_1 = arith.constant 0 : i32
    return %c0_i32, %c0_i32_0 : i32, i32
  }
  func.func @transform_3(%arg0: i32, %arg1: i32) -> (i32, i32) {
    %c0_i32 = arith.constant 0 : i32
    %c0_i32_0 = arith.constant 0 : i32
    %c0_i32_1 = arith.constant 0 : i32
    return %c0_i32, %c0_i32_0 : i32, i32
  }
  func.func @transform_4(%arg0: i32, %arg1: i32) -> (i32, i32) {
    %c0_i32 = arith.constant 0 : i32
    %c0_i32_0 = arith.constant 0 : i32
    %c0_i32_1 = arith.constant 0 : i32
    return %c0_i32, %c0_i32_0 : i32, i32
  }
  func.func @transform_5(%arg0: i32, %arg1: i32) -> (i32, i32) {
    %c0_i32 = arith.constant 0 : i32
    %c0_i32_0 = arith.constant 0 : i32
    %c0_i32_1 = arith.constant 0 : i32
    return %c0_i32, %c0_i32_0 : i32, i32
  }
  func.func @transform_6(%arg0: i32, %arg1: i32) -> (i32, i32) {
    %c0_i32 = arith.constant 0 : i32
    %c0_i32_0 = arith.constant 0 : i32
    %c0_i32_1 = arith.constant 0 : i32
    return %c0_i32, %c0_i32_0 : i32, i32
  }
  func.func @transform_7(%arg0: i32, %arg1: i32) -> (i32, i32) {
    %c0_i32 = arith.constant 0 : i32
    %c0_i32_0 = arith.constant 0 : i32
    %c0_i32_1 = arith.constant 0 : i32
    return %c0_i32, %c0_i32_0 : i32, i32
  }
  func.func @transform_8(%arg0: i32, %arg1: i32) -> (i32, i32) {
    %c0_i32 = arith.constant 0 : i32
    %c0_i32_0 = arith.constant 0 : i32
    %c0_i32_1 = arith.constant 0 : i32
    return %c0_i32, %c0_i32_0 : i32, i32
  }
  func.func @transform_9(%arg0: i32, %arg1: i32) -> (i32, i32, i32) {
    %c0_i32 = arith.constant 0 : i32
    %c0_i32_0 = arith.constant 0 : i32
    return %arg0, %c0_i32, %arg1 : i32, i32, i32
  }
  func.func @transform_10(%arg0: i32, %arg1: i32) -> (i32, i32, i32) {
    %c0_i32 = arith.constant 0 : i32
    %c0_i32_0 = arith.constant 0 : i32
    return %arg0, %c0_i32, %arg1 : i32, i32, i32
  }
}

</mosaic_0001>

<bundles_post_ra>
// kernel: custom-call.24
= control target key start
LH: loop header
LB: loop body
LE: loop exit
PB: predicated region body
PF: predicated region fallthrough
CT: control target
= control target key end

     0   :  { %s6_s0 = inlined_call_operand.vmem [shape: f32[2,64], index: 0, kind: output, shape index: {}]  }

// kernel: custom-call.25
= control target key start
LH: loop header
LB: loop body
LE: loop exit
PB: predicated region body
PF: predicated region fallthrough
CT: control target
= control target key end

     0   :  { %s6_s0 = inlined_call_operand.vmem [shape: f32[2,16], index: 0, kind: output, shape index: {}]  }

// kernel: model_forward.10
= control target key start
LH: loop header
LB: loop body
LE: loop exit
PB: predicated region body
PF: predicated region fallthrough
CT: control target
= control target key end

     0   :  { %s741_s12 = smov 0   ;;  %s837_s0 = inlined_call_operand.vmem [shape: f32[2,64,16], index: 0, kind: input, shape index: {}]   ;;  %s838_s1 = inlined_call_operand.vmem [shape: bf16[64,64], index: 1, kind: input, shape index: {}]   ;;  %s839_s2 = inlined_call_operand.vmem [shape: bf16[64,64], index: 2, kind: input, shape index: {}]   ;;  %s840_s3 = inlined_call_operand.vmem [shape: f32[2,64,16], index: 3, kind: output, shape index: {}]  }
   0x1 LB: > { %s586_s13 = sadd.s32 4294967295, %s719_s12   ;;  %p590_p0 = scmp.ge.s32.totalorder %s719_s12, 1  ;;  %s719_s12 = sphi %s741_s12, %s13_s12  }
   0x2   : > { %p137_p1 = scmp.lt.s32.totalorder %s719_s12, 3 }
   0x4   : > { %p138_p2 = pnand %p590_p0, %p137_p1 }
   0x5   : > { %p161_p3 = scmp.lt.s32.totalorder (!%p138_p2), %s586_s13, 1  ;;  %v671_v0 = vld [vmem:[%s838_s1] sm:$0xff] (!%p138_p2)   ;;  %vm212_vm0 = vcmask (!%p138_p2), 523264   ;;  %v672_v13 = vld [vmem:[%s838_s1 + $0x8] sm:$0xff] (!%p138_p2)   ;;  %v673_v14 = vld [vmem:[%s838_s1 + $0x10] sm:$0xff] (!%p138_p2)   ;;  %vm290_vm1 = vcmask (!%p138_p2), 130048  }
   0x6   : > { %141 = sbr.rel (%p138_p2) target bundleno = 738 (0x2e2), region = 32  ;;  %639 = vmatprep.mubr.msk.bf16.mxu0 (!%p138_p2), %vm212_vm0, %v671_v0  ;;  %v674_v15 = vld [vmem:[%s838_s1 + $0x18] sm:$0xff] (!%p138_p2)  }
   0xd   : > { %s842_s13 = smov (!%p161_p3, %s586_s13), 1 }
   0xe   : > { %s613_s16 = sshll.u32 %s842_s13, 6 }
   0xf   : > { %s165_s19 = scalar_lea.vmem %s837_s0, %s613_s16  ;;  %s170_s9 = scalar_lea.vmem %s840_s3, %s613_s16 }
  0x10   : > { %v180_v1 = vld [vmem:[%s165_s19] sm:$0xff]  ;;  %v181_v2 = vld [vmem:[%s165_s19 + $0x8] sm:$0xff]  ;;  %v182_v3 = vld [vmem:[%s165_s19 + $0x10] sm:$0xff] }
  0x11   : > { %v188_v4 = vpack.c.bf16 %v181_v2, %v180_v1  ;;  %v183_v5 = vld [vmem:[%s165_s19 + $0x18] sm:$0xff]  ;;  %v184_v7 = vld [vmem:[%s165_s19 + $0x20] sm:$0xff]  ;;  %v185_v8 = vld [vmem:[%s165_s19 + $0x28] sm:$0xff] }
  0x12   : > { %v189_v6 = vpack.c.bf16 %v183_v5, %v182_v3  ;;  %v190_v9 = vpack.c.bf16 %v185_v8, %v184_v7  ;;  %v186_v10 = vld [vmem:[%s165_s19 + $0x30] sm:$0xff]  ;;  %v187_v11 = vld [vmem:[%s165_s19 + $0x38] sm:$0xff] }
  0x13   : > { %631 = vmatprep.subr.bf16.mxu0 %v188_v4  ;;  %v191_v12 = vpack.c.bf16 %v187_v11, %v186_v10 }
  0x14   : > { %632 = vmatpush3.bf16.msra.mxu0 %v188_v4 }
  0x15   : > { %633 = vmatprep.subr.bf16.mxu0 %v189_v6 }
  0x18   : > { %634 = vmatpush3.bf16.msra.mxu0 %v189_v6 }
  0x19   : > { %635 = vmatprep.subr.bf16.mxu0 %v190_v9 }
  0x1c   : > { %636 = vmatpush3.bf16.msra.mxu0 %v190_v9 }
  0x1d   : > { %637 = vmatprep.subr.bf16.mxu0 %v191_v12 }
  0x20   : > { %638 = vmatpush3.bf16.msra.mxu0 %v191_v12 }
  0x23   : > { %640 = vmatmul.mubr.msk.bf16.vlgmr.msra.gmra.mrb[0].mxu0 %vm212_vm0, %v672_v13 }
  0x24   : > { %643 = vmatprep.mubr.msk.bf16.mxu0 %vm212_vm0, %v673_v14 }
  0x2b   : > { %644 = vmatmul.mubr.msk.bf16.gmra.mrb[4].mxu0 %vm212_vm0, %v674_v15 }
  0xf6   : > { %v641_v16 = vpop.f32.mrb[0].mxu0 }
  0xf7   : > { %v259_v17 = vpop.f32.mrb[1].mxu0  ;;  %v293_v21 = vsel %vm290_vm1, %v641_v16, -inf }
  0xf8   : > { %v642_v18 = vpop.f32.mrb[2].mxu0  ;;  %v291_v24 = vsel %vm290_vm1, %v259_v17, -inf }
  0xf9   : > { %v262_v19 = vpop.f32.mrb[3].mxu0  ;;  %v294_v28 = vsel %vm290_vm1, %v642_v18, -inf }
  0xfa   : > { %v292_v32 = vsel %vm290_vm1, %v262_v19, -inf }
  0xfe   : > { %v645_v20 = vpop.f32.mrb[4].mxu0 }
  0xff   : > { %v299_v22 = vsel %vm290_vm1, %v645_v20, -inf  ;;  %v275_v23 = vpop.f32.mrb[5].mxu0 }
 0x100   : > { %v300_v25 = vmax.f32 %v293_v21, %v299_v22  ;;  %v295_v26 = vsel %vm290_vm1, %v275_v23, -inf  ;;  %v646_v27 = vpop.f32.mrb[6].mxu0 }
 0x101   : > { %v296_v29 = vmax.f32 %v291_v24, %v295_v26  ;;  %v301_v30 = vsel %vm290_vm1, %v646_v27, -inf  ;;  %v278_v31 = vpop.f32.mrb[7].mxu0 }
 0x102   : > { %v302_v33 = vmax.f32 %v294_v28, %v301_v30  ;;  %v297_v34 = vsel %vm290_vm1, %v278_v31, -inf }
 0x103   : > { %v298_v35 = vmax.f32 %v292_v32, %v297_v34 }
 0x104   : > { %v304_v36 = vmax.f32 %v300_v25, %v302_v33 }
 0x105   : > { %v303_v37 = vmax.f32 %v296_v29, %v298_v35 }
 0x107   : > { %v305_v38 = vmax.f32 %v303_v37, %v304_v36 }
 0x109   : > { %v306_v39 = vrot.slane %v305_v38, 4 }
 0x10b   : > { %v307_v40 = vmax.f32 %v305_v38, %v306_v39 }
 0x10d   : > { %v308_v41 = vrot.slane %v307_v40, 2 }
 0x10f   : > { %v309_v42 = vmax.f32 %v307_v40, %v308_v41 }
 0x111   : > { %v310_v43 = vrot.slane %v309_v42, 1 }
 0x113   : > { %v311_v44 = vmax.f32 %v309_v42, %v310_v43  ;;  %v675_v43 = vld [vmem:[%s839_s2] sm:$0xff]  }
 0x114   : > { %655 = vmatprep.mubr.msk.bf16.mxu1 %vm212_vm0, %v675_v43 }
 0x115   : > { %v317_v45 = vsub.f32 %v278_v31, %v311_v44  ;;  %v318_v46 = vsub.f32 %v645_v20, %v311_v44  ;;  %v319_v47 = vsub.f32 %v646_v27, %v311_v44  ;;  %v312_v48 = vsub.f32 %v259_v17, %v311_v44 }
 0x116   : > { %v313_v49 = vsub.f32 %v262_v19, %v311_v44  ;;  %v314_v50 = vsub.f32 %v641_v16, %v311_v44  ;;  %v315_v51 = vsub.f32 %v642_v18, %v311_v44  ;;  %v316_v52 = vsub.f32 %v275_v23, %v311_v44 }
 0x117   : > { %v320_v53 = vmul.f32 1.442695, %v312_v48  ;;  %v330_v58 = vmul.f32 1.442695, %v317_v45  ;;  %v332_v59 = vmul.f32 1.442695, %v318_v46 }
 0x118   : > { %v322_v54 = vmul.f32 1.442695, %v313_v49  ;;  %v324_v55 = vmul.f32 1.442695, %v314_v50  ;;  %v326_v56 = vmul.f32 1.442695, %v315_v51 }
 0x119   : > { %679 = vpow2.f32 %v320_v53  ;;  %v328_v57 = vmul.f32 1.442695, %v316_v52  ;;  %v334_v60 = vmul.f32 1.442695, %v319_v47 }
 0x11a   : > { %681 = vpow2.f32 %v322_v54 }
 0x11b   : > { %683 = vpow2.f32 %v324_v55 }
 0x11c   : > { %685 = vpow2.f32 %v326_v56 }
 0x11d   : > { %687 = vpow2.f32 %v328_v57 }
 0x11e   : > { %689 = vpow2.f32 %v330_v58 }
 0x11f   : > { %691 = vpow2.f32 %v332_v59 }
 0x120   : > { %693 = vpow2.f32 %v334_v60 }
 0x123   : > { %v680_v61 = vpop.eup %679 }
 0x124   : > { %v682_v62 = vpop.eup %681  ;;  %v336_v63 = vsel %vm290_vm1, %v680_v61, 0.0 }
 0x125   : > { %v684_v0 = vpop.eup %683  ;;  %v337_v1 = vsel %vm290_vm1, %v682_v62, 0.0 }
 0x126   : > { %v686_v2 = vpop.eup %685  ;;  %v338_v3 = vadd.f32 %v337_v1, %v336_v63  ;;  %v339_v4 = vsel %vm290_vm1, %v684_v0, 0.0 }
 0x127   : > { %v688_v5 = vpop.eup %687  ;;  %v341_v7 = vsel %vm290_vm1, %v686_v2, 0.0 }
 0x128   : > { %v340_v6 = vadd.f32 %v339_v4, %v338_v3  ;;  %v690_v8 = vpop.eup %689  ;;  %v343_v10 = vsel %vm290_vm1, %v688_v5, 0.0 }
 0x129   : > { %v692_v11 = vpop.eup %691  ;;  %v345_v13 = vsel %vm290_vm1, %v690_v8, 0.0 }
 0x12a   : > { %v342_v9 = vadd.f32 %v341_v7, %v340_v6  ;;  %v694_v14 = vpop.eup %693  ;;  %v347_v16 = vsel %vm290_vm1, %v692_v11, 0.0 }
 0x12b   : > { %v349_v18 = vsel %vm290_vm1, %v694_v14, 0.0 }
 0x12c   : > { %v344_v12 = vadd.f32 %v343_v10, %v342_v9 }
 0x12e   : > { %v346_v15 = vadd.f32 %v345_v13, %v344_v12 }
 0x130   : > { %v348_v17 = vadd.f32 %v347_v16, %v346_v15  ;;  %v676_v16 = vld [vmem:[%s839_s2 + $0x8] sm:$0xff]  }
 0x132   : > { %v350_v19 = vadd.f32 %v349_v18, %v348_v17  ;;  %v677_v17 = vld [vmem:[%s839_s2 + $0x10] sm:$0xff]   ;;  %v678_v18 = vld [vmem:[%s839_s2 + $0x18] sm:$0xff]  }
 0x134   : > { %v351_v20 = vrot.slane %v350_v19, 4 }
 0x136   : > { %v352_v21 = vadd.f32 %v351_v20, %v350_v19 }
 0x138   : > { %v353_v22 = vrot.slane %v352_v21, 2 }
 0x13a   : > { %v354_v23 = vadd.f32 %v353_v22, %v352_v21 }
 0x13c   : > { %v355_v24 = vrot.slane %v354_v23, 1 }
 0x13e   : > { %v356_v25 = vadd.f32 %v355_v24, %v354_v23 }
 0x140   : > { %695 = vrcp.f32 %v356_v25 }
 0x14a   : > { %v696_v26 = vpop.eup %695 }
 0x14b   : > { %v360_v27 = vmul.f32 %v696_v26, %v684_v0  ;;  %v358_v28 = vmul.f32 %v696_v26, %v680_v61  ;;  %v361_v29 = vmul.f32 %v696_v26, %v686_v2  ;;  %v359_v30 = vmul.f32 %v696_v26, %v682_v62 }
 0x14c   : > { %v363_v31 = vmul.f32 %v696_v26, %v690_v8  ;;  %v362_v32 = vmul.f32 %v696_v26, %v688_v5  ;;  %v789_v33 = vmul.f32 %v696_v26, %v694_v14  ;;  %v791_v34 = vmul.f32 %v696_v26, %v692_v11 }
 0x14d   : > { %v372_v35 = vsel %vm290_vm1, %v360_v27, 0.0  ;;  %v366_v36 = vsel %vm290_vm1, %v358_v28, 0.0  ;;  %v375_v37 = vsel %vm290_vm1, %v361_v29, 0.0  ;;  %v369_v38 = vsel %vm290_vm1, %v359_v30, 0.0 }
 0x14e   : > { %373 = vadd.xlane.f32.xlu1 %v372_v35  ;;  %367 = vadd.xlane.f32.xlu0 %v366_v36  ;;  %v381_v39 = vsel %vm290_vm1, %v363_v31, 0.0  ;;  %v378_v40 = vsel %vm290_vm1, %v362_v32, 0.0  ;;  %v387_v41 = vsel %vm290_vm1, %v789_v33, 0.0  ;;  %v384_v42 = vsel %vm290_vm1, %v791_v34, 0.0 }
 0x152   : > { %376 = vadd.xlane.f32.xlu1 %v375_v37  ;;  %370 = vadd.xlane.f32.xlu0 %v369_v38 }
 0x156   : > { %382 = vadd.xlane.f32.xlu1 %v381_v39  ;;  %379 = vadd.xlane.f32.xlu0 %v378_v40 }
 0x15a   : > { %388 = vadd.xlane.f32.xlu1 %v387_v41  ;;  %385 = vadd.xlane.f32.xlu0 %v384_v42 }
 0x1db   : > { %v374_v44 = vpop.xlane.xlu1 %373  ;;  %v368_v45 = vpop.xlane.xlu0 %367 }
 0x1dc   : > { %v392_v46 = vadd.f32 1e-09, %v374_v44  ;;  %v390_v47 = vadd.f32 1e-09, %v368_v45 }
 0x1de   : > { %697 = vrcp.f32 %v392_v46 }
 0x1df   : > { %v377_v48 = vpop.xlane.xlu1 %376  ;;  %v371_v49 = vpop.xlane.xlu0 %370  ;;  %699 = vrcp.f32 %v390_v47 }
 0x1e0   : > { %v393_v50 = vadd.f32 1e-09, %v377_v48  ;;  %v391_v51 = vadd.f32 1e-09, %v371_v49 }
 0x1e2   : > { %701 = vrcp.f32 %v393_v50 }
 0x1e3   : > { %703 = vrcp.f32 %v391_v51  ;;  %v383_v52 = vpop.xlane.xlu1 %382  ;;  %v380_v53 = vpop.xlane.xlu0 %379 }
 0x1e4   : > { %v395_v54 = vadd.f32 1e-09, %v383_v52  ;;  %v394_v55 = vadd.f32 1e-09, %v380_v53 }
 0x1e6   : > { %705 = vrcp.f32 %v395_v54 }
 0x1e7   : > { %707 = vrcp.f32 %v394_v55  ;;  %v389_v56 = vpop.xlane.xlu1 %388  ;;  %v386_v57 = vpop.xlane.xlu0 %385 }
 0x1e8   : > { %v397_v58 = vadd.f32 1e-09, %v389_v56  ;;  %v396_v59 = vadd.f32 1e-09, %v386_v57  ;;  %v698_v60 = vpop.eup %697 }
 0x1e9   : > { %v700_v61 = vpop.eup %699  ;;  %v403_v5 = vmul.f32 %v698_v60, %v360_v27 }
 0x1ea   : > { %709 = vrcp.f32 %v397_v58  ;;  %v399_v0 = vmul.f32 %v700_v61, %v358_v28 }
 0x1eb   : > { %711 = vrcp.f32 %v396_v59 }
 0x1ec   : > { %v702_v62 = vpop.eup %701 }
 0x1ed   : > { %v704_v63 = vpop.eup %703  ;;  %v405_v2 = vmul.f32 %v702_v62, %v361_v29 }
 0x1ee   : > { %v401_v1 = vmul.f32 %v704_v63, %v359_v30 }
 0x1ef   : > { %v423_v7 = vpack.c.bf16 %v405_v2, %v403_v5 }
 0x1f0   : > { %v706_v3 = vpop.eup %705  ;;  %v422_v4 = vpack.c.bf16 %v401_v1, %v399_v0 }
 0x1f1   : > { %v708_v6 = vpop.eup %707  ;;  %v409_v9 = vmul.f32 %v706_v3, %v363_v31 }
 0x1f2   : > { %647 = vmatprep.subr.bf16.mxu1 %v422_v4  ;;  %v407_v8 = vmul.f32 %v708_v6, %v362_v32 }
 0x1f3   : > { %648 = vmatpush3.bf16.msra.mxu1 %v422_v4 }
 0x1f4   : > { %v710_v10 = vpop.eup %709  ;;  %649 = vmatprep.subr.bf16.mxu1 %v423_v7  ;;  %v424_v12 = vpack.c.bf16 %v409_v9, %v407_v8 }
 0x1f5   : > { %v712_v11 = vpop.eup %711  ;;  %v413_v14 = vmul.f32 %v710_v10, %v789_v33 }
 0x1f6   : > { %v411_v13 = vmul.f32 %v712_v11, %v791_v34 }
 0x1f7   : > { %650 = vmatpush3.bf16.msra.mxu1 %v423_v7 }
 0x1f8   : > { %651 = vmatprep.subr.bf16.mxu1 %v424_v12  ;;  %v425_v15 = vpack.c.bf16 %v413_v14, %v411_v13 }
 0x1fb   : > { %652 = vmatpush3.bf16.msra.mxu1 %v424_v12 }
 0x1fc   : > { %653 = vmatprep.subr.bf16.mxu1 %v425_v15 }
 0x1ff   : > { %654 = vmatpush3.bf16.msra.mxu1 %v425_v15 }
 0x202   : > { %656 = vmatmul.mubr.msk.bf16.vlgmr.msra.gmra.mrb[0].mxu1 %vm212_vm0, %v676_v16 }
 0x203   : > { %659 = vmatprep.mubr.msk.bf16.mxu1 %vm212_vm0, %v677_v17 }
 0x20a   : > { %660 = vmatmul.mubr.msk.bf16.gmra.mrb[4].mxu1 %vm212_vm0, %v678_v18 }
 0x2d5   : > { %v657_v19 = vpop.f32.mrb[0].mxu1 }
 0x2d6   : > { %525 = vst.msk [vmem:[%s170_s9 + $0x10] sm:$0xff] %vm290_vm1, %v657_v19  ;;  %v492_v20 = vpop.f32.mrb[1].mxu1 }
 0x2d7   : > { %523 = vst.msk [vmem:[%s170_s9] sm:$0xff] %vm290_vm1, %v492_v20  ;;  %v658_v21 = vpop.f32.mrb[2].mxu1 }
 0x2d8   : > { %526 = vst.msk [vmem:[%s170_s9 + $0x18] sm:$0xff] %vm290_vm1, %v658_v21  ;;  %v495_v22 = vpop.f32.mrb[3].mxu1 }
 0x2d9   : > { %524 = vst.msk [vmem:[%s170_s9 + $0x8] sm:$0xff] %vm290_vm1, %v495_v22 }
 0x2dd   : > { %v661_v23 = vpop.f32.mrb[4].mxu1 }
 0x2de   : > { %529 = vst.msk [vmem:[%s170_s9 + $0x30] sm:$0xff] %vm290_vm1, %v661_v23  ;;  %v508_v24 = vpop.f32.mrb[5].mxu1 }
 0x2df   : > { %527 = vst.msk [vmem:[%s170_s9 + $0x20] sm:$0xff] %vm290_vm1, %v508_v24  ;;  %v662_v25 = vpop.f32.mrb[6].mxu1 }
 0x2e0   : > { %530 = vst.msk [vmem:[%s170_s9 + $0x38] sm:$0xff] %vm290_vm1, %v662_v25  ;;  %v511_v26 = vpop.f32.mrb[7].mxu1 }
 0x2e1   : > { %528 = vst.msk [vmem:[%s170_s9 + $0x28] sm:$0xff] %vm290_vm1, %v511_v26 }
 0x2e2 PF: > { %s13_s12 = sadd.s32 1, %s719_s12  }
 0x2e3   : > { %p10_p4 = scmp.ge.s32.totalorder %s13_s12, 4  }
 0x2e5   :  { %12 = sbr.rel (!%p10_p4) target bundleno = 1 (0x1), region = 62 }

// kernel: model_forward.9
= control target key start
LH: loop header
LB: loop body
LE: loop exit
PB: predicated region body
PF: predicated region fallthrough
CT: control target
= control target key end

     0   :  { %s2521_s24 = smov 0   ;;  %s2523_s25 = smov 0   ;;  %s3093_s0 = inlined_call_operand.vmem [shape: f32[2,8,5,16], index: 0, kind: input, shape index: {}]   ;;  %s3094_s1 = inlined_call_operand.vmem [shape: bf16[8,5], index: 1, kind: input, shape index: {}]   ;;  %s3095_s2 = inlined_call_operand.vmem [shape: f32[8,1], index: 2, kind: input, shape index: {}]   ;;  %s3096_s3 = inlined_call_operand.vmem [shape: bf16[32,8], index: 3, kind: input, shape index: {}]   ;;  %s3097_s4 = inlined_call_operand.vmem [shape: f32[32,1], index: 4, kind: input, shape index: {}]   ;;  %s3098_s5 = inlined_call_operand.vmem [shape: bf16[64,32], index: 5, kind: input, shape index: {}]   ;;  %s3099_s6 = inlined_call_operand.vmem [shape: f32[64,1], index: 6, kind: input, shape index: {}]   ;;  %s3100_s7 = inlined_call_operand.vmem [shape: f32[2,64,16], index: 7, kind: output, shape index: {}]  }
   0x1   :  { %s2525_s26 = smov 0  }
   0x2 LB: > { %s29_s27 = sadd.s32 1, %s2471_s25  ;;  %p2044_p0 = scmp.ge.s32.totalorder %s2475_s26, 1  ;;  %s2475_s26 = sphi %s2525_s26, %s17_s26   ;;  %s2471_s25 = sphi %s2523_s25, %s3102_s25   ;;  %s2467_s24 = sphi %s2521_s24, %s3101_s24  }
   0x3   : > { %p31_p1 = scmp.ge.s32.totalorder %s29_s27, 2  ;;  %p256_p2 = scmp.lt.s32.totalorder %s2475_s26, 3 }
   0x5   : > { %s3104_s27 = smov (%p31_p1, %s29_s27), 0  ;;  %p257_p3 = pnand %p2044_p0, %p256_p2 }
   0x6   : > { %p294_p4 = scmp.lt.s32.totalorder (!%p257_p3), %s2467_s24, 1  ;;  %vm324_vm0 = vcmask (!%p257_p3), 1041408   ;;  %vm325_vm1 = vcmask (!%p257_p3), 1042432   ;;  %v313_v0 = vld [vmem:[%s3095_s2] sm:$0xff] (!%p257_p3)  ;;  %v2477_v1 = vmov (!%p257_p3), 0.0   ;;  %v2478_v2 = vmov (!%p257_p3), 65535  }
   0x7   : > { %260 = sbr.rel (%p257_p3) target bundleno = 2545 (0x9f1), region = 48  ;;  %2210 = vmatprep.subr.bf16.mxu0 (!%p257_p3), %v2477_v1  ;;  %v326_v3 = vsel (!%p257_p3), %vm324_vm0, 4294967295, %v2478_v2  ;;  %vm2479_vm2 = vmmov (!%p257_p3), 0   ;;  %v2480_v4 = vmov (!%p257_p3), 0   ;;  %v376_v6 = vld [vmem:[%s3097_s4] sm:$0xff] (!%p257_p3)  ;;  %v379_v9 = vld [vmem:[%s3097_s4 + $0x18] sm:$0xff] (!%p257_p3) }
   0x8   : > { %2212 = vmatprep.mubr.msk.bf16.mxu0 (!%p257_p3), %vm2479_vm2, %v2477_v1  ;;  %2442 = vset.pattern.permute.xlu0 (!%p257_p3), %v2480_v4  ;;  %v2547_v5 = vsel (!%p257_p3), %vm325_vm1, %v326_v3, 0  ;;  %v2568_v11 = vld [vmem:[%s3094_s1] sm:$0xf] (!%p257_p3)  ;;  %vm320_vm3 = vcmask (!%p257_p3), 39936   ;;  %v484_v12 = vld [vmem:[%s3099_s6 + $0x8] sm:$0xff] (!%p257_p3)  ;;  %v486_v13 = vld [vmem:[%s3099_s6 + $0x18] sm:$0xff] (!%p257_p3) }
   0x9   : > { %317 = vperm.xlu0 (!%p257_p3), %2442, %v313_v0   ;;  %2443 = vset.pattern.permute.xlu1 (!%p257_p3), %v2480_v4  ;;  %v488_v14 = vld [vmem:[%s3099_s6 + $0x28] sm:$0xff] (!%p257_p3)  ;;  %v490_v15 = vld [vmem:[%s3099_s6 + $0x38] sm:$0xff] (!%p257_p3)  ;;  %v2587_v16 = vld [vmem:[%s3096_s3] sm:$0xff] (!%p257_p3)   ;;  %vm411_vm4 = vcmask (!%p257_p3), 64512   ;;  %vm418_vm5 = vcmask (!%p257_p3), 1043456   ;;  %vm553_vm6 = vcmask (!%p257_p3), 261120  }
   0xa   : > { %2218 = vmatprep.mubr.msk.bf16.mxu1 (!%p257_p3), %vm411_vm4, %v2587_v16  ;;  %v377_v17 = vld [vmem:[%s3097_s4 + $0x8] sm:$0xff] (!%p257_p3)  ;;  %v378_v18 = vld [vmem:[%s3097_s4 + $0x10] sm:$0xff] (!%p257_p3)  ;;  %v483_v19 = vld [vmem:[%s3099_s6] sm:$0xff] (!%p257_p3)  ;;  %vm1948_vm7 = vcmask (!%p257_p3), 130048  }
   0xb   : > { %388 = vperm.xlu1 (!%p257_p3), %2443, %v377_v17   ;;  %v485_v20 = vld [vmem:[%s3099_s6 + $0x10] sm:$0xff] (!%p257_p3)  ;;  %v487_v21 = vld [vmem:[%s3099_s6 + $0x20] sm:$0xff] (!%p257_p3)  ;;  %v2617_v32 = vld [vmem:[%s3096_s3 + $0x8] sm:$0xff] (!%p257_p3)  }
   0xc   : > { %v489_v22 = vld [vmem:[%s3099_s6 + $0x30] sm:$0xff] (!%p257_p3)  ;;  %v2624_v33 = vld [vmem:[%s3098_s5] sm:$0xff] (!%p257_p3)   ;;  %v2651_v55 = vld [vmem:[%s3098_s5 + $0x8] sm:$0xff] (!%p257_p3)  }
   0xd   : > { %383 = vperm.xlu0 (!%p257_p3), %2442, %v376_v6   ;;  %v2629_v34 = vld [vmem:[%s3098_s5 + $0x10] sm:$0xff] (!%p257_p3)   ;;  %v2656_v56 = vld [vmem:[%s3098_s5 + $0x18] sm:$0xff] (!%p257_p3)  }
   0xe   : > { %s3106_s24 = smov (!%p294_p4, %s2467_s24), 1 }
   0xf   : > { %s2120_s30 = sshll.u32 %s3106_s24, 6  ;;  %393 = vperm.xlu1 %2443, %v378_v18  }
  0x10   : > { %s2558_s12 = scalar_lea.vmem %s3093_s0, %s2120_s30  ;;  %s3061_s22 = scalar_lea.vmem %s3100_s7, %s2120_s30 }
  0x11   : > { %v311_v7 = vld [vmem:[%s2558_s12] sm:$0x1f]  ;;  %398 = vperm.xlu0 %2442, %v379_v9   ;;  %v2062_v53 = vld [vmem:[%s2558_s12 + $0x8] sm:$0x1f] }
  0x12   : > { %v314_v8 = vpack.c.bf16 %v311_v7, %v311_v7  ;;  %v641_v54 = vpack.c.bf16 %v2062_v53, %v2062_v53  ;;  %v2070_v7 = vld [vmem:[%s2558_s12 + $0x10] sm:$0x1f] }
  0x13   : > { %495 = vperm.xlu1 %2443, %v483_v19  }
  0x14   : > { %v329_v10 = vand.u32 %v2547_v5, %v314_v8  ;;  %v643_v57 = vand.u32 %v641_v54, %v2547_v5 }
  0x15   : > { %500 = vperm.xlu0 %2442, %v484_v12   ;;  %v828_v12 = vpack.c.bf16 %v2070_v7, %v2070_v7 }
  0x16   : > { %2211 = vmatpush3.bf16.msra.mxu0 %v329_v10 }
  0x17   : > { %505 = vperm.xlu1 %2443, %v485_v20  }
  0x19   : > { %2213 = vmatmul.mubr.msk.bf16.vlgmr.msra.gmra.mrb[0].mxu0 %vm320_vm3, %v2568_v11  ;;  %510 = vperm.xlu0 %2442, %v486_v13  }
  0x1a   : > { %2226 = vmatprep.mubr.msk.bf16.mxu0 %vm553_vm6, %v2624_v33 }
  0x1b   : > { %515 = vperm.xlu1 %2443, %v487_v21  }
  0x1d   : > { %520 = vperm.xlu0 %2442, %v488_v14  }
  0x1f   : > { %525 = vperm.xlu1 %2443, %v489_v22  }
  0x21   : > { %530 = vperm.xlu0 %2442, %v490_v15   ;;  %v830_v15 = vand.u32 %v828_v12, %v2547_v5 }
  0x88   : > { %v2609_v23 = vpop.permute.xlu0 %317 }
  0x8a   : > { %v2635_v35 = vpop.permute.xlu1 %388 }
  0x8c   : > { %v2637_v36 = vpop.permute.xlu0 %383 }
  0x8e   : > { %v2639_v37 = vpop.permute.xlu1 %393 }
  0x90   : > { %v2642_v41 = vpop.permute.xlu0 %398 }
  0xec   : > { %v365_v24 = vpop.f32.mrb[0].mxu0 }
  0xed   : > { %v366_v25 = vadd.f32 %v365_v24, %v2609_v23  ;;  %v2214_v26 = vpop.f32.mrb[1].mxu0 }
  0xee   : > { %v368_v27 = vpop.f32.mrb[2].mxu0 }
  0xef   : > { %v371_v28 = vmax.f32 %v366_v25, 0.0  ;;  %v2215_v29 = vpop.f32.mrb[3].mxu0 }
  0xf1   : > { %v380_v30 = vpack.c.bf16 %v371_v28, %v371_v28 }
  0xf3   : > { %2406 = vmatprep.subr.msk.bf16.mxu1 %vm418_vm5, %v380_v30  ;;  %v420_v31 = vsel %vm418_vm5, %v380_v30, 0 }
  0xf4   : > { %2217 = vmatpush3.bf16.msra.mxu1 %v420_v31 }
  0xf7   : > { %2219 = vmatmul.mubr.msk.bf16.vlgmr.msra.gmra.mrb[0].mxu1 %vm411_vm4, %v2617_v32 }
  0xf8   : > { %2230 = vmatprep.mubr.msk.bf16.mxu1 %vm553_vm6, %v2629_v34 }
 0x1ca   : > { %v2220_v38 = vpop.f32.mrb[0].mxu1 }
 0x1cb   : > { %v465_v39 = vadd.f32 %v2220_v38, %v2639_v37  ;;  %v456_v40 = vpop.f32.mrb[1].mxu1 }
 0x1cc   : > { %v457_v42 = vadd.f32 %v456_v40, %v2637_v36  ;;  %v2221_v43 = vpop.f32.mrb[2].mxu1 }
 0x1cd   : > { %v468_v44 = vadd.f32 %v2221_v43, %v2642_v41  ;;  %v459_v45 = vpop.f32.mrb[3].mxu1  ;;  %v473_v47 = vmax.f32 %v465_v39, 0.0 }
 0x1ce   : > { %v460_v46 = vadd.f32 %v459_v45, %v2635_v35  ;;  %v471_v49 = vmax.f32 %v457_v42, 0.0  ;;  %v2078_v42 = vld [vmem:[%s2558_s12 + $0x18] sm:$0x1f] }
 0x1cf   : > { %v474_v48 = vmax.f32 %v468_v44, 0.0 }
 0x1d0   : > { %v472_v50 = vmax.f32 %v460_v46, 0.0  ;;  %v1015_v46 = vpack.c.bf16 %v2078_v42, %v2078_v42 }
 0x1d1   : > { %v492_v51 = vpack.c.bf16 %v474_v48, %v473_v47 }
 0x1d2   : > { %v491_v52 = vpack.c.bf16 %v472_v50, %v471_v49  ;;  %v1017_v49 = vand.u32 %v1015_v46, %v2547_v5  ;;  %v2728_v50 = vpop.permute.xlu0 %500 }
 0x1d4   : > { %2222 = vmatprep.subr.bf16.mxu0 %v491_v52  ;;  %2402 = vmatprep.subr.bf16.mxu1 %v491_v52 }
 0x1d5   : > { %2223 = vmatpush3.bf16.msra.mxu0 %v491_v52  ;;  %2404 = vmatpush3.bf16.msra.mxu1 %v491_v52 }
 0x1d6   : > { %2224 = vmatprep.subr.bf16.mxu0 %v492_v51  ;;  %2403 = vmatprep.subr.bf16.mxu1 %v492_v51  ;;  %v2732_v52 = vpop.permute.xlu0 %510 }
 0x1d9   : > { %2225 = vmatpush3.bf16.msra.mxu0 %v492_v51  ;;  %2405 = vmatpush3.bf16.msra.mxu1 %v492_v51  ;;  %v2730_v51 = vpop.permute.xlu1 %495 }
 0x1da   : > { %2234 = vmatprep.subr.bf16.mxu1 %v2477_v1 }
 0x1dc   : > { %2227 = vmatmul.mubr.msk.bf16.vlgmr.msra.gmra.mrb[4].mxu0 %vm553_vm6, %v2651_v55  ;;  %2231 = vmatmul.mubr.msk.bf16.vlgmr.msra.gmra.mrb[4].mxu1 %vm553_vm6, %v2656_v56 }
 0x1dd   : > { %2235 = vmatpush3.bf16.msra.mxu1 %v643_v57  ;;  %2236 = vmatprep.mubr.msk.bf16.mxu1 %vm2479_vm2, %v2477_v1  ;;  %v2734_v53 = vpop.permute.xlu1 %505  ;;  %v2738_v57 = vpop.permute.xlu0 %520 }
 0x1de   : > { %2250 = vmatprep.mubr.msk.bf16.mxu0 %vm553_vm6, %v2624_v33 }
 0x1e4   : > { %2237 = vmatmul.mubr.msk.bf16.vlgmr.msra.gmra.mrb[8].mxu1 %vm320_vm3, %v2568_v11 }
 0x1e5   : > { %2242 = vmatprep.mubr.msk.bf16.mxu1 %vm411_vm4, %v2587_v16 }
 0x2af   : > { %v2672_v58 = vpop.f32.mrb[4].mxu0  ;;  %v2674_v59 = vpop.f32.mrb[4].mxu1 }
 0x2b0   : > { %v2676_v60 = vpop.f32.mrb[5].mxu0  ;;  %v2678_v61 = vpop.f32.mrb[5].mxu1  ;;  %v609_v54 = vadd.f32 %v2672_v58, %v2734_v53 }
 0x2b1   : > { %v2680_v62 = vpop.f32.mrb[6].mxu0  ;;  %v2682_v63 = vpop.f32.mrb[6].mxu1 }
 0x2b2   : > { %v2684_v0 = vpop.f32.mrb[7].mxu0  ;;  %v2686_v2 = vpop.f32.mrb[7].mxu1 }
 0x2b7   : > { %v679_v3 = vpop.f32.mrb[8].mxu1 }
 0x2b8   : > { %v680_v4 = vadd.f32 %v679_v3, %v2609_v23  ;;  %v2238_v6 = vpop.f32.mrb[9].mxu1  ;;  %v601_v3 = vadd.f32 %v2676_v60, %v2730_v51 }
 0x2b9   : > { %v682_v8 = vpop.f32.mrb[10].mxu1  ;;  %v612_v6 = vadd.f32 %v2680_v62, %v2732_v52 }
 0x2ba   : > { %v685_v9 = vmax.f32 %v680_v4, 0.0  ;;  %v2239_v10 = vpop.f32.mrb[11].mxu1  ;;  %v2742_v4 = vpop.permute.xlu1 %515  ;;  %v604_v8 = vadd.f32 %v2684_v0, %v2728_v50 }
 0x2bb   : > { %v634_v0 = vmax.f32 %v612_v6, 0.0 }
 0x2bc   : > { %v686_v13 = vpack.c.bf16 %v685_v9, %v685_v9 }
 0x2be   : > { %2407 = vmatprep.subr.msk.bf16.mxu1 %vm418_vm5, %v686_v13  ;;  %v688_v14 = vsel %vm418_vm5, %v686_v13, 0  ;;  %v633_v13 = vmax.f32 %v609_v54, 0.0 }
 0x2bf   : > { %2241 = vmatpush3.bf16.msra.mxu1 %v688_v14 }
 0x2c0   : > { %2258 = vmatprep.subr.bf16.mxu1 %v2477_v1 }
 0x2c2   : > { %2243 = vmatmul.mubr.msk.bf16.vlgmr.msra.gmra.mrb[12].mxu1 %vm411_vm4, %v2617_v32 }
 0x2c3   : > { %2259 = vmatpush3.bf16.msra.mxu1 %v830_v15  ;;  %2260 = vmatprep.mubr.msk.bf16.mxu1 %vm2479_vm2, %v2477_v1 }
 0x2ca   : > { %2261 = vmatmul.mubr.msk.bf16.vlgmr.msra.gmra.mrb[16].mxu1 %vm320_vm3, %v2568_v11 }
 0x2cb   : > { %2266 = vmatprep.mubr.msk.bf16.mxu1 %vm411_vm4, %v2587_v16 }
 0x395   : > { %v2244_v17 = vpop.f32.mrb[12].mxu1 }
 0x396   : > { %v733_v18 = vadd.f32 %v2244_v17, %v2639_v37  ;;  %v724_v19 = vpop.f32.mrb[13].mxu1  ;;  %v631_v17 = vmax.f32 %v601_v3, 0.0 }
 0x397   : > { %v725_v20 = vadd.f32 %v724_v19, %v2637_v36  ;;  %v2245_v21 = vpop.f32.mrb[14].mxu1 }
 0x398   : > { %v736_v22 = vadd.f32 %v2245_v21, %v2642_v41  ;;  %v727_v24 = vpop.f32.mrb[15].mxu1  ;;  %v741_v26 = vmax.f32 %v733_v18, 0.0 }
 0x399   : > { %v728_v25 = vadd.f32 %v727_v24, %v2635_v35  ;;  %v739_v28 = vmax.f32 %v725_v20, 0.0 }
 0x39a   : > { %v742_v27 = vmax.f32 %v736_v22, 0.0 }
 0x39b   : > { %v740_v29 = vmax.f32 %v728_v25, 0.0 }
 0x39c   : > { %v744_v30 = vpack.c.bf16 %v742_v27, %v741_v26  ;;  %v632_v27 = vmax.f32 %v604_v8, 0.0 }
 0x39d   : > { %v743_v31 = vpack.c.bf16 %v740_v29, %v739_v28  ;;  %v866_v38 = vpop.f32.mrb[16].mxu1 }
 0x39e   : > { %v867_v39 = vadd.f32 %v866_v38, %v2609_v23  ;;  %v2262_v40 = vpop.f32.mrb[17].mxu1 }
 0x39f   : > { %2246 = vmatprep.subr.bf16.mxu0 %v743_v31  ;;  %v869_v43 = vpop.f32.mrb[18].mxu1 }
 0x3a0   : > { %v872_v44 = vmax.f32 %v867_v39, 0.0  ;;  %2247 = vmatpush3.bf16.msra.mxu0 %v743_v31  ;;  %v2263_v45 = vpop.f32.mrb[19].mxu1  ;;  %v2758_v31 = vpop.permute.xlu1 %525 }
 0x3a1   : > { %2248 = vmatprep.subr.bf16.mxu0 %v744_v30  ;;  %v625_v43 = vadd.f32 %v2674_v59, %v2758_v31 }
 0x3a2   : > { %v873_v47 = vpack.c.bf16 %v872_v44, %v872_v44 }
 0x3a4   : > { %2249 = vmatpush3.bf16.msra.mxu0 %v744_v30  ;;  %2408 = vmatprep.subr.msk.bf16.mxu1 %vm418_vm5, %v873_v47  ;;  %v875_v48 = vsel %vm418_vm5, %v873_v47, 0  ;;  %v2766_v47 = vpop.permute.xlu0 %530 }
 0x3a5   : > { %2265 = vmatpush3.bf16.msra.mxu1 %v875_v48  ;;  %v617_v48 = vadd.f32 %v2678_v61, %v2742_v4  ;;  %v628_v6 = vadd.f32 %v2682_v63, %v2766_v47 }
 0x3a6   : > { %2282 = vmatprep.subr.bf16.mxu1 %v2477_v1 }
 0x3a7   : > { %2251 = vmatmul.mubr.msk.bf16.vlgmr.msra.gmra.mrb[8].mxu0 %vm553_vm6, %v2651_v55 }
 0x3a8   : > { %2267 = vmatmul.mubr.msk.bf16.vlgmr.msra.gmra.mrb[20].mxu1 %vm411_vm4, %v2617_v32  ;;  %2254 = vmatprep.mubr.msk.bf16.mxu0 %vm553_vm6, %v2629_v34 }
 0x3a9   : > { %2283 = vmatpush3.bf16.msra.mxu1 %v1017_v49  ;;  %2284 = vmatprep.mubr.msk.bf16.mxu1 %vm2479_vm2, %v2477_v1 }
 0x3af   : > { %2255 = vmatmul.mubr.msk.bf16.gmra.mrb[12].mxu0 %vm553_vm6, %v2656_v56 }
 0x3b0   : > { %2285 = vmatmul.mubr.msk.bf16.vlgmr.msra.gmra.mrb[24].mxu1 %vm320_vm3, %v2568_v11  ;;  %2274 = vmatprep.mubr.msk.bf16.mxu0 %vm553_vm6, %v2624_v33 }
 0x3b1   : > { %2290 = vmatprep.mubr.msk.bf16.mxu1 %vm411_vm4, %v2587_v16 }
 0x47a   : > { %v2252_v7 = vpop.f32.mrb[8].mxu0 }
 0x47b   : > { %v788_v9 = vadd.f32 %v2252_v7, %v2734_v53  ;;  %v779_v10 = vpop.f32.mrb[9].mxu0  ;;  %v2268_v12 = vpop.f32.mrb[20].mxu1 }
 0x47c   : > { %v780_v58 = vadd.f32 %v779_v10, %v2730_v51  ;;  %v920_v14 = vadd.f32 %v2268_v12, %v2639_v37  ;;  %v2253_v15 = vpop.f32.mrb[10].mxu0  ;;  %v911_v60 = vpop.f32.mrb[21].mxu1  ;;  %v620_v10 = vadd.f32 %v2686_v2, %v2738_v57 }
 0x47d   : > { %v812_v18 = vmax.f32 %v788_v9, 0.0  ;;  %v791_v19 = vadd.f32 %v2253_v15, %v2732_v52  ;;  %v912_v62 = vadd.f32 %v911_v60, %v2637_v36  ;;  %v782_v20 = vpop.f32.mrb[11].mxu0  ;;  %v2269_v21 = vpop.f32.mrb[22].mxu1  ;;  %v637_v15 = vmax.f32 %v625_v43, 0.0 }
 0x47e   : > { %v810_v22 = vmax.f32 %v780_v58, 0.0  ;;  %v783_v24 = vadd.f32 %v782_v20, %v2728_v50  ;;  %v923_v25 = vadd.f32 %v2269_v21, %v2642_v41  ;;  %v914_v26 = vpop.f32.mrb[23].mxu1  ;;  %v928_v39 = vmax.f32 %v920_v14, 0.0  ;;  %v2086_v14 = vld [vmem:[%s2558_s12 + $0x20] sm:$0x1f] }
 0x47f   : > { %v2755_v28 = vmax.f32 %v633_v13, %v812_v18  ;;  %v813_v29 = vmax.f32 %v791_v19, 0.0  ;;  %v915_v30 = vadd.f32 %v914_v26, %v2635_v35  ;;  %v926_v45 = vmax.f32 %v912_v62, 0.0 }
 0x480   : > { %v2760_v38 = vmax.f32 %v631_v17, %v810_v22  ;;  %v811_v40 = vmax.f32 %v783_v24, 0.0  ;;  %v929_v42 = vmax.f32 %v923_v25, 0.0  ;;  %v635_v19 = vmax.f32 %v617_v48, 0.0 }
 0x481   : > { %v2764_v44 = vmax.f32 %v634_v0, %v813_v29  ;;  %v927_v46 = vmax.f32 %v915_v30, 0.0  ;;  %v638_v0 = vmax.f32 %v628_v6, 0.0  ;;  %v1202_v25 = vpack.c.bf16 %v2086_v14, %v2086_v14 }
 0x482   : > { %v2770_v49 = vmax.f32 %v632_v27, %v811_v40  ;;  %v931_v54 = vpack.c.bf16 %v929_v42, %v928_v39  ;;  %v2256_v3 = vpop.f32.mrb[12].mxu0  ;;  %v636_v26 = vmax.f32 %v620_v10, 0.0 }
 0x483   : > { %v930_v7 = vpack.c.bf16 %v927_v46, %v926_v45  ;;  %v804_v59 = vadd.f32 %v2256_v3, %v2758_v31  ;;  %v795_v8 = vpop.f32.mrb[13].mxu0  ;;  %v1053_v9 = vpop.f32.mrb[24].mxu1  ;;  %v1204_v43 = vand.u32 %v1202_v25, %v2547_v5 }
 0x484   : > { %v796_v12 = vadd.f32 %v795_v8, %v2742_v4  ;;  %v1054_v13 = vadd.f32 %v1053_v9, %v2609_v23  ;;  %v2257_v61 = vpop.f32.mrb[14].mxu0  ;;  %v2286_v58 = vpop.f32.mrb[25].mxu1 }
 0x485   : > { %v816_v60 = vmax.f32 %v804_v59, 0.0  ;;  %v807_v17 = vadd.f32 %v2257_v61, %v2766_v47  ;;  %v798_v63 = vpop.f32.mrb[15].mxu0  ;;  %2270 = vmatprep.subr.bf16.mxu0 %v930_v7  ;;  %v1056_v18 = vpop.f32.mrb[26].mxu1 }
 0x486   : > { %v814_v62 = vmax.f32 %v796_v12, 0.0  ;;  %v1059_v20 = vmax.f32 %v1054_v13, 0.0  ;;  %v799_v21 = vadd.f32 %v798_v63, %v2738_v57  ;;  %2271 = vmatpush3.bf16.msra.mxu0 %v930_v7  ;;  %v2287_v2 = vpop.f32.mrb[27].mxu1 }
 0x487   : > { %v2782_v22 = vmax.f32 %v637_v15, %v816_v60  ;;  %v817_v24 = vmax.f32 %v807_v17, 0.0  ;;  %2272 = vmatprep.subr.bf16.mxu0 %v931_v54 }
 0x488   : > { %v2784_v27 = vmax.f32 %v635_v19, %v814_v62  ;;  %v1060_v29 = vpack.c.bf16 %v1059_v20, %v1059_v20  ;;  %v815_v30 = vmax.f32 %v799_v21, 0.0 }
 0x489   : > { %v2786_v39 = vmax.f32 %v638_v0, %v817_v24 }
 0x48a   : > { %v2788_v40 = vmax.f32 %v636_v26, %v815_v30  ;;  %2273 = vmatpush3.bf16.msra.mxu0 %v931_v54  ;;  %2409 = vmatprep.subr.msk.bf16.mxu1 %vm418_vm5, %v1060_v29  ;;  %v1062_v42 = vsel %vm418_vm5, %v1060_v29, 0 }
 0x48b   : > { %2289 = vmatpush3.bf16.msra.mxu1 %v1062_v42 }
 0x48c   : > { %2306 = vmatprep.subr.bf16.mxu1 %v2477_v1 }
 0x48d   : > { %2275 = vmatmul.mubr.msk.bf16.vlgmr.msra.gmra.mrb[16].mxu0 %vm553_vm6, %v2651_v55 }
 0x48e   : > { %2291 = vmatmul.mubr.msk.bf16.vlgmr.msra.gmra.mrb[28].mxu1 %vm411_vm4, %v2617_v32  ;;  %2278 = vmatprep.mubr.msk.bf16.mxu0 %vm553_vm6, %v2629_v34 }
 0x48f   : > { %2307 = vmatpush3.bf16.msra.mxu1 %v1204_v43  ;;  %2308 = vmatprep.mubr.msk.bf16.mxu1 %vm2479_vm2, %v2477_v1 }
 0x495   : > { %2279 = vmatmul.mubr.msk.bf16.gmra.mrb[20].mxu0 %vm553_vm6, %v2656_v56 }
 0x496   : > { %2309 = vmatmul.mubr.msk.bf16.vlgmr.msra.gmra.mrb[32].mxu1 %vm320_vm3, %v2568_v11  ;;  %2298 = vmatprep.mubr.msk.bf16.mxu0 %vm553_vm6, %v2624_v33 }
 0x497   : > { %2314 = vmatprep.mubr.msk.bf16.mxu1 %vm411_vm4, %v2587_v16 }
 0x560   : > { %v2276_v45 = vpop.f32.mrb[16].mxu0 }
 0x561   : > { %v975_v46 = vadd.f32 %v2276_v45, %v2734_v53  ;;  %v966_v48 = vpop.f32.mrb[17].mxu0  ;;  %v2292_v54 = vpop.f32.mrb[28].mxu1 }
 0x562   : > { %v967_v3 = vadd.f32 %v966_v48, %v2730_v51  ;;  %v1107_v6 = vadd.f32 %v2292_v54, %v2639_v37  ;;  %v2277_v7 = vpop.f32.mrb[18].mxu0  ;;  %v1098_v59 = vpop.f32.mrb[29].mxu1 }
 0x563   : > { %v999_v8 = vmax.f32 %v975_v46, 0.0  ;;  %v978_v9 = vadd.f32 %v2277_v7, %v2732_v52  ;;  %v1099_v10 = vadd.f32 %v1098_v59, %v2637_v36  ;;  %v969_v12 = vpop.f32.mrb[19].mxu0  ;;  %v2293_v13 = vpop.f32.mrb[30].mxu1 }
 0x564   : > { %v997_v61 = vmax.f32 %v967_v3, 0.0  ;;  %v970_v58 = vadd.f32 %v969_v12, %v2728_v50  ;;  %v1110_v14 = vadd.f32 %v2293_v13, %v2642_v41  ;;  %v1101_v15 = vpop.f32.mrb[31].mxu1  ;;  %v1115_v19 = vmax.f32 %v1107_v6, 0.0 }
 0x565   : > { %v2818_v60 = vmax.f32 %v2755_v28, %v999_v8  ;;  %v1000_v17 = vmax.f32 %v978_v9, 0.0  ;;  %v1102_v63 = vadd.f32 %v1101_v15, %v2635_v35  ;;  %v1113_v2 = vmax.f32 %v1099_v10, 0.0 }
 0x566   : > { %v2822_v18 = vmax.f32 %v2760_v38, %v997_v61  ;;  %v998_v62 = vmax.f32 %v970_v58, 0.0  ;;  %v1116_v20 = vmax.f32 %v1110_v14, 0.0 }
 0x567   : > { %v2825_v21 = vmax.f32 %v2764_v44, %v1000_v17  ;;  %v1114_v0 = vmax.f32 %v1102_v63, 0.0  ;;  %v2094_v44 = vld [vmem:[%s2558_s12 + $0x28] sm:$0x1f] }
 0x568   : > { %v2828_v24 = vmax.f32 %v2770_v49, %v998_v62  ;;  %v1118_v28 = vpack.c.bf16 %v1116_v20, %v1115_v19  ;;  %v2280_v25 = vpop.f32.mrb[20].mxu0  ;;  %v1389_v12 = vpack.c.bf16 %v2094_v44, %v2094_v44 }
 0x569   : > { %v1117_v26 = vpack.c.bf16 %v1114_v0, %v1113_v2  ;;  %v991_v29 = vadd.f32 %v2280_v25, %v2758_v31  ;;  %v982_v30 = vpop.f32.mrb[21].mxu0  ;;  %v1240_v38 = vpop.f32.mrb[32].mxu1 }
 0x56a   : > { %v983_v42 = vadd.f32 %v982_v30, %v2742_v4  ;;  %v1241_v43 = vadd.f32 %v1240_v38, %v2609_v23  ;;  %v2281_v45 = vpop.f32.mrb[22].mxu0  ;;  %v2310_v46 = vpop.f32.mrb[33].mxu1  ;;  %v1391_v17 = vand.u32 %v1389_v12, %v2547_v5 }
 0x56b   : > { %v1003_v48 = vmax.f32 %v991_v29, 0.0  ;;  %v994_v54 = vadd.f32 %v2281_v45, %v2766_v47  ;;  %v985_v3 = vpop.f32.mrb[23].mxu0  ;;  %2294 = vmatprep.subr.bf16.mxu0 %v1117_v26  ;;  %v1243_v49 = vpop.f32.mrb[34].mxu1 }
 0x56c   : > { %v1001_v6 = vmax.f32 %v983_v42, 0.0  ;;  %v1246_v7 = vmax.f32 %v1241_v43, 0.0  ;;  %v986_v59 = vadd.f32 %v985_v3, %v2738_v57  ;;  %2295 = vmatpush3.bf16.msra.mxu0 %v1117_v26  ;;  %v2311_v8 = vpop.f32.mrb[35].mxu1 }
 0x56d   : > { %v2837_v9 = vmax.f32 %v2782_v22, %v1003_v48  ;;  %v1004_v10 = vmax.f32 %v994_v54, 0.0  ;;  %2296 = vmatprep.subr.bf16.mxu0 %v1118_v28 }
 0x56e   : > { %v2840_v13 = vmax.f32 %v2784_v27, %v1001_v6  ;;  %v1247_v61 = vpack.c.bf16 %v1246_v7, %v1246_v7  ;;  %v1002_v58 = vmax.f32 %v986_v59, 0.0 }
 0x56f   : > { %v2843_v14 = vmax.f32 %v2786_v39, %v1004_v10 }
 0x570   : > { %v2846_v15 = vmax.f32 %v2788_v40, %v1002_v58  ;;  %2297 = vmatpush3.bf16.msra.mxu0 %v1118_v28  ;;  %2410 = vmatprep.subr.msk.bf16.mxu1 %vm418_vm5, %v1247_v61  ;;  %v1249_v22 = vsel %vm418_vm5, %v1247_v61, 0 }
 0x571   : > { %2313 = vmatpush3.bf16.msra.mxu1 %v1249_v22 }
 0x572   : > { %2330 = vmatprep.subr.bf16.mxu1 %v2477_v1 }
 0x573   : > { %2299 = vmatmul.mubr.msk.bf16.vlgmr.msra.gmra.mrb[24].mxu0 %vm553_vm6, %v2651_v55 }
 0x574   : > { %2315 = vmatmul.mubr.msk.bf16.vlgmr.msra.gmra.mrb[36].mxu1 %vm411_vm4, %v2617_v32  ;;  %2302 = vmatprep.mubr.msk.bf16.mxu0 %vm553_vm6, %v2629_v34 }
 0x575   : > { %2331 = vmatpush3.bf16.msra.mxu1 %v1391_v17  ;;  %2332 = vmatprep.mubr.msk.bf16.mxu1 %vm2479_vm2, %v2477_v1 }
 0x57b   : > { %2303 = vmatmul.mubr.msk.bf16.gmra.mrb[28].mxu0 %vm553_vm6, %v2656_v56 }
 0x57c   : > { %2333 = vmatmul.mubr.msk.bf16.vlgmr.msra.gmra.mrb[40].mxu1 %vm320_vm3, %v2568_v11  ;;  %2322 = vmatprep.mubr.msk.bf16.mxu0 %vm553_vm6, %v2624_v33 }
 0x57d   : > { %2338 = vmatprep.mubr.msk.bf16.mxu1 %vm411_vm4, %v2587_v16 }
 0x646   : > { %v2300_v27 = vpop.f32.mrb[24].mxu0 }
 0x647   : > { %v1162_v39 = vadd.f32 %v2300_v27, %v2734_v53  ;;  %v1153_v40 = vpop.f32.mrb[25].mxu0  ;;  %v2316_v63 = vpop.f32.mrb[36].mxu1 }
 0x648   : > { %v1154_v19 = vadd.f32 %v1153_v40, %v2730_v51  ;;  %v1294_v62 = vadd.f32 %v2316_v63, %v2639_v37  ;;  %v2301_v20 = vpop.f32.mrb[26].mxu0  ;;  %v1285_v2 = vpop.f32.mrb[37].mxu1 }
 0x649   : > { %v1186_v0 = vmax.f32 %v1162_v39, 0.0  ;;  %v1165_v28 = vadd.f32 %v2301_v20, %v2732_v52  ;;  %v1286_v25 = vadd.f32 %v1285_v2, %v2637_v36  ;;  %v1156_v26 = vpop.f32.mrb[27].mxu0  ;;  %v2317_v29 = vpop.f32.mrb[38].mxu1 }
 0x64a   : > { %v1184_v30 = vmax.f32 %v1154_v19, 0.0  ;;  %v1157_v38 = vadd.f32 %v1156_v26, %v2728_v50  ;;  %v1297_v42 = vadd.f32 %v2317_v29, %v2642_v41  ;;  %v1288_v43 = vpop.f32.mrb[39].mxu1  ;;  %v1302_v54 = vmax.f32 %v1294_v62, 0.0 }
 0x64b   : > { %v2876_v45 = vmax.f32 %v2818_v60, %v1186_v0  ;;  %v1187_v46 = vmax.f32 %v1165_v28, 0.0  ;;  %v1289_v44 = vadd.f32 %v1288_v43, %v2635_v35  ;;  %v1300_v7 = vmax.f32 %v1286_v25, 0.0 }
 0x64c   : > { %v2880_v48 = vmax.f32 %v2822_v18, %v1184_v30  ;;  %v1185_v3 = vmax.f32 %v1157_v38, 0.0  ;;  %v1303_v49 = vmax.f32 %v1297_v42, 0.0 }
 0x64d   : > { %v2883_v6 = vmax.f32 %v2825_v21, %v1187_v46  ;;  %v1301_v59 = vmax.f32 %v1289_v44, 0.0  ;;  %v2102_v21 = vld [vmem:[%s2558_s12 + $0x30] sm:$0x1f] }
 0x64e   : > { %v2886_v8 = vmax.f32 %v2828_v24, %v1185_v3  ;;  %v1305_v60 = vpack.c.bf16 %v1303_v49, %v1302_v54  ;;  %v2304_v10 = vpop.f32.mrb[28].mxu0  ;;  %v1576_v26 = vpack.c.bf16 %v2102_v21, %v2102_v21 }
 0x64f   : > { %v1304_v12 = vpack.c.bf16 %v1301_v59, %v1300_v7  ;;  %v1178_v61 = vadd.f32 %v2304_v10, %v2758_v31  ;;  %v1169_v58 = vpop.f32.mrb[29].mxu0  ;;  %v1427_v18 = vpop.f32.mrb[40].mxu1 }
 0x650   : > { %v1170_v22 = vadd.f32 %v1169_v58, %v2742_v4  ;;  %v1428_v17 = vadd.f32 %v1427_v18, %v2609_v23  ;;  %v2305_v27 = vpop.f32.mrb[30].mxu0  ;;  %v2334_v39 = vpop.f32.mrb[41].mxu1  ;;  %v1578_v46 = vand.u32 %v1576_v26, %v2547_v5 }
 0x651   : > { %v1190_v40 = vmax.f32 %v1178_v61, 0.0  ;;  %v1181_v63 = vadd.f32 %v2305_v27, %v2766_v47  ;;  %v1172_v19 = vpop.f32.mrb[31].mxu0  ;;  %2318 = vmatprep.subr.bf16.mxu0 %v1304_v12  ;;  %v1430_v24 = vpop.f32.mrb[42].mxu1 }
 0x652   : > { %v1188_v62 = vmax.f32 %v1170_v22, 0.0  ;;  %v1433_v20 = vmax.f32 %v1428_v17, 0.0  ;;  %v1173_v2 = vadd.f32 %v1172_v19, %v2738_v57  ;;  %2319 = vmatpush3.bf16.msra.mxu0 %v1304_v12  ;;  %v2335_v0 = vpop.f32.mrb[43].mxu1 }
 0x653   : > { %v2895_v28 = vmax.f32 %v2837_v9, %v1190_v40  ;;  %v1191_v25 = vmax.f32 %v1181_v63, 0.0  ;;  %2320 = vmatprep.subr.bf16.mxu0 %v1305_v60 }
 0x654   : > { %v2898_v29 = vmax.f32 %v2840_v13, %v1188_v62  ;;  %v1434_v30 = vpack.c.bf16 %v1433_v20, %v1433_v20  ;;  %v1189_v38 = vmax.f32 %v1173_v2, 0.0 }
 0x655   : > { %v2901_v42 = vmax.f32 %v2843_v14, %v1191_v25 }
 0x656   : > { %v2904_v43 = vmax.f32 %v2846_v15, %v1189_v38  ;;  %2321 = vmatpush3.bf16.msra.mxu0 %v1305_v60  ;;  %2411 = vmatprep.subr.msk.bf16.mxu1 %vm418_vm5, %v1434_v30  ;;  %v1436_v9 = vsel %vm418_vm5, %v1434_v30, 0 }
 0x657   : > { %2337 = vmatpush3.bf16.msra.mxu1 %v1436_v9 }
 0x658   : > { %2354 = vmatprep.subr.bf16.mxu1 %v2477_v1 }
 0x659   : > { %2323 = vmatmul.mubr.msk.bf16.vlgmr.msra.gmra.mrb[32].mxu0 %vm553_vm6, %v2651_v55 }
 0x65a   : > { %2339 = vmatmul.mubr.msk.bf16.vlgmr.msra.gmra.mrb[44].mxu1 %vm411_vm4, %v2617_v32  ;;  %2326 = vmatprep.mubr.msk.bf16.mxu0 %vm553_vm6, %v2629_v34 }
 0x65b   : > { %2355 = vmatpush3.bf16.msra.mxu1 %v1578_v46  ;;  %2356 = vmatprep.mubr.msk.bf16.mxu1 %vm2479_vm2, %v2477_v1 }
 0x661   : > { %2327 = vmatmul.mubr.msk.bf16.gmra.mrb[36].mxu0 %vm553_vm6, %v2656_v56 }
 0x662   : > { %2357 = vmatmul.mubr.msk.bf16.vlgmr.msra.gmra.mrb[48].mxu1 %vm320_vm3, %v2568_v11  ;;  %2346 = vmatprep.mubr.msk.bf16.mxu0 %vm553_vm6, %v2624_v33 }
 0x663   : > { %2362 = vmatprep.mubr.msk.bf16.mxu1 %vm411_vm4, %v2587_v16 }
 0x72c   : > { %v2324_v13 = vpop.f32.mrb[32].mxu0 }
 0x72d   : > { %v1349_v14 = vadd.f32 %v2324_v13, %v2734_v53  ;;  %v1340_v15 = vpop.f32.mrb[33].mxu0  ;;  %v2340_v44 = vpop.f32.mrb[44].mxu1 }
 0x72e   : > { %v1341_v54 = vadd.f32 %v1340_v15, %v2730_v51  ;;  %v1481_v3 = vadd.f32 %v2340_v44, %v2639_v37  ;;  %v2325_v49 = vpop.f32.mrb[34].mxu0  ;;  %v1472_v7 = vpop.f32.mrb[45].mxu1 }
 0x72f   : > { %v1373_v59 = vmax.f32 %v1349_v14, 0.0  ;;  %v1352_v60 = vadd.f32 %v2325_v49, %v2732_v52  ;;  %v1473_v10 = vadd.f32 %v1472_v7, %v2637_v36  ;;  %v1343_v12 = vpop.f32.mrb[35].mxu0  ;;  %v2341_v61 = vpop.f32.mrb[46].mxu1 }
 0x730   : > { %v1371_v58 = vmax.f32 %v1341_v54, 0.0  ;;  %v1344_v18 = vadd.f32 %v1343_v12, %v2728_v50  ;;  %v1484_v22 = vadd.f32 %v2341_v61, %v2642_v41  ;;  %v1475_v17 = vpop.f32.mrb[47].mxu1  ;;  %v1489_v63 = vmax.f32 %v1481_v3, 0.0 }
 0x731   : > { %v2934_v27 = vmax.f32 %v2876_v45, %v1373_v59  ;;  %v1374_v39 = vmax.f32 %v1352_v60, 0.0  ;;  %v1476_v21 = vadd.f32 %v1475_v17, %v2635_v35  ;;  %v1487_v20 = vmax.f32 %v1473_v10, 0.0 }
 0x732   : > { %v2938_v40 = vmax.f32 %v2880_v48, %v1371_v58  ;;  %v1372_v19 = vmax.f32 %v1344_v18, 0.0  ;;  %v1490_v24 = vmax.f32 %v1484_v22, 0.0 }
 0x733   : > { %v2941_v62 = vmax.f32 %v2883_v6, %v1374_v39  ;;  %v1488_v2 = vmax.f32 %v1476_v21, 0.0  ;;  %v2110_v6 = vld [vmem:[%s2558_s12 + $0x38] sm:$0x1f] }
 0x734   : > { %v2944_v0 = vmax.f32 %v2886_v8, %v1372_v19  ;;  %v1492_v45 = vpack.c.bf16 %v1490_v24, %v1489_v63  ;;  %v2328_v25 = vpop.f32.mrb[36].mxu0  ;;  %v1763_v12 = vpack.c.bf16 %v2110_v6, %v2110_v6 }
 0x735   : > { %v1491_v26 = vpack.c.bf16 %v1488_v2, %v1487_v20  ;;  %v1365_v30 = vadd.f32 %v2328_v25, %v2758_v31  ;;  %v1356_v38 = vpop.f32.mrb[37].mxu0  ;;  %v1614_v48 = vpop.f32.mrb[48].mxu1 }
 0x736   : > { %v1357_v9 = vadd.f32 %v1356_v38, %v2742_v4  ;;  %v1615_v46 = vadd.f32 %v1614_v48, %v2609_v23  ;;  %v2329_v13 = vpop.f32.mrb[38].mxu0  ;;  %v2358_v14 = vpop.f32.mrb[49].mxu1  ;;  %v1765_v39 = vand.u32 %v1763_v12, %v2547_v5 }
 0x737   : > { %v1377_v15 = vmax.f32 %v1365_v30, 0.0  ;;  %v1368_v44 = vadd.f32 %v2329_v13, %v2766_v47  ;;  %v1359_v54 = vpop.f32.mrb[39].mxu0  ;;  %2342 = vmatprep.subr.bf16.mxu0 %v1491_v26  ;;  %v1617_v8 = vpop.f32.mrb[50].mxu1 }
 0x738   : > { %v1375_v3 = vmax.f32 %v1357_v9, 0.0  ;;  %v1620_v49 = vmax.f32 %v1615_v46, 0.0  ;;  %v1360_v7 = vadd.f32 %v1359_v54, %v2738_v57  ;;  %2343 = vmatpush3.bf16.msra.mxu0 %v1491_v26  ;;  %v2359_v59 = vpop.f32.mrb[51].mxu1 }
 0x739   : > { %v2953_v60 = vmax.f32 %v2895_v28, %v1377_v15  ;;  %v1378_v10 = vmax.f32 %v1368_v44, 0.0  ;;  %2344 = vmatprep.subr.bf16.mxu0 %v1492_v45 }
 0x73a   : > { %v2956_v61 = vmax.f32 %v2898_v29, %v1375_v3  ;;  %v1621_v58 = vpack.c.bf16 %v1620_v49, %v1620_v49  ;;  %v1376_v18 = vmax.f32 %v1360_v7, 0.0 }
 0x73b   : > { %v2959_v22 = vmax.f32 %v2901_v42, %v1378_v10 }
 0x73c   : > { %v2962_v17 = vmax.f32 %v2904_v43, %v1376_v18  ;;  %2345 = vmatpush3.bf16.msra.mxu0 %v1492_v45  ;;  %2412 = vmatprep.subr.msk.bf16.mxu1 %vm418_vm5, %v1621_v58  ;;  %v1623_v28 = vsel %vm418_vm5, %v1621_v58, 0 }
 0x73d   : > { %2361 = vmatpush3.bf16.msra.mxu1 %v1623_v28 }
 0x73e   : > { %2378 = vmatprep.subr.bf16.mxu1 %v2477_v1 }
 0x73f   : > { %2347 = vmatmul.mubr.msk.bf16.vlgmr.msra.gmra.mrb[40].mxu0 %vm553_vm6, %v2651_v55 }
 0x740   : > { %2363 = vmatmul.mubr.msk.bf16.vlgmr.msra.gmra.mrb[52].mxu1 %vm411_vm4, %v2617_v32  ;;  %2350 = vmatprep.mubr.msk.bf16.mxu0 %vm553_vm6, %v2629_v34 }
 0x741   : > { %2379 = vmatpush3.bf16.msra.mxu1 %v1765_v39  ;;  %2380 = vmatprep.mubr.msk.bf16.mxu1 %vm2479_vm2, %v2477_v1 }
 0x747   : > { %2351 = vmatmul.mubr.msk.bf16.gmra.mrb[44].mxu0 %vm553_vm6, %v2656_v56 }
 0x748   : > { %2381 = vmatmul.mubr.msk.bf16.vlgmr.msra.gmra.mrb[56].mxu1 %vm320_vm3, %v2568_v11  ;;  %2370 = vmatprep.mubr.msk.bf16.mxu0 %vm553_vm6, %v2624_v33 }
 0x749   : > { %2386 = vmatprep.mubr.msk.bf16.mxu1 %vm411_vm4, %v2587_v16 }
 0x812   : > { %v2348_v5 = vpop.f32.mrb[40].mxu0 }
 0x813   : > { %v1536_v29 = vadd.f32 %v2348_v5, %v2734_v53  ;;  %v1527_v42 = vpop.f32.mrb[41].mxu0  ;;  %v2364_v43 = vpop.f32.mrb[52].mxu1 }
 0x814   : > { %v1528_v21 = vadd.f32 %v1527_v42, %v2730_v51  ;;  %v1668_v1 = vadd.f32 %v2364_v43, %v2639_v37  ;;  %v2349_v63 = vpop.f32.mrb[42].mxu0  ;;  %v1659_v19 = vpop.f32.mrb[53].mxu1 }
 0x815   : > { %v1560_v24 = vmax.f32 %v1536_v29, 0.0  ;;  %v1539_v11 = vadd.f32 %v2349_v63, %v2732_v52  ;;  %v1660_v20 = vadd.f32 %v1659_v19, %v2637_v36  ;;  %v1530_v2 = vpop.f32.mrb[43].mxu0  ;;  %v2365_v45 = vpop.f32.mrb[54].mxu1 }
 0x816   : > { %v1558_v25 = vmax.f32 %v1528_v21, 0.0  ;;  %v1531_v16 = vadd.f32 %v1530_v2, %v2728_v50  ;;  %v1671_v26 = vadd.f32 %v2365_v45, %v2642_v41  ;;  %v1662_v30 = vpop.f32.mrb[55].mxu1  ;;  %v1676_v13 = vmax.f32 %v1668_v1, 0.0 }
 0x817   : > { %v2992_v38 = vmax.f32 %v2934_v27, %v1560_v24  ;;  %v1561_v48 = vmax.f32 %v1539_v11, 0.0  ;;  %v1663_v9 = vadd.f32 %v1662_v30, %v2635_v35  ;;  %v1674_v44 = vmax.f32 %v1660_v20, 0.0 }
 0x818   : > { %v2996_v46 = vmax.f32 %v2938_v40, %v1558_v25  ;;  %v1559_v14 = vmax.f32 %v1531_v16, 0.0  ;;  %v1677_v6 = vmax.f32 %v1671_v26, 0.0 }
 0x819   : > { %v2999_v15 = vmax.f32 %v2941_v62, %v1561_v48  ;;  %v1675_v54 = vmax.f32 %v1663_v9, 0.0 }
 0x81a   : > { %v3002_v8 = vmax.f32 %v2944_v0, %v1559_v14  ;;  %v1679_v3 = vpack.c.bf16 %v1677_v6, %v1676_v13  ;;  %v2352_v27 = vpop.f32.mrb[44].mxu0 }
 0x81b   : > { %v1678_v49 = vpack.c.bf16 %v1675_v54, %v1674_v44  ;;  %v1552_v7 = vadd.f32 %v2352_v27, %v2758_v31  ;;  %v1543_v59 = vpop.f32.mrb[45].mxu0  ;;  %v1801_v10 = vpop.f32.mrb[56].mxu1 }
 0x81c   : > { %v1544_v40 = vadd.f32 %v1543_v59, %v2742_v4  ;;  %v1802_v12 = vadd.f32 %v1801_v10, %v2609_v23  ;;  %v2353_v58 = vpop.f32.mrb[46].mxu0  ;;  %v2382_v18 = vpop.f32.mrb[57].mxu1 }
 0x81d   : > { %v1564_v62 = vmax.f32 %v1552_v7, 0.0  ;;  %v1555_v28 = vadd.f32 %v2353_v58, %v2766_v47  ;;  %v1546_v39 = vpop.f32.mrb[47].mxu0  ;;  %2366 = vmatprep.subr.bf16.mxu0 %v1678_v49  ;;  %v1804_v0 = vpop.f32.mrb[58].mxu1 }
 0x81e   : > { %v1562_v5 = vmax.f32 %v1544_v40, 0.0  ;;  %v1807_v29 = vmax.f32 %v1802_v12, 0.0  ;;  %v1547_v42 = vadd.f32 %v1546_v39, %v2738_v57  ;;  %2367 = vmatpush3.bf16.msra.mxu0 %v1678_v49  ;;  %v2383_v43 = vpop.f32.mrb[59].mxu1 }
 0x81f   : > { %v1572_v21 = vmax.f32 %v2953_v60, %v1564_v62  ;;  %v1565_v1 = vmax.f32 %v1555_v28, 0.0  ;;  %2368 = vmatprep.subr.bf16.mxu0 %v1679_v3  ;;  %v2451_v43 = vld [vmem:[%s3098_s5 + $0x10] sm:$0xff]  }
 0x820   : > { %v1570_v23 = vmax.f32 %v2956_v61, %v1562_v5  ;;  %v1808_v63 = vpack.c.bf16 %v1807_v29, %v1807_v29  ;;  %v1563_v19 = vmax.f32 %v1547_v42, 0.0  ;;  %v2450_v42 = vld [vmem:[%s3098_s5 + $0x8] sm:$0xff]  }
 0x821   : > { %v1573_v24 = vmax.f32 %v2959_v22, %v1565_v1 }
 0x822   : > { %v1571_v11 = vmax.f32 %v2962_v17, %v1563_v19  ;;  %2369 = vmatpush3.bf16.msra.mxu0 %v1679_v3  ;;  %2413 = vmatprep.subr.msk.bf16.mxu1 %vm418_vm5, %v1808_v63  ;;  %v1810_v20 = vsel %vm418_vm5, %v1808_v63, 0 }
 0x823   : > { %2385 = vmatpush3.bf16.msra.mxu1 %v1810_v20 }
 0x825   : > { %2371 = vmatmul.mubr.msk.bf16.vlgmr.msra.gmra.mrb[48].mxu0 %vm553_vm6, %v2651_v55 }
 0x826   : > { %2387 = vmatmul.mubr.msk.bf16.vlgmr.msra.gmra.mrb[60].mxu1 %vm411_vm4, %v2617_v32  ;;  %2374 = vmatprep.mubr.msk.bf16.mxu0 %vm553_vm6, %v2629_v34 }
 0x82d   : > { %2375 = vmatmul.mubr.msk.bf16.gmra.mrb[52].mxu0 %vm553_vm6, %v2656_v56 }
 0x82e   : > { %2394 = vmatprep.mubr.msk.bf16.mxu0 %vm553_vm6, %v2624_v33 }
 0x8f8   : > { %v2372_v60 = vpop.f32.mrb[48].mxu0 }
 0x8f9   : > { %v1723_v61 = vadd.f32 %v2372_v60, %v2734_v53  ;;  %v1714_v22 = vpop.f32.mrb[49].mxu0  ;;  %v2388_v17 = vpop.f32.mrb[60].mxu1 }
 0x8fa   : > { %v1715_v2 = vadd.f32 %v1714_v22, %v2730_v51  ;;  %v1855_v55 = vadd.f32 %v2388_v17, %v2639_v37  ;;  %v2373_v45 = vpop.f32.mrb[50].mxu0  ;;  %v1846_v32 = vpop.f32.mrb[61].mxu1 }
 0x8fb   : > { %v1747_v25 = vmax.f32 %v1723_v61, 0.0  ;;  %v1726_v34 = vadd.f32 %v2373_v45, %v2732_v52  ;;  %v1847_v16 = vadd.f32 %v1846_v32, %v2637_v36  ;;  %v1717_v56 = vpop.f32.mrb[51].mxu0  ;;  %v2389_v26 = vpop.f32.mrb[62].mxu1 }
 0x8fc   : > { %v1745_v30 = vmax.f32 %v1715_v2, 0.0  ;;  %v1718_v33 = vadd.f32 %v1717_v56, %v2728_v50  ;;  %v1858_v48 = vadd.f32 %v2389_v26, %v2642_v41  ;;  %v1849_v9 = vpop.f32.mrb[63].mxu1  ;;  %v1863_v44 = vmax.f32 %v1855_v55, 0.0 }
 0x8fd   : > { %v1755_v13 = vmax.f32 %v2992_v38, %v1747_v25  ;;  %v1748_v14 = vmax.f32 %v1726_v34, 0.0  ;;  %v1850_v37 = vadd.f32 %v1849_v9, %v2635_v35  ;;  %v1861_v27 = vmax.f32 %v1847_v16, 0.0 }
 0x8fe   : > { %v1753_v6 = vmax.f32 %v2996_v46, %v1745_v30  ;;  %v1746_v54 = vmax.f32 %v1718_v33, 0.0  ;;  %v1864_v3 = vmax.f32 %v1858_v48, 0.0 }
 0x8ff   : > { %v1756_v36 = vmax.f32 %v2999_v15, %v1748_v14  ;;  %v1862_v49 = vmax.f32 %v1850_v37, 0.0 }
 0x900   : > { %v1754_v7 = vmax.f32 %v3002_v8, %v1746_v54  ;;  %v1866_v59 = vpack.c.bf16 %v1864_v3, %v1863_v44  ;;  %v2376_v10 = vpop.f32.mrb[52].mxu0 }
 0x901   : > { %v1865_v41 = vpack.c.bf16 %v1862_v49, %v1861_v27  ;;  %v1739_v40 = vadd.f32 %v2376_v10, %v2758_v31  ;;  %v1730_v38 = vpop.f32.mrb[53].mxu0 }
 0x902   : > { %v1731_v12 = vadd.f32 %v1730_v38, %v2742_v4  ;;  %v2377_v35 = vpop.f32.mrb[54].mxu0 }
 0x903   : > { %v1751_v58 = vmax.f32 %v1739_v40, 0.0  ;;  %v1742_v46 = vadd.f32 %v2377_v35, %v2766_v47  ;;  %v1733_v18 = vpop.f32.mrb[55].mxu0  ;;  %2390 = vmatprep.subr.bf16.mxu0 %v1865_v41 }
 0x904   : > { %v1749_v62 = vmax.f32 %v1731_v12, 0.0  ;;  %v1734_v15 = vadd.f32 %v1733_v18, %v2738_v57  ;;  %2391 = vmatpush3.bf16.msra.mxu0 %v1865_v41 }
 0x905   : > { %v1759_v28 = vmax.f32 %v1572_v21, %v1751_v58  ;;  %v1752_v8 = vmax.f32 %v1742_v46, 0.0  ;;  %2392 = vmatprep.subr.bf16.mxu0 %v1866_v59  ;;  %v2452_v21 = vld [vmem:[%s3098_s5 + $0x18] sm:$0xff]  }
 0x906   : > { %v1757_v39 = vmax.f32 %v1570_v23, %v1749_v62  ;;  %v1750_v0 = vmax.f32 %v1734_v15, 0.0 }
 0x907   : > { %v1760_v5 = vmax.f32 %v1573_v24, %v1752_v8 }
 0x908   : > { %v1758_v29 = vmax.f32 %v1571_v11, %v1750_v0  ;;  %2393 = vmatpush3.bf16.msra.mxu0 %v1866_v59 }
 0x90b   : > { %2395 = vmatmul.mubr.msk.bf16.vlgmr.msra.gmra.mrb[56].mxu0 %vm553_vm6, %v2450_v42 }
 0x90c   : > { %2398 = vmatprep.mubr.msk.bf16.mxu0 %vm553_vm6, %v2451_v43 }
 0x913   : > { %2399 = vmatmul.mubr.msk.bf16.gmra.mrb[60].mxu0 %vm553_vm6, %v2452_v21 }
 0x9de   : > { %v2396_v1 = vpop.f32.mrb[56].mxu0 }
 0x9df   : > { %v1910_v23 = vadd.f32 %v2396_v1, %v2734_v53  ;;  %v1901_v63 = vpop.f32.mrb[57].mxu0 }
 0x9e0   : > { %v1902_v19 = vadd.f32 %v1901_v63, %v2730_v51  ;;  %v2397_v24 = vpop.f32.mrb[58].mxu0 }
 0x9e1   : > { %v1934_v11 = vmax.f32 %v1910_v23, 0.0  ;;  %v1913_v20 = vadd.f32 %v2397_v24, %v2732_v52  ;;  %v1904_v60 = vpop.f32.mrb[59].mxu0 }
 0x9e2   : > { %v1932_v53 = vmax.f32 %v1902_v19, 0.0  ;;  %v1905_v61 = vadd.f32 %v1904_v60, %v2728_v50 }
 0x9e3   : > { %v1942_v51 = vmax.f32 %v1755_v13, %v1934_v11  ;;  %v1935_v22 = vmax.f32 %v1913_v20, 0.0 }
 0x9e4   : > { %v1940_v17 = vmax.f32 %v1753_v6, %v1932_v53  ;;  %v1933_v2 = vmax.f32 %v1905_v61, 0.0 }
 0x9e5   : > { %1951 = vst.msk [vmem:[%s3061_s22 + $0x10] sm:$0xff] %vm1948_vm7, %v1942_v51  ;;  %v1943_v52 = vmax.f32 %v1756_v36, %v1935_v22 }
 0x9e6   : > { %1949 = vst.msk [vmem:[%s3061_s22] sm:$0xff] %vm1948_vm7, %v1940_v17  ;;  %v1941_v55 = vmax.f32 %v1754_v7, %v1933_v2  ;;  %v2400_v45 = vpop.f32.mrb[60].mxu0 }
 0x9e7   : > { %1952 = vst.msk [vmem:[%s3061_s22 + $0x18] sm:$0xff] %vm1948_vm7, %v1943_v52  ;;  %v1926_v32 = vadd.f32 %v2400_v45, %v2758_v31  ;;  %v1917_v25 = vpop.f32.mrb[61].mxu0 }
 0x9e8   : > { %1950 = vst.msk [vmem:[%s3061_s22 + $0x8] sm:$0xff] %vm1948_vm7, %v1941_v55  ;;  %v1918_v50 = vadd.f32 %v1917_v25, %v2742_v4  ;;  %v2401_v34 = vpop.f32.mrb[62].mxu0 }
 0x9e9   : > { %v1938_v16 = vmax.f32 %v1926_v32, 0.0  ;;  %v1929_v56 = vadd.f32 %v2401_v34, %v2766_v47  ;;  %v1920_v26 = vpop.f32.mrb[63].mxu0 }
 0x9ea   : > { %v1936_v30 = vmax.f32 %v1918_v50, 0.0  ;;  %v1921_v33 = vadd.f32 %v1920_v26, %v2738_v57 }
 0x9eb   : > { %v1946_v48 = vmax.f32 %v1759_v28, %v1938_v16  ;;  %v1939_v9 = vmax.f32 %v1929_v56, 0.0 }
 0x9ec   : > { %v1944_v13 = vmax.f32 %v1757_v39, %v1936_v30  ;;  %v1937_v31 = vmax.f32 %v1921_v33, 0.0 }
 0x9ed   : > { %1955 = vst.msk [vmem:[%s3061_s22 + $0x30] sm:$0xff] %vm1948_vm7, %v1946_v48  ;;  %v1947_v14 = vmax.f32 %v1760_v5, %v1939_v9 }
 0x9ee   : > { %1953 = vst.msk [vmem:[%s3061_s22 + $0x20] sm:$0xff] %vm1948_vm7, %v1944_v13  ;;  %v1945_v37 = vmax.f32 %v1758_v29, %v1937_v31 }
 0x9ef   : > { %1956 = vst.msk [vmem:[%s3061_s22 + $0x38] sm:$0xff] %vm1948_vm7, %v1947_v14 }
 0x9f0   : > { %1954 = vst.msk [vmem:[%s3061_s22 + $0x28] sm:$0xff] %vm1948_vm7, %v1945_v37 }
 0x9f1 PF: > { %s17_s26 = sadd.s32 1, %s2475_s26   ;;  %s3101_s24 = smov %s2471_s25 }
 0x9f2   : > { %p14_p5 = scmp.ge.s32.totalorder %s17_s26, 4   ;;  %s3102_s25 = smov %s3104_s27 }
 0x9f4   :  { %16 = sbr.rel (!%p14_p5) target bundleno = 2 (0x2), region = 85 }

// kernel: model_forward.12
= control target key start
LH: loop header
LB: loop body
LE: loop exit
PB: predicated region body
PF: predicated region fallthrough
CT: control target
= control target key end

     0   :  { %s1129_s12 = smov 0   ;;  %s1377_s0 = inlined_call_operand.vmem [shape: f32[2,256,4], index: 0, kind: input, shape index: {}]   ;;  %s1378_s1 = inlined_call_operand.vmem [shape: bf16[64,256], index: 1, kind: input, shape index: {}]   ;;  %s1379_s2 = inlined_call_operand.vmem [shape: bf16[256,64], index: 2, kind: input, shape index: {}]   ;;  %s1380_s3 = inlined_call_operand.vmem [shape: f32[2,256,4], index: 3, kind: output, shape index: {}]  }
   0x1 LB: > { %s870_s13 = sadd.s32 4294967295, %s1107_s12   ;;  %p874_p0 = scmp.ge.s32.totalorder %s1107_s12, 1  ;;  %s1107_s12 = sphi %s1129_s12, %s13_s12  }
   0x2   : > { %p137_p1 = scmp.lt.s32.totalorder %s1107_s12, 3 }
   0x4   : > { %p138_p2 = pnand %p874_p0, %p137_p1 }
   0x5   : > { %p161_p3 = scmp.lt.s32.totalorder (!%p138_p2), %s870_s13, 1  ;;  %v1041_v0 = vld [vmem:[%s1378_s1 + $0x4] ss:$8 sps:$4 sm:$0xff] (!%p138_p2)   ;;  %v1039_v49 = vld [vmem:[%s1378_s1] ss:$8 sps:$4 sm:$0xff] (!%p138_p2)   ;;  %vm333_vm0 = vcmask (!%p138_p2), 31744  }
   0x6   : > { %141 = sbr.rel (%p138_p2) target bundleno = 812 (0x32c), region = 32  ;;  %300 = vmatprep.mubr.bf16.mxu0 (!%p138_p2), %v1041_v0  ;;  %v1042_v50 = vld [vmem:[%s1378_s1 + $0x14] ss:$8 sps:$4 sm:$0xff] (!%p138_p2)   ;;  %v1044_v51 = vld [vmem:[%s1378_s1 + $0x10] ss:$8 sps:$4 sm:$0xff] (!%p138_p2)   ;;  %vm573_vm1 = vcmask (!%p138_p2), 523264  }
   0x7   : > { %v1045_v52 = vld [vmem:[%s1378_s1 + $0x24] ss:$8 sps:$4 sm:$0xff] (!%p138_p2)   ;;  %v1047_v53 = vld [vmem:[%s1378_s1 + $0x20] ss:$8 sps:$4 sm:$0xff] (!%p138_p2)   ;;  %v1048_v54 = vld [vmem:[%s1378_s1 + $0x34] ss:$8 sps:$4 sm:$0xff] (!%p138_p2)  }
   0x8   : > { %v1050_v55 = vld [vmem:[%s1378_s1 + $0x30] ss:$8 sps:$4 sm:$0xff] (!%p138_p2)  }
   0xd   : > { %s1382_s13 = smov (!%p161_p3, %s870_s13), 1 }
   0xe   : > { %s921_s16 = sshll.u32 %s1382_s13, 8 }
   0xf   : > { %s1148_s19 = scalar_lea.vmem %s1377_s0, %s921_s16  ;;  %s1308_s20 = scalar_lea.vmem %s1380_s3, %s921_s16 }
  0x10   : > { %v196_v1 = vld [vmem:[%s1148_s19 + $0x80] sm:$0xff]  ;;  %v197_v2 = vld [vmem:[%s1148_s19 + $0x88] sm:$0xff]  ;;  %v198_v6 = vld [vmem:[%s1148_s19 + $0x90] sm:$0xff] }
  0x11   : > { %v180_v3 = vld [vmem:[%s1148_s19] sm:$0xff]  ;;  %v220_v4 = vpack.c.bf16 %v197_v2, %v196_v1  ;;  %v181_v5 = vld [vmem:[%s1148_s19 + $0x8] sm:$0xff]  ;;  %v199_v7 = vld [vmem:[%s1148_s19 + $0x98] sm:$0xff] }
  0x12   : > { %v212_v8 = vpack.c.bf16 %v181_v5, %v180_v3  ;;  %v221_v9 = vpack.c.bf16 %v199_v7, %v198_v6  ;;  %v182_v10 = vld [vmem:[%s1148_s19 + $0x10] sm:$0xff]  ;;  %v183_v11 = vld [vmem:[%s1148_s19 + $0x18] sm:$0xff]  ;;  %v200_v12 = vld [vmem:[%s1148_s19 + $0xa0] sm:$0xff] }
  0x13   : > { %923 = vmatprep.subr.bf16.mxu0 %v220_v4  ;;  %v201_v13 = vld [vmem:[%s1148_s19 + $0xa8] sm:$0xff]  ;;  %v213_v14 = vpack.c.bf16 %v183_v11, %v182_v10  ;;  %v184_v16 = vld [vmem:[%s1148_s19 + $0x20] sm:$0xff]  ;;  %v202_v18 = vld [vmem:[%s1148_s19 + $0xb0] sm:$0xff] }
  0x14   : > { %924 = vmatpush3.bf16.msra.mxu0 %v212_v8  ;;  %v222_v15 = vpack.c.bf16 %v201_v13, %v200_v12  ;;  %v185_v17 = vld [vmem:[%s1148_s19 + $0x28] sm:$0xff]  ;;  %v203_v19 = vld [vmem:[%s1148_s19 + $0xb8] sm:$0xff]  ;;  %v186_v22 = vld [vmem:[%s1148_s19 + $0x30] sm:$0xff] }
  0x15   : > { %925 = vmatprep.subr.bf16.mxu0 %v221_v9  ;;  %v214_v20 = vpack.c.bf16 %v185_v17, %v184_v16  ;;  %v223_v21 = vpack.c.bf16 %v203_v19, %v202_v18  ;;  %v187_v23 = vld [vmem:[%s1148_s19 + $0x38] sm:$0xff]  ;;  %v204_v24 = vld [vmem:[%s1148_s19 + $0xc0] sm:$0xff]  ;;  %v205_v25 = vld [vmem:[%s1148_s19 + $0xc8] sm:$0xff] }
  0x16   : > { %v188_v26 = vld [vmem:[%s1148_s19 + $0x40] sm:$0xff]  ;;  %v189_v27 = vld [vmem:[%s1148_s19 + $0x48] sm:$0xff]  ;;  %v215_v28 = vpack.c.bf16 %v187_v23, %v186_v22  ;;  %v206_v29 = vld [vmem:[%s1148_s19 + $0xd0] sm:$0xff]  ;;  %v224_v31 = vpack.c.bf16 %v205_v25, %v204_v24 }
  0x17   : > { %v207_v30 = vld [vmem:[%s1148_s19 + $0xd8] sm:$0xff]  ;;  %v190_v32 = vld [vmem:[%s1148_s19 + $0x50] sm:$0xff]  ;;  %v216_v34 = vpack.c.bf16 %v189_v27, %v188_v26  ;;  %v208_v35 = vld [vmem:[%s1148_s19 + $0xe0] sm:$0xff] }
  0x18   : > { %926 = vmatpush3.bf16.msra.mxu0 %v213_v14  ;;  %v191_v33 = vld [vmem:[%s1148_s19 + $0x58] sm:$0xff]  ;;  %v209_v36 = vld [vmem:[%s1148_s19 + $0xe8] sm:$0xff]  ;;  %v225_v37 = vpack.c.bf16 %v207_v30, %v206_v29  ;;  %v192_v40 = vld [vmem:[%s1148_s19 + $0x60] sm:$0xff] }
  0x19   : > { %927 = vmatprep.subr.bf16.mxu0 %v222_v15  ;;  %v217_v38 = vpack.c.bf16 %v191_v33, %v190_v32  ;;  %v226_v39 = vpack.c.bf16 %v209_v36, %v208_v35  ;;  %v193_v41 = vld [vmem:[%s1148_s19 + $0x68] sm:$0xff]  ;;  %v210_v42 = vld [vmem:[%s1148_s19 + $0xf0] sm:$0xff]  ;;  %v211_v43 = vld [vmem:[%s1148_s19 + $0xf8] sm:$0xff] }
  0x1a   : > { %v218_v44 = vpack.c.bf16 %v193_v41, %v192_v40  ;;  %v227_v45 = vpack.c.bf16 %v211_v43, %v210_v42  ;;  %v194_v46 = vld [vmem:[%s1148_s19 + $0x70] sm:$0xff]  ;;  %v195_v47 = vld [vmem:[%s1148_s19 + $0x78] sm:$0xff] }
  0x1b   : > { %v219_v48 = vpack.c.bf16 %v195_v47, %v194_v46 }
  0x1c   : > { %928 = vmatpush3.bf16.msra.mxu0 %v214_v20 }
  0x1d   : > { %929 = vmatprep.subr.bf16.mxu0 %v223_v21 }
  0x20   : > { %930 = vmatpush3.bf16.msra.mxu0 %v215_v28 }
  0x21   : > { %931 = vmatprep.subr.bf16.mxu0 %v224_v31 }
  0x24   : > { %932 = vmatpush3.bf16.msra.mxu0 %v216_v34 }
  0x25   : > { %933 = vmatprep.subr.bf16.mxu0 %v225_v37 }
  0x28   : > { %934 = vmatpush3.bf16.msra.mxu0 %v217_v38 }
  0x29   : > { %935 = vmatprep.subr.bf16.mxu0 %v226_v39 }
  0x2c   : > { %936 = vmatpush3.bf16.msra.mxu0 %v218_v44 }
  0x2d   : > { %937 = vmatprep.subr.bf16.mxu0 %v227_v45 }
  0x30   : > { %938 = vmatpush3.bf16.msra.mxu0 %v219_v48 }
  0x33   : > { %301 = vmatmul.mubr.bf16.vlgmr.msra.gmra.mrb[0].mxu0 %v1039_v49 }
  0x34   : > { %308 = vmatprep.mubr.bf16.mxu0 %v1042_v50 }
  0x3b   : > { %309 = vmatmul.mubr.bf16.gmra.mrb[4].mxu0 %v1044_v51 }
  0x3c   : > { %316 = vmatprep.mubr.bf16.mxu0 %v1045_v52 }
  0x43   : > { %317 = vmatmul.mubr.bf16.gmra.mrb[8].mxu0 %v1047_v53 }
  0x44   : > { %324 = vmatprep.mubr.bf16.mxu0 %v1048_v54 }
  0x4b   : > { %325 = vmatmul.mubr.bf16.gmra.mrb[12].mxu0 %v1050_v55 }
 0x106   : > { %v939_v56 = vpop.f32.mrb[0].mxu0 }
 0x107   : > { %v940_v57 = vpop.f32.mrb[1].mxu0 }
 0x108   : > { %v941_v58 = vadd.f32 %v940_v57, %v939_v56  ;;  %v942_v59 = vpop.f32.mrb[2].mxu0 }
 0x109   : > { %v943_v60 = vpop.f32.mrb[3].mxu0 }
 0x10a   : > { %v944_v61 = vadd.f32 %v943_v60, %v942_v59  ;;  %v334_v9 = vsel %vm333_vm0, %v941_v58, -inf }
 0x10c   : > { %v335_v13 = vsel %vm333_vm0, %v944_v61, -inf }
 0x10e   : > { %v945_v62 = vpop.f32.mrb[4].mxu0 }
 0x10f   : > { %v946_v63 = vpop.f32.mrb[5].mxu0 }
 0x110   : > { %v947_v0 = vadd.f32 %v946_v63, %v945_v62  ;;  %v948_v1 = vpop.f32.mrb[6].mxu0 }
 0x111   : > { %v949_v2 = vpop.f32.mrb[7].mxu0 }
 0x112   : > { %v950_v3 = vadd.f32 %v949_v2, %v948_v1  ;;  %v336_v22 = vsel %vm333_vm0, %v947_v0, -inf }
 0x114   : > { %v337_v26 = vsel %vm333_vm0, %v950_v3, -inf }
 0x116   : > { %v951_v4 = vpop.f32.mrb[8].mxu0 }
 0x117   : > { %v952_v5 = vpop.f32.mrb[9].mxu0 }
 0x118   : > { %v953_v6 = vadd.f32 %v952_v5, %v951_v4  ;;  %v954_v7 = vpop.f32.mrb[10].mxu0 }
 0x119   : > { %v955_v8 = vpop.f32.mrb[11].mxu0 }
 0x11a   : > { %v338_v10 = vsel %vm333_vm0, %v953_v6, -inf  ;;  %v956_v11 = vadd.f32 %v955_v8, %v954_v7 }
 0x11b   : > { %v339_v12 = vmax.f32 %v334_v9, %v338_v10 }
 0x11c   : > { %v340_v14 = vsel %vm333_vm0, %v956_v11, -inf }
 0x11d   : > { %v341_v15 = vmax.f32 %v335_v13, %v340_v14 }
 0x11e   : > { %v957_v16 = vpop.f32.mrb[12].mxu0 }
 0x11f   : > { %v346_v17 = vmax.f32 %v339_v12, %v341_v15  ;;  %v958_v18 = vpop.f32.mrb[13].mxu0 }
 0x120   : > { %v959_v19 = vadd.f32 %v958_v18, %v957_v16  ;;  %v960_v20 = vpop.f32.mrb[14].mxu0 }
 0x121   : > { %v961_v21 = vpop.f32.mrb[15].mxu0 }
 0x122   : > { %v342_v23 = vsel %vm333_vm0, %v959_v19, -inf  ;;  %v962_v24 = vadd.f32 %v961_v21, %v960_v20 }
 0x123   : > { %v343_v25 = vmax.f32 %v336_v22, %v342_v23 }
 0x124   : > { %v344_v27 = vsel %vm333_vm0, %v962_v24, -inf }
 0x125   : > { %v345_v28 = vmax.f32 %v337_v26, %v344_v27 }
 0x127   : > { %v347_v29 = vmax.f32 %v343_v25, %v345_v28 }
 0x129   : > { %v348_v30 = vmax.f32 %v346_v17, %v347_v29 }
 0x12b   : > { %v349_v31 = vrot.slane %v348_v30, 4 }
 0x12d   : > { %v350_v32 = vmax.f32 %v348_v30, %v349_v31 }
 0x12f   : > { %v351_v33 = vrot.slane %v350_v32, 2 }
 0x131   : > { %v352_v34 = vmax.f32 %v350_v32, %v351_v33 }
 0x133   : > { %v353_v35 = vrot.slane %v352_v34, 1 }
 0x135   : > { %v354_v36 = vmax.f32 %v352_v34, %v353_v35  ;;  %v1051_v35 = vld [vmem:[%s1379_s2 + $0x10] sm:$0xff]  }
 0x136   : > { %995 = vmatprep.mubr.msk.bf16.mxu1 %vm573_vm1, %v1051_v35 }
 0x137   : > { %v361_v37 = vsub.f32 %v959_v19, %v354_v36  ;;  %v362_v38 = vsub.f32 %v962_v24, %v354_v36  ;;  %v355_v39 = vsub.f32 %v941_v58, %v354_v36  ;;  %v356_v40 = vsub.f32 %v944_v61, %v354_v36 }
 0x138   : > { %v357_v41 = vsub.f32 %v947_v0, %v354_v36  ;;  %v358_v42 = vsub.f32 %v950_v3, %v354_v36  ;;  %v359_v43 = vsub.f32 %v953_v6, %v354_v36  ;;  %v360_v44 = vsub.f32 %v956_v11, %v354_v36  ;;  %v1063_v36 = vld [vmem:[%s1379_s2] sm:$0xff]  }
 0x139   : > { %v363_v45 = vmul.f32 1.442695, %v355_v39  ;;  %v365_v46 = vmul.f32 1.442695, %v356_v40  ;;  %v375_v51 = vmul.f32 1.442695, %v361_v37  ;;  %991 = vmatprep.mubr.msk.bf16.mxu0 %vm573_vm1, %v1063_v36 }
 0x13a   : > { %v367_v47 = vmul.f32 1.442695, %v357_v41  ;;  %v369_v48 = vmul.f32 1.442695, %v358_v42  ;;  %v371_v49 = vmul.f32 1.442695, %v359_v43 }
 0x13b   : > { %1067 = vpow2.f32 %v363_v45  ;;  %v373_v50 = vmul.f32 1.442695, %v360_v44  ;;  %v377_v52 = vmul.f32 1.442695, %v362_v38 }
 0x13c   : > { %1069 = vpow2.f32 %v365_v46 }
 0x13d   : > { %1071 = vpow2.f32 %v367_v47 }
 0x13e   : > { %1073 = vpow2.f32 %v369_v48 }
 0x13f   : > { %1075 = vpow2.f32 %v371_v49 }
 0x140   : > { %1077 = vpow2.f32 %v373_v50 }
 0x141   : > { %1079 = vpow2.f32 %v375_v51 }
 0x142   : > { %1081 = vpow2.f32 %v377_v52 }
 0x145   : > { %v1068_v53 = vpop.eup %1067 }
 0x146   : > { %v1070_v54 = vpop.eup %1069  ;;  %v379_v55 = vsel %vm333_vm0, %v1068_v53, 0.0 }
 0x147   : > { %v1072_v56 = vpop.eup %1071  ;;  %v380_v57 = vsel %vm333_vm0, %v1070_v54, 0.0 }
 0x148   : > { %v1074_v58 = vpop.eup %1073  ;;  %v381_v59 = vadd.f32 %v380_v57, %v379_v55  ;;  %v382_v60 = vsel %vm333_vm0, %v1072_v56, 0.0 }
 0x149   : > { %v1076_v61 = vpop.eup %1075  ;;  %v384_v63 = vsel %vm333_vm0, %v1074_v58, 0.0 }
 0x14a   : > { %v383_v62 = vadd.f32 %v382_v60, %v381_v59  ;;  %v1078_v0 = vpop.eup %1077  ;;  %v386_v2 = vsel %vm333_vm0, %v1076_v61, 0.0 }
 0x14b   : > { %v1080_v3 = vpop.eup %1079  ;;  %v388_v5 = vsel %vm333_vm0, %v1078_v0, 0.0 }
 0x14c   : > { %v385_v1 = vadd.f32 %v384_v63, %v383_v62  ;;  %v1082_v6 = vpop.eup %1081  ;;  %v390_v8 = vsel %vm333_vm0, %v1080_v3, 0.0 }
 0x14d   : > { %v392_v10 = vsel %vm333_vm0, %v1082_v6, 0.0 }
 0x14e   : > { %v387_v4 = vadd.f32 %v386_v2, %v385_v1 }
 0x150   : > { %v389_v7 = vadd.f32 %v388_v5, %v387_v4 }
 0x152   : > { %v391_v9 = vadd.f32 %v390_v8, %v389_v7 }
 0x154   : > { %v393_v11 = vadd.f32 %v392_v10, %v391_v9  ;;  %v1052_v9 = vld [vmem:[%s1379_s2 + $0x18] sm:$0xff]   ;;  %v1064_v10 = vld [vmem:[%s1379_s2 + $0x8] sm:$0xff]  }
 0x156   : > { %v394_v12 = vrot.slane %v393_v11, 4 }
 0x158   : > { %v395_v13 = vadd.f32 %v394_v12, %v393_v11  ;;  %v1053_v11 = vld [vmem:[%s1379_s2 + $0x20] sm:$0xff]   ;;  %v1054_v12 = vld [vmem:[%s1379_s2 + $0x28] sm:$0xff]  }
 0x15a   : > { %v396_v14 = vrot.slane %v395_v13, 2 }
 0x15c   : > { %v397_v15 = vadd.f32 %v396_v14, %v395_v13  ;;  %v1055_v13 = vld [vmem:[%s1379_s2 + $0x30] sm:$0xff]   ;;  %v1056_v14 = vld [vmem:[%s1379_s2 + $0x38] sm:$0xff]  }
 0x15e   : > { %v398_v16 = vrot.slane %v397_v15, 1 }
 0x160   : > { %v399_v17 = vadd.f32 %v398_v16, %v397_v15  ;;  %v1057_v15 = vld [vmem:[%s1379_s2 + $0x40] sm:$0xff]   ;;  %v1058_v16 = vld [vmem:[%s1379_s2 + $0x48] sm:$0xff]  }
 0x162   : > { %1083 = vrcp.f32 %v399_v17  ;;  %v1059_v17 = vld [vmem:[%s1379_s2 + $0x50] sm:$0xff]  }
 0x16c   : > { %v1084_v18 = vpop.eup %1083 }
 0x16d   : > { %v403_v19 = vmul.f32 %v1084_v18, %v1072_v56  ;;  %v401_v20 = vmul.f32 %v1084_v18, %v1068_v53  ;;  %v404_v21 = vmul.f32 %v1084_v18, %v1074_v58  ;;  %v402_v22 = vmul.f32 %v1084_v18, %v1070_v54 }
 0x16e   : > { %v1219_v23 = vmul.f32 %v1084_v18, %v1078_v0  ;;  %v405_v24 = vmul.f32 %v1084_v18, %v1076_v61  ;;  %v1221_v25 = vmul.f32 %v1084_v18, %v1082_v6  ;;  %v1223_v26 = vmul.f32 %v1084_v18, %v1080_v3  ;;  %v1060_v18 = vld [vmem:[%s1379_s2 + $0x58] sm:$0xff]  }
 0x16f   : > { %v415_v27 = vsel %vm333_vm0, %v403_v19, 0.0  ;;  %v409_v28 = vsel %vm333_vm0, %v401_v20, 0.0  ;;  %v418_v29 = vsel %vm333_vm0, %v404_v21, 0.0  ;;  %v412_v30 = vsel %vm333_vm0, %v402_v22, 0.0 }
 0x170   : > { %416 = vadd.xlane.f32.xlu1 %v415_v27  ;;  %410 = vadd.xlane.f32.xlu0 %v409_v28  ;;  %v424_v31 = vsel %vm333_vm0, %v1219_v23, 0.0  ;;  %v421_v32 = vsel %vm333_vm0, %v405_v24, 0.0  ;;  %v430_v33 = vsel %vm333_vm0, %v1221_v25, 0.0  ;;  %v427_v34 = vsel %vm333_vm0, %v1223_v26, 0.0 }
 0x174   : > { %419 = vadd.xlane.f32.xlu1 %v418_v29  ;;  %413 = vadd.xlane.f32.xlu0 %v412_v30 }
 0x178   : > { %425 = vadd.xlane.f32.xlu1 %v424_v31  ;;  %422 = vadd.xlane.f32.xlu0 %v421_v32 }
 0x17c   : > { %431 = vadd.xlane.f32.xlu1 %v430_v33  ;;  %428 = vadd.xlane.f32.xlu0 %v427_v34 }
 0x1fd   : > { %v417_v37 = vpop.xlane.xlu1 %416  ;;  %v411_v38 = vpop.xlane.xlu0 %410 }
 0x1fe   : > { %v435_v39 = vadd.f32 1e-09, %v417_v37  ;;  %v433_v40 = vadd.f32 1e-09, %v411_v38 }
 0x200   : > { %1085 = vrcp.f32 %v435_v39 }
 0x201   : > { %v420_v41 = vpop.xlane.xlu1 %419  ;;  %v414_v42 = vpop.xlane.xlu0 %413  ;;  %1087 = vrcp.f32 %v433_v40 }
 0x202   : > { %v436_v43 = vadd.f32 1e-09, %v420_v41  ;;  %v434_v44 = vadd.f32 1e-09, %v414_v42 }
 0x204   : > { %1089 = vrcp.f32 %v436_v43 }
 0x205   : > { %1091 = vrcp.f32 %v434_v44  ;;  %v426_v45 = vpop.xlane.xlu1 %425  ;;  %v423_v46 = vpop.xlane.xlu0 %422 }
 0x206   : > { %v438_v47 = vadd.f32 1e-09, %v426_v45  ;;  %v437_v48 = vadd.f32 1e-09, %v423_v46 }
 0x208   : > { %1093 = vrcp.f32 %v438_v47 }
 0x209   : > { %1095 = vrcp.f32 %v437_v48  ;;  %v432_v49 = vpop.xlane.xlu1 %431  ;;  %v429_v50 = vpop.xlane.xlu0 %428 }
 0x20a   : > { %v440_v51 = vadd.f32 1e-09, %v432_v49  ;;  %v439_v52 = vadd.f32 1e-09, %v429_v50  ;;  %v1086_v53 = vpop.eup %1085 }
 0x20b   : > { %v1088_v54 = vpop.eup %1087  ;;  %v446_v62 = vmul.f32 %v1086_v53, %v403_v19  ;;  %v1061_v19 = vld [vmem:[%s1379_s2 + $0x60] sm:$0xff]  }
 0x20c   : > { %1097 = vrcp.f32 %v440_v51  ;;  %v442_v57 = vmul.f32 %v1088_v54, %v401_v20  ;;  %v1062_v20 = vld [vmem:[%s1379_s2 + $0x68] sm:$0xff]  }
 0x20d   : > { %1099 = vrcp.f32 %v439_v52 }
 0x20e   : > { %v1090_v55 = vpop.eup %1089 }
 0x20f   : > { %v1092_v56 = vpop.eup %1091  ;;  %v448_v59 = vmul.f32 %v1090_v55, %v404_v21  ;;  %v1065_v21 = vld [vmem:[%s1379_s2 + $0x70] sm:$0xff]  }
 0x210   : > { %v444_v58 = vmul.f32 %v1092_v56, %v402_v22  ;;  %v1066_v22 = vld [vmem:[%s1379_s2 + $0x78] sm:$0xff]  }
 0x211   : > { %v490_v0 = vpack.c.bf16 %v448_v59, %v446_v62 }
 0x212   : > { %v1094_v60 = vpop.eup %1093  ;;  %v489_v61 = vpack.c.bf16 %v444_v58, %v442_v57 }
 0x213   : > { %v1096_v63 = vpop.eup %1095  ;;  %v452_v2 = vmul.f32 %v1094_v60, %v1219_v23 }
 0x214   : > { %983 = vmatprep.subr.bf16.mxu0 %v489_v61  ;;  %1023 = vmatprep.subr.bf16.mxu1 %v489_v61  ;;  %v450_v1 = vmul.f32 %v1096_v63, %v405_v24 }
 0x215   : > { %984 = vmatpush3.bf16.msra.mxu0 %v489_v61  ;;  %1027 = vmatpush3.bf16.msra.mxu1 %v489_v61 }
 0x216   : > { %v1098_v3 = vpop.eup %1097  ;;  %985 = vmatprep.subr.bf16.mxu0 %v490_v0  ;;  %1024 = vmatprep.subr.bf16.mxu1 %v490_v0  ;;  %v491_v5 = vpack.c.bf16 %v452_v2, %v450_v1 }
 0x217   : > { %v1100_v4 = vpop.eup %1099  ;;  %v456_v7 = vmul.f32 %v1098_v3, %v1221_v25 }
 0x218   : > { %v454_v6 = vmul.f32 %v1100_v4, %v1223_v26 }
 0x219   : > { %986 = vmatpush3.bf16.msra.mxu0 %v490_v0  ;;  %1028 = vmatpush3.bf16.msra.mxu1 %v490_v0 }
 0x21a   : > { %987 = vmatprep.subr.bf16.mxu0 %v491_v5  ;;  %1025 = vmatprep.subr.bf16.mxu1 %v491_v5  ;;  %v492_v8 = vpack.c.bf16 %v456_v7, %v454_v6 }
 0x21d   : > { %988 = vmatpush3.bf16.msra.mxu0 %v491_v5  ;;  %1029 = vmatpush3.bf16.msra.mxu1 %v491_v5 }
 0x21e   : > { %989 = vmatprep.subr.bf16.mxu0 %v492_v8  ;;  %1026 = vmatprep.subr.bf16.mxu1 %v492_v8 }
 0x221   : > { %990 = vmatpush3.bf16.msra.mxu0 %v492_v8  ;;  %1030 = vmatpush3.bf16.msra.mxu1 %v492_v8 }
 0x224   : > { %996 = vmatmul.mubr.msk.bf16.vlgmr.msra.gmra.mrb[0].mxu1 %vm573_vm1, %v1052_v9  ;;  %992 = vmatmul.mubr.msk.bf16.vlgmr.msra.gmra.mrb[16].mxu0 %vm573_vm1, %v1064_v10 }
 0x225   : > { %999 = vmatprep.mubr.msk.bf16.mxu1 %vm573_vm1, %v1053_v11 }
 0x22c   : > { %1000 = vmatmul.mubr.msk.bf16.gmra.mrb[4].mxu1 %vm573_vm1, %v1054_v12 }
 0x22d   : > { %1003 = vmatprep.mubr.msk.bf16.mxu1 %vm573_vm1, %v1055_v13 }
 0x234   : > { %1004 = vmatmul.mubr.msk.bf16.gmra.mrb[8].mxu1 %vm573_vm1, %v1056_v14 }
 0x235   : > { %1007 = vmatprep.mubr.msk.bf16.mxu1 %vm573_vm1, %v1057_v15 }
 0x23c   : > { %1008 = vmatmul.mubr.msk.bf16.gmra.mrb[12].mxu1 %vm573_vm1, %v1058_v16 }
 0x23d   : > { %1011 = vmatprep.mubr.msk.bf16.mxu1 %vm573_vm1, %v1059_v17 }
 0x244   : > { %1012 = vmatmul.mubr.msk.bf16.gmra.mrb[16].mxu1 %vm573_vm1, %v1060_v18 }
 0x245   : > { %1015 = vmatprep.mubr.msk.bf16.mxu1 %vm573_vm1, %v1061_v19 }
 0x24c   : > { %1016 = vmatmul.mubr.msk.bf16.gmra.mrb[20].mxu1 %vm573_vm1, %v1062_v20 }
 0x24d   : > { %1019 = vmatprep.mubr.msk.bf16.mxu1 %vm573_vm1, %v1065_v21 }
 0x254   : > { %1020 = vmatmul.mubr.msk.bf16.gmra.mrb[24].mxu1 %vm573_vm1, %v1066_v22 }
 0x2f7   : > { %v997_v23 = vpop.f32.mrb[0].mxu1  ;;  %v993_v24 = vpop.f32.mrb[16].mxu0 }
 0x2f8   : > { %789 = vst.msk [vmem:[%s1308_s20 + $0x30] sm:$0xff] %vm333_vm0, %v997_v23  ;;  %v672_v25 = vpop.f32.mrb[1].mxu1  ;;  %785 = vst.msk [vmem:[%s1308_s20 + $0x10] sm:$0xff] %vm333_vm0, %v993_v24  ;;  %v656_v26 = vpop.f32.mrb[17].mxu0 }
 0x2f9   : > { %787 = vst.msk [vmem:[%s1308_s20 + $0x20] sm:$0xff] %vm333_vm0, %v672_v25  ;;  %v998_v27 = vpop.f32.mrb[2].mxu1  ;;  %783 = vst.msk [vmem:[%s1308_s20] sm:$0xff] %vm333_vm0, %v656_v26  ;;  %v994_v28 = vpop.f32.mrb[18].mxu0 }
 0x2fa   : > { %790 = vst.msk [vmem:[%s1308_s20 + $0x38] sm:$0xff] %vm333_vm0, %v998_v27  ;;  %v675_v29 = vpop.f32.mrb[3].mxu1  ;;  %786 = vst.msk [vmem:[%s1308_s20 + $0x18] sm:$0xff] %vm333_vm0, %v994_v28  ;;  %v659_v30 = vpop.f32.mrb[19].mxu0 }
 0x2fb   : > { %788 = vst.msk [vmem:[%s1308_s20 + $0x28] sm:$0xff] %vm333_vm0, %v675_v29  ;;  %784 = vst.msk [vmem:[%s1308_s20 + $0x8] sm:$0xff] %vm333_vm0, %v659_v30 }
 0x2ff   : > { %v1001_v31 = vpop.f32.mrb[4].mxu1 }
 0x300   : > { %793 = vst.msk [vmem:[%s1308_s20 + $0x50] sm:$0xff] %vm333_vm0, %v1001_v31  ;;  %v688_v32 = vpop.f32.mrb[5].mxu1 }
 0x301   : > { %791 = vst.msk [vmem:[%s1308_s20 + $0x40] sm:$0xff] %vm333_vm0, %v688_v32  ;;  %v1002_v33 = vpop.f32.mrb[6].mxu1 }
 0x302   : > { %794 = vst.msk [vmem:[%s1308_s20 + $0x58] sm:$0xff] %vm333_vm0, %v1002_v33  ;;  %v691_v34 = vpop.f32.mrb[7].mxu1 }
 0x303   : > { %792 = vst.msk [vmem:[%s1308_s20 + $0x48] sm:$0xff] %vm333_vm0, %v691_v34 }
 0x307   : > { %v1005_v35 = vpop.f32.mrb[8].mxu1 }
 0x308   : > { %797 = vst.msk [vmem:[%s1308_s20 + $0x70] sm:$0xff] %vm333_vm0, %v1005_v35  ;;  %v704_v36 = vpop.f32.mrb[9].mxu1 }
 0x309   : > { %795 = vst.msk [vmem:[%s1308_s20 + $0x60] sm:$0xff] %vm333_vm0, %v704_v36  ;;  %v1006_v37 = vpop.f32.mrb[10].mxu1 }
 0x30a   : > { %798 = vst.msk [vmem:[%s1308_s20 + $0x78] sm:$0xff] %vm333_vm0, %v1006_v37  ;;  %v707_v38 = vpop.f32.mrb[11].mxu1 }
 0x30b   : > { %796 = vst.msk [vmem:[%s1308_s20 + $0x68] sm:$0xff] %vm333_vm0, %v707_v38 }
 0x30f   : > { %v1009_v39 = vpop.f32.mrb[12].mxu1 }
 0x310   : > { %801 = vst.msk [vmem:[%s1308_s20 + $0x90] sm:$0xff] %vm333_vm0, %v1009_v39  ;;  %v720_v40 = vpop.f32.mrb[13].mxu1 }
 0x311   : > { %799 = vst.msk [vmem:[%s1308_s20 + $0x80] sm:$0xff] %vm333_vm0, %v720_v40  ;;  %v1010_v41 = vpop.f32.mrb[14].mxu1 }
 0x312   : > { %802 = vst.msk [vmem:[%s1308_s20 + $0x98] sm:$0xff] %vm333_vm0, %v1010_v41  ;;  %v723_v42 = vpop.f32.mrb[15].mxu1 }
 0x313   : > { %800 = vst.msk [vmem:[%s1308_s20 + $0x88] sm:$0xff] %vm333_vm0, %v723_v42 }
 0x317   : > { %v1013_v43 = vpop.f32.mrb[16].mxu1 }
 0x318   : > { %805 = vst.msk [vmem:[%s1308_s20 + $0xb0] sm:$0xff] %vm333_vm0, %v1013_v43  ;;  %v736_v44 = vpop.f32.mrb[17].mxu1 }
 0x319   : > { %803 = vst.msk [vmem:[%s1308_s20 + $0xa0] sm:$0xff] %vm333_vm0, %v736_v44  ;;  %v1014_v45 = vpop.f32.mrb[18].mxu1 }
 0x31a   : > { %806 = vst.msk [vmem:[%s1308_s20 + $0xb8] sm:$0xff] %vm333_vm0, %v1014_v45  ;;  %v739_v46 = vpop.f32.mrb[19].mxu1 }
 0x31b   : > { %804 = vst.msk [vmem:[%s1308_s20 + $0xa8] sm:$0xff] %vm333_vm0, %v739_v46 }
 0x31f   : > { %v1017_v47 = vpop.f32.mrb[20].mxu1 }
 0x320   : > { %809 = vst.msk [vmem:[%s1308_s20 + $0xd0] sm:$0xff] %vm333_vm0, %v1017_v47  ;;  %v752_v48 = vpop.f32.mrb[21].mxu1 }
 0x321   : > { %807 = vst.msk [vmem:[%s1308_s20 + $0xc0] sm:$0xff] %vm333_vm0, %v752_v48  ;;  %v1018_v49 = vpop.f32.mrb[22].mxu1 }
 0x322   : > { %810 = vst.msk [vmem:[%s1308_s20 + $0xd8] sm:$0xff] %vm333_vm0, %v1018_v49  ;;  %v755_v50 = vpop.f32.mrb[23].mxu1 }
 0x323   : > { %808 = vst.msk [vmem:[%s1308_s20 + $0xc8] sm:$0xff] %vm333_vm0, %v755_v50 }
 0x327   : > { %v1021_v51 = vpop.f32.mrb[24].mxu1 }
 0x328   : > { %813 = vst.msk [vmem:[%s1308_s20 + $0xf0] sm:$0xff] %vm333_vm0, %v1021_v51  ;;  %v768_v52 = vpop.f32.mrb[25].mxu1 }
 0x329   : > { %811 = vst.msk [vmem:[%s1308_s20 + $0xe0] sm:$0xff] %vm333_vm0, %v768_v52  ;;  %v1022_v53 = vpop.f32.mrb[26].mxu1 }
 0x32a   : > { %814 = vst.msk [vmem:[%s1308_s20 + $0xf8] sm:$0xff] %vm333_vm0, %v1022_v53  ;;  %v771_v54 = vpop.f32.mrb[27].mxu1 }
 0x32b   : > { %812 = vst.msk [vmem:[%s1308_s20 + $0xe8] sm:$0xff] %vm333_vm0, %v771_v54 }
 0x32c PF: > { %s13_s12 = sadd.s32 1, %s1107_s12  }
 0x32d   : > { %p10_p4 = scmp.ge.s32.totalorder %s13_s12, 4  }
 0x32f   :  { %12 = sbr.rel (!%p10_p4) target bundleno = 1 (0x1), region = 62 }

// kernel: model_forward.11
= control target key start
LH: loop header
LB: loop body
LE: loop exit
PB: predicated region body
PF: predicated region fallthrough
CT: control target
= control target key end

     0   :  { %s5995_s24 = smov 0   ;;  %s5997_s25 = smov 0   ;;  %s7978_s0 = inlined_call_operand.vmem [shape: f32[2,8,67,4], index: 0, kind: input, shape index: {}]   ;;  %s7979_s1 = inlined_call_operand.vmem [shape: bf16[64,67], index: 1, kind: input, shape index: {}]   ;;  %s7980_s2 = inlined_call_operand.vmem [shape: f32[64,1], index: 2, kind: input, shape index: {}]   ;;  %s7981_s3 = inlined_call_operand.vmem [shape: bf16[128,64], index: 3, kind: input, shape index: {}]   ;;  %s7982_s4 = inlined_call_operand.vmem [shape: f32[128,1], index: 4, kind: input, shape index: {}]   ;;  %s7983_s5 = inlined_call_operand.vmem [shape: bf16[256,128], index: 5, kind: input, shape index: {}]   ;;  %s7984_s6 = inlined_call_operand.vmem [shape: f32[256,1], index: 6, kind: input, shape index: {}]   ;;  %s7985_s7 = inlined_call_operand.vmem [shape: f32[2,256,4], index: 7, kind: output, shape index: {}]  }
   0x1   :  { %s5999_s26 = smov 0  }
   0x2 LB: > { %s29_s27 = sadd.s32 1, %s5947_s25  ;;  %p4516_p0 = scmp.ge.s32.totalorder %s5951_s26, 1  ;;  %s5951_s26 = sphi %s5999_s26, %s17_s26   ;;  %s5947_s25 = sphi %s5997_s25, %s8417_s25   ;;  %s5943_s24 = sphi %s5995_s24, %s8416_s24  }
   0x3   : > { %p31_p1 = scmp.ge.s32.totalorder %s29_s27, 2  ;;  %p256_p2 = scmp.lt.s32.totalorder %s5951_s26, 3 }
   0x5   : > { %s8419_s27 = smov (%p31_p1, %s29_s27), 0  ;;  %p257_p3 = pnand %p4516_p0, %p256_p2 }
   0x7   : > { %260 = sbr.rel (%p257_p3) target bundleno = 2493 (0x9bd), region = 48 }
   0xe   : > { %v328_v0 = vld [vmem:[%s7980_s2] sm:$0xff]  ;;  %v330_v1 = vld [vmem:[%s7980_s2 + $0x10] sm:$0xff]  ;;  %p294_p4 = scmp.lt.s32.totalorder %s5943_s24, 1  ;;  %v5953_v2 = vmov 0   ;;  %v329_v3 = vld [vmem:[%s7980_s2 + $0x8] sm:$0xff]  ;;  %vm401_vm0 = vcmask 547840  }
   0xf   : > { %5817 = vset.pattern.permute.xlu0 %v5953_v2  ;;  %5818 = vset.pattern.permute.xlu1 %v5953_v2  ;;  %v331_v4 = vld [vmem:[%s7980_s2 + $0x18] sm:$0xff]  ;;  %v6031_v5 = vld [vmem:[%s7979_s1] sm:$0xff]   ;;  %v333_v12 = vld [vmem:[%s7980_s2 + $0x28] sm:$0xff]  ;;  %vm414_vm1 = vcmask 1040384   ;;  %vm415_vm2 = vcmask 1041408   ;;  %v5954_v22 = vmov 65535  }
  0x10   : > { %343 = vperm.xlu0 %5817, %v328_v0   ;;  %353 = vperm.xlu1 %5818, %v330_v1   ;;  %s8421_s24 = smov (!%p294_p4, %s5943_s24), 1  ;;  %v332_v6 = vld [vmem:[%s7980_s2 + $0x20] sm:$0xff]  ;;  %v334_v16 = vld [vmem:[%s7980_s2 + $0x30] sm:$0xff]  ;;  %v335_v17 = vld [vmem:[%s7980_s2 + $0x38] sm:$0xff]  ;;  %v416_v23 = vsel %vm414_vm1, 4294967295, %v5954_v22  ;;  %vm650_vm3 = vcmask 523264  }
  0x11   : > { %s5790_s13 = smul.u32 576, %s8421_s24  ;;  %5080 = vmatprep.mubr.msk.bf16.mxu0 %vm401_vm0, %v6031_v5  ;;  %v510_v24 = vld [vmem:[%s7982_s4] sm:$0xff]  ;;  %v511_v26 = vld [vmem:[%s7982_s4 + $0x8] sm:$0xff]  ;;  %v6067_v28 = vsel %vm415_vm2, %v416_v23, 0  ;;  %v512_v29 = vld [vmem:[%s7982_s4 + $0x10] sm:$0xff]  ;;  %s4709_s12 = sshll.u32 %s8421_s24, 8 }
  0x12   : > { %8137 = vst [vmem:[#allocation2_spill] sm:$0xff] %v6067_v28  ;;  %v513_v31 = vld [vmem:[%s7982_s4 + $0x18] sm:$0xff]  ;;  %v514_v34 = vld [vmem:[%s7982_s4 + $0x20] sm:$0xff]  ;;  %v515_v36 = vld [vmem:[%s7982_s4 + $0x28] sm:$0xff]  ;;  %s7778_s14 = scalar_lea.vmem %s7985_s7, %s4709_s12  ;;  %vm4396_vm4 = vcmask 31744  }
  0x13   : > { %s6036_s18 = scalar_lea.vmem %s7978_s0, %s5790_s13  ;;  %v6089_v39 = vld [vmem:[%s7979_s1 + $0x8] sm:$0xff]   ;;  %v516_v40 = vld [vmem:[%s7982_s4 + $0x30] sm:$0xff]  ;;  %v517_v41 = vld [vmem:[%s7982_s4 + $0x38] sm:$0xff] }
  0x14   : > { %348 = vperm.xlu0 %5817, %v329_v3   ;;  %358 = vperm.xlu1 %5818, %v331_v4   ;;  %v311_v7 = vld [vmem:[%s6036_s18] sm:$0xff]  ;;  %v312_v8 = vld [vmem:[%s6036_s18 + $0x8] sm:$0xff]  ;;  %v313_v9 = vld [vmem:[%s6036_s18 + $0x10] sm:$0xff] }
  0x15   : > { %v336_v10 = vpack.c.bf16 %v312_v8, %v311_v7  ;;  %v314_v11 = vld [vmem:[%s6036_s18 + $0x18] sm:$0xff]  ;;  %v315_v14 = vld [vmem:[%s6036_s18 + $0x20] sm:$0xff]  ;;  %v316_v15 = vld [vmem:[%s6036_s18 + $0x28] sm:$0xff] }
  0x16   : > { %v337_v13 = vpack.c.bf16 %v314_v11, %v313_v9  ;;  %v317_v18 = vld [vmem:[%s6036_s18 + $0x30] sm:$0xff]  ;;  %v338_v19 = vpack.c.bf16 %v316_v15, %v315_v14  ;;  %v318_v20 = vld [vmem:[%s6036_s18 + $0x38] sm:$0xff]  ;;  %v319_v21 = vld [vmem:[%s6036_s18 + $0x40] sm:$0x7] }
  0x17   : > { %5070 = vmatprep.subr.bf16.mxu0 %v336_v10  ;;  %v339_v25 = vpack.c.bf16 %v318_v20, %v317_v18  ;;  %v340_v27 = vpack.c.bf16 %v319_v21, %v319_v21  ;;  %v4560_v32 = vld [vmem:[%s6036_s18 + $0x48] sm:$0xff]  ;;  %v4561_v33 = vld [vmem:[%s6036_s18 + $0x50] sm:$0xff]  ;;  %v4562_v37 = vld [vmem:[%s6036_s18 + $0x58] sm:$0xff] }
  0x18   : > { %363 = vperm.xlu0 %5817, %v332_v6   ;;  %5071 = vmatpush3.bf16.msra.mxu0 %v336_v10  ;;  %v1319_v35 = vpack.c.bf16 %v4561_v33, %v4560_v32  ;;  %v4563_v38 = vld [vmem:[%s6036_s18 + $0x60] sm:$0xff]  ;;  %v6100_v42 = vld [vmem:[%s7979_s1 + $0x10] sm:$0xff]   ;;  %v4564_v44 = vld [vmem:[%s6036_s18 + $0x68] sm:$0xff] }
  0x19   : > { %368 = vperm.xlu1 %5818, %v333_v12   ;;  %5072 = vmatprep.subr.bf16.mxu0 %v337_v13  ;;  %v419_v30 = vand.u32 %v6067_v28, %v340_v27  ;;  %v1320_v43 = vpack.c.bf16 %v4563_v38, %v4562_v37  ;;  %v4565_v45 = vld [vmem:[%s6036_s18 + $0x70] sm:$0xff]  ;;  %v518_v46 = vld [vmem:[%s7982_s4 + $0x40] sm:$0xff]  ;;  %v519_v47 = vld [vmem:[%s7982_s4 + $0x48] sm:$0xff] }
  0x1a   : > { %v4566_v48 = vld [vmem:[%s6036_s18 + $0x78] sm:$0xff]  ;;  %v4567_v49 = vld [vmem:[%s6036_s18 + $0x80] sm:$0xff]  ;;  %v4568_v50 = vld [vmem:[%s6036_s18 + $0x88] sm:$0x7]  ;;  %v1321_v52 = vpack.c.bf16 %v4565_v45, %v4564_v44 }
  0x1b   : > { %v6120_v51 = vld [vmem:[%s7979_s1 + $0x18] sm:$0xff]   ;;  %v520_v53 = vld [vmem:[%s7982_s4 + $0x50] sm:$0xff]  ;;  %v1322_v55 = vpack.c.bf16 %v4567_v49, %v4566_v48  ;;  %v1323_v56 = vpack.c.bf16 %v4568_v50, %v4568_v50  ;;  %v522_v57 = vld [vmem:[%s7982_s4 + $0x60] sm:$0xff] }
  0x1c   : > { %373 = vperm.xlu0 %5817, %v334_v16   ;;  %5073 = vmatpush3.bf16.msra.mxu0 %v337_v13  ;;  %v521_v54 = vld [vmem:[%s7982_s4 + $0x58] sm:$0xff]  ;;  %v523_v58 = vld [vmem:[%s7982_s4 + $0x68] sm:$0xff]  ;;  %v524_v60 = vld [vmem:[%s7982_s4 + $0x70] sm:$0xff] }
  0x1d   : > { %378 = vperm.xlu1 %5818, %v335_v17   ;;  %5074 = vmatprep.subr.bf16.mxu0 %v338_v19  ;;  %v1325_v59 = vand.u32 %v1323_v56, %v6067_v28  ;;  %v525_v61 = vld [vmem:[%s7982_s4 + $0x78] sm:$0xff]  ;;  %v820_v62 = vld [vmem:[%s7984_s6] sm:$0xff]  ;;  %v821_v63 = vld [vmem:[%s7984_s6 + $0x8] sm:$0xff] }
  0x1e   : > { %v822_v0 = vld [vmem:[%s7984_s6 + $0x10] sm:$0xff]  ;;  %v823_v1 = vld [vmem:[%s7984_s6 + $0x18] sm:$0xff]  ;;  %v824_v2 = vld [vmem:[%s7984_s6 + $0x20] sm:$0xff] }
  0x1f   : > { %v825_v3 = vld [vmem:[%s7984_s6 + $0x28] sm:$0xff]  ;;  %v826_v4 = vld [vmem:[%s7984_s6 + $0x30] sm:$0xff]  ;;  %v828_v6 = vld [vmem:[%s7984_s6 + $0x40] sm:$0xff] }
  0x20   : > { %532 = vperm.xlu0 %5817, %v510_v24   ;;  %5075 = vmatpush3.bf16.msra.mxu0 %v338_v19  ;;  %v829_v7 = vld [vmem:[%s7984_s6 + $0x48] sm:$0xff]  ;;  %v830_v8 = vld [vmem:[%s7984_s6 + $0x50] sm:$0xff]  ;;  %v831_v9 = vld [vmem:[%s7984_s6 + $0x58] sm:$0xff] }
  0x21   : > { %537 = vperm.xlu1 %5818, %v511_v26   ;;  %5076 = vmatprep.subr.bf16.mxu0 %v339_v25  ;;  %v832_v10 = vld [vmem:[%s7984_s6 + $0x60] sm:$0xff]  ;;  %v833_v11 = vld [vmem:[%s7984_s6 + $0x68] sm:$0xff]  ;;  %v834_v12 = vld [vmem:[%s7984_s6 + $0x70] sm:$0xff] }
  0x22   : > { %v835_v13 = vld [vmem:[%s7984_s6 + $0x78] sm:$0xff]  ;;  %v836_v14 = vld [vmem:[%s7984_s6 + $0x80] sm:$0xff]  ;;  %v837_v15 = vld [vmem:[%s7984_s6 + $0x88] sm:$0xff] }
  0x23   : > { %v838_v16 = vld [vmem:[%s7984_s6 + $0x90] sm:$0xff]  ;;  %v839_v17 = vld [vmem:[%s7984_s6 + $0x98] sm:$0xff]  ;;  %v840_v18 = vld [vmem:[%s7984_s6 + $0xa0] sm:$0xff] }
  0x24   : > { %542 = vperm.xlu0 %5817, %v512_v29   ;;  %5077 = vmatpush3.bf16.msra.mxu0 %v339_v25  ;;  %v841_v19 = vld [vmem:[%s7984_s6 + $0xa8] sm:$0xff]  ;;  %v842_v20 = vld [vmem:[%s7984_s6 + $0xb0] sm:$0xff]  ;;  %v843_v21 = vld [vmem:[%s7984_s6 + $0xb8] sm:$0xff] }
  0x25   : > { %547 = vperm.xlu1 %5818, %v513_v31   ;;  %5078 = vmatprep.subr.bf16.mxu0 %v419_v30  ;;  %v844_v22 = vld [vmem:[%s7984_s6 + $0xc0] sm:$0xff]  ;;  %v845_v23 = vld [vmem:[%s7984_s6 + $0xc8] sm:$0xff]  ;;  %v846_v24 = vld [vmem:[%s7984_s6 + $0xd0] sm:$0xff] }
  0x26   : > { %v847_v25 = vld [vmem:[%s7984_s6 + $0xd8] sm:$0xff]  ;;  %v848_v26 = vld [vmem:[%s7984_s6 + $0xe0] sm:$0xff]  ;;  %v849_v27 = vld [vmem:[%s7984_s6 + $0xe8] sm:$0xff] }
  0x27   : > { %v850_v29 = vld [vmem:[%s7984_s6 + $0xf0] sm:$0xff]  ;;  %v6250_v31 = vld [vmem:[%s7981_s3] sm:$0xff]  }
  0x28   : > { %552 = vperm.xlu0 %5817, %v514_v34   ;;  %5079 = vmatpush3.bf16.msra.mxu0 %v419_v30  ;;  %v851_v30 = vld [vmem:[%s7984_s6 + $0xf8] sm:$0xff] }
  0x29   : > { %557 = vperm.xlu1 %5818, %v515_v36   ;;  %5160 = vmatprep.subr.bf16.mxu0 %v1319_v35 }
  0x2a   : > { %5096 = vmatprep.mubr.msk.bf16.mxu1 %vm650_vm3, %v6250_v31 }
  0x2b   : > { %5081 = vmatmul.mubr.msk.bf16.vlgmr.msra.gmra.mrb[0].mxu0 %vm401_vm0, %v6089_v39 }
  0x2c   : > { %562 = vperm.xlu0 %5817, %v516_v40   ;;  %5161 = vmatpush3.bf16.msra.mxu0 %v1319_v35 }
  0x2d   : > { %567 = vperm.xlu1 %5818, %v517_v41   ;;  %5162 = vmatprep.subr.bf16.mxu0 %v1320_v43 }
  0x2e   : > { %5084 = vmatprep.mubr.msk.bf16.mxu0 %vm401_vm0, %v6100_v42 }
  0x30   : > { %572 = vperm.xlu0 %5817, %v518_v46   ;;  %5163 = vmatpush3.bf16.msra.mxu0 %v1320_v43 }
  0x31   : > { %577 = vperm.xlu1 %5818, %v519_v47   ;;  %5164 = vmatprep.subr.bf16.mxu0 %v1321_v52 }
  0x33   : > { %5085 = vmatmul.mubr.msk.bf16.gmra.mrb[4].mxu0 %vm401_vm0, %v6120_v51 }
  0x34   : > { %582 = vperm.xlu0 %5817, %v520_v53   ;;  %5165 = vmatpush3.bf16.msra.mxu0 %v1321_v52 }
  0x35   : > { %587 = vperm.xlu1 %5818, %v521_v54   ;;  %5166 = vmatprep.subr.bf16.mxu0 %v1322_v55 }
  0x36   : > { %5170 = vmatprep.mubr.msk.bf16.mxu0 %vm401_vm0, %v6031_v5  ;;  %v827_v5 = vld [vmem:[%s7984_s6 + $0x38] sm:$0xff] }
  0x38   : > { %592 = vperm.xlu0 %5817, %v522_v57   ;;  %5167 = vmatpush3.bf16.msra.mxu0 %v1322_v55 }
  0x39   : > { %597 = vperm.xlu1 %5818, %v523_v58   ;;  %5168 = vmatprep.subr.bf16.mxu0 %v1325_v59 }
  0x3c   : > { %602 = vperm.xlu0 %5817, %v524_v60   ;;  %5169 = vmatpush3.bf16.msra.mxu0 %v1325_v59 }
  0x3d   : > { %607 = vperm.xlu1 %5818, %v525_v61  }
  0x3f   : > { %5171 = vmatmul.mubr.msk.bf16.vlgmr.msra.gmra.mrb[8].mxu0 %vm401_vm0, %v6089_v39 }
  0x40   : > { %862 = vperm.xlu0 %5817, %v820_v62   ;;  %5174 = vmatprep.mubr.msk.bf16.mxu0 %vm401_vm0, %v6100_v42 }
  0x41   : > { %867 = vperm.xlu1 %5818, %v821_v63  }
  0x44   : > { %872 = vperm.xlu0 %5817, %v822_v0  }
  0x45   : > { %877 = vperm.xlu1 %5818, %v823_v1  }
  0x47   : > { %5175 = vmatmul.mubr.msk.bf16.gmra.mrb[12].mxu0 %vm401_vm0, %v6120_v51 }
  0x48   : > { %882 = vperm.xlu0 %5817, %v824_v2   ;;  %5186 = vmatprep.mubr.msk.bf16.mxu0 %vm650_vm3, %v6250_v31 }
  0x49   : > { %887 = vperm.xlu1 %5818, %v825_v3  }
  0x4c   : > { %892 = vperm.xlu0 %5817, %v826_v4  }
  0x4d   : > { %897 = vperm.xlu1 %5818, %v827_v5  }
  0x50   : > { %902 = vperm.xlu0 %5817, %v828_v6  }
  0x51   : > { %907 = vperm.xlu1 %5818, %v829_v7  }
  0x54   : > { %912 = vperm.xlu0 %5817, %v830_v8  }
  0x55   : > { %917 = vperm.xlu1 %5818, %v831_v9  }
  0x58   : > { %922 = vperm.xlu0 %5817, %v832_v10  }
  0x59   : > { %927 = vperm.xlu1 %5818, %v833_v11  }
  0x5c   : > { %932 = vperm.xlu0 %5817, %v834_v12   ;;  %v5824_v12 = vld [vmem:[%s7981_s3 + $0x8] sm:$0xff]  }
  0x5d   : > { %937 = vperm.xlu1 %5818, %v835_v13  }
  0x60   : > { %942 = vperm.xlu0 %5817, %v836_v14  }
  0x61   : > { %947 = vperm.xlu1 %5818, %v837_v15   ;;  %v5825_v15 = vld [vmem:[%s7981_s3 + $0x10] sm:$0xff]  }
  0x64   : > { %952 = vperm.xlu0 %5817, %v838_v16  }
  0x65   : > { %957 = vperm.xlu1 %5818, %v839_v17  }
  0x68   : > { %962 = vperm.xlu0 %5817, %v840_v18  }
  0x69   : > { %967 = vperm.xlu1 %5818, %v841_v19  }
  0x6c   : > { %972 = vperm.xlu0 %5817, %v842_v20  }
  0x6d   : > { %977 = vperm.xlu1 %5818, %v843_v21  }
  0x70   : > { %982 = vperm.xlu0 %5817, %v844_v22  }
  0x71   : > { %987 = vperm.xlu1 %5818, %v845_v23  }
  0x74   : > { %992 = vperm.xlu0 %5817, %v846_v24  }
  0x75   : > { %997 = vperm.xlu1 %5818, %v847_v25  }
  0x78   : > { %1002 = vperm.xlu0 %5817, %v848_v26  }
  0x79   : > { %1007 = vperm.xlu1 %5818, %v849_v27  }
  0x7c   : > { %1012 = vperm.xlu0 %5817, %v850_v29   ;;  %v5826_v29 = vld [vmem:[%s7981_s3 + $0x18] sm:$0xff]  }
  0x7d   : > { %1017 = vperm.xlu1 %5818, %v851_v30  }
  0x8f   : > { %v6256_v32 = vpop.permute.xlu0 %343  ;;  %v6258_v33 = vpop.permute.xlu1 %353 }
  0x90   : > { %8138 = vst [vmem:[#allocation3_spill] sm:$0xff] %v6256_v32  ;;  %8139 = vst [vmem:[#allocation4_spill] sm:$0xff] %v6258_v33 }
  0x93   : > { %v6260_v34 = vpop.permute.xlu0 %348  ;;  %v6262_v35 = vpop.permute.xlu1 %358 }
  0x94   : > { %8140 = vst [vmem:[#allocation5_spill] sm:$0xff] %v6260_v34  ;;  %8141 = vst [vmem:[#allocation6_spill] sm:$0xff] %v6262_v35 }
  0x97   : > { %v6265_v40 = vpop.permute.xlu0 %363 }
  0x98   : > { %8142 = vst [vmem:[#allocation7_spill] sm:$0xff] %v6265_v40  ;;  %v6269_v46 = vpop.permute.xlu1 %368 }
  0x99   : > { %8143 = vst [vmem:[#allocation8_spill] sm:$0xff] %v6269_v46 }
  0x9b   : > { %v6272_v54 = vpop.permute.xlu0 %373 }
  0x9c   : > { %8144 = vst [vmem:[#allocation9_spill] sm:$0xff] %v6272_v54  ;;  %v6275_v59 = vpop.permute.xlu1 %378 }
  0x9d   : > { %8145 = vst [vmem:[#allocation10_spill] sm:$0xff] %v6275_v59 }
  0xfe   : > { %v5082_v36 = vpop.f32.mrb[0].mxu0 }
  0xff   : > { %v464_v37 = vadd.f32 %v5082_v36, %v6258_v33  ;;  %v455_v38 = vpop.f32.mrb[1].mxu0 }
 0x100   : > { %v456_v41 = vadd.f32 %v455_v38, %v6256_v32  ;;  %v5083_v43 = vpop.f32.mrb[2].mxu0 }
 0x101   : > { %v467_v44 = vadd.f32 %v5083_v43, %v6262_v35  ;;  %v458_v45 = vpop.f32.mrb[3].mxu0  ;;  %v488_v48 = vmax.f32 %v464_v37, 0.0  ;;  %v5827_v37 = vld [vmem:[%s7981_s3 + $0x20] sm:$0xff]  }
 0x102   : > { %v459_v47 = vadd.f32 %v458_v45, %v6260_v34  ;;  %v486_v50 = vmax.f32 %v456_v41, 0.0 }
 0x103   : > { %v489_v49 = vmax.f32 %v467_v44, 0.0 }
 0x104   : > { %v487_v52 = vmax.f32 %v459_v47, 0.0 }
 0x105   : > { %v527_v53 = vpack.c.bf16 %v489_v49, %v488_v48  ;;  %v5828_v49 = vld [vmem:[%s7981_s3 + $0x28] sm:$0xff]  }
 0x106   : > { %v5086_v55 = vpop.f32.mrb[4].mxu0  ;;  %v526_v56 = vpack.c.bf16 %v487_v52, %v486_v50  ;;  %v5829_v50 = vld [vmem:[%s7981_s3 + $0x30] sm:$0xff]   ;;  %v5830_v52 = vld [vmem:[%s7981_s3 + $0x38] sm:$0xff]  }
 0x107   : > { %v480_v57 = vadd.f32 %v5086_v55, %v6272_v54  ;;  %v471_v58 = vpop.f32.mrb[5].mxu0  ;;  %v6326_v55 = vpop.permute.xlu0 %532 }
 0x108   : > { %v472_v60 = vadd.f32 %v471_v58, %v6265_v40  ;;  %v5087_v61 = vpop.f32.mrb[6].mxu0  ;;  %5088 = vmatprep.subr.bf16.mxu1 %v526_v56  ;;  %8146 = vst [vmem:[#allocation11_spill] sm:$0xff] %v6326_v55 }
 0x109   : > { %v483_v62 = vadd.f32 %v5087_v61, %v6275_v59  ;;  %v474_v63 = vpop.f32.mrb[7].mxu0  ;;  %5089 = vmatpush3.bf16.msra.mxu1 %v526_v56  ;;  %v492_v1 = vmax.f32 %v480_v57, 0.0  ;;  %v6328_v56 = vpop.permute.xlu1 %537 }
 0x10a   : > { %v475_v0 = vadd.f32 %v474_v63, %v6269_v46  ;;  %5090 = vmatprep.subr.bf16.mxu1 %v527_v53  ;;  %v490_v3 = vmax.f32 %v472_v60, 0.0  ;;  %8147 = vst [vmem:[#allocation12_spill] sm:$0xff] %v6328_v56 }
 0x10b   : > { %v493_v2 = vmax.f32 %v483_v62, 0.0  ;;  %v6330_v57 = vpop.permute.xlu0 %542 }
 0x10c   : > { %v491_v4 = vmax.f32 %v475_v0, 0.0  ;;  %8148 = vst [vmem:[#allocation13_spill] sm:$0xff] %v6330_v57 }
 0x10d   : > { %v529_v5 = vpack.c.bf16 %v493_v2, %v492_v1  ;;  %5091 = vmatpush3.bf16.msra.mxu1 %v527_v53  ;;  %v5831_v53 = vld [vmem:[%s7983_s5] sm:$0xff]   ;;  %v6332_v58 = vpop.permute.xlu1 %547 }
 0x10e   : > { %v528_v6 = vpack.c.bf16 %v491_v4, %v490_v3  ;;  %8149 = vst [vmem:[#allocation14_spill] sm:$0xff] %v6332_v58 }
 0x10f   : > { %v6334_v60 = vpop.permute.xlu0 %552 }
 0x110   : > { %5092 = vmatprep.subr.bf16.mxu1 %v528_v6  ;;  %8150 = vst [vmem:[#allocation15_spill] sm:$0xff] %v6334_v60 }
 0x111   : > { %5093 = vmatpush3.bf16.msra.mxu1 %v528_v6  ;;  %v6336_v61 = vpop.permute.xlu1 %557 }
 0x112   : > { %5094 = vmatprep.subr.bf16.mxu1 %v529_v5  ;;  %v5172_v7 = vpop.f32.mrb[8].mxu0  ;;  %8151 = vst [vmem:[#allocation16_spill] sm:$0xff] %v6336_v61 }
 0x113   : > { %v1370_v8 = vadd.f32 %v5172_v7, %v6258_v33  ;;  %v1361_v9 = vpop.f32.mrb[9].mxu0  ;;  %v6338_v62 = vpop.permute.xlu0 %562 }
 0x114   : > { %v1362_v10 = vadd.f32 %v1361_v9, %v6256_v32  ;;  %v5173_v11 = vpop.f32.mrb[10].mxu0  ;;  %8152 = vst [vmem:[#allocation17_spill] sm:$0xff] %v6338_v62 }
 0x115   : > { %v1373_v13 = vadd.f32 %v5173_v11, %v6262_v35  ;;  %5095 = vmatpush3.bf16.msra.mxu1 %v529_v5  ;;  %v1364_v14 = vpop.f32.mrb[11].mxu0  ;;  %v1394_v17 = vmax.f32 %v1370_v8, 0.0  ;;  %v6341_v2 = vpop.permute.xlu1 %567 }
 0x116   : > { %v1365_v16 = vadd.f32 %v1364_v14, %v6260_v34  ;;  %v1392_v19 = vmax.f32 %v1362_v10, 0.0  ;;  %8153 = vst [vmem:[#allocation18_spill] sm:$0xff] %v6341_v2 }
 0x117   : > { %v1395_v18 = vmax.f32 %v1373_v13, 0.0  ;;  %v6346_v10 = vpop.permute.xlu0 %572 }
 0x118   : > { %v1393_v20 = vmax.f32 %v1365_v16, 0.0  ;;  %5097 = vmatmul.mubr.msk.bf16.vlgmr.msra.gmra.mrb[0].mxu1 %vm650_vm3, %v5824_v12  ;;  %8154 = vst [vmem:[#allocation19_spill] sm:$0xff] %v6346_v10 }
 0x119   : > { %v1401_v21 = vpack.c.bf16 %v1395_v18, %v1394_v17  ;;  %5100 = vmatprep.mubr.msk.bf16.mxu1 %vm650_vm3, %v5825_v15  ;;  %v6348_v14 = vpop.permute.xlu1 %577 }
 0x11a   : > { %v1400_v22 = vpack.c.bf16 %v1393_v20, %v1392_v19  ;;  %v5176_v23 = vpop.f32.mrb[12].mxu0  ;;  %8155 = vst [vmem:[#allocation20_spill] sm:$0xff] %v6348_v14 }
 0x11b   : > { %v1386_v24 = vadd.f32 %v5176_v23, %v6272_v54  ;;  %v1377_v25 = vpop.f32.mrb[13].mxu0  ;;  %v6353_v23 = vpop.permute.xlu0 %582 }
 0x11c   : > { %v1378_v26 = vadd.f32 %v1377_v25, %v6265_v40  ;;  %v5177_v27 = vpop.f32.mrb[14].mxu0  ;;  %5178 = vmatprep.subr.bf16.mxu0 %v1400_v22  ;;  %8156 = vst [vmem:[#allocation21_spill] sm:$0xff] %v6353_v23 }
 0x11d   : > { %v1389_v30 = vadd.f32 %v5177_v27, %v6275_v59  ;;  %v1380_v36 = vpop.f32.mrb[15].mxu0  ;;  %5179 = vmatpush3.bf16.msra.mxu0 %v1400_v22  ;;  %v1398_v41 = vmax.f32 %v1386_v24, 0.0  ;;  %v6356_v27 = vpop.permute.xlu1 %587 }
 0x11e   : > { %v1381_v38 = vadd.f32 %v1380_v36, %v6269_v46  ;;  %5180 = vmatprep.subr.bf16.mxu0 %v1401_v21  ;;  %v1396_v44 = vmax.f32 %v1378_v26, 0.0  ;;  %8157 = vst [vmem:[#allocation22_spill] sm:$0xff] %v6356_v27 }
 0x11f   : > { %v1399_v43 = vmax.f32 %v1389_v30, 0.0 }
 0x120   : > { %v1397_v45 = vmax.f32 %v1381_v38, 0.0  ;;  %5101 = vmatmul.mubr.msk.bf16.gmra.mrb[4].mxu1 %vm650_vm3, %v5826_v29 }
 0x121   : > { %v1403_v47 = vpack.c.bf16 %v1399_v43, %v1398_v41  ;;  %5181 = vmatpush3.bf16.msra.mxu0 %v1401_v21  ;;  %5104 = vmatprep.mubr.msk.bf16.mxu1 %vm650_vm3, %v5827_v37 }
 0x122   : > { %v1402_v48 = vpack.c.bf16 %v1397_v45, %v1396_v44  ;;  %v6359_v44 = vpop.permute.xlu0 %592 }
 0x123   : > { %8158 = vst [vmem:[#allocation23_spill] sm:$0xff] %v6359_v44 }
 0x124   : > { %5182 = vmatprep.subr.bf16.mxu0 %v1402_v48 }
 0x125   : > { %5183 = vmatpush3.bf16.msra.mxu0 %v1402_v48 }
 0x126   : > { %5184 = vmatprep.subr.bf16.mxu0 %v1403_v47 }
 0x128   : > { %5105 = vmatmul.mubr.msk.bf16.gmra.mrb[8].mxu1 %vm650_vm3, %v5828_v49 }
 0x129   : > { %5185 = vmatpush3.bf16.msra.mxu0 %v1403_v47  ;;  %5108 = vmatprep.mubr.msk.bf16.mxu1 %vm650_vm3, %v5829_v50 }
 0x12c   : > { %5187 = vmatmul.mubr.msk.bf16.vlgmr.msra.gmra.mrb[16].mxu0 %vm650_vm3, %v5824_v12 }
 0x12d   : > { %5190 = vmatprep.mubr.msk.bf16.mxu0 %vm650_vm3, %v5825_v15 }
 0x130   : > { %5109 = vmatmul.mubr.msk.bf16.gmra.mrb[12].mxu1 %vm650_vm3, %v5830_v52 }
 0x131   : > { %5128 = vmatprep.mubr.bf16.mxu1 %v5831_v53 }
 0x134   : > { %5191 = vmatmul.mubr.msk.bf16.gmra.mrb[20].mxu0 %vm650_vm3, %v5826_v29 }
 0x135   : > { %5194 = vmatprep.mubr.msk.bf16.mxu0 %vm650_vm3, %v5827_v37 }
 0x13c   : > { %5195 = vmatmul.mubr.msk.bf16.gmra.mrb[24].mxu0 %vm650_vm3, %v5828_v49 }
 0x13d   : > { %5198 = vmatprep.mubr.msk.bf16.mxu0 %vm650_vm3, %v5829_v50  ;;  %v6363_v50 = vpop.permute.xlu1 %597 }
 0x13e   : > { %8159 = vst [vmem:[#allocation24_spill] sm:$0xff] %v6363_v50 }
 0x144   : > { %5199 = vmatmul.mubr.msk.bf16.gmra.mrb[28].mxu0 %vm650_vm3, %v5830_v52 }
 0x145   : > { %5218 = vmatprep.mubr.bf16.mxu0 %v5831_v53 }
 0x1eb   : > { %v5098_v63 = vpop.f32.mrb[0].mxu1 }
 0x1ec   : > { %v718_v0 = vadd.f32 %v5098_v63, %v6330_v57  ;;  %v709_v1 = vpop.f32.mrb[1].mxu1 }
 0x1ed   : > { %v710_v3 = vadd.f32 %v709_v1, %v6326_v55  ;;  %v5099_v4 = vpop.f32.mrb[2].mxu1 }
 0x1ee   : > { %v721_v5 = vadd.f32 %v5099_v4, %v6332_v58  ;;  %v712_v6 = vpop.f32.mrb[3].mxu1  ;;  %v774_v8 = vmax.f32 %v718_v0, 0.0 }
 0x1ef   : > { %v713_v7 = vadd.f32 %v712_v6, %v6328_v56  ;;  %v772_v11 = vmax.f32 %v710_v3, 0.0 }
 0x1f0   : > { %v775_v9 = vmax.f32 %v721_v5, 0.0 }
 0x1f1   : > { %v773_v12 = vmax.f32 %v713_v7, 0.0 }
 0x1f2   : > { %v853_v13 = vpack.c.bf16 %v775_v9, %v774_v8 }
 0x1f3   : > { %v852_v15 = vpack.c.bf16 %v773_v12, %v772_v11  ;;  %v5102_v16 = vpop.f32.mrb[4].mxu1  ;;  %v6369_v12 = vpop.permute.xlu0 %602 }
 0x1f4   : > { %v734_v17 = vadd.f32 %v5102_v16, %v6338_v62  ;;  %v725_v18 = vpop.f32.mrb[5].mxu1  ;;  %8160 = vst [vmem:[#allocation25_spill] sm:$0xff] %v6369_v12 }
 0x1f5   : > { %v726_v19 = vadd.f32 %v725_v18, %v6334_v60  ;;  %v5103_v20 = vpop.f32.mrb[6].mxu1  ;;  %5112 = vmatprep.subr.bf16.mxu1 %v852_v15 }
 0x1f6   : > { %v737_v21 = vadd.f32 %v5103_v20, %v6341_v2  ;;  %v728_v22 = vpop.f32.mrb[7].mxu1  ;;  %5113 = vmatpush3.bf16.msra.mxu1 %v852_v15  ;;  %v778_v25 = vmax.f32 %v734_v17, 0.0 }
 0x1f7   : > { %v729_v24 = vadd.f32 %v728_v22, %v6336_v61  ;;  %5114 = vmatprep.subr.bf16.mxu1 %v853_v13  ;;  %v776_v29 = vmax.f32 %v726_v19, 0.0 }
 0x1f8   : > { %v779_v26 = vmax.f32 %v737_v21, 0.0  ;;  %v6373_v21 = vpop.permute.xlu1 %607 }
 0x1f9   : > { %v777_v30 = vmax.f32 %v729_v24, 0.0  ;;  %8161 = vst [vmem:[#allocation26_spill] sm:$0xff] %v6373_v21 }
 0x1fa   : > { %v855_v36 = vpack.c.bf16 %v779_v26, %v778_v25  ;;  %5115 = vmatpush3.bf16.msra.mxu1 %v853_v13 }
 0x1fb   : > { %v854_v37 = vpack.c.bf16 %v777_v30, %v776_v29  ;;  %v5106_v38 = vpop.f32.mrb[8].mxu1 }
 0x1fc   : > { %v750_v41 = vadd.f32 %v5106_v38, %v6353_v23  ;;  %v741_v43 = vpop.f32.mrb[9].mxu1 }
 0x1fd   : > { %v742_v45 = vadd.f32 %v741_v43, %v6346_v10  ;;  %v5107_v47 = vpop.f32.mrb[10].mxu1  ;;  %5116 = vmatprep.subr.bf16.mxu1 %v854_v37 }
 0x1fe   : > { %v753_v48 = vadd.f32 %v5107_v47, %v6356_v27  ;;  %v744_v49 = vpop.f32.mrb[11].mxu1  ;;  %5117 = vmatpush3.bf16.msra.mxu1 %v854_v37  ;;  %v782_v63 = vmax.f32 %v750_v41, 0.0 }
 0x1ff   : > { %v745_v52 = vadd.f32 %v744_v49, %v6348_v14  ;;  %5118 = vmatprep.subr.bf16.mxu1 %v855_v36  ;;  %v5188_v53 = vpop.f32.mrb[16].mxu0  ;;  %v780_v4 = vmax.f32 %v742_v45, 0.0 }
 0x200   : > { %v783_v0 = vmax.f32 %v753_v48, 0.0  ;;  %v1447_v1 = vadd.f32 %v5188_v53, %v6330_v57  ;;  %v1438_v3 = vpop.f32.mrb[17].mxu0 }
 0x201   : > { %v781_v5 = vmax.f32 %v745_v52, 0.0  ;;  %v1439_v6 = vadd.f32 %v1438_v3, %v6326_v55  ;;  %v5189_v7 = vpop.f32.mrb[18].mxu0 }
 0x202   : > { %v857_v8 = vpack.c.bf16 %v783_v0, %v782_v63  ;;  %v1450_v9 = vadd.f32 %v5189_v7, %v6332_v58  ;;  %5119 = vmatpush3.bf16.msra.mxu1 %v855_v36  ;;  %v1441_v11 = vpop.f32.mrb[19].mxu0  ;;  %v1503_v17 = vmax.f32 %v1447_v1, 0.0 }
 0x203   : > { %v856_v13 = vpack.c.bf16 %v781_v5, %v780_v4  ;;  %v1442_v15 = vadd.f32 %v1441_v11, %v6328_v56  ;;  %v5110_v16 = vpop.f32.mrb[12].mxu1  ;;  %v1501_v22 = vmax.f32 %v1439_v6, 0.0  ;;  %v4582_v11 = vld [vmem:[%s6036_s18 + $0x98] sm:$0xff] }
 0x204   : > { %v1504_v18 = vmax.f32 %v1450_v9, 0.0  ;;  %v766_v19 = vadd.f32 %v5110_v16, %v6369_v12  ;;  %v757_v20 = vpop.f32.mrb[13].mxu1  ;;  %v4581_v9 = vld [vmem:[%s6036_s18 + $0x90] sm:$0xff] }
 0x205   : > { %v1502_v24 = vmax.f32 %v1442_v15, 0.0  ;;  %v758_v25 = vadd.f32 %v757_v20, %v6359_v44  ;;  %v5111_v26 = vpop.f32.mrb[14].mxu1  ;;  %5120 = vmatprep.subr.bf16.mxu1 %v856_v13 }
 0x206   : > { %v1518_v29 = vpack.c.bf16 %v1504_v18, %v1503_v17  ;;  %v769_v30 = vadd.f32 %v5111_v26, %v6373_v21  ;;  %v760_v36 = vpop.f32.mrb[15].mxu1  ;;  %5121 = vmatpush3.bf16.msra.mxu1 %v856_v13  ;;  %v786_v43 = vmax.f32 %v766_v19, 0.0  ;;  %v1760_v18 = vpack.c.bf16 %v4582_v11, %v4581_v9  ;;  %v4583_v26 = vld [vmem:[%s6036_s18 + $0xa0] sm:$0xff]  ;;  %v4588_v11 = vld [vmem:[%s6036_s18 + $0xc8] sm:$0xff] }
 0x207   : > { %v1517_v37 = vpack.c.bf16 %v1502_v24, %v1501_v22  ;;  %v761_v38 = vadd.f32 %v760_v36, %v6363_v50  ;;  %5122 = vmatprep.subr.bf16.mxu1 %v857_v8  ;;  %v5192_v41 = vpop.f32.mrb[20].mxu0  ;;  %v784_v49 = vmax.f32 %v758_v25, 0.0  ;;  %v6389_v25 = vld [vmem:[%s7983_s5 + $0x8] sm:$0xff]   ;;  %v4587_v9 = vld [vmem:[%s6036_s18 + $0xc0] sm:$0xff] }
 0x208   : > { %v787_v45 = vmax.f32 %v769_v30, 0.0  ;;  %v1463_v47 = vadd.f32 %v5192_v41, %v6338_v62  ;;  %v1454_v48 = vpop.f32.mrb[21].mxu0  ;;  %v4584_v30 = vld [vmem:[%s6036_s18 + $0xa8] sm:$0xff] }
 0x209   : > { %v785_v52 = vmax.f32 %v761_v38, 0.0  ;;  %v1455_v53 = vadd.f32 %v1454_v48, %v6334_v60  ;;  %v5193_v63 = vpop.f32.mrb[22].mxu0  ;;  %5202 = vmatprep.subr.bf16.mxu0 %v1517_v37 }
 0x20a   : > { %v859_v0 = vpack.c.bf16 %v787_v45, %v786_v43  ;;  %v1466_v1 = vadd.f32 %v5193_v63, %v6341_v2  ;;  %5123 = vmatpush3.bf16.msra.mxu1 %v857_v8  ;;  %v1457_v3 = vpop.f32.mrb[23].mxu0  ;;  %5203 = vmatpush3.bf16.msra.mxu0 %v1517_v37  ;;  %v1507_v6 = vmax.f32 %v1463_v47, 0.0  ;;  %v6397_v37 = vld [vmem:[%s7983_s5 + $0x10] sm:$0xff]   ;;  %v1761_v45 = vpack.c.bf16 %v4584_v30, %v4583_v26 }
 0x20b   : > { %v858_v4 = vpack.c.bf16 %v785_v52, %v784_v49  ;;  %v1458_v5 = vadd.f32 %v1457_v3, %v6336_v61  ;;  %5204 = vmatprep.subr.bf16.mxu0 %v1518_v29  ;;  %v1505_v13 = vmax.f32 %v1455_v53, 0.0  ;;  %v4585_v49 = vld [vmem:[%s6036_s18 + $0xb0] sm:$0xff]  ;;  %v4586_v52 = vld [vmem:[%s6036_s18 + $0xb8] sm:$0xff] }
 0x20c   : > { %v1508_v7 = vmax.f32 %v1466_v1, 0.0 }
 0x20d   : > { %v1506_v15 = vmax.f32 %v1458_v5, 0.0  ;;  %5124 = vmatprep.subr.bf16.mxu1 %v858_v4  ;;  %v1762_v5 = vpack.c.bf16 %v4586_v52, %v4585_v49  ;;  %v5839_v49 = vld [vmem:[%s7983_s5 + $0x40] sm:$0xff]   ;;  %v5840_v52 = vld [vmem:[%s7983_s5 + $0x48] sm:$0xff]  }
 0x20e   : > { %v1520_v16 = vpack.c.bf16 %v1508_v7, %v1507_v6  ;;  %5125 = vmatpush3.bf16.msra.mxu1 %v858_v4  ;;  %5205 = vmatpush3.bf16.msra.mxu0 %v1518_v29  ;;  %v5834_v4 = vld [vmem:[%s7983_s5 + $0x18] sm:$0xff]  }
 0x20f   : > { %v1519_v17 = vpack.c.bf16 %v1506_v15, %v1505_v13  ;;  %5126 = vmatprep.subr.bf16.mxu1 %v859_v0  ;;  %v5196_v8 = vpop.f32.mrb[24].mxu0  ;;  %v4589_v13 = vld [vmem:[%s6036_s18 + $0xd0] sm:$0x7] }
 0x210   : > { %v1479_v19 = vadd.f32 %v5196_v8, %v6353_v23  ;;  %v1470_v20 = vpop.f32.mrb[25].mxu0 }
 0x211   : > { %v1471_v22 = vadd.f32 %v1470_v20, %v6346_v10  ;;  %v5197_v24 = vpop.f32.mrb[26].mxu0  ;;  %5206 = vmatprep.subr.bf16.mxu0 %v1519_v17  ;;  %v1763_v20 = vpack.c.bf16 %v4588_v11, %v4587_v9  ;;  %v4607_v9 = vld [vmem:[%s6036_s18 + $0x100] sm:$0xff] }
 0x212   : > { %v1482_v29 = vadd.f32 %v5197_v24, %v6356_v27  ;;  %5127 = vmatpush3.bf16.msra.mxu1 %v859_v0  ;;  %v1473_v36 = vpop.f32.mrb[27].mxu0  ;;  %5207 = vmatpush3.bf16.msra.mxu0 %v1519_v17  ;;  %v1511_v41 = vmax.f32 %v1479_v19, 0.0  ;;  %v5835_v17 = vld [vmem:[%s7983_s5 + $0x20] sm:$0xff]  }
 0x213   : > { %v1474_v38 = vadd.f32 %v1473_v36, %v6348_v14  ;;  %5208 = vmatprep.subr.bf16.mxu0 %v1520_v16  ;;  %5250 = vmatprep.subr.bf16.mxu1 %v1760_v18  ;;  %v1509_v47 = vmax.f32 %v1471_v22, 0.0  ;;  %v1764_v22 = vpack.c.bf16 %v4589_v13, %v4589_v13  ;;  %v4608_v13 = vld [vmem:[%s6036_s18 + $0x108] sm:$0xff] }
 0x214   : > { %v1512_v43 = vmax.f32 %v1482_v29, 0.0 }
 0x215   : > { %v1510_v48 = vmax.f32 %v1474_v38, 0.0  ;;  %5129 = vmatmul.mubr.bf16.vlgmr.msra.gmra.mrb[16].mxu1 %v6389_v25  ;;  %v1766_v36 = vand.u32 %v1764_v22, %v6067_v28  ;;  %v5836_v38 = vld [vmem:[%s7983_s5 + $0x28] sm:$0xff]  }
 0x216   : > { %v1522_v53 = vpack.c.bf16 %v1512_v43, %v1511_v41  ;;  %5209 = vmatpush3.bf16.msra.mxu0 %v1520_v16  ;;  %5132 = vmatprep.mubr.bf16.mxu1 %v6397_v37  ;;  %v4602_v41 = vld [vmem:[%s6036_s18 + $0xd8] sm:$0xff]  ;;  %v4603_v43 = vld [vmem:[%s6036_s18 + $0xe0] sm:$0xff] }
 0x217   : > { %v1521_v63 = vpack.c.bf16 %v1510_v48, %v1509_v47  ;;  %v5200_v0 = vpop.f32.mrb[28].mxu0  ;;  %5251 = vmatpush3.bf16.msra.mxu1 %v1760_v18  ;;  %v2201_v47 = vpack.c.bf16 %v4603_v43, %v4602_v41  ;;  %v5838_v48 = vld [vmem:[%s7983_s5 + $0x38] sm:$0xff]  }
 0x218   : > { %v1495_v1 = vadd.f32 %v5200_v0, %v6369_v12  ;;  %v1486_v3 = vpop.f32.mrb[29].mxu0  ;;  %5252 = vmatprep.subr.bf16.mxu1 %v1761_v45  ;;  %v5845_v0 = vld [vmem:[%s7983_s5 + $0x70] sm:$0xff]  }
 0x219   : > { %v1487_v6 = vadd.f32 %v1486_v3, %v6359_v44  ;;  %v5201_v7 = vpop.f32.mrb[30].mxu0  ;;  %5210 = vmatprep.subr.bf16.mxu0 %v1521_v63  ;;  %v5847_v3 = vld [vmem:[%s7979_s1] sm:$0xff]  }
 0x21a   : > { %v1498_v15 = vadd.f32 %v5201_v7, %v6373_v21  ;;  %v1489_v16 = vpop.f32.mrb[31].mxu0  ;;  %5211 = vmatpush3.bf16.msra.mxu0 %v1521_v63  ;;  %v1515_v18 = vmax.f32 %v1495_v1, 0.0  ;;  %v5844_v63 = vld [vmem:[%s7983_s5 + $0x68] sm:$0xff]   ;;  %v5846_v1 = vld [vmem:[%s7983_s5 + $0x78] sm:$0xff]  }
 0x21b   : > { %v1490_v8 = vadd.f32 %v1489_v16, %v6363_v50  ;;  %5212 = vmatprep.subr.bf16.mxu0 %v1522_v53  ;;  %5253 = vmatpush3.bf16.msra.mxu1 %v1761_v45  ;;  %v1513_v24 = vmax.f32 %v1487_v6, 0.0  ;;  %v5837_v45 = vld [vmem:[%s7983_s5 + $0x30] sm:$0xff]   ;;  %v4606_v7 = vld [vmem:[%s6036_s18 + $0xf8] sm:$0xff] }
 0x21c   : > { %v1516_v19 = vmax.f32 %v1498_v15, 0.0  ;;  %5254 = vmatprep.subr.bf16.mxu1 %v1762_v5  ;;  %v2203_v11 = vpack.c.bf16 %v4607_v9, %v4606_v7  ;;  %v4609_v15 = vld [vmem:[%s6036_s18 + $0x110] sm:$0xff]  ;;  %v4610_v16 = vld [vmem:[%s6036_s18 + $0x118] sm:$0x7] }
 0x21d   : > { %v1514_v26 = vmax.f32 %v1490_v8, 0.0  ;;  %5133 = vmatmul.mubr.bf16.gmra.mrb[20].mxu1 %v5834_v4  ;;  %v2205_v8 = vpack.c.bf16 %v4610_v16, %v4610_v16 }
 0x21e   : > { %v1524_v30 = vpack.c.bf16 %v1516_v19, %v1515_v18  ;;  %5213 = vmatpush3.bf16.msra.mxu0 %v1522_v53  ;;  %5136 = vmatprep.mubr.bf16.mxu1 %v5835_v17  ;;  %v5843_v53 = vld [vmem:[%s7983_s5 + $0x60] sm:$0xff]   ;;  %v5849_v18 = vld [vmem:[%s7979_s1 + $0x10] sm:$0xff]   ;;  %v6488_v19 = vpop.permute.xlu0 %862 }
 0x21f   : > { %v1523_v29 = vpack.c.bf16 %v1514_v26, %v1513_v24  ;;  %5255 = vmatpush3.bf16.msra.mxu1 %v1762_v5  ;;  %v4605_v5 = vld [vmem:[%s6036_s18 + $0xf0] sm:$0xff]  ;;  %8162 = vst [vmem:[#allocation27_spill] sm:$0xff] %v6488_v19 }
 0x220   : > { %5256 = vmatprep.subr.bf16.mxu1 %v1763_v20 }
 0x221   : > { %5214 = vmatprep.subr.bf16.mxu0 %v1523_v29 }
 0x222   : > { %5215 = vmatpush3.bf16.msra.mxu0 %v1523_v29  ;;  %v6492_v22 = vpop.permute.xlu0 %872 }
 0x223   : > { %5216 = vmatprep.subr.bf16.mxu0 %v1524_v30  ;;  %5257 = vmatpush3.bf16.msra.mxu1 %v1763_v20  ;;  %v6490_v20 = vpop.permute.xlu1 %867  ;;  %8164 = vst [vmem:[#allocation29_spill] sm:$0xff] %v6492_v22 }
 0x224   : > { %5258 = vmatprep.subr.bf16.mxu1 %v1766_v36  ;;  %8163 = vst [vmem:[#allocation28_spill] sm:$0xff] %v6490_v20 }
 0x225   : > { %5137 = vmatmul.mubr.bf16.gmra.mrb[24].mxu1 %v5836_v38 }
 0x226   : > { %5217 = vmatpush3.bf16.msra.mxu0 %v1524_v30  ;;  %5140 = vmatprep.mubr.bf16.mxu1 %v5837_v45  ;;  %v6496_v26 = vpop.permute.xlu0 %882 }
 0x227   : > { %5259 = vmatpush3.bf16.msra.mxu1 %v1766_v36  ;;  %v6494_v24 = vpop.permute.xlu1 %877  ;;  %8166 = vst [vmem:[#allocation31_spill] sm:$0xff] %v6496_v26 }
 0x228   : > { %5340 = vmatprep.subr.bf16.mxu1 %v2201_v47  ;;  %8165 = vst [vmem:[#allocation30_spill] sm:$0xff] %v6494_v24 }
 0x229   : > { %5219 = vmatmul.mubr.bf16.vlgmr.msra.gmra.mrb[32].mxu0 %v6389_v25  ;;  %v5841_v25 = vld [vmem:[%s7983_s5 + $0x50] sm:$0xff]  }
 0x22a   : > { %5222 = vmatprep.mubr.bf16.mxu0 %v6397_v37  ;;  %v5842_v37 = vld [vmem:[%s7983_s5 + $0x58] sm:$0xff]  }
 0x22b   : > { %v6498_v30 = vpop.permute.xlu1 %887 }
 0x22c   : > { %8167 = vst [vmem:[#allocation32_spill] sm:$0xff] %v6498_v30 }
 0x22d   : > { %5141 = vmatmul.mubr.bf16.gmra.mrb[28].mxu1 %v5838_v48 }
 0x22e   : > { %5144 = vmatprep.mubr.bf16.mxu1 %v5839_v49 }
 0x22f   : > { %v6502_v43 = vpop.permute.xlu1 %897 }
 0x230   : > { %8169 = vst [vmem:[#allocation34_spill] sm:$0xff] %v6502_v43 }
 0x231   : > { %5223 = vmatmul.mubr.bf16.gmra.mrb[36].mxu0 %v5834_v4  ;;  %v4604_v4 = vld [vmem:[%s6036_s18 + $0xe8] sm:$0xff] }
 0x232   : > { %5226 = vmatprep.mubr.bf16.mxu0 %v5835_v17  ;;  %v2202_v6 = vpack.c.bf16 %v4605_v5, %v4604_v4  ;;  %v2204_v17 = vpack.c.bf16 %v4609_v15, %v4608_v13 }
 0x235   : > { %5145 = vmatmul.mubr.bf16.gmra.mrb[32].mxu1 %v5840_v52 }
 0x236   : > { %5148 = vmatprep.mubr.bf16.mxu1 %v5841_v25 }
 0x239   : > { %5227 = vmatmul.mubr.bf16.gmra.mrb[40].mxu0 %v5836_v38  ;;  %v6500_v38 = vpop.permute.xlu0 %892 }
 0x23a   : > { %5230 = vmatprep.mubr.bf16.mxu0 %v5837_v45  ;;  %8168 = vst [vmem:[#allocation33_spill] sm:$0xff] %v6500_v38 }
 0x23d   : > { %5149 = vmatmul.mubr.bf16.gmra.mrb[36].mxu1 %v5842_v37 }
 0x23e   : > { %5152 = vmatprep.mubr.bf16.mxu1 %v5843_v53 }
 0x241   : > { %5231 = vmatmul.mubr.bf16.gmra.mrb[44].mxu0 %v5838_v48  ;;  %v6506_v48 = vpop.permute.xlu1 %907 }
 0x242   : > { %5234 = vmatprep.mubr.bf16.mxu0 %v5839_v49  ;;  %8171 = vst [vmem:[#allocation36_spill] sm:$0xff] %v6506_v48 }
 0x245   : > { %5153 = vmatmul.mubr.bf16.gmra.mrb[40].mxu1 %v5844_v63 }
 0x246   : > { %5156 = vmatprep.mubr.bf16.mxu1 %v5845_v0 }
 0x249   : > { %5235 = vmatmul.mubr.bf16.gmra.mrb[48].mxu0 %v5840_v52 }
 0x24a   : > { %5238 = vmatprep.mubr.bf16.mxu0 %v5841_v25 }
 0x24d   : > { %5157 = vmatmul.mubr.bf16.gmra.mrb[44].mxu1 %v5846_v1 }
 0x24e   : > { %5260 = vmatprep.mubr.msk.bf16.mxu1 %vm401_vm0, %v5847_v3 }
 0x251   : > { %5239 = vmatmul.mubr.bf16.gmra.mrb[52].mxu0 %v5842_v37  ;;  %v6510_v37 = vpop.permute.xlu1 %917 }
 0x252   : > { %5242 = vmatprep.mubr.bf16.mxu0 %v5843_v53  ;;  %8173 = vst [vmem:[#allocation38_spill] sm:$0xff] %v6510_v37 }
 0x255   : > { %5261 = vmatmul.mubr.msk.bf16.vlgmr.msra.gmra.mrb[48].mxu1 %vm401_vm0, %v6089_v39  ;;  %v2207_v39 = vand.u32 %v2205_v8, %v6067_v28  ;;  %v6526_v13 = vpop.permute.xlu1 %927 }
 0x256   : > { %5341 = vmatpush3.bf16.msra.mxu1 %v2201_v47  ;;  %5264 = vmatprep.mubr.msk.bf16.mxu1 %vm401_vm0, %v6100_v42  ;;  %v5848_v42 = vld [vmem:[%s7979_s1 + $0x8] sm:$0xff]   ;;  %8175 = vst [vmem:[#allocation40_spill] sm:$0xff] %v6526_v13 }
 0x257   : > { %5342 = vmatprep.subr.bf16.mxu1 %v2202_v6 }
 0x259   : > { %5243 = vmatmul.mubr.bf16.gmra.mrb[56].mxu0 %v5844_v63 }
 0x25a   : > { %5343 = vmatpush3.bf16.msra.mxu1 %v2202_v6  ;;  %5246 = vmatprep.mubr.bf16.mxu0 %v5845_v0 }
 0x25b   : > { %5344 = vmatprep.subr.bf16.mxu1 %v2203_v11 }
 0x25d   : > { %5265 = vmatmul.mubr.msk.bf16.gmra.mrb[52].mxu1 %vm401_vm0, %v6120_v51 }
 0x25e   : > { %5345 = vmatpush3.bf16.msra.mxu1 %v2203_v11  ;;  %5350 = vmatprep.mubr.msk.bf16.mxu1 %vm401_vm0, %v5847_v3 }
 0x25f   : > { %5346 = vmatprep.subr.bf16.mxu1 %v2204_v17 }
 0x261   : > { %5247 = vmatmul.mubr.bf16.gmra.mrb[60].mxu0 %v5846_v1 }
 0x262   : > { %5347 = vmatpush3.bf16.msra.mxu1 %v2204_v17  ;;  %5276 = vmatprep.mubr.msk.bf16.mxu0 %vm650_vm3, %v6250_v31 }
 0x263   : > { %5348 = vmatprep.subr.bf16.mxu1 %v2207_v39 }
 0x266   : > { %5349 = vmatpush3.bf16.msra.mxu1 %v2207_v39 }
 0x269   : > { %5351 = vmatmul.mubr.msk.bf16.vlgmr.msra.gmra.mrb[56].mxu1 %vm401_vm0, %v5848_v42 }
 0x26a   : > { %5354 = vmatprep.mubr.msk.bf16.mxu1 %vm401_vm0, %v5849_v18 }
 0x271   : > { %5355 = vmatmul.mubr.msk.bf16.gmra.mrb[60].mxu1 %vm401_vm0, %v6120_v51 }
 0x272   : > { %5366 = vmatprep.mubr.msk.bf16.mxu1 %vm650_vm3, %v6250_v31  ;;  %v6504_v31 = vpop.permute.xlu0 %902 }
 0x273   : > { %8170 = vst [vmem:[#allocation35_spill] sm:$0xff] %v6504_v31 }
 0x276   : > { %v6508_v25 = vpop.permute.xlu0 %912 }
 0x277   : > { %8172 = vst [vmem:[#allocation37_spill] sm:$0xff] %v6508_v25 }
 0x27a   : > { %v6521_v4 = vpop.permute.xlu0 %922 }
 0x27b   : > { %8174 = vst [vmem:[#allocation39_spill] sm:$0xff] %v6521_v4 }
 0x2e8   : > { %v5130_v29 = vpop.f32.mrb[16].mxu1 }
 0x2e9   : > { %v1150_v36 = vpop.f32.mrb[17].mxu1  ;;  %v1159_v1 = vadd.f32 %v5130_v29, %v6492_v22 }
 0x2ea   : > { %v5131_v51 = vpop.f32.mrb[18].mxu1  ;;  %v1151_v5 = vadd.f32 %v1150_v36, %v6488_v19 }
 0x2eb   : > { %v1153_v41 = vpop.f32.mrb[19].mxu1  ;;  %v1162_v7 = vadd.f32 %v5131_v51, %v6494_v24  ;;  %v1279_v8 = vmax.f32 %v1159_v1, 0.0 }
 0x2ec   : > { %v1154_v15 = vadd.f32 %v1153_v41, %v6490_v20  ;;  %v1277_v29 = vmax.f32 %v1151_v5, 0.0  ;;  %v6538_v41 = vpop.permute.xlu0 %932 }
 0x2ed   : > { %8177 = vst [vmem:[#allocation42_spill] sm:$0xff] %v6538_v41 }
 0x2f0   : > { %v5134_v45 = vpop.f32.mrb[20].mxu1 }
 0x2f1   : > { %v1166_v47 = vpop.f32.mrb[21].mxu1  ;;  %v1175_v5 = vadd.f32 %v5134_v45, %v6500_v38 }
 0x2f2   : > { %v5135_v49 = vpop.f32.mrb[22].mxu1 }
 0x2f3   : > { %v1169_v52 = vpop.f32.mrb[23].mxu1 }
 0x2f8   : > { %v6512_v53 = vpop.f32.mrb[24].mxu1 }
 0x2f9   : > { %v6514_v63 = vpop.f32.mrb[25].mxu1 }
 0x2fa   : > { %v6516_v0 = vpop.f32.mrb[26].mxu1 }
 0x2fb   : > { %v6519_v3 = vpop.f32.mrb[27].mxu1 }
 0x2fc   : > { %v5220_v6 = vpop.f32.mrb[32].mxu0 }
 0x2fd   : > { %v1568_v9 = vadd.f32 %v5220_v6, %v6492_v22  ;;  %v1559_v11 = vpop.f32.mrb[33].mxu0  ;;  %v1280_v6 = vmax.f32 %v1162_v7, 0.0  ;;  %v6549_v7 = vpop.permute.xlu1 %937 }
 0x2fe   : > { %v1560_v16 = vadd.f32 %v1559_v11, %v6488_v19  ;;  %v5221_v17 = vpop.f32.mrb[34].mxu0  ;;  %v1278_v11 = vmax.f32 %v1154_v15, 0.0  ;;  %v1178_v15 = vadd.f32 %v5135_v49, %v6502_v43 }
 0x2ff   : > { %v1688_v39 = vmax.f32 %v1568_v9, 0.0  ;;  %v1571_v42 = vadd.f32 %v5221_v17, %v6494_v24  ;;  %v1562_v18 = vpop.f32.mrb[35].mxu0 }
 0x300   : > { %v1686_v36 = vmax.f32 %v1560_v16, 0.0  ;;  %v1563_v28 = vadd.f32 %v1562_v18, %v6490_v20  ;;  %v6532_v51 = vpop.f32.mrb[28].mxu1  ;;  %v6559_v20 = vpop.permute.xlu0 %942 }
 0x301   : > { %v6534_v22 = vmax.f32 %v1279_v8, %v1688_v39  ;;  %v1689_v50 = vmax.f32 %v1571_v42, 0.0  ;;  %v6536_v21 = vpop.f32.mrb[29].mxu1  ;;  %v1167_v8 = vadd.f32 %v1166_v47, %v6496_v26  ;;  %8181 = vst [vmem:[#allocation46_spill] sm:$0xff] %v6559_v20 }
 0x302   : > { %v6540_v1 = vmax.f32 %v1277_v29, %v1686_v36  ;;  %v1687_v9 = vmax.f32 %v1563_v28, 0.0  ;;  %v6542_v17 = vpop.f32.mrb[30].mxu1  ;;  %v1170_v36 = vadd.f32 %v1169_v52, %v6498_v30 }
 0x303   : > { %8176 = vst [vmem:[#allocation41_spill] sm:$0xff] %v6534_v22  ;;  %v6545_v16 = vmax.f32 %v1280_v6, %v1689_v50  ;;  %v6547_v18 = vpop.f32.mrb[31].mxu1  ;;  %v1283_v6 = vmax.f32 %v1175_v5, 0.0  ;;  %v1281_v47 = vmax.f32 %v1167_v8, 0.0  ;;  %v1191_v8 = vadd.f32 %v6512_v53, %v6508_v25 }
 0x304   : > { %8178 = vst [vmem:[#allocation43_spill] sm:$0xff] %v6540_v1  ;;  %v6552_v39 = vmax.f32 %v1278_v11, %v1687_v9  ;;  %v5224_v42 = vpop.f32.mrb[36].mxu0  ;;  %v1282_v5 = vmax.f32 %v1170_v36, 0.0  ;;  %v1194_v36 = vadd.f32 %v6516_v0, %v6510_v37  ;;  %v1186_v53 = vadd.f32 %v6519_v3, %v6506_v48 }
 0x305   : > { %8179 = vst [vmem:[#allocation44_spill] sm:$0xff] %v6545_v16  ;;  %v1584_v29 = vadd.f32 %v5224_v42, %v6500_v38  ;;  %v1575_v28 = vpop.f32.mrb[37].mxu0  ;;  %v1284_v42 = vmax.f32 %v1178_v15, 0.0 }
 0x306   : > { %8180 = vst [vmem:[#allocation45_spill] sm:$0xff] %v6552_v39  ;;  %v1576_v45 = vadd.f32 %v1575_v28, %v6496_v26  ;;  %v5225_v50 = vpop.f32.mrb[38].mxu0  ;;  %v6568_v28 = vpop.permute.xlu1 %947 }
 0x307   : > { %v1692_v16 = vmax.f32 %v1584_v29, 0.0  ;;  %v1587_v1 = vadd.f32 %v5225_v50, %v6502_v43  ;;  %v1578_v22 = vpop.f32.mrb[39].mxu0  ;;  %8183 = vst [vmem:[#allocation48_spill] sm:$0xff] %v6568_v28 }
 0x308   : > { %v1690_v11 = vmax.f32 %v1576_v45, 0.0  ;;  %v1579_v9 = vadd.f32 %v1578_v22, %v6498_v30  ;;  %v6562_v49 = vpop.f32.mrb[32].mxu1 }
 0x309   : > { %v6564_v38 = vmax.f32 %v1283_v6, %v1692_v16  ;;  %v1693_v52 = vmax.f32 %v1587_v1, 0.0  ;;  %v6566_v39 = vpop.f32.mrb[33].mxu1  ;;  %v1183_v1 = vadd.f32 %v6514_v63, %v6504_v31 }
 0x30a   : > { %v6570_v29 = vmax.f32 %v1281_v47, %v1690_v11  ;;  %v1691_v50 = vmax.f32 %v1579_v9, 0.0  ;;  %v6572_v43 = vpop.f32.mrb[34].mxu1  ;;  %v6587_v11 = vpop.permute.xlu0 %952 }
 0x30b   : > { %8182 = vst [vmem:[#allocation47_spill] sm:$0xff] %v6564_v38  ;;  %v6576_v22 = vmax.f32 %v1284_v42, %v1693_v52  ;;  %v6578_v45 = vpop.f32.mrb[35].mxu1  ;;  %8187 = vst [vmem:[#allocation52_spill] sm:$0xff] %v6587_v11  ;;  %v1287_v52 = vmax.f32 %v1191_v8, 0.0 }
 0x30c   : > { %8184 = vst [vmem:[#allocation49_spill] sm:$0xff] %v6570_v29  ;;  %v6582_v16 = vmax.f32 %v1282_v5, %v1691_v50  ;;  %v5228_v15 = vpop.f32.mrb[40].mxu0  ;;  %v6593_v50 = vpop.permute.xlu1 %957  ;;  %v1288_v29 = vmax.f32 %v1194_v36, 0.0 }
 0x30d   : > { %8185 = vst [vmem:[#allocation50_spill] sm:$0xff] %v6576_v22  ;;  %v1600_v6 = vadd.f32 %v5228_v15, %v6508_v25  ;;  %v1591_v47 = vpop.f32.mrb[41].mxu0  ;;  %8188 = vst [vmem:[#allocation53_spill] sm:$0xff] %v6593_v50 }
 0x30e   : > { %8186 = vst [vmem:[#allocation51_spill] sm:$0xff] %v6582_v16  ;;  %v1592_v9 = vadd.f32 %v1591_v47, %v6504_v31  ;;  %v5229_v42 = vpop.f32.mrb[42].mxu0  ;;  %v1285_v16 = vmax.f32 %v1183_v1, 0.0  ;;  %v1286_v47 = vmax.f32 %v1186_v53, 0.0  ;;  %v1207_v1 = vadd.f32 %v6532_v51, %v6538_v41 }
 0x30f   : > { %v1696_v22 = vmax.f32 %v1600_v6, 0.0  ;;  %v1603_v63 = vadd.f32 %v5229_v42, %v6510_v37  ;;  %v1594_v5 = vpop.f32.mrb[43].mxu0  ;;  %v1202_v51 = vadd.f32 %v6547_v18, %v6526_v13 }
 0x310   : > { %v1694_v0 = vmax.f32 %v1592_v9, 0.0  ;;  %v1595_v15 = vadd.f32 %v1594_v5, %v6506_v48  ;;  %v6596_v25 = vpop.f32.mrb[36].mxu1  ;;  %v6612_v48 = vpop.permute.xlu0 %962 }
 0x311   : > { %v6598_v38 = vmax.f32 %v1287_v52, %v1696_v22  ;;  %v1697_v3 = vmax.f32 %v1603_v63, 0.0  ;;  %v6600_v30 = vpop.f32.mrb[37].mxu1  ;;  %8192 = vst [vmem:[#allocation57_spill] sm:$0xff] %v6612_v48  ;;  %v1199_v22 = vadd.f32 %v6536_v21, %v6521_v4 }
 0x312   : > { %v6602_v8 = vmax.f32 %v1285_v16, %v1694_v0  ;;  %v1695_v6 = vmax.f32 %v1595_v15, 0.0  ;;  %v6604_v42 = vpop.f32.mrb[38].mxu1  ;;  %v1210_v16 = vadd.f32 %v6542_v17, %v6549_v7  ;;  %v6621_v0 = vpop.permute.xlu1 %967 }
 0x313   : > { %8189 = vst [vmem:[#allocation54_spill] sm:$0xff] %v6598_v38  ;;  %v6608_v9 = vmax.f32 %v1288_v29, %v1697_v3  ;;  %v6610_v5 = vpop.f32.mrb[39].mxu1  ;;  %8194 = vst [vmem:[#allocation59_spill] sm:$0xff] %v6621_v0  ;;  %v1291_v3 = vmax.f32 %v1207_v1, 0.0 }
 0x314   : > { %8190 = vst [vmem:[#allocation55_spill] sm:$0xff] %v6602_v8  ;;  %v6616_v36 = vmax.f32 %v1286_v47, %v1695_v6  ;;  %v5232_v53 = vpop.f32.mrb[44].mxu0  ;;  %v1289_v6 = vmax.f32 %v1199_v22, 0.0  ;;  %v6634_v18 = vpop.permute.xlu0 %972  ;;  %v1223_v22 = vadd.f32 %v6562_v49, %v6587_v11 }
 0x315   : > { %8191 = vst [vmem:[#allocation56_spill] sm:$0xff] %v6608_v9  ;;  %v1616_v52 = vadd.f32 %v5232_v53, %v6538_v41  ;;  %v1607_v63 = vpop.f32.mrb[45].mxu0  ;;  %v1292_v53 = vmax.f32 %v1210_v16, 0.0  ;;  %8196 = vst [vmem:[#allocation61_spill] sm:$0xff] %v6634_v18  ;;  %v1215_v16 = vadd.f32 %v6566_v39, %v6559_v20 }
 0x316   : > { %8193 = vst [vmem:[#allocation58_spill] sm:$0xff] %v6616_v36  ;;  %v1608_v29 = vadd.f32 %v1607_v63, %v6521_v4  ;;  %v5233_v15 = vpop.f32.mrb[46].mxu0  ;;  %v1290_v63 = vmax.f32 %v1202_v51, 0.0 }
 0x317   : > { %v1700_v9 = vmax.f32 %v1616_v52, 0.0  ;;  %v1619_v21 = vadd.f32 %v5233_v15, %v6549_v7  ;;  %v1610_v47 = vpop.f32.mrb[47].mxu0 }
 0x318   : > { %v1698_v36 = vmax.f32 %v1608_v29, 0.0  ;;  %v1611_v17 = vadd.f32 %v1610_v47, %v6526_v13  ;;  %v6628_v8 = vpop.f32.mrb[40].mxu1 }
 0x319   : > { %v6630_v41 = vmax.f32 %v1291_v3, %v1700_v9  ;;  %v1701_v38 = vmax.f32 %v1619_v21, 0.0  ;;  %v6632_v37 = vpop.f32.mrb[41].mxu1  ;;  %v6646_v9 = vpop.permute.xlu1 %977 }
 0x31a   : > { %v6636_v1 = vmax.f32 %v1289_v6, %v1698_v36  ;;  %v1699_v52 = vmax.f32 %v1611_v17, 0.0  ;;  %v6638_v15 = vpop.f32.mrb[42].mxu1  ;;  %8199 = vst [vmem:[#allocation64_spill] sm:$0xff] %v6646_v9  ;;  %v1226_v36 = vadd.f32 %v6572_v43, %v6593_v50 }
 0x31b   : > { %8195 = vst [vmem:[#allocation60_spill] sm:$0xff] %v6630_v41  ;;  %v6642_v29 = vmax.f32 %v1292_v53, %v1701_v38  ;;  %v6644_v47 = vpop.f32.mrb[43].mxu1  ;;  %v1218_v38 = vadd.f32 %v6578_v45, %v6568_v28  ;;  %v1295_v53 = vmax.f32 %v1223_v22, 0.0 }
 0x31c   : > { %8197 = vst [vmem:[#allocation62_spill] sm:$0xff] %v6636_v1  ;;  %v6650_v3 = vmax.f32 %v1290_v63, %v1699_v52  ;;  %v5236_v51 = vpop.f32.mrb[48].mxu0  ;;  %v6659_v63 = vpop.permute.xlu0 %982  ;;  %v1293_v52 = vmax.f32 %v1215_v16, 0.0  ;;  %v1239_v16 = vadd.f32 %v6596_v25, %v6634_v18  ;;  %v1234_v25 = vadd.f32 %v6610_v5, %v6621_v0 }
 0x31d   : > { %8198 = vst [vmem:[#allocation63_spill] sm:$0xff] %v6642_v29  ;;  %v1632_v21 = vadd.f32 %v5236_v51, %v6587_v11  ;;  %v1623_v6 = vpop.f32.mrb[49].mxu0  ;;  %v1296_v51 = vmax.f32 %v1226_v36, 0.0  ;;  %v1294_v22 = vmax.f32 %v1218_v38, 0.0 }
 0x31e   : > { %8200 = vst [vmem:[#allocation65_spill] sm:$0xff] %v6650_v3  ;;  %v1624_v49 = vadd.f32 %v1623_v6, %v6559_v20  ;;  %v5237_v17 = vpop.f32.mrb[50].mxu0  ;;  %v6668_v6 = vpop.permute.xlu1 %987 }
 0x31f   : > { %v1704_v29 = vmax.f32 %v1632_v21, 0.0  ;;  %v1635_v1 = vadd.f32 %v5237_v17, %v6593_v50  ;;  %v1626_v39 = vpop.f32.mrb[51].mxu0 }
 0x320   : > { %v1702_v3 = vmax.f32 %v1624_v49, 0.0  ;;  %v1627_v43 = vadd.f32 %v1626_v39, %v6568_v28  ;;  %v6662_v41 = vpop.f32.mrb[44].mxu1 }
 0x321   : > { %v6664_v11 = vmax.f32 %v1295_v53, %v1704_v29  ;;  %v1705_v45 = vmax.f32 %v1635_v1, 0.0  ;;  %v6666_v13 = vpop.f32.mrb[45].mxu1  ;;  %v1231_v1 = vadd.f32 %v6600_v30, %v6612_v48 }
 0x322   : > { %v6670_v21 = vmax.f32 %v1293_v52, %v1702_v3  ;;  %v1703_v17 = vmax.f32 %v1627_v43, 0.0  ;;  %v6672_v50 = vpop.f32.mrb[46].mxu1  ;;  %v1242_v3 = vadd.f32 %v6604_v42, %v6646_v9  ;;  %v6687_v52 = vpop.permute.xlu0 %992 }
 0x323   : > { %8201 = vst [vmem:[#allocation66_spill] sm:$0xff] %v6664_v11  ;;  %v6676_v49 = vmax.f32 %v1296_v51, %v1705_v45  ;;  %v6678_v39 = vpop.f32.mrb[47].mxu1  ;;  %8205 = vst [vmem:[#allocation70_spill] sm:$0xff] %v6687_v52  ;;  %v1299_v45 = vmax.f32 %v1239_v16, 0.0 }
 0x324   : > { %8202 = vst [vmem:[#allocation67_spill] sm:$0xff] %v6670_v21  ;;  %v6682_v29 = vmax.f32 %v1294_v22, %v1703_v17  ;;  %v5240_v36 = vpop.f32.mrb[52].mxu0  ;;  %v6693_v17 = vpop.permute.xlu1 %997  ;;  %v1300_v21 = vmax.f32 %v1242_v3, 0.0 }
 0x325   : > { %8203 = vst [vmem:[#allocation68_spill] sm:$0xff] %v6676_v49  ;;  %v1648_v38 = vadd.f32 %v5240_v36, %v6634_v18  ;;  %v1639_v53 = vpop.f32.mrb[53].mxu0 }
 0x326   : > { %8204 = vst [vmem:[#allocation69_spill] sm:$0xff] %v6682_v29  ;;  %v1640_v43 = vadd.f32 %v1639_v53, %v6612_v48  ;;  %v5241_v51 = vpop.f32.mrb[54].mxu0  ;;  %v1297_v29 = vmax.f32 %v1231_v1, 0.0  ;;  %v1298_v48 = vmax.f32 %v1234_v25, 0.0  ;;  %v1255_v1 = vadd.f32 %v6628_v8, %v6687_v52 }
 0x327   : > { %v1708_v49 = vmax.f32 %v1648_v38, 0.0  ;;  %v1651_v30 = vadd.f32 %v5241_v51, %v6646_v9  ;;  %v1642_v22 = vpop.f32.mrb[55].mxu0 }
 0x328   : > { %v1706_v42 = vmax.f32 %v1640_v43, 0.0  ;;  %v1643_v36 = vadd.f32 %v1642_v22, %v6621_v0  ;;  %v5262_v18 = vpop.f32.mrb[48].mxu1  ;;  %v1258_v22 = vadd.f32 %v6638_v15, %v6693_v17 }
 0x329   : > { %v6696_v11 = vmax.f32 %v1299_v45, %v1708_v49  ;;  %v1709_v28 = vmax.f32 %v1651_v30, 0.0  ;;  %v1811_v5 = vadd.f32 %v5262_v18, %v6258_v33  ;;  %v1802_v53 = vpop.f32.mrb[49].mxu1  ;;  %v6707_v45 = vpop.permute.xlu0 %1002  ;;  %v1247_v18 = vadd.f32 %v6632_v37, %v6659_v63 }
 0x32a   : > { %v6699_v16 = vmax.f32 %v1297_v29, %v1706_v42  ;;  %v1707_v38 = vmax.f32 %v1643_v36, 0.0  ;;  %v1803_v51 = vadd.f32 %v1802_v53, %v6256_v32  ;;  %v5263_v9 = vpop.f32.mrb[50].mxu1  ;;  %8209 = vst [vmem:[#allocation74_spill] sm:$0xff] %v6707_v45  ;;  %v1250_v36 = vadd.f32 %v6644_v47, %v6668_v6 }
 0x32b   : > { %8206 = vst [vmem:[#allocation71_spill] sm:$0xff] %v6696_v11  ;;  %v6704_v43 = vmax.f32 %v1300_v21, %v1709_v28  ;;  %v1814_v3 = vadd.f32 %v5263_v9, %v6262_v35  ;;  %v1805_v49 = vpop.f32.mrb[51].mxu1  ;;  %v1835_v42 = vmax.f32 %v1811_v5, 0.0  ;;  %v6717_v9 = vpop.permute.xlu1 %1007  ;;  %v1304_v0 = vmax.f32 %v1258_v22, 0.0 }
 0x32c   : > { %8207 = vst [vmem:[#allocation72_spill] sm:$0xff] %v6699_v16  ;;  %v6711_v25 = vmax.f32 %v1298_v48, %v1707_v38  ;;  %v1806_v29 = vadd.f32 %v1805_v49, %v6260_v34  ;;  %v5244_v30 = vpop.f32.mrb[56].mxu0  ;;  %8211 = vst [vmem:[#allocation76_spill] sm:$0xff] %v6717_v9  ;;  %v1833_v53 = vmax.f32 %v1803_v51, 0.0  ;;  %v1303_v49 = vmax.f32 %v1255_v1, 0.0 }
 0x32d   : > { %8208 = vst [vmem:[#allocation73_spill] sm:$0xff] %v6704_v43  ;;  %v1836_v8 = vmax.f32 %v1814_v3, 0.0  ;;  %v1664_v28 = vadd.f32 %v5244_v30, %v6687_v52  ;;  %v1655_v21 = vpop.f32.mrb[57].mxu0  ;;  %v1301_v3 = vmax.f32 %v1247_v18, 0.0  ;;  %v1302_v1 = vmax.f32 %v1250_v36, 0.0 }
 0x32e   : > { %8210 = vst [vmem:[#allocation75_spill] sm:$0xff] %v6711_v25  ;;  %v1834_v37 = vmax.f32 %v1806_v29, 0.0  ;;  %v1656_v48 = vadd.f32 %v1655_v21, %v6659_v63  ;;  %v5245_v38 = vpop.f32.mrb[58].mxu0  ;;  %v6727_v21 = vpop.permute.xlu0 %1012  ;;  %v1263_v36 = vadd.f32 %v6666_v13, %v6707_v45 }
 0x32f   : > { %v1842_v25 = vpack.c.bf16 %v1836_v8, %v1835_v42  ;;  %v1712_v43 = vmax.f32 %v1664_v28, 0.0  ;;  %v1667_v15 = vadd.f32 %v5245_v38, %v6693_v17  ;;  %v1658_v5 = vpop.f32.mrb[59].mxu0  ;;  %8212 = vst [vmem:[#allocation77_spill] sm:$0xff] %v6727_v21 }
 0x330   : > { %v1841_v16 = vpack.c.bf16 %v1834_v37, %v1833_v53  ;;  %v1710_v30 = vmax.f32 %v1656_v48, 0.0  ;;  %v1659_v52 = vadd.f32 %v1658_v5, %v6668_v6  ;;  %v5266_v11 = vpop.f32.mrb[52].mxu1  ;;  %v1271_v53 = vadd.f32 %v6662_v41, %v6727_v21 }
 0x331   : > { %v6724_v20 = vmax.f32 %v1303_v49, %v1712_v43  ;;  %v1713_v47 = vmax.f32 %v1667_v15, 0.0  ;;  %v1827_v51 = vadd.f32 %v5266_v11, %v6272_v54  ;;  %v1818_v29 = vpop.f32.mrb[53].mxu1  ;;  %v6737_v11 = vpop.permute.xlu1 %1017 }
 0x332   : > { %v6729_v42 = vmax.f32 %v1301_v3, %v1710_v30  ;;  %v1711_v8 = vmax.f32 %v1659_v52, 0.0  ;;  %v1819_v18 = vadd.f32 %v1818_v29, %v6265_v40  ;;  %v5267_v28 = vpop.f32.mrb[54].mxu1  ;;  %5268 = vmatprep.subr.bf16.mxu0 %v1841_v16  ;;  %8213 = vst [vmem:[#allocation78_spill] sm:$0xff] %v6737_v11  ;;  %v1274_v41 = vadd.f32 %v6672_v50, %v6737_v11 }
 0x333   : > { %v6734_v22 = vmax.f32 %v1304_v0, %v1713_v47  ;;  %v1830_v43 = vadd.f32 %v5267_v28, %v6275_v59  ;;  %v1821_v37 = vpop.f32.mrb[55].mxu1  ;;  %5269 = vmatpush3.bf16.msra.mxu0 %v1841_v16  ;;  %v1839_v0 = vmax.f32 %v1827_v51, 0.0  ;;  %v1266_v16 = vadd.f32 %v6678_v39, %v6717_v9 }
 0x334   : > { %v6741_v48 = vmax.f32 %v1302_v1, %v1711_v8  ;;  %v1822_v52 = vadd.f32 %v1821_v37, %v6269_v46  ;;  %v5248_v38 = vpop.f32.mrb[60].mxu0  ;;  %5270 = vmatprep.subr.bf16.mxu0 %v1842_v25  ;;  %v1837_v3 = vmax.f32 %v1819_v18, 0.0  ;;  %v1307_v29 = vmax.f32 %v1271_v53, 0.0 }
 0x335   : > { %v1840_v49 = vmax.f32 %v1830_v43, 0.0  ;;  %v1680_v15 = vadd.f32 %v5248_v38, %v6727_v21  ;;  %v1671_v5 = vpop.f32.mrb[61].mxu0  ;;  %v1305_v50 = vmax.f32 %v1263_v36, 0.0  ;;  %v1308_v21 = vmax.f32 %v1274_v41, 0.0 }
 0x336   : > { %8214 = vst [vmem:[#allocation79_spill] sm:$0xff] %v6741_v48  ;;  %v1838_v30 = vmax.f32 %v1822_v52, 0.0  ;;  %v1672_v13 = vadd.f32 %v1671_v5, %v6707_v45  ;;  %v5249_v47 = vpop.f32.mrb[62].mxu0  ;;  %v1306_v18 = vmax.f32 %v1266_v16, 0.0 }
 0x337   : > { %v1844_v1 = vpack.c.bf16 %v1840_v49, %v1839_v0  ;;  %v1716_v8 = vmax.f32 %v1680_v15, 0.0  ;;  %v1683_v28 = vadd.f32 %v5249_v47, %v6737_v11  ;;  %v1674_v37 = vpop.f32.mrb[63].mxu0  ;;  %5271 = vmatpush3.bf16.msra.mxu0 %v1842_v25 }
 0x338   : > { %v1843_v51 = vpack.c.bf16 %v1838_v30, %v1837_v3  ;;  %v1714_v43 = vmax.f32 %v1672_v13, 0.0  ;;  %v1675_v38 = vadd.f32 %v1674_v37, %v6717_v9  ;;  %v5851_v37 = vld [vmem:[%s7981_s3 + $0x10] sm:$0xff]  }
 0x339   : > { %v6752_v48 = vmax.f32 %v1307_v29, %v1716_v8  ;;  %v1717_v39 = vmax.f32 %v1683_v28, 0.0  ;;  %v5850_v8 = vld [vmem:[%s7981_s3 + $0x8] sm:$0xff]  }
 0x33a   : > { %v6754_v52 = vmax.f32 %v1305_v50, %v1714_v43  ;;  %v1715_v5 = vmax.f32 %v1675_v38, 0.0  ;;  %5272 = vmatprep.subr.bf16.mxu0 %v1843_v51 }
 0x33b   : > { %v6756_v53 = vmax.f32 %v1308_v21, %v1717_v39  ;;  %5273 = vmatpush3.bf16.msra.mxu0 %v1843_v51 }
 0x33c   : > { %v6758_v0 = vmax.f32 %v1306_v18, %v1715_v5  ;;  %v5352_v25 = vpop.f32.mrb[56].mxu1  ;;  %5274 = vmatprep.subr.bf16.mxu0 %v1844_v1 }
 0x33d   : > { %v2252_v36 = vadd.f32 %v5352_v25, %v6258_v33  ;;  %v2243_v49 = vpop.f32.mrb[57].mxu1 }
 0x33e   : > { %v2244_v41 = vadd.f32 %v2243_v49, %v6256_v32  ;;  %v5353_v15 = vpop.f32.mrb[58].mxu1 }
 0x33f   : > { %v2255_v3 = vadd.f32 %v5353_v15, %v6262_v35  ;;  %v2246_v16 = vpop.f32.mrb[59].mxu1  ;;  %5275 = vmatpush3.bf16.msra.mxu0 %v1844_v1  ;;  %v2276_v13 = vmax.f32 %v2252_v36, 0.0 }
 0x340   : > { %v2247_v30 = vadd.f32 %v2246_v16, %v6260_v34  ;;  %v2274_v47 = vmax.f32 %v2244_v41, 0.0 }
 0x341   : > { %v2277_v21 = vmax.f32 %v2255_v3, 0.0  ;;  %v5852_v3 = vld [vmem:[%s7981_s3 + $0x18] sm:$0xff]  }
 0x342   : > { %v2275_v29 = vmax.f32 %v2247_v30, 0.0  ;;  %5277 = vmatmul.mubr.msk.bf16.vlgmr.msra.gmra.mrb[64].mxu0 %vm650_vm3, %v5850_v8  ;;  %v5853_v30 = vld [vmem:[%s7981_s3 + $0x20] sm:$0xff]  }
 0x343   : > { %v2283_v28 = vpack.c.bf16 %v2277_v21, %v2276_v13  ;;  %5280 = vmatprep.mubr.msk.bf16.mxu0 %vm650_vm3, %v5851_v37  ;;  %v5854_v21 = vld [vmem:[%s7981_s3 + $0x28] sm:$0xff]  }
 0x344   : > { %v2282_v1 = vpack.c.bf16 %v2275_v29, %v2274_v47  ;;  %v5356_v50 = vpop.f32.mrb[60].mxu1  ;;  %v5855_v47 = vld [vmem:[%s7981_s3 + $0x30] sm:$0xff]   ;;  %v5856_v29 = vld [vmem:[%s7981_s3 + $0x38] sm:$0xff]  }
 0x345   : > { %v2268_v51 = vadd.f32 %v5356_v50, %v6272_v54  ;;  %v2259_v43 = vpop.f32.mrb[61].mxu1 }
 0x346   : > { %v2260_v38 = vadd.f32 %v2259_v43, %v6265_v40  ;;  %v5357_v39 = vpop.f32.mrb[62].mxu1  ;;  %5358 = vmatprep.subr.bf16.mxu1 %v2282_v1 }
 0x347   : > { %v2271_v18 = vadd.f32 %v5357_v39, %v6275_v59  ;;  %v2262_v5 = vpop.f32.mrb[63].mxu1  ;;  %5359 = vmatpush3.bf16.msra.mxu1 %v2282_v1  ;;  %v2280_v36 = vmax.f32 %v2268_v51, 0.0 }
 0x348   : > { %v2263_v25 = vadd.f32 %v2262_v5, %v6269_v46  ;;  %5360 = vmatprep.subr.bf16.mxu1 %v2283_v28  ;;  %v2278_v41 = vmax.f32 %v2260_v38, 0.0 }
 0x349   : > { %v2281_v49 = vmax.f32 %v2271_v18, 0.0 }
 0x34a   : > { %v2279_v15 = vmax.f32 %v2263_v25, 0.0  ;;  %5281 = vmatmul.mubr.msk.bf16.gmra.mrb[68].mxu0 %vm650_vm3, %v5852_v3 }
 0x34b   : > { %v2285_v16 = vpack.c.bf16 %v2281_v49, %v2280_v36  ;;  %5361 = vmatpush3.bf16.msra.mxu1 %v2283_v28  ;;  %5284 = vmatprep.mubr.msk.bf16.mxu0 %vm650_vm3, %v5853_v30  ;;  %v5857_v28 = vld [vmem:[%s7983_s5] sm:$0xff]  }
 0x34c   : > { %v2284_v13 = vpack.c.bf16 %v2279_v15, %v2278_v41 }
 0x34e   : > { %5362 = vmatprep.subr.bf16.mxu1 %v2284_v13 }
 0x34f   : > { %5363 = vmatpush3.bf16.msra.mxu1 %v2284_v13 }
 0x350   : > { %5364 = vmatprep.subr.bf16.mxu1 %v2285_v16 }
 0x352   : > { %5285 = vmatmul.mubr.msk.bf16.gmra.mrb[72].mxu0 %vm650_vm3, %v5854_v21 }
 0x353   : > { %5365 = vmatpush3.bf16.msra.mxu1 %v2285_v16  ;;  %5288 = vmatprep.mubr.msk.bf16.mxu0 %vm650_vm3, %v5855_v47 }
 0x356   : > { %5367 = vmatmul.mubr.msk.bf16.vlgmr.msra.gmra.mrb[64].mxu1 %vm650_vm3, %v5850_v8 }
 0x357   : > { %5370 = vmatprep.mubr.msk.bf16.mxu1 %vm650_vm3, %v5851_v37 }
 0x35a   : > { %5289 = vmatmul.mubr.msk.bf16.gmra.mrb[76].mxu0 %vm650_vm3, %v5856_v29 }
 0x35b   : > { %5308 = vmatprep.mubr.bf16.mxu0 %v5857_v28 }
 0x35e   : > { %5371 = vmatmul.mubr.msk.bf16.gmra.mrb[68].mxu1 %vm650_vm3, %v5852_v3 }
 0x35f   : > { %5374 = vmatprep.mubr.msk.bf16.mxu1 %vm650_vm3, %v5853_v30 }
 0x366   : > { %5375 = vmatmul.mubr.msk.bf16.gmra.mrb[72].mxu1 %vm650_vm3, %v5854_v21 }
 0x367   : > { %5378 = vmatprep.mubr.msk.bf16.mxu1 %vm650_vm3, %v5855_v47 }
 0x36e   : > { %5379 = vmatmul.mubr.msk.bf16.gmra.mrb[76].mxu1 %vm650_vm3, %v5856_v29 }
 0x36f   : > { %5398 = vmatprep.mubr.bf16.mxu1 %v5857_v28 }
 0x415   : > { %v5278_v8 = vpop.f32.mrb[64].mxu0 }
 0x416   : > { %v1888_v37 = vadd.f32 %v5278_v8, %v6330_v57  ;;  %v1879_v1 = vpop.f32.mrb[65].mxu0 }
 0x417   : > { %v1880_v50 = vadd.f32 %v1879_v1, %v6326_v55  ;;  %v5279_v51 = vpop.f32.mrb[66].mxu0 }
 0x418   : > { %v1891_v43 = vadd.f32 %v5279_v51, %v6332_v58  ;;  %v1882_v38 = vpop.f32.mrb[67].mxu0  ;;  %v1944_v18 = vmax.f32 %v1888_v37, 0.0 }
 0x419   : > { %v1883_v39 = vadd.f32 %v1882_v38, %v6328_v56  ;;  %v1942_v25 = vmax.f32 %v1880_v50, 0.0 }
 0x41a   : > { %v1945_v5 = vmax.f32 %v1891_v43, 0.0 }
 0x41b   : > { %v1943_v36 = vmax.f32 %v1883_v39, 0.0 }
 0x41c   : > { %v1959_v49 = vpack.c.bf16 %v1945_v5, %v1944_v18 }
 0x41d   : > { %v1958_v41 = vpack.c.bf16 %v1943_v36, %v1942_v25  ;;  %v5282_v15 = vpop.f32.mrb[68].mxu0 }
 0x41e   : > { %v1904_v3 = vadd.f32 %v5282_v15, %v6338_v62  ;;  %v1895_v16 = vpop.f32.mrb[69].mxu0 }
 0x41f   : > { %v1896_v30 = vadd.f32 %v1895_v16, %v6334_v60  ;;  %v5283_v13 = vpop.f32.mrb[70].mxu0  ;;  %5292 = vmatprep.subr.bf16.mxu0 %v1958_v41 }
 0x420   : > { %v1907_v21 = vadd.f32 %v5283_v13, %v6341_v2  ;;  %v1898_v47 = vpop.f32.mrb[71].mxu0  ;;  %5293 = vmatpush3.bf16.msra.mxu0 %v1958_v41  ;;  %v1948_v28 = vmax.f32 %v1904_v3, 0.0 }
 0x421   : > { %v1899_v29 = vadd.f32 %v1898_v47, %v6336_v61  ;;  %5294 = vmatprep.subr.bf16.mxu0 %v1959_v49  ;;  %v1946_v37 = vmax.f32 %v1896_v30, 0.0 }
 0x422   : > { %v1949_v8 = vmax.f32 %v1907_v21, 0.0 }
 0x423   : > { %v1947_v1 = vmax.f32 %v1899_v29, 0.0 }
 0x424   : > { %v1961_v50 = vpack.c.bf16 %v1949_v8, %v1948_v28  ;;  %5295 = vmatpush3.bf16.msra.mxu0 %v1959_v49 }
 0x425   : > { %v1960_v51 = vpack.c.bf16 %v1947_v1, %v1946_v37  ;;  %v5286_v43 = vpop.f32.mrb[72].mxu0 }
 0x426   : > { %v1920_v38 = vadd.f32 %v5286_v43, %v6353_v23  ;;  %v1911_v39 = vpop.f32.mrb[73].mxu0 }
 0x427   : > { %v1912_v18 = vadd.f32 %v1911_v39, %v6346_v10  ;;  %v5287_v5 = vpop.f32.mrb[74].mxu0  ;;  %5296 = vmatprep.subr.bf16.mxu0 %v1960_v51 }
 0x428   : > { %v1923_v25 = vadd.f32 %v5287_v5, %v6356_v27  ;;  %v1914_v36 = vpop.f32.mrb[75].mxu0  ;;  %5297 = vmatpush3.bf16.msra.mxu0 %v1960_v51  ;;  %v1952_v3 = vmax.f32 %v1920_v38, 0.0 }
 0x429   : > { %v1915_v41 = vadd.f32 %v1914_v36, %v6348_v14  ;;  %v5368_v15 = vpop.f32.mrb[64].mxu1  ;;  %5298 = vmatprep.subr.bf16.mxu0 %v1961_v50  ;;  %v1950_v13 = vmax.f32 %v1912_v18, 0.0 }
 0x42a   : > { %v1953_v16 = vmax.f32 %v1923_v25, 0.0  ;;  %v2329_v49 = vadd.f32 %v5368_v15, %v6330_v57  ;;  %v2320_v30 = vpop.f32.mrb[65].mxu1 }
 0x42b   : > { %v1951_v21 = vmax.f32 %v1915_v41, 0.0  ;;  %v2321_v47 = vadd.f32 %v2320_v30, %v6326_v55  ;;  %v5369_v29 = vpop.f32.mrb[66].mxu1 }
 0x42c   : > { %v1963_v28 = vpack.c.bf16 %v1953_v16, %v1952_v3  ;;  %v2332_v8 = vadd.f32 %v5369_v29, %v6332_v58  ;;  %v2323_v37 = vpop.f32.mrb[67].mxu1  ;;  %5299 = vmatpush3.bf16.msra.mxu0 %v1961_v50  ;;  %v2385_v39 = vmax.f32 %v2329_v49, 0.0  ;;  %v8215_v16 = vld [vmem:[#allocation26_spill] sm:$0xff] }
 0x42d   : > { %v1962_v1 = vpack.c.bf16 %v1951_v21, %v1950_v13  ;;  %v2324_v51 = vadd.f32 %v2323_v37, %v6328_v56  ;;  %v5290_v43 = vpop.f32.mrb[76].mxu0  ;;  %v2383_v36 = vmax.f32 %v2321_v47, 0.0  ;;  %v8216_v13 = vld [vmem:[#allocation24_spill] sm:$0xff] }
 0x42e   : > { %v2386_v38 = vmax.f32 %v2332_v8, 0.0  ;;  %v1936_v5 = vadd.f32 %v5290_v43, %v6369_v12  ;;  %v1927_v25 = vpop.f32.mrb[77].mxu0 }
 0x42f   : > { %v2384_v18 = vmax.f32 %v2324_v51, 0.0  ;;  %v1928_v41 = vadd.f32 %v1927_v25, %v6359_v44  ;;  %v5291_v15 = vpop.f32.mrb[78].mxu0  ;;  %5300 = vmatprep.subr.bf16.mxu0 %v1962_v1 }
 0x430   : > { %v2400_v3 = vpack.c.bf16 %v2386_v38, %v2385_v39  ;;  %v1939_v30 = vadd.f32 %v5291_v15, %v8215_v16  ;;  %v1930_v29 = vpop.f32.mrb[79].mxu0  ;;  %5301 = vmatpush3.bf16.msra.mxu0 %v1962_v1  ;;  %v1956_v49 = vmax.f32 %v1936_v5, 0.0 }
 0x431   : > { %v2399_v50 = vpack.c.bf16 %v2384_v18, %v2383_v36  ;;  %v1931_v21 = vadd.f32 %v1930_v29, %v8216_v13  ;;  %v5372_v37 = vpop.f32.mrb[68].mxu1  ;;  %5302 = vmatprep.subr.bf16.mxu0 %v1963_v28  ;;  %v1954_v51 = vmax.f32 %v1928_v41, 0.0  ;;  %v4624_v41 = vld [vmem:[%s6036_s18 + $0x128] sm:$0xff] }
 0x432   : > { %v1957_v8 = vmax.f32 %v1939_v30, 0.0  ;;  %v2345_v43 = vadd.f32 %v5372_v37, %v6338_v62  ;;  %v2336_v47 = vpop.f32.mrb[69].mxu1  ;;  %v4623_v37 = vld [vmem:[%s6036_s18 + $0x120] sm:$0xff] }
 0x433   : > { %v1955_v25 = vmax.f32 %v1931_v21, 0.0  ;;  %v2337_v39 = vadd.f32 %v2336_v47, %v6334_v60  ;;  %v5373_v38 = vpop.f32.mrb[70].mxu1  ;;  %5382 = vmatprep.subr.bf16.mxu1 %v2399_v50 }
 0x434   : > { %v1965_v15 = vpack.c.bf16 %v1957_v8, %v1956_v49  ;;  %v2348_v1 = vadd.f32 %v5373_v38, %v6341_v2  ;;  %v2339_v36 = vpop.f32.mrb[71].mxu1  ;;  %5383 = vmatpush3.bf16.msra.mxu1 %v2399_v50  ;;  %5303 = vmatpush3.bf16.msra.mxu0 %v1963_v28  ;;  %v2389_v30 = vmax.f32 %v2345_v43, 0.0  ;;  %v2642_v28 = vpack.c.bf16 %v4624_v41, %v4623_v37  ;;  %v4625_v38 = vld [vmem:[%s6036_s18 + $0x130] sm:$0xff]  ;;  %v6841_v41 = vld [vmem:[%s7983_s5 + $0x8] sm:$0xff]  }
 0x435   : > { %v1964_v18 = vpack.c.bf16 %v1955_v25, %v1954_v51  ;;  %v2340_v5 = vadd.f32 %v2339_v36, %v6336_v61  ;;  %5384 = vmatprep.subr.bf16.mxu1 %v2400_v3  ;;  %v2387_v21 = vmax.f32 %v2337_v39, 0.0  ;;  %v4626_v39 = vld [vmem:[%s6036_s18 + $0x138] sm:$0xff] }
 0x436   : > { %v2390_v29 = vmax.f32 %v2348_v1, 0.0 }
 0x437   : > { %v2388_v47 = vmax.f32 %v2340_v5, 0.0  ;;  %5304 = vmatprep.subr.bf16.mxu0 %v1964_v18 }
 0x438   : > { %v2402_v60 = vpack.c.bf16 %v2390_v29, %v2389_v30  ;;  %5385 = vmatpush3.bf16.msra.mxu1 %v2400_v3  ;;  %5305 = vmatpush3.bf16.msra.mxu0 %v1964_v18  ;;  %v2643_v30 = vpack.c.bf16 %v4626_v39, %v4625_v38 }
 0x439   : > { %v2401_v49 = vpack.c.bf16 %v2388_v47, %v2387_v21  ;;  %v5376_v8 = vpop.f32.mrb[72].mxu1  ;;  %5306 = vmatprep.subr.bf16.mxu0 %v1965_v15  ;;  %v4627_v21 = vld [vmem:[%s6036_s18 + $0x140] sm:$0xff]  ;;  %v4628_v47 = vld [vmem:[%s6036_s18 + $0x148] sm:$0xff] }
 0x43a   : > { %v2361_v50 = vadd.f32 %v5376_v8, %v6353_v23  ;;  %v2352_v51 = vpop.f32.mrb[73].mxu1 }
 0x43b   : > { %v2353_v43 = vadd.f32 %v2352_v51, %v6346_v10  ;;  %v5377_v25 = vpop.f32.mrb[74].mxu1  ;;  %5386 = vmatprep.subr.bf16.mxu1 %v2401_v49 }
 0x43c   : > { %v2364_v1 = vadd.f32 %v5377_v25, %v6356_v27  ;;  %v2355_v36 = vpop.f32.mrb[75].mxu1  ;;  %5387 = vmatpush3.bf16.msra.mxu1 %v2401_v49  ;;  %5307 = vmatpush3.bf16.msra.mxu0 %v1965_v15  ;;  %v2393_v18 = vmax.f32 %v2361_v50, 0.0  ;;  %v5859_v49 = vld [vmem:[%s7983_s5 + $0x10] sm:$0xff]   ;;  %v2644_v25 = vpack.c.bf16 %v4628_v47, %v4627_v21 }
 0x43d   : > { %v2356_v3 = vadd.f32 %v2355_v36, %v6348_v14  ;;  %5388 = vmatprep.subr.bf16.mxu1 %v2402_v60  ;;  %5430 = vmatprep.subr.bf16.mxu0 %v2642_v28  ;;  %v2391_v29 = vmax.f32 %v2353_v43, 0.0  ;;  %v4630_v36 = vld [vmem:[%s6036_s18 + $0x158] sm:$0xff] }
 0x43e   : > { %v2394_v5 = vmax.f32 %v2364_v1, 0.0  ;;  %v4629_v1 = vld [vmem:[%s6036_s18 + $0x150] sm:$0xff] }
 0x43f   : > { %v2392_v37 = vmax.f32 %v2356_v3, 0.0  ;;  %5309 = vmatmul.mubr.bf16.vlgmr.msra.gmra.mrb[80].mxu0 %v6841_v41 }
 0x440   : > { %v2404_v15 = vpack.c.bf16 %v2394_v5, %v2393_v18  ;;  %5389 = vmatpush3.bf16.msra.mxu1 %v2402_v60  ;;  %5312 = vmatprep.mubr.bf16.mxu0 %v5859_v49  ;;  %v4631_v60 = vld [vmem:[%s6036_s18 + $0x160] sm:$0x7] }
 0x441   : > { %v2403_v8 = vpack.c.bf16 %v2392_v37, %v2391_v29  ;;  %v5380_v50 = vpop.f32.mrb[76].mxu1  ;;  %5431 = vmatpush3.bf16.msra.mxu0 %v2642_v28  ;;  %v2645_v37 = vpack.c.bf16 %v4630_v36, %v4629_v1  ;;  %v2646_v21 = vpack.c.bf16 %v4631_v60, %v4631_v60  ;;  %v4645_v1 = vld [vmem:[%s6036_s18 + $0x170] sm:$0xff] }
 0x442   : > { %v2377_v51 = vadd.f32 %v5380_v50, %v6369_v12  ;;  %v2368_v43 = vpop.f32.mrb[77].mxu1  ;;  %5432 = vmatprep.subr.bf16.mxu0 %v2643_v30 }
 0x443   : > { %v2369_v38 = vadd.f32 %v2368_v43, %v6359_v44  ;;  %v5381_v39 = vpop.f32.mrb[78].mxu1  ;;  %5390 = vmatprep.subr.bf16.mxu1 %v2403_v8  ;;  %v5860_v43 = vld [vmem:[%s7983_s5 + $0x18] sm:$0xff]   ;;  %v8225_v44 = vld [vmem:[#allocation34_spill] sm:$0xff] }
 0x444   : > { %v2380_v3 = vadd.f32 %v5381_v39, %v8215_v16  ;;  %v2371_v18 = vpop.f32.mrb[79].mxu1  ;;  %5391 = vmatpush3.bf16.msra.mxu1 %v2403_v8  ;;  %v2397_v28 = vmax.f32 %v2377_v51, 0.0  ;;  %v4644_v51 = vld [vmem:[%s6036_s18 + $0x168] sm:$0xff] }
 0x445   : > { %v2372_v5 = vadd.f32 %v2371_v18, %v8216_v13  ;;  %5392 = vmatprep.subr.bf16.mxu1 %v2404_v15  ;;  %5433 = vmatpush3.bf16.msra.mxu0 %v2643_v30  ;;  %v2395_v47 = vmax.f32 %v2369_v38, 0.0  ;;  %v5861_v30 = vld [vmem:[%s7983_s5 + $0x20] sm:$0xff]   ;;  %v3083_v60 = vpack.c.bf16 %v4645_v1, %v4644_v51  ;;  %v5863_v18 = vld [vmem:[%s7983_s5 + $0x30] sm:$0xff]   ;;  %v5866_v1 = vld [vmem:[%s7983_s5 + $0x48] sm:$0xff]  }
 0x446   : > { %v2398_v29 = vmax.f32 %v2380_v3, 0.0  ;;  %5434 = vmatprep.subr.bf16.mxu0 %v2644_v25  ;;  %v8217_v38 = vld [vmem:[#allocation2_spill] sm:$0xff] }
 0x447   : > { %v2396_v50 = vmax.f32 %v2372_v5, 0.0  ;;  %5313 = vmatmul.mubr.bf16.gmra.mrb[84].mxu0 %v5860_v43  ;;  %v2648_v36 = vand.u32 %v2646_v21, %v8217_v38  ;;  %v4647_v3 = vld [vmem:[%s6036_s18 + $0x180] sm:$0xff]  ;;  %v4650_v21 = vld [vmem:[%s6036_s18 + $0x198] sm:$0xff] }
 0x448   : > { %v2406_v39 = vpack.c.bf16 %v2398_v29, %v2397_v28  ;;  %5393 = vmatpush3.bf16.msra.mxu1 %v2404_v15  ;;  %5316 = vmatprep.mubr.bf16.mxu0 %v5861_v30  ;;  %v4646_v15 = vld [vmem:[%s6036_s18 + $0x178] sm:$0xff]  ;;  %v4648_v28 = vld [vmem:[%s6036_s18 + $0x188] sm:$0xff]  ;;  %v4649_v29 = vld [vmem:[%s6036_s18 + $0x190] sm:$0xff] }
 0x449   : > { %v2405_v8 = vpack.c.bf16 %v2396_v50, %v2395_v47  ;;  %5435 = vmatpush3.bf16.msra.mxu0 %v2644_v25  ;;  %v5862_v25 = vld [vmem:[%s7983_s5 + $0x28] sm:$0xff]   ;;  %v3084_v5 = vpack.c.bf16 %v4647_v3, %v4646_v15  ;;  %v4651_v47 = vld [vmem:[%s6036_s18 + $0x1a0] sm:$0xff]  ;;  %v5871_v15 = vld [vmem:[%s7983_s5 + $0x70] sm:$0xff]  }
 0x44a   : > { %5436 = vmatprep.subr.bf16.mxu0 %v2645_v37  ;;  %v4652_v50 = vld [vmem:[%s6036_s18 + $0x1a8] sm:$0x7]  ;;  %v5872_v3 = vld [vmem:[%s7983_s5 + $0x78] sm:$0xff]  }
 0x44b   : > { %5394 = vmatprep.subr.bf16.mxu1 %v2405_v8 }
 0x44c   : > { %5395 = vmatpush3.bf16.msra.mxu1 %v2405_v8  ;;  %v5865_v8 = vld [vmem:[%s7983_s5 + $0x40] sm:$0xff]  }
 0x44d   : > { %5396 = vmatprep.subr.bf16.mxu1 %v2406_v39  ;;  %5437 = vmatpush3.bf16.msra.mxu0 %v2645_v37  ;;  %v3085_v37 = vpack.c.bf16 %v4649_v29, %v4648_v28  ;;  %v5876_v28 = vld [vmem:[%s7979_s1 + $0x18] sm:$0xff]   ;;  %v5877_v29 = vld [vmem:[%s7981_s3] sm:$0xff]  }
 0x44e   : > { %5438 = vmatprep.subr.bf16.mxu0 %v2648_v36 }
 0x44f   : > { %5317 = vmatmul.mubr.bf16.gmra.mrb[88].mxu0 %v5862_v25 }
 0x450   : > { %5397 = vmatpush3.bf16.msra.mxu1 %v2406_v39  ;;  %5320 = vmatprep.mubr.bf16.mxu0 %v5863_v18  ;;  %v5864_v39 = vld [vmem:[%s7983_s5 + $0x38] sm:$0xff]  }
 0x451   : > { %5520 = vmatprep.subr.bf16.mxu1 %v3083_v60  ;;  %5439 = vmatpush3.bf16.msra.mxu0 %v2648_v36  ;;  %v5867_v36 = vld [vmem:[%s7983_s5 + $0x50] sm:$0xff]  }
 0x453   : > { %5399 = vmatmul.mubr.bf16.vlgmr.msra.gmra.mrb[80].mxu1 %v6841_v41  ;;  %v3086_v41 = vpack.c.bf16 %v4651_v47, %v4650_v21  ;;  %v8218_v21 = vld [vmem:[#allocation29_spill] sm:$0xff] }
 0x454   : > { %5402 = vmatprep.mubr.bf16.mxu1 %v5859_v49  ;;  %5521 = vmatpush3.bf16.msra.mxu1 %v3083_v60  ;;  %v3087_v49 = vpack.c.bf16 %v4652_v50, %v4652_v50  ;;  %v5870_v60 = vld [vmem:[%s7983_s5 + $0x68] sm:$0xff]  }
 0x455   : > { %5522 = vmatprep.subr.bf16.mxu1 %v3084_v5 }
 0x456   : > { %v3089_v51 = vand.u32 %v3087_v49, %v8217_v38 }
 0x457   : > { %5321 = vmatmul.mubr.bf16.gmra.mrb[92].mxu0 %v5864_v39 }
 0x458   : > { %5324 = vmatprep.mubr.bf16.mxu0 %v5865_v8  ;;  %5523 = vmatpush3.bf16.msra.mxu1 %v3084_v5  ;;  %v5875_v5 = vld [vmem:[%s7979_s1 + $0x10] sm:$0xff]  }
 0x459   : > { %5524 = vmatprep.subr.bf16.mxu1 %v3085_v37 }
 0x45b   : > { %5403 = vmatmul.mubr.bf16.gmra.mrb[84].mxu1 %v5860_v43  ;;  %v5868_v43 = vld [vmem:[%s7983_s5 + $0x58] sm:$0xff]  }
 0x45c   : > { %5406 = vmatprep.mubr.bf16.mxu1 %v5861_v30  ;;  %5525 = vmatpush3.bf16.msra.mxu1 %v3085_v37  ;;  %v5869_v30 = vld [vmem:[%s7983_s5 + $0x60] sm:$0xff]  }
 0x45d   : > { %5526 = vmatprep.subr.bf16.mxu1 %v3086_v41 }
 0x45f   : > { %5325 = vmatmul.mubr.bf16.gmra.mrb[96].mxu0 %v5866_v1 }
 0x460   : > { %5328 = vmatprep.mubr.bf16.mxu0 %v5867_v36  ;;  %5527 = vmatpush3.bf16.msra.mxu1 %v3086_v41 }
 0x461   : > { %5528 = vmatprep.subr.bf16.mxu1 %v3089_v51 }
 0x463   : > { %5407 = vmatmul.mubr.bf16.gmra.mrb[88].mxu1 %v5862_v25  ;;  %v5873_v25 = vld [vmem:[%s7979_s1] sm:$0xff]  }
 0x464   : > { %5410 = vmatprep.mubr.bf16.mxu1 %v5863_v18  ;;  %5529 = vmatpush3.bf16.msra.mxu1 %v3089_v51  ;;  %v5874_v18 = vld [vmem:[%s7979_s1 + $0x8] sm:$0xff]  }
 0x467   : > { %5329 = vmatmul.mubr.bf16.gmra.mrb[100].mxu0 %v5868_v43 }
 0x468   : > { %5332 = vmatprep.mubr.bf16.mxu0 %v5869_v30 }
 0x46b   : > { %5411 = vmatmul.mubr.bf16.gmra.mrb[92].mxu1 %v5864_v39 }
 0x46c   : > { %5414 = vmatprep.mubr.bf16.mxu1 %v5865_v8 }
 0x46f   : > { %5333 = vmatmul.mubr.bf16.gmra.mrb[104].mxu0 %v5870_v60 }
 0x470   : > { %5336 = vmatprep.mubr.bf16.mxu0 %v5871_v15 }
 0x473   : > { %5415 = vmatmul.mubr.bf16.gmra.mrb[96].mxu1 %v5866_v1 }
 0x474   : > { %5418 = vmatprep.mubr.bf16.mxu1 %v5867_v36  ;;  %v8219_v36 = vld [vmem:[#allocation28_spill] sm:$0xff] }
 0x477   : > { %5337 = vmatmul.mubr.bf16.gmra.mrb[108].mxu0 %v5872_v3 }
 0x478   : > { %5440 = vmatprep.mubr.msk.bf16.mxu0 %vm401_vm0, %v5873_v25 }
 0x47b   : > { %5419 = vmatmul.mubr.bf16.gmra.mrb[100].mxu1 %v5868_v43 }
 0x47c   : > { %5422 = vmatprep.mubr.bf16.mxu1 %v5869_v30  ;;  %v8220_v30 = vld [vmem:[#allocation41_spill] sm:$0xff] }
 0x47f   : > { %5441 = vmatmul.mubr.msk.bf16.vlgmr.msra.gmra.mrb[112].mxu0 %vm401_vm0, %v5874_v18 }
 0x480   : > { %5444 = vmatprep.mubr.msk.bf16.mxu0 %vm401_vm0, %v5875_v5 }
 0x483   : > { %5423 = vmatmul.mubr.bf16.gmra.mrb[104].mxu1 %v5870_v60 }
 0x484   : > { %5426 = vmatprep.mubr.bf16.mxu1 %v5871_v15 }
 0x487   : > { %5445 = vmatmul.mubr.msk.bf16.gmra.mrb[116].mxu0 %vm401_vm0, %v5876_v28 }
 0x488   : > { %5456 = vmatprep.mubr.msk.bf16.mxu0 %vm650_vm3, %v5877_v29 }
 0x48b   : > { %5427 = vmatmul.mubr.bf16.gmra.mrb[108].mxu1 %v5872_v3  ;;  %v8221_v3 = vld [vmem:[#allocation43_spill] sm:$0xff] }
 0x48c   : > { %5530 = vmatprep.mubr.msk.bf16.mxu1 %vm401_vm0, %v5873_v25 }
 0x493   : > { %5531 = vmatmul.mubr.msk.bf16.vlgmr.msra.gmra.mrb[112].mxu1 %vm401_vm0, %v5874_v18 }
 0x494   : > { %5534 = vmatprep.mubr.msk.bf16.mxu1 %vm401_vm0, %v5875_v5  ;;  %v8222_v5 = vld [vmem:[#allocation44_spill] sm:$0xff] }
 0x49b   : > { %5535 = vmatmul.mubr.msk.bf16.gmra.mrb[116].mxu1 %vm401_vm0, %v5876_v28 }
 0x49c   : > { %5546 = vmatprep.mubr.msk.bf16.mxu1 %vm650_vm3, %v5877_v29  ;;  %v8223_v29 = vld [vmem:[#allocation45_spill] sm:$0xff] }
 0x512   : > { %v5310_v37 = vpop.f32.mrb[80].mxu0 }
 0x513   : > { %v2009_v47 = vadd.f32 %v5310_v37, %v8218_v21  ;;  %v2000_v50 = vpop.f32.mrb[81].mxu0 }
 0x514   : > { %v2001_v39 = vadd.f32 %v2000_v50, %v6488_v19  ;;  %v5311_v8 = vpop.f32.mrb[82].mxu0  ;;  %v8224_v50 = vld [vmem:[#allocation33_spill] sm:$0xff] }
 0x515   : > { %v2129_v41 = vmax.f32 %v2009_v47, 0.0  ;;  %v2012_v49 = vadd.f32 %v5311_v8, %v6494_v24  ;;  %v2003_v51 = vpop.f32.mrb[83].mxu0 }
 0x516   : > { %v2127_v1 = vmax.f32 %v2001_v39, 0.0  ;;  %v2004_v43 = vadd.f32 %v2003_v51, %v8219_v36 }
 0x517   : > { %v2161_v60 = vmax.f32 %v8220_v30, %v2129_v41  ;;  %v2130_v15 = vmax.f32 %v2012_v49, 0.0  ;;  %v8226_v49 = vld [vmem:[#allocation32_spill] sm:$0xff] }
 0x518   : > { %v2159_v25 = vmax.f32 %v8221_v3, %v2127_v1  ;;  %v2128_v18 = vmax.f32 %v2004_v43, 0.0  ;;  %v8227_v1 = vld [vmem:[#allocation47_spill] sm:$0xff]  ;;  %v8228_v3 = vld [vmem:[#allocation49_spill] sm:$0xff] }
 0x519   : > { %v2162_v28 = vmax.f32 %v8222_v5, %v2130_v15 }
 0x51a   : > { %v2160_v37 = vmax.f32 %v8223_v29, %v2128_v18  ;;  %v5314_v38 = vpop.f32.mrb[84].mxu0 }
 0x51b   : > { %v2025_v13 = vadd.f32 %v5314_v38, %v8224_v50  ;;  %v2016_v47 = vpop.f32.mrb[85].mxu0  ;;  %v8229_v38 = vld [vmem:[#allocation50_spill] sm:$0xff] }
 0x51c   : > { %v2017_v8 = vadd.f32 %v2016_v47, %v6496_v26  ;;  %v5315_v16 = vpop.f32.mrb[86].mxu0  ;;  %v8230_v47 = vld [vmem:[#allocation51_spill] sm:$0xff] }
 0x51d   : > { %v2133_v39 = vmax.f32 %v2025_v13, 0.0  ;;  %v2028_v51 = vadd.f32 %v5315_v16, %v8225_v44  ;;  %v2019_v12 = vpop.f32.mrb[87].mxu0  ;;  %v8231_v16 = vld [vmem:[#allocation37_spill] sm:$0xff] }
 0x51e   : > { %v2131_v41 = vmax.f32 %v2017_v8, 0.0  ;;  %v2020_v30 = vadd.f32 %v2019_v12, %v8226_v49 }
 0x51f   : > { %v6945_v43 = vmax.f32 %v8227_v1, %v2133_v39  ;;  %v2134_v15 = vmax.f32 %v2028_v51, 0.0  ;;  %v8232_v1 = vld [vmem:[#allocation38_spill] sm:$0xff] }
 0x520   : > { %v6948_v18 = vmax.f32 %v8228_v3, %v2131_v41  ;;  %v2132_v5 = vmax.f32 %v2020_v30, 0.0  ;;  %v8233_v3 = vld [vmem:[#allocation36_spill] sm:$0xff] }
 0x521   : > { %v6951_v29 = vmax.f32 %v8229_v38, %v2134_v15  ;;  %v8234_v15 = vld [vmem:[#allocation54_spill] sm:$0xff] }
 0x522   : > { %v6954_v14 = vmax.f32 %v8230_v47, %v2132_v5  ;;  %v5318_v13 = vpop.f32.mrb[88].mxu0 }
 0x523   : > { %v2041_v27 = vadd.f32 %v5318_v13, %v8231_v16  ;;  %v2032_v8 = vpop.f32.mrb[89].mxu0  ;;  %v8235_v13 = vld [vmem:[#allocation55_spill] sm:$0xff] }
 0x524   : > { %v2033_v12 = vadd.f32 %v2032_v8, %v6504_v31  ;;  %v5319_v10 = vpop.f32.mrb[90].mxu0 }
 0x525   : > { %v2137_v39 = vmax.f32 %v2041_v27, 0.0  ;;  %v2044_v51 = vadd.f32 %v5319_v10, %v8232_v1  ;;  %v2035_v23 = vpop.f32.mrb[91].mxu0  ;;  %v8236_v10 = vld [vmem:[#allocation56_spill] sm:$0xff] }
 0x526   : > { %v2135_v41 = vmax.f32 %v2033_v12, 0.0  ;;  %v2036_v30 = vadd.f32 %v2035_v23, %v8233_v3  ;;  %v5400_v61 = vpop.f32.mrb[80].mxu1 }
 0x527   : > { %v6961_v38 = vmax.f32 %v8234_v15, %v2137_v39  ;;  %v2138_v5 = vmax.f32 %v2044_v51, 0.0  ;;  %v2450_v47 = vadd.f32 %v5400_v61, %v8218_v21  ;;  %v2441_v2 = vpop.f32.mrb[81].mxu1  ;;  %v8237_v39 = vld [vmem:[#allocation58_spill] sm:$0xff] }
 0x528   : > { %v6965_v62 = vmax.f32 %v8235_v13, %v2135_v41  ;;  %v2136_v8 = vmax.f32 %v2036_v30, 0.0  ;;  %v2442_v27 = vadd.f32 %v2441_v2, %v6488_v19  ;;  %v5401_v56 = vpop.f32.mrb[82].mxu1  ;;  %v8239_v13 = vld [vmem:[#allocation42_spill] sm:$0xff] }
 0x529   : > { %v6969_v58 = vmax.f32 %v8236_v10, %v2138_v5  ;;  %v2570_v12 = vmax.f32 %v2450_v47, 0.0  ;;  %v2453_v23 = vadd.f32 %v5401_v56, %v6494_v24  ;;  %v2444_v55 = vpop.f32.mrb[83].mxu1 }
 0x52a   : > { %v6973_v15 = vmax.f32 %v8237_v39, %v2136_v8  ;;  %v2568_v51 = vmax.f32 %v2442_v27, 0.0  ;;  %v2445_v61 = vadd.f32 %v2444_v55, %v8219_v36  ;;  %v5322_v21 = vpop.f32.mrb[92].mxu0 }
 0x52b   : > { %v6976_v41 = vmax.f32 %v2161_v60, %v2570_v12  ;;  %v2571_v30 = vmax.f32 %v2453_v23, 0.0  ;;  %v2057_v2 = vadd.f32 %v5322_v21, %v8239_v13  ;;  %v2048_v19 = vpop.f32.mrb[93].mxu0  ;;  %v8241_v12 = vld [vmem:[#allocation40_spill] sm:$0xff] }
 0x52c   : > { %v6979_v57 = vmax.f32 %v2159_v25, %v2568_v51  ;;  %v2569_v5 = vmax.f32 %v2445_v61, 0.0  ;;  %v2049_v47 = vadd.f32 %v2048_v19, %v6521_v4  ;;  %v5323_v56 = vpop.f32.mrb[94].mxu0  ;;  %v8242_v21 = vld [vmem:[#allocation60_spill] sm:$0xff]  ;;  %v8243_v61 = vld [vmem:[#allocation62_spill] sm:$0xff] }
 0x52d   : > { %8238 = vst [vmem:[#allocation41_spill] sm:$0xff] %v6976_v41  ;;  %v6982_v10 = vmax.f32 %v2162_v28, %v2571_v30  ;;  %v2141_v8 = vmax.f32 %v2057_v2, 0.0  ;;  %v2060_v27 = vadd.f32 %v5323_v56, %v6549_v7  ;;  %v2051_v39 = vpop.f32.mrb[95].mxu0 }
 0x52e   : > { %v6985_v55 = vmax.f32 %v2160_v37, %v2569_v5  ;;  %v2139_v60 = vmax.f32 %v2049_v47, 0.0  ;;  %v2052_v23 = vadd.f32 %v2051_v39, %v8241_v12  ;;  %v5404_v41 = vpop.f32.mrb[84].mxu1  ;;  %v8244_v37 = vld [vmem:[#allocation63_spill] sm:$0xff] }
 0x52f   : > { %v6989_v36 = vmax.f32 %v8242_v21, %v2141_v8  ;;  %v2142_v25 = vmax.f32 %v2060_v27, 0.0  ;;  %v2466_v51 = vadd.f32 %v5404_v41, %v8224_v50  ;;  %v2457_v19 = vpop.f32.mrb[85].mxu1  ;;  %v8245_v8 = vld [vmem:[#allocation65_spill] sm:$0xff] }
 0x530   : > { %8240 = vst [vmem:[#allocation43_spill] sm:$0xff] %v6985_v55  ;;  %v6993_v28 = vmax.f32 %v8243_v61, %v2139_v60  ;;  %v2140_v30 = vmax.f32 %v2052_v23, 0.0  ;;  %v2458_v2 = vadd.f32 %v2457_v19, %v6496_v26  ;;  %v5405_v56 = vpop.f32.mrb[86].mxu1  ;;  %v8247_v19 = vld [vmem:[#allocation52_spill] sm:$0xff] }
 0x531   : > { %v6997_v5 = vmax.f32 %v8244_v37, %v2142_v25  ;;  %v2574_v47 = vmax.f32 %v2466_v51, 0.0  ;;  %v2469_v39 = vadd.f32 %v5405_v56, %v8225_v44  ;;  %v2460_v55 = vpop.f32.mrb[87].mxu1  ;;  %v8249_v56 = vld [vmem:[#allocation46_spill] sm:$0xff] }
 0x532   : > { %v7001_v21 = vmax.f32 %v8245_v8, %v2140_v30  ;;  %v2572_v27 = vmax.f32 %v2458_v2, 0.0  ;;  %v2461_v41 = vadd.f32 %v2460_v55, %v8226_v49  ;;  %v5326_v50 = vpop.f32.mrb[96].mxu0  ;;  %v8251_v55 = vld [vmem:[#allocation53_spill] sm:$0xff] }
 0x533   : > { %v7005_v60 = vmax.f32 %v6945_v43, %v2574_v47  ;;  %v2575_v23 = vmax.f32 %v2469_v39, 0.0  ;;  %v2073_v61 = vadd.f32 %v5326_v50, %v8247_v19  ;;  %v2064_v26 = vpop.f32.mrb[97].mxu0  ;;  %v8253_v50 = vld [vmem:[#allocation48_spill] sm:$0xff] }
 0x534   : > { %v7009_v25 = vmax.f32 %v6948_v18, %v2572_v27  ;;  %v2573_v51 = vmax.f32 %v2461_v41, 0.0  ;;  %v2065_v37 = vadd.f32 %v2064_v26, %v8249_v56  ;;  %v5327_v44 = vpop.f32.mrb[98].mxu0  ;;  %v8254_v18 = vld [vmem:[#allocation66_spill] sm:$0xff] }
 0x535   : > { %8246 = vst [vmem:[#allocation44_spill] sm:$0xff] %v7005_v60  ;;  %v7013_v30 = vmax.f32 %v6951_v29, %v2575_v23  ;;  %v2145_v2 = vmax.f32 %v2073_v61, 0.0  ;;  %v2076_v8 = vadd.f32 %v5327_v44, %v8251_v55  ;;  %v2067_v49 = vpop.f32.mrb[99].mxu0  ;;  %v8255_v29 = vld [vmem:[#allocation67_spill] sm:$0xff] }
 0x536   : > { %8248 = vst [vmem:[#allocation45_spill] sm:$0xff] %v7009_v25  ;;  %v7017_v43 = vmax.f32 %v6954_v14, %v2573_v51  ;;  %v2143_v47 = vmax.f32 %v2065_v37, 0.0  ;;  %v2068_v39 = vadd.f32 %v2067_v49, %v8253_v50  ;;  %v5408_v60 = vpop.f32.mrb[88].mxu1  ;;  %v8256_v14 = vld [vmem:[#allocation68_spill] sm:$0xff] }
 0x537   : > { %8250 = vst [vmem:[#allocation47_spill] sm:$0xff] %v7013_v30  ;;  %v7021_v27 = vmax.f32 %v8254_v18, %v2145_v2  ;;  %v2146_v41 = vmax.f32 %v2076_v8, 0.0  ;;  %v2482_v26 = vadd.f32 %v5408_v60, %v8231_v16  ;;  %v2473_v25 = vpop.f32.mrb[89].mxu1  ;;  %v8257_v2 = vld [vmem:[#allocation69_spill] sm:$0xff] }
 0x538   : > { %8252 = vst [vmem:[#allocation49_spill] sm:$0xff] %v7017_v43  ;;  %v7025_v23 = vmax.f32 %v8255_v29, %v2143_v47  ;;  %v2144_v61 = vmax.f32 %v2068_v39, 0.0  ;;  %v2474_v44 = vadd.f32 %v2473_v25, %v6504_v31  ;;  %v5409_v30 = vpop.f32.mrb[90].mxu1  ;;  %v8259_v25 = vld [vmem:[#allocation61_spill] sm:$0xff] }
 0x539   : > { %v7029_v51 = vmax.f32 %v8256_v14, %v2146_v41  ;;  %v2578_v37 = vmax.f32 %v2482_v26, 0.0  ;;  %v2485_v49 = vadd.f32 %v5409_v30, %v8232_v1  ;;  %v2476_v43 = vpop.f32.mrb[91].mxu1  ;;  %v8261_v30 = vld [vmem:[#allocation57_spill] sm:$0xff] }
 0x53a   : > { %v7033_v18 = vmax.f32 %v8257_v2, %v2144_v61  ;;  %v2576_v8 = vmax.f32 %v2474_v44, 0.0  ;;  %v2477_v60 = vadd.f32 %v2476_v43, %v8233_v3  ;;  %v5330_v16 = vpop.f32.mrb[100].mxu0  ;;  %v8263_v43 = vld [vmem:[#allocation64_spill] sm:$0xff] }
 0x53b   : > { %v7037_v47 = vmax.f32 %v6961_v38, %v2578_v37  ;;  %v2579_v39 = vmax.f32 %v2485_v49, 0.0  ;;  %v2089_v29 = vadd.f32 %v5330_v16, %v8259_v25  ;;  %v2080_v31 = vpop.f32.mrb[101].mxu0  ;;  %v8265_v16 = vld [vmem:[#allocation59_spill] sm:$0xff] }
 0x53c   : > { %v7041_v41 = vmax.f32 %v6965_v62, %v2576_v8  ;;  %v2577_v26 = vmax.f32 %v2477_v60, 0.0  ;;  %v2081_v14 = vadd.f32 %v2080_v31, %v8261_v30  ;;  %v5331_v1 = vpop.f32.mrb[102].mxu0  ;;  %v8266_v62 = vld [vmem:[#allocation71_spill] sm:$0xff] }
 0x53d   : > { %8258 = vst [vmem:[#allocation50_spill] sm:$0xff] %v7037_v47  ;;  %v7045_v61 = vmax.f32 %v6969_v58, %v2579_v39  ;;  %v2149_v44 = vmax.f32 %v2089_v29, 0.0  ;;  %v2092_v2 = vadd.f32 %v5331_v1, %v8263_v43  ;;  %v2083_v3 = vpop.f32.mrb[103].mxu0  ;;  %v8267_v58 = vld [vmem:[#allocation72_spill] sm:$0xff] }
 0x53e   : > { %8260 = vst [vmem:[#allocation51_spill] sm:$0xff] %v7041_v41  ;;  %v7049_v38 = vmax.f32 %v6973_v15, %v2577_v26  ;;  %v2147_v37 = vmax.f32 %v2081_v14, 0.0  ;;  %v2084_v49 = vadd.f32 %v2083_v3, %v8265_v16  ;;  %v5412_v47 = vpop.f32.mrb[92].mxu1  ;;  %v8268_v15 = vld [vmem:[#allocation73_spill] sm:$0xff] }
 0x53f   : > { %8262 = vst [vmem:[#allocation54_spill] sm:$0xff] %v7045_v61  ;;  %v7053_v8 = vmax.f32 %v8266_v62, %v2149_v44  ;;  %v2150_v60 = vmax.f32 %v2092_v2, 0.0  ;;  %v2498_v31 = vadd.f32 %v5412_v47, %v8239_v13  ;;  %v2489_v41 = vpop.f32.mrb[93].mxu1  ;;  %v8269_v44 = vld [vmem:[#allocation75_spill] sm:$0xff] }
 0x540   : > { %8264 = vst [vmem:[#allocation55_spill] sm:$0xff] %v7049_v38  ;;  %v7057_v39 = vmax.f32 %v8267_v58, %v2147_v37  ;;  %v2148_v29 = vmax.f32 %v2084_v49, 0.0  ;;  %v2490_v1 = vadd.f32 %v2489_v41, %v6521_v4  ;;  %v5413_v61 = vpop.f32.mrb[94].mxu1  ;;  %v8270_v41 = vld [vmem:[#allocation70_spill] sm:$0xff] }
 0x541   : > { %v7061_v26 = vmax.f32 %v8268_v15, %v2150_v60  ;;  %v2582_v14 = vmax.f32 %v2498_v31, 0.0  ;;  %v2501_v3 = vadd.f32 %v5413_v61, %v6549_v7  ;;  %v2492_v38 = vpop.f32.mrb[95].mxu1 }
 0x542   : > { %v7065_v62 = vmax.f32 %v8269_v44, %v2148_v29  ;;  %v2580_v2 = vmax.f32 %v2490_v1, 0.0  ;;  %v2493_v47 = vadd.f32 %v2492_v38, %v8241_v12  ;;  %v5334_v13 = vpop.f32.mrb[104].mxu0 }
 0x543   : > { %v7069_v37 = vmax.f32 %v6989_v36, %v2582_v14  ;;  %v2583_v49 = vmax.f32 %v2501_v3, 0.0  ;;  %v2105_v58 = vadd.f32 %v5334_v13, %v8270_v41  ;;  %v2096_v4 = vpop.f32.mrb[105].mxu0 }
 0x544   : > { %v7073_v60 = vmax.f32 %v6993_v28, %v2580_v2  ;;  %v2581_v31 = vmax.f32 %v2493_v47, 0.0  ;;  %v2097_v61 = vadd.f32 %v2096_v4, %v6659_v63  ;;  %v5335_v15 = vpop.f32.mrb[106].mxu0 }
 0x545   : > { %v7077_v29 = vmax.f32 %v6997_v5, %v2583_v49  ;;  %v2153_v1 = vmax.f32 %v2105_v58, 0.0  ;;  %v2108_v38 = vadd.f32 %v5335_v15, %v6693_v17  ;;  %v2099_v44 = vpop.f32.mrb[107].mxu0 }
 0x546   : > { %v7081_v36 = vmax.f32 %v7001_v21, %v2581_v31  ;;  %v2151_v14 = vmax.f32 %v2097_v61, 0.0  ;;  %v2100_v13 = vadd.f32 %v2099_v44, %v6668_v6  ;;  %v5416_v3 = vpop.f32.mrb[96].mxu1 }
 0x547   : > { %v7085_v28 = vmax.f32 %v6724_v20, %v2153_v1  ;;  %v2154_v2 = vmax.f32 %v2108_v38, 0.0  ;;  %v2514_v4 = vadd.f32 %v5416_v3, %v8247_v19  ;;  %v2505_v47 = vpop.f32.mrb[97].mxu1  ;;  %v8271_v20 = vld [vmem:[#allocation79_spill] sm:$0xff] }
 0x548   : > { %v7089_v5 = vmax.f32 %v6729_v42, %v2151_v14  ;;  %v2152_v49 = vmax.f32 %v2100_v13, 0.0  ;;  %v2506_v58 = vadd.f32 %v2505_v47, %v8249_v56  ;;  %v5417_v15 = vpop.f32.mrb[98].mxu1  ;;  %v8272_v13 = vld [vmem:[#allocation77_spill] sm:$0xff] }
 0x549   : > { %v7093_v21 = vmax.f32 %v6734_v22, %v2154_v2  ;;  %v2586_v31 = vmax.f32 %v2514_v4, 0.0  ;;  %v2517_v61 = vadd.f32 %v5417_v15, %v8251_v55  ;;  %v2508_v44 = vpop.f32.mrb[99].mxu1 }
 0x54a   : > { %v7097_v1 = vmax.f32 %v8271_v20, %v2152_v49  ;;  %v2584_v38 = vmax.f32 %v2506_v58, 0.0  ;;  %v2509_v3 = vadd.f32 %v2508_v44, %v8253_v50  ;;  %v5338_v19 = vpop.f32.mrb[108].mxu0 }
 0x54b   : > { %v7101_v42 = vmax.f32 %v7021_v27, %v2586_v31  ;;  %v2587_v14 = vmax.f32 %v2517_v61, 0.0  ;;  %v2121_v47 = vadd.f32 %v5338_v19, %v8272_v13  ;;  %v2112_v56 = vpop.f32.mrb[109].mxu0 }
 0x54c   : > { %v7105_v22 = vmax.f32 %v7025_v23, %v2584_v38  ;;  %v2585_v2 = vmax.f32 %v2509_v3, 0.0  ;;  %v2113_v4 = vadd.f32 %v2112_v56, %v6707_v45  ;;  %v5339_v15 = vpop.f32.mrb[110].mxu0 }
 0x54d   : > { %v7109_v49 = vmax.f32 %v7029_v51, %v2587_v14  ;;  %v2157_v58 = vmax.f32 %v2121_v47, 0.0  ;;  %v2124_v44 = vadd.f32 %v5339_v15, %v6737_v11  ;;  %v2115_v20 = vpop.f32.mrb[111].mxu0 }
 0x54e   : > { %v7113_v27 = vmax.f32 %v7033_v18, %v2585_v2  ;;  %v2155_v31 = vmax.f32 %v2113_v4, 0.0  ;;  %v2116_v19 = vadd.f32 %v2115_v20, %v6717_v9  ;;  %v5420_v61 = vpop.f32.mrb[100].mxu1 }
 0x54f   : > { %v7117_v23 = vmax.f32 %v6752_v48, %v2157_v58  ;;  %v2158_v38 = vmax.f32 %v2124_v44, 0.0  ;;  %v2530_v56 = vadd.f32 %v5420_v61, %v8259_v25  ;;  %v2521_v3 = vpop.f32.mrb[101].mxu1 }
 0x550   : > { %v7121_v51 = vmax.f32 %v6754_v52, %v2155_v31  ;;  %v2156_v14 = vmax.f32 %v2116_v19, 0.0  ;;  %v2522_v47 = vadd.f32 %v2521_v3, %v8261_v30  ;;  %v5421_v15 = vpop.f32.mrb[102].mxu1 }
 0x551   : > { %v7125_v18 = vmax.f32 %v6756_v53, %v2158_v38  ;;  %v2590_v2 = vmax.f32 %v2530_v56, 0.0  ;;  %v2533_v4 = vadd.f32 %v5421_v15, %v8263_v43  ;;  %v2524_v20 = vpop.f32.mrb[103].mxu1 }
 0x552   : > { %v7129_v48 = vmax.f32 %v6758_v0, %v2156_v14  ;;  %v2588_v58 = vmax.f32 %v2522_v47, 0.0  ;;  %v2525_v44 = vadd.f32 %v2524_v20, %v8265_v16  ;;  %v5442_v61 = vpop.f32.mrb[112].mxu0 }
 0x553   : > { %v7133_v52 = vmax.f32 %v7053_v8, %v2590_v2  ;;  %v2591_v31 = vmax.f32 %v2533_v4, 0.0  ;;  %v2693_v19 = vadd.f32 %v5442_v61, %v6258_v33  ;;  %v2684_v3 = vpop.f32.mrb[113].mxu0 }
 0x554   : > { %v7137_v53 = vmax.f32 %v7057_v39, %v2588_v58  ;;  %v2589_v38 = vmax.f32 %v2525_v44, 0.0  ;;  %v2685_v56 = vadd.f32 %v2684_v3, %v6256_v32  ;;  %v5443_v15 = vpop.f32.mrb[114].mxu0 }
 0x555   : > { %8273 = vst [vmem:[#allocation56_spill] sm:$0xff] %v7133_v52  ;;  %v7141_v0 = vmax.f32 %v7061_v26, %v2591_v31  ;;  %v2696_v14 = vadd.f32 %v5443_v15, %v6262_v35  ;;  %v2687_v47 = vpop.f32.mrb[115].mxu0  ;;  %v2717_v20 = vmax.f32 %v2693_v19, 0.0 }
 0x556   : > { %8274 = vst [vmem:[#allocation58_spill] sm:$0xff] %v7137_v53  ;;  %v7145_v8 = vmax.f32 %v7065_v62, %v2589_v38  ;;  %v5424_v2 = vpop.f32.mrb[104].mxu1  ;;  %v2688_v4 = vadd.f32 %v2687_v47, %v6260_v34  ;;  %v2715_v44 = vmax.f32 %v2685_v56, 0.0 }
 0x557   : > { %8275 = vst [vmem:[#allocation40_spill] sm:$0xff] %v7141_v0  ;;  %v2718_v61 = vmax.f32 %v2696_v14, 0.0  ;;  %v2546_v39 = vadd.f32 %v5424_v2, %v8270_v41  ;;  %v2537_v58 = vpop.f32.mrb[105].mxu1 }
 0x558   : > { %8276 = vst [vmem:[#allocation60_spill] sm:$0xff] %v7145_v8  ;;  %v2716_v3 = vmax.f32 %v2688_v4, 0.0  ;;  %v2538_v53 = vadd.f32 %v2537_v58, %v6659_v63  ;;  %v5425_v26 = vpop.f32.mrb[106].mxu1 }
 0x559   : > { %v2724_v31 = vpack.c.bf16 %v2718_v61, %v2717_v20  ;;  %v2594_v0 = vmax.f32 %v2546_v39, 0.0  ;;  %v2549_v15 = vadd.f32 %v5425_v26, %v6693_v17  ;;  %v2540_v52 = vpop.f32.mrb[107].mxu1 }
 0x55a   : > { %v2723_v62 = vpack.c.bf16 %v2716_v3, %v2715_v44  ;;  %v2592_v38 = vmax.f32 %v2538_v53, 0.0  ;;  %v2541_v8 = vadd.f32 %v2540_v52, %v6668_v6  ;;  %v5446_v47 = vpop.f32.mrb[116].mxu0 }
 0x55b   : > { %v7153_v19 = vmax.f32 %v7085_v28, %v2594_v0  ;;  %v2595_v14 = vmax.f32 %v2549_v15, 0.0  ;;  %v2709_v56 = vadd.f32 %v5446_v47, %v6272_v54  ;;  %v2700_v2 = vpop.f32.mrb[117].mxu0 }
 0x55c   : > { %v7157_v4 = vmax.f32 %v7089_v5, %v2592_v38  ;;  %v2593_v20 = vmax.f32 %v2541_v8, 0.0  ;;  %v2701_v61 = vadd.f32 %v2700_v2, %v6265_v40  ;;  %v5447_v39 = vpop.f32.mrb[118].mxu0  ;;  %5448 = vmatprep.subr.bf16.mxu0 %v2723_v62 }
 0x55d   : > { %v7161_v53 = vmax.f32 %v7093_v21, %v2595_v14  ;;  %v2712_v52 = vadd.f32 %v5447_v39, %v6275_v59  ;;  %v2703_v58 = vpop.f32.mrb[119].mxu0  ;;  %5449 = vmatpush3.bf16.msra.mxu0 %v2723_v62  ;;  %v2721_v5 = vmax.f32 %v2709_v56, 0.0 }
 0x55e   : > { %v7165_v28 = vmax.f32 %v7097_v1, %v2593_v20  ;;  %v5428_v0 = vpop.f32.mrb[108].mxu1  ;;  %v2704_v44 = vadd.f32 %v2703_v58, %v6269_v46  ;;  %5450 = vmatprep.subr.bf16.mxu0 %v2724_v31  ;;  %v2719_v15 = vmax.f32 %v2701_v61, 0.0 }
 0x55f   : > { %v2722_v8 = vmax.f32 %v2712_v52, 0.0  ;;  %v2562_v3 = vadd.f32 %v5428_v0, %v8272_v13  ;;  %v2553_v26 = vpop.f32.mrb[109].mxu1 }
 0x560   : > { %8277 = vst [vmem:[#allocation62_spill] sm:$0xff] %v7165_v28  ;;  %v2720_v38 = vmax.f32 %v2704_v44, 0.0  ;;  %v2554_v21 = vadd.f32 %v2553_v26, %v6707_v45  ;;  %v5429_v47 = vpop.f32.mrb[110].mxu1 }
 0x561   : > { %v2726_v14 = vpack.c.bf16 %v2722_v8, %v2721_v5  ;;  %v2598_v2 = vmax.f32 %v2562_v3, 0.0  ;;  %v2565_v62 = vadd.f32 %v5429_v47, %v6737_v11  ;;  %v2556_v1 = vpop.f32.mrb[111].mxu1  ;;  %5451 = vmatpush3.bf16.msra.mxu0 %v2724_v31 }
 0x562   : > { %v2725_v20 = vpack.c.bf16 %v2720_v38, %v2719_v15  ;;  %v2596_v39 = vmax.f32 %v2554_v21, 0.0  ;;  %v2557_v58 = vadd.f32 %v2556_v1, %v6717_v9  ;;  %v5879_v1 = vld [vmem:[%s7981_s3 + $0x10] sm:$0xff]  }
 0x563   : > { %v7173_v56 = vmax.f32 %v7117_v23, %v2598_v2  ;;  %v2599_v52 = vmax.f32 %v2565_v62, 0.0 }
 0x564   : > { %v7176_v61 = vmax.f32 %v7121_v51, %v2596_v39  ;;  %v2597_v0 = vmax.f32 %v2557_v58, 0.0  ;;  %5452 = vmatprep.subr.bf16.mxu0 %v2725_v20 }
 0x565   : > { %8278 = vst [vmem:[#allocation63_spill] sm:$0xff] %v7173_v56  ;;  %v7179_v44 = vmax.f32 %v7125_v18, %v2599_v52  ;;  %5453 = vmatpush3.bf16.msra.mxu0 %v2725_v20 }
 0x566   : > { %8279 = vst [vmem:[#allocation65_spill] sm:$0xff] %v7176_v61  ;;  %v7182_v5 = vmax.f32 %v7129_v48, %v2597_v0  ;;  %v5532_v31 = vpop.f32.mrb[112].mxu1  ;;  %5454 = vmatprep.subr.bf16.mxu0 %v2726_v14  ;;  %v5878_v48 = vld [vmem:[%s7981_s3 + $0x8] sm:$0xff]  }
 0x567   : > { %8280 = vst [vmem:[#allocation66_spill] sm:$0xff] %v7179_v44  ;;  %v3134_v8 = vadd.f32 %v5532_v31, %v6258_v33  ;;  %v3125_v3 = vpop.f32.mrb[113].mxu1 }
 0x568   : > { %8281 = vst [vmem:[#allocation67_spill] sm:$0xff] %v7182_v5  ;;  %v3126_v23 = vadd.f32 %v3125_v3, %v6256_v32  ;;  %v5533_v26 = vpop.f32.mrb[114].mxu1 }
 0x569   : > { %v3137_v51 = vadd.f32 %v5533_v26, %v6262_v35  ;;  %v3128_v15 = vpop.f32.mrb[115].mxu1  ;;  %5455 = vmatpush3.bf16.msra.mxu0 %v2726_v14  ;;  %v3158_v18 = vmax.f32 %v3134_v8, 0.0  ;;  %v8291_v35 = vld [vmem:[#allocation19_spill] sm:$0xff] }
 0x56a   : > { %v3129_v38 = vadd.f32 %v3128_v15, %v6260_v34  ;;  %v3156_v47 = vmax.f32 %v3126_v23, 0.0  ;;  %v8289_v34 = vld [vmem:[#allocation16_spill] sm:$0xff] }
 0x56b   : > { %v3159_v21 = vmax.f32 %v3137_v51, 0.0 }
 0x56c   : > { %v3157_v2 = vmax.f32 %v3129_v38, 0.0  ;;  %5457 = vmatmul.mubr.msk.bf16.vlgmr.msra.gmra.mrb[120].mxu0 %vm650_vm3, %v5878_v48  ;;  %v5880_v38 = vld [vmem:[%s7981_s3 + $0x18] sm:$0xff]  }
 0x56d   : > { %v3165_v62 = vpack.c.bf16 %v3159_v21, %v3158_v18  ;;  %5460 = vmatprep.mubr.msk.bf16.mxu0 %vm650_vm3, %v5879_v1  ;;  %v5881_v21 = vld [vmem:[%s7981_s3 + $0x20] sm:$0xff]  }
 0x56e   : > { %v3164_v14 = vpack.c.bf16 %v3157_v2, %v3156_v47  ;;  %v5536_v20 = vpop.f32.mrb[116].mxu1  ;;  %v5882_v2 = vld [vmem:[%s7981_s3 + $0x28] sm:$0xff]  }
 0x56f   : > { %v3150_v39 = vadd.f32 %v5536_v20, %v6272_v54  ;;  %v3141_v58 = vpop.f32.mrb[117].mxu1  ;;  %v5885_v20 = vld [vmem:[%s7983_s5] sm:$0xff]  }
 0x570   : > { %v3142_v52 = vadd.f32 %v3141_v58, %v6265_v40  ;;  %v5537_v0 = vpop.f32.mrb[118].mxu1  ;;  %5538 = vmatprep.subr.bf16.mxu1 %v3164_v14 }
 0x571   : > { %v3153_v31 = vadd.f32 %v5537_v0, %v6275_v59  ;;  %v3144_v8 = vpop.f32.mrb[119].mxu1  ;;  %5539 = vmatpush3.bf16.msra.mxu1 %v3164_v14  ;;  %v3162_v23 = vmax.f32 %v3150_v39, 0.0  ;;  %v5884_v14 = vld [vmem:[%s7981_s3 + $0x38] sm:$0xff]  }
 0x572   : > { %v3145_v3 = vadd.f32 %v3144_v8, %v6269_v46  ;;  %5540 = vmatprep.subr.bf16.mxu1 %v3165_v62  ;;  %v3160_v51 = vmax.f32 %v3142_v52, 0.0  ;;  %v8283_v52 = vld [vmem:[#allocation11_spill] sm:$0xff]  ;;  %v8284_v8 = vld [vmem:[#allocation14_spill] sm:$0xff] }
 0x573   : > { %v3163_v26 = vmax.f32 %v3153_v31, 0.0 }
 0x574   : > { %v3161_v15 = vmax.f32 %v3145_v3, 0.0  ;;  %5461 = vmatmul.mubr.msk.bf16.gmra.mrb[124].mxu0 %vm650_vm3, %v5880_v38 }
 0x575   : > { %v3167_v18 = vpack.c.bf16 %v3163_v26, %v3162_v23  ;;  %5541 = vmatpush3.bf16.msra.mxu1 %v3165_v62  ;;  %5464 = vmatprep.mubr.msk.bf16.mxu0 %vm650_vm3, %v5881_v21  ;;  %v5883_v62 = vld [vmem:[%s7981_s3 + $0x30] sm:$0xff]  }
 0x576   : > { %v3166_v47 = vpack.c.bf16 %v3161_v15, %v3160_v51  ;;  %v8285_v26 = vld [vmem:[#allocation12_spill] sm:$0xff] }
 0x578   : > { %5542 = vmatprep.subr.bf16.mxu1 %v3166_v47 }
 0x579   : > { %5543 = vmatpush3.bf16.msra.mxu1 %v3166_v47 }
 0x57a   : > { %5544 = vmatprep.subr.bf16.mxu1 %v3167_v18 }
 0x57c   : > { %5465 = vmatmul.mubr.msk.bf16.gmra.mrb[128].mxu0 %vm650_vm3, %v5882_v2 }
 0x57d   : > { %5545 = vmatpush3.bf16.msra.mxu1 %v3167_v18  ;;  %5468 = vmatprep.mubr.msk.bf16.mxu0 %vm650_vm3, %v5883_v62 }
 0x580   : > { %5547 = vmatmul.mubr.msk.bf16.vlgmr.msra.gmra.mrb[120].mxu1 %vm650_vm3, %v5878_v48 }
 0x581   : > { %5550 = vmatprep.mubr.msk.bf16.mxu1 %vm650_vm3, %v5879_v1  ;;  %v8282_v1 = vld [vmem:[#allocation13_spill] sm:$0xff] }
 0x584   : > { %5469 = vmatmul.mubr.msk.bf16.gmra.mrb[132].mxu0 %vm650_vm3, %v5884_v14 }
 0x585   : > { %5488 = vmatprep.mubr.bf16.mxu0 %v5885_v20 }
 0x588   : > { %5551 = vmatmul.mubr.msk.bf16.gmra.mrb[124].mxu1 %vm650_vm3, %v5880_v38 }
 0x589   : > { %5554 = vmatprep.mubr.msk.bf16.mxu1 %vm650_vm3, %v5881_v21 }
 0x590   : > { %5555 = vmatmul.mubr.msk.bf16.gmra.mrb[128].mxu1 %vm650_vm3, %v5882_v2 }
 0x591   : > { %5558 = vmatprep.mubr.msk.bf16.mxu1 %vm650_vm3, %v5883_v62 }
 0x598   : > { %5559 = vmatmul.mubr.msk.bf16.gmra.mrb[132].mxu1 %vm650_vm3, %v5884_v14  ;;  %v8286_v14 = vld [vmem:[#allocation17_spill] sm:$0xff] }
 0x599   : > { %5578 = vmatprep.mubr.bf16.mxu1 %v5885_v20 }
 0x63f   : > { %v5458_v48 = vpop.f32.mrb[120].mxu0 }
 0x640   : > { %v2770_v39 = vadd.f32 %v5458_v48, %v8282_v1  ;;  %v2761_v58 = vpop.f32.mrb[121].mxu0  ;;  %v8287_v48 = vld [vmem:[#allocation15_spill] sm:$0xff] }
 0x641   : > { %v2762_v0 = vadd.f32 %v2761_v58, %v8283_v52  ;;  %v5459_v31 = vpop.f32.mrb[122].mxu0  ;;  %v8288_v58 = vld [vmem:[#allocation18_spill] sm:$0xff] }
 0x642   : > { %v2773_v3 = vadd.f32 %v5459_v31, %v8284_v8  ;;  %v2764_v23 = vpop.f32.mrb[123].mxu0  ;;  %v2826_v15 = vmax.f32 %v2770_v39, 0.0 }
 0x643   : > { %v2765_v51 = vadd.f32 %v2764_v23, %v8285_v26  ;;  %v2824_v18 = vmax.f32 %v2762_v0, 0.0 }
 0x644   : > { %v2827_v38 = vmax.f32 %v2773_v3, 0.0 }
 0x645   : > { %v2825_v21 = vmax.f32 %v2765_v51, 0.0 }
 0x646   : > { %v2841_v47 = vpack.c.bf16 %v2827_v38, %v2826_v15 }
 0x647   : > { %v2840_v2 = vpack.c.bf16 %v2825_v21, %v2824_v18  ;;  %v5462_v62 = vpop.f32.mrb[124].mxu0  ;;  %v8290_v21 = vld [vmem:[#allocation21_spill] sm:$0xff] }
 0x648   : > { %v2786_v20 = vadd.f32 %v5462_v62, %v8286_v14  ;;  %v2777_v46 = vpop.f32.mrb[125].mxu0 }
 0x649   : > { %v2778_v59 = vadd.f32 %v2777_v46, %v8287_v48  ;;  %v5463_v40 = vpop.f32.mrb[126].mxu0  ;;  %5472 = vmatprep.subr.bf16.mxu0 %v2840_v2 }
 0x64a   : > { %v2789_v54 = vadd.f32 %v5463_v40, %v8288_v58  ;;  %v2780_v31 = vpop.f32.mrb[127].mxu0  ;;  %5473 = vmatpush3.bf16.msra.mxu0 %v2840_v2  ;;  %v2830_v39 = vmax.f32 %v2786_v20, 0.0  ;;  %v8292_v40 = vld [vmem:[#allocation22_spill] sm:$0xff] }
 0x64b   : > { %v2781_v23 = vadd.f32 %v2780_v31, %v8289_v34  ;;  %5474 = vmatprep.subr.bf16.mxu0 %v2841_v47  ;;  %v2828_v3 = vmax.f32 %v2778_v59, 0.0  ;;  %v8293_v31 = vld [vmem:[#allocation20_spill] sm:$0xff] }
 0x64c   : > { %v2831_v0 = vmax.f32 %v2789_v54, 0.0 }
 0x64d   : > { %v2829_v51 = vmax.f32 %v2781_v23, 0.0 }
 0x64e   : > { %v2843_v15 = vpack.c.bf16 %v2831_v0, %v2830_v39  ;;  %5475 = vmatpush3.bf16.msra.mxu0 %v2841_v47 }
 0x64f   : > { %v2842_v38 = vpack.c.bf16 %v2829_v51, %v2828_v3  ;;  %v5466_v18 = vpop.f32.mrb[128].mxu0 }
 0x650   : > { %v2802_v62 = vadd.f32 %v5466_v18, %v8290_v21  ;;  %v2793_v46 = vpop.f32.mrb[129].mxu0 }
 0x651   : > { %v2794_v32 = vadd.f32 %v2793_v46, %v8291_v35  ;;  %v5467_v33 = vpop.f32.mrb[130].mxu0  ;;  %5476 = vmatprep.subr.bf16.mxu0 %v2842_v38 }
 0x652   : > { %v2805_v2 = vadd.f32 %v5467_v33, %v8292_v40  ;;  %v2796_v5 = vpop.f32.mrb[131].mxu0  ;;  %5477 = vmatpush3.bf16.msra.mxu0 %v2842_v38  ;;  %v2834_v59 = vmax.f32 %v2802_v62, 0.0 }
 0x653   : > { %v2797_v20 = vadd.f32 %v2796_v5, %v8293_v31  ;;  %v5548_v54 = vpop.f32.mrb[120].mxu1  ;;  %5478 = vmatprep.subr.bf16.mxu0 %v2843_v15  ;;  %v2832_v0 = vmax.f32 %v2794_v32, 0.0 }
 0x654   : > { %v2835_v23 = vmax.f32 %v2805_v2, 0.0  ;;  %v3211_v47 = vadd.f32 %v5548_v54, %v8282_v1  ;;  %v3202_v39 = vpop.f32.mrb[121].mxu1  ;;  %v8294_v2 = vld [vmem:[#allocation25_spill] sm:$0xff] }
 0x655   : > { %v2833_v3 = vmax.f32 %v2797_v20, 0.0  ;;  %v3203_v51 = vadd.f32 %v3202_v39, %v8283_v52  ;;  %v5549_v18 = vpop.f32.mrb[122].mxu1  ;;  %v8295_v20 = vld [vmem:[#allocation23_spill] sm:$0xff] }
 0x656   : > { %v2845_v46 = vpack.c.bf16 %v2835_v23, %v2834_v59  ;;  %v3214_v44 = vadd.f32 %v5549_v18, %v8284_v8  ;;  %v3205_v33 = vpop.f32.mrb[123].mxu1  ;;  %5479 = vmatpush3.bf16.msra.mxu0 %v2843_v15  ;;  %v3267_v56 = vmax.f32 %v3211_v47, 0.0  ;;  %v8296_v23 = vld [vmem:[#allocation26_spill] sm:$0xff] }
 0x657   : > { %v2844_v38 = vpack.c.bf16 %v2833_v3, %v2832_v0  ;;  %v3206_v5 = vadd.f32 %v3205_v33, %v8285_v26  ;;  %v5470_v61 = vpop.f32.mrb[132].mxu0  ;;  %v3265_v1 = vmax.f32 %v3203_v51, 0.0  ;;  %v8297_v0 = vld [vmem:[#allocation24_spill] sm:$0xff] }
 0x658   : > { %v3268_v62 = vmax.f32 %v3214_v44, 0.0  ;;  %v2818_v9 = vadd.f32 %v5470_v61, %v8294_v2  ;;  %v2809_v54 = vpop.f32.mrb[133].mxu0 }
 0x659   : > { %v3266_v32 = vmax.f32 %v3206_v5, 0.0  ;;  %v2810_v11 = vadd.f32 %v2809_v54, %v8295_v20  ;;  %v5471_v39 = vpop.f32.mrb[134].mxu0  ;;  %5480 = vmatprep.subr.bf16.mxu0 %v2844_v38 }
 0x65a   : > { %v3282_v59 = vpack.c.bf16 %v3268_v62, %v3267_v56  ;;  %v2821_v18 = vadd.f32 %v5471_v39, %v8296_v23  ;;  %v2812_v8 = vpop.f32.mrb[135].mxu0  ;;  %5481 = vmatpush3.bf16.msra.mxu0 %v2844_v38  ;;  %v2838_v44 = vmax.f32 %v2818_v9, 0.0 }
 0x65b   : > { %v3281_v15 = vpack.c.bf16 %v3266_v32, %v3265_v1  ;;  %v2813_v3 = vadd.f32 %v2812_v8, %v8297_v0  ;;  %v5552_v33 = vpop.f32.mrb[124].mxu1  ;;  %5482 = vmatprep.subr.bf16.mxu0 %v2845_v46  ;;  %v2836_v5 = vmax.f32 %v2810_v11, 0.0  ;;  %v4666_v11 = vld [vmem:[%s6036_s18 + $0x1b8] sm:$0xff] }
 0x65c   : > { %v2839_v47 = vmax.f32 %v2821_v18, 0.0  ;;  %v3227_v61 = vadd.f32 %v5552_v33, %v8286_v14  ;;  %v3218_v51 = vpop.f32.mrb[125].mxu1  ;;  %v4665_v33 = vld [vmem:[%s6036_s18 + $0x1b0] sm:$0xff] }
 0x65d   : > { %v2837_v54 = vmax.f32 %v2813_v3, 0.0  ;;  %v3219_v56 = vadd.f32 %v3218_v51, %v8287_v48  ;;  %v5553_v62 = vpop.f32.mrb[126].mxu1  ;;  %5562 = vmatprep.subr.bf16.mxu1 %v3281_v15 }
 0x65e   : > { %v2847_v39 = vpack.c.bf16 %v2839_v47, %v2838_v44  ;;  %v3230_v1 = vadd.f32 %v5553_v62, %v8288_v58  ;;  %v3221_v38 = vpop.f32.mrb[127].mxu1  ;;  %5563 = vmatpush3.bf16.msra.mxu1 %v3281_v15  ;;  %5483 = vmatpush3.bf16.msra.mxu0 %v2845_v46  ;;  %v3271_v32 = vmax.f32 %v3227_v61, 0.0  ;;  %v3524_v46 = vpack.c.bf16 %v4666_v11, %v4665_v33  ;;  %v4667_v62 = vld [vmem:[%s6036_s18 + $0x1c0] sm:$0xff]  ;;  %v7265_v11 = vld [vmem:[%s7983_s5 + $0x8] sm:$0xff]  }
 0x65f   : > { %v2846_v8 = vpack.c.bf16 %v2837_v54, %v2836_v5  ;;  %v3222_v9 = vadd.f32 %v3221_v38, %v8289_v34  ;;  %5564 = vmatprep.subr.bf16.mxu1 %v3282_v59  ;;  %v3269_v3 = vmax.f32 %v3219_v56, 0.0  ;;  %v4668_v56 = vld [vmem:[%s6036_s18 + $0x1c8] sm:$0xff] }
 0x660   : > { %v3272_v18 = vmax.f32 %v3230_v1, 0.0 }
 0x661   : > { %v3270_v51 = vmax.f32 %v3222_v9, 0.0  ;;  %5484 = vmatprep.subr.bf16.mxu0 %v2846_v8 }
 0x662   : > { %v3284_v48 = vpack.c.bf16 %v3272_v18, %v3271_v32  ;;  %5565 = vmatpush3.bf16.msra.mxu1 %v3282_v59  ;;  %5485 = vmatpush3.bf16.msra.mxu0 %v2846_v8  ;;  %v3525_v32 = vpack.c.bf16 %v4668_v56, %v4667_v62 }
 0x663   : > { %v3283_v44 = vpack.c.bf16 %v3270_v51, %v3269_v3  ;;  %v5556_v47 = vpop.f32.mrb[128].mxu1  ;;  %5486 = vmatprep.subr.bf16.mxu0 %v2847_v39  ;;  %v4669_v3 = vld [vmem:[%s6036_s18 + $0x1d0] sm:$0xff]  ;;  %v4670_v51 = vld [vmem:[%s6036_s18 + $0x1d8] sm:$0xff] }
 0x664   : > { %v3243_v15 = vadd.f32 %v5556_v47, %v8290_v21  ;;  %v3234_v5 = vpop.f32.mrb[129].mxu1 }
 0x665   : > { %v3235_v61 = vadd.f32 %v3234_v5, %v8291_v35  ;;  %v5557_v54 = vpop.f32.mrb[130].mxu1  ;;  %5566 = vmatprep.subr.bf16.mxu1 %v3283_v44  ;;  %v8313_v35 = vld [vmem:[#allocation35_spill] sm:$0xff] }
 0x666   : > { %v3246_v1 = vadd.f32 %v5557_v54, %v8292_v40  ;;  %v3237_v38 = vpop.f32.mrb[131].mxu1  ;;  %5567 = vmatpush3.bf16.msra.mxu1 %v3283_v44  ;;  %5487 = vmatpush3.bf16.msra.mxu0 %v2847_v39  ;;  %v3275_v8 = vmax.f32 %v3243_v15, 0.0  ;;  %v5887_v44 = vld [vmem:[%s7983_s5 + $0x10] sm:$0xff]   ;;  %v3526_v54 = vpack.c.bf16 %v4670_v51, %v4669_v3 }
 0x667   : > { %v3238_v59 = vadd.f32 %v3237_v38, %v8293_v31  ;;  %5568 = vmatprep.subr.bf16.mxu1 %v3284_v48  ;;  %5610 = vmatprep.subr.bf16.mxu0 %v3524_v46  ;;  %v3273_v18 = vmax.f32 %v3235_v61, 0.0  ;;  %v4672_v38 = vld [vmem:[%s6036_s18 + $0x1e8] sm:$0xff] }
 0x668   : > { %v3276_v9 = vmax.f32 %v3246_v1, 0.0  ;;  %v4671_v1 = vld [vmem:[%s6036_s18 + $0x1e0] sm:$0xff] }
 0x669   : > { %v3274_v33 = vmax.f32 %v3238_v59, 0.0  ;;  %5489 = vmatmul.mubr.bf16.vlgmr.msra.gmra.mrb[136].mxu0 %v7265_v11 }
 0x66a   : > { %v3286_v39 = vpack.c.bf16 %v3276_v9, %v3275_v8  ;;  %5569 = vmatpush3.bf16.msra.mxu1 %v3284_v48  ;;  %5492 = vmatprep.mubr.bf16.mxu0 %v5887_v44  ;;  %v4673_v48 = vld [vmem:[%s6036_s18 + $0x1f0] sm:$0x7] }
 0x66b   : > { %v3285_v47 = vpack.c.bf16 %v3274_v33, %v3273_v18  ;;  %v5560_v15 = vpop.f32.mrb[132].mxu1  ;;  %5611 = vmatpush3.bf16.msra.mxu0 %v3524_v46  ;;  %v3527_v33 = vpack.c.bf16 %v4672_v38, %v4671_v1  ;;  %v3528_v3 = vpack.c.bf16 %v4673_v48, %v4673_v48  ;;  %v4687_v1 = vld [vmem:[%s6036_s18 + $0x200] sm:$0xff] }
 0x66c   : > { %v3259_v5 = vadd.f32 %v5560_v15, %v8294_v2  ;;  %v3250_v61 = vpop.f32.mrb[133].mxu1  ;;  %5612 = vmatprep.subr.bf16.mxu0 %v3525_v32 }
 0x66d   : > { %v3251_v62 = vadd.f32 %v3250_v61, %v8295_v20  ;;  %v5561_v56 = vpop.f32.mrb[134].mxu1  ;;  %5570 = vmatprep.subr.bf16.mxu1 %v3285_v47  ;;  %v5888_v61 = vld [vmem:[%s7983_s5 + $0x18] sm:$0xff]   ;;  %v8306_v20 = vld [vmem:[#allocation34_spill] sm:$0xff] }
 0x66e   : > { %v3262_v59 = vadd.f32 %v5561_v56, %v8296_v23  ;;  %v3253_v8 = vpop.f32.mrb[135].mxu1  ;;  %5571 = vmatpush3.bf16.msra.mxu1 %v3285_v47  ;;  %v3279_v46 = vmax.f32 %v3259_v5, 0.0  ;;  %v4686_v5 = vld [vmem:[%s6036_s18 + $0x1f8] sm:$0xff] }
 0x66f   : > { %v3254_v9 = vadd.f32 %v3253_v8, %v8297_v0  ;;  %5572 = vmatprep.subr.bf16.mxu1 %v3286_v39  ;;  %5613 = vmatpush3.bf16.msra.mxu0 %v3525_v32  ;;  %v3277_v51 = vmax.f32 %v3251_v62, 0.0  ;;  %v5889_v32 = vld [vmem:[%s7983_s5 + $0x20] sm:$0xff]   ;;  %v3965_v48 = vpack.c.bf16 %v4687_v1, %v4686_v5  ;;  %v5891_v8 = vld [vmem:[%s7983_s5 + $0x30] sm:$0xff]   ;;  %v5894_v1 = vld [vmem:[%s7983_s5 + $0x48] sm:$0xff]  }
 0x670   : > { %v3280_v18 = vmax.f32 %v3262_v59, 0.0  ;;  %5614 = vmatprep.subr.bf16.mxu0 %v3526_v54  ;;  %v8298_v62 = vld [vmem:[#allocation2_spill] sm:$0xff]  ;;  %v4689_v59 = vld [vmem:[%s6036_s18 + $0x210] sm:$0xff]  ;;  %v8305_v0 = vld [vmem:[#allocation31_spill] sm:$0xff] }
 0x671   : > { %v3278_v15 = vmax.f32 %v3254_v9, 0.0  ;;  %5493 = vmatmul.mubr.bf16.gmra.mrb[140].mxu0 %v5888_v61  ;;  %v3530_v38 = vand.u32 %v3528_v3, %v8298_v62  ;;  %v4692_v3 = vld [vmem:[%s6036_s18 + $0x228] sm:$0xff] }
 0x672   : > { %v3288_v56 = vpack.c.bf16 %v3280_v18, %v3279_v46  ;;  %5573 = vmatpush3.bf16.msra.mxu1 %v3286_v39  ;;  %5496 = vmatprep.mubr.bf16.mxu0 %v5889_v32  ;;  %v4688_v39 = vld [vmem:[%s6036_s18 + $0x208] sm:$0xff]  ;;  %v4690_v46 = vld [vmem:[%s6036_s18 + $0x218] sm:$0xff]  ;;  %v4691_v18 = vld [vmem:[%s6036_s18 + $0x220] sm:$0xff] }
 0x673   : > { %v3287_v47 = vpack.c.bf16 %v3278_v15, %v3277_v51  ;;  %5615 = vmatpush3.bf16.msra.mxu0 %v3526_v54  ;;  %v5890_v54 = vld [vmem:[%s7983_s5 + $0x28] sm:$0xff]   ;;  %v3966_v9 = vpack.c.bf16 %v4689_v59, %v4688_v39  ;;  %v4693_v51 = vld [vmem:[%s6036_s18 + $0x230] sm:$0xff]  ;;  %v4694_v15 = vld [vmem:[%s6036_s18 + $0x238] sm:$0x7] }
 0x674   : > { %5616 = vmatprep.subr.bf16.mxu0 %v3527_v33  ;;  %v5900_v39 = vld [vmem:[%s7983_s5 + $0x78] sm:$0xff]   ;;  %v5901_v59 = vld [vmem:[%s7979_s1] sm:$0xff]  }
 0x675   : > { %5574 = vmatprep.subr.bf16.mxu1 %v3287_v47 }
 0x676   : > { %5575 = vmatpush3.bf16.msra.mxu1 %v3287_v47  ;;  %v5893_v47 = vld [vmem:[%s7983_s5 + $0x40] sm:$0xff]  }
 0x677   : > { %5576 = vmatprep.subr.bf16.mxu1 %v3288_v56  ;;  %5617 = vmatpush3.bf16.msra.mxu0 %v3527_v33  ;;  %v3967_v33 = vpack.c.bf16 %v4691_v18, %v4690_v46  ;;  %v5905_v46 = vld [vmem:[%s7981_s3] sm:$0xff]  }
 0x678   : > { %5618 = vmatprep.subr.bf16.mxu0 %v3530_v38 }
 0x679   : > { %5497 = vmatmul.mubr.bf16.gmra.mrb[144].mxu0 %v5890_v54 }
 0x67a   : > { %5577 = vmatpush3.bf16.msra.mxu1 %v3288_v56  ;;  %5500 = vmatprep.mubr.bf16.mxu0 %v5891_v8  ;;  %v5892_v56 = vld [vmem:[%s7983_s5 + $0x38] sm:$0xff]  }
 0x67b   : > { %5700 = vmatprep.subr.bf16.mxu1 %v3965_v48  ;;  %5619 = vmatpush3.bf16.msra.mxu0 %v3530_v38  ;;  %v5895_v38 = vld [vmem:[%s7983_s5 + $0x50] sm:$0xff]  }
 0x67d   : > { %5579 = vmatmul.mubr.bf16.vlgmr.msra.gmra.mrb[136].mxu1 %v7265_v11  ;;  %v3968_v11 = vpack.c.bf16 %v4693_v51, %v4692_v3 }
 0x67e   : > { %5582 = vmatprep.mubr.bf16.mxu1 %v5887_v44  ;;  %5701 = vmatpush3.bf16.msra.mxu1 %v3965_v48  ;;  %v3969_v44 = vpack.c.bf16 %v4694_v15, %v4694_v15  ;;  %v5899_v48 = vld [vmem:[%s7983_s5 + $0x70] sm:$0xff]   ;;  %v8300_v15 = vld [vmem:[#allocation27_spill] sm:$0xff] }
 0x67f   : > { %5702 = vmatprep.subr.bf16.mxu1 %v3966_v9 }
 0x680   : > { %v3971_v5 = vand.u32 %v3969_v44, %v8298_v62  ;;  %v5898_v62 = vld [vmem:[%s7983_s5 + $0x68] sm:$0xff]  }
 0x681   : > { %5501 = vmatmul.mubr.bf16.gmra.mrb[148].mxu0 %v5892_v56 }
 0x682   : > { %5504 = vmatprep.mubr.bf16.mxu0 %v5893_v47  ;;  %5703 = vmatpush3.bf16.msra.mxu1 %v3966_v9  ;;  %v5904_v9 = vld [vmem:[%s7979_s1 + $0x18] sm:$0xff]  }
 0x683   : > { %5704 = vmatprep.subr.bf16.mxu1 %v3967_v33 }
 0x685   : > { %5583 = vmatmul.mubr.bf16.gmra.mrb[140].mxu1 %v5888_v61  ;;  %v5896_v61 = vld [vmem:[%s7983_s5 + $0x58] sm:$0xff]  }
 0x686   : > { %5586 = vmatprep.mubr.bf16.mxu1 %v5889_v32  ;;  %5705 = vmatpush3.bf16.msra.mxu1 %v3967_v33  ;;  %v5897_v32 = vld [vmem:[%s7983_s5 + $0x60] sm:$0xff]   ;;  %v8299_v33 = vld [vmem:[#allocation29_spill] sm:$0xff] }
 0x687   : > { %5706 = vmatprep.subr.bf16.mxu1 %v3968_v11 }
 0x689   : > { %5505 = vmatmul.mubr.bf16.gmra.mrb[152].mxu0 %v5894_v1 }
 0x68a   : > { %5508 = vmatprep.mubr.bf16.mxu0 %v5895_v38  ;;  %5707 = vmatpush3.bf16.msra.mxu1 %v3968_v11 }
 0x68b   : > { %5708 = vmatprep.subr.bf16.mxu1 %v3971_v5 }
 0x68d   : > { %5587 = vmatmul.mubr.bf16.gmra.mrb[144].mxu1 %v5890_v54  ;;  %v5902_v54 = vld [vmem:[%s7979_s1 + $0x8] sm:$0xff]  }
 0x68e   : > { %5590 = vmatprep.mubr.bf16.mxu1 %v5891_v8  ;;  %5709 = vmatpush3.bf16.msra.mxu1 %v3971_v5  ;;  %v5903_v8 = vld [vmem:[%s7979_s1 + $0x10] sm:$0xff]  }
 0x691   : > { %5509 = vmatmul.mubr.bf16.gmra.mrb[156].mxu0 %v5896_v61 }
 0x692   : > { %5512 = vmatprep.mubr.bf16.mxu0 %v5897_v32 }
 0x695   : > { %5591 = vmatmul.mubr.bf16.gmra.mrb[148].mxu1 %v5892_v56 }
 0x696   : > { %5594 = vmatprep.mubr.bf16.mxu1 %v5893_v47 }
 0x699   : > { %5513 = vmatmul.mubr.bf16.gmra.mrb[160].mxu0 %v5898_v62 }
 0x69a   : > { %5516 = vmatprep.mubr.bf16.mxu0 %v5899_v48 }
 0x69d   : > { %5595 = vmatmul.mubr.bf16.gmra.mrb[152].mxu1 %v5894_v1 }
 0x69e   : > { %5598 = vmatprep.mubr.bf16.mxu1 %v5895_v38  ;;  %v8301_v38 = vld [vmem:[#allocation28_spill] sm:$0xff] }
 0x6a1   : > { %5517 = vmatmul.mubr.bf16.gmra.mrb[164].mxu0 %v5900_v39 }
 0x6a2   : > { %5620 = vmatprep.mubr.msk.bf16.mxu0 %vm401_vm0, %v5901_v59 }
 0x6a5   : > { %5599 = vmatmul.mubr.bf16.gmra.mrb[156].mxu1 %v5896_v61 }
 0x6a6   : > { %5602 = vmatprep.mubr.bf16.mxu1 %v5897_v32  ;;  %v8302_v32 = vld [vmem:[#allocation41_spill] sm:$0xff] }
 0x6a9   : > { %5621 = vmatmul.mubr.msk.bf16.vlgmr.msra.gmra.mrb[168].mxu0 %vm401_vm0, %v5902_v54 }
 0x6aa   : > { %5624 = vmatprep.mubr.msk.bf16.mxu0 %vm401_vm0, %v5903_v8 }
 0x6ad   : > { %5603 = vmatmul.mubr.bf16.gmra.mrb[160].mxu1 %v5898_v62 }
 0x6ae   : > { %5606 = vmatprep.mubr.bf16.mxu1 %v5899_v48 }
 0x6b1   : > { %5625 = vmatmul.mubr.msk.bf16.gmra.mrb[172].mxu0 %vm401_vm0, %v5904_v9 }
 0x6b2   : > { %5636 = vmatprep.mubr.msk.bf16.mxu0 %vm650_vm3, %v5905_v46 }
 0x6b5   : > { %5607 = vmatmul.mubr.bf16.gmra.mrb[164].mxu1 %v5900_v39 }
 0x6b6   : > { %5710 = vmatprep.mubr.msk.bf16.mxu1 %vm401_vm0, %v5901_v59 }
 0x6bd   : > { %5711 = vmatmul.mubr.msk.bf16.vlgmr.msra.gmra.mrb[168].mxu1 %vm401_vm0, %v5902_v54 }
 0x6be   : > { %5714 = vmatprep.mubr.msk.bf16.mxu1 %vm401_vm0, %v5903_v8  ;;  %v8303_v8 = vld [vmem:[#allocation43_spill] sm:$0xff] }
 0x6c5   : > { %5715 = vmatmul.mubr.msk.bf16.gmra.mrb[172].mxu1 %vm401_vm0, %v5904_v9 }
 0x6c6   : > { %5726 = vmatprep.mubr.msk.bf16.mxu1 %vm650_vm3, %v5905_v46 }
 0x73c   : > { %v5490_v18 = vpop.f32.mrb[136].mxu0 }
 0x73d   : > { %v2891_v3 = vadd.f32 %v5490_v18, %v8299_v33  ;;  %v2882_v51 = vpop.f32.mrb[137].mxu0  ;;  %v8304_v18 = vld [vmem:[#allocation33_spill] sm:$0xff] }
 0x73e   : > { %v2883_v56 = vadd.f32 %v2882_v51, %v8300_v15  ;;  %v5491_v47 = vpop.f32.mrb[138].mxu0 }
 0x73f   : > { %v3011_v11 = vmax.f32 %v2891_v3, 0.0  ;;  %v2894_v44 = vadd.f32 %v5491_v47, %v6494_v24  ;;  %v2885_v5 = vpop.f32.mrb[139].mxu0 }
 0x740   : > { %v3009_v1 = vmax.f32 %v2883_v56, 0.0  ;;  %v2886_v61 = vadd.f32 %v2885_v5, %v8301_v38 }
 0x741   : > { %v3043_v62 = vmax.f32 %v8302_v32, %v3011_v11  ;;  %v3012_v48 = vmax.f32 %v2894_v44, 0.0  ;;  %v8307_v44 = vld [vmem:[#allocation32_spill] sm:$0xff] }
 0x742   : > { %v3041_v39 = vmax.f32 %v6979_v57, %v3009_v1  ;;  %v3010_v59 = vmax.f32 %v2886_v61, 0.0  ;;  %v8308_v57 = vld [vmem:[#allocation44_spill] sm:$0xff]  ;;  %v8309_v61 = vld [vmem:[#allocation45_spill] sm:$0xff] }
 0x743   : > { %v3044_v54 = vmax.f32 %v6982_v10, %v3012_v48 }
 0x744   : > { %v3042_v9 = vmax.f32 %v8303_v8, %v3010_v59  ;;  %v5494_v46 = vpop.f32.mrb[140].mxu0  ;;  %v8310_v8 = vld [vmem:[#allocation47_spill] sm:$0xff] }
 0x745   : > { %v2907_v51 = vadd.f32 %v5494_v46, %v8304_v18  ;;  %v2898_v3 = vpop.f32.mrb[141].mxu0 }
 0x746   : > { %v2899_v47 = vadd.f32 %v2898_v3, %v8305_v0  ;;  %v5495_v23 = vpop.f32.mrb[142].mxu0  ;;  %v8311_v3 = vld [vmem:[#allocation49_spill] sm:$0xff] }
 0x747   : > { %v3015_v56 = vmax.f32 %v2907_v51, 0.0  ;;  %v2910_v5 = vadd.f32 %v5495_v23, %v8306_v20  ;;  %v2901_v2 = vpop.f32.mrb[143].mxu0  ;;  %v8312_v23 = vld [vmem:[#allocation37_spill] sm:$0xff] }
 0x748   : > { %v3013_v11 = vmax.f32 %v2899_v47, 0.0  ;;  %v2902_v32 = vadd.f32 %v2901_v2, %v8307_v44 }
 0x749   : > { %v7369_v1 = vmax.f32 %v8308_v57, %v3015_v56  ;;  %v3016_v10 = vmax.f32 %v2910_v5, 0.0  ;;  %v8314_v57 = vld [vmem:[#allocation38_spill] sm:$0xff] }
 0x74a   : > { %v7372_v48 = vmax.f32 %v8309_v61, %v3013_v11  ;;  %v3014_v59 = vmax.f32 %v2902_v32, 0.0  ;;  %v8315_v61 = vld [vmem:[#allocation36_spill] sm:$0xff] }
 0x74b   : > { %v7375_v46 = vmax.f32 %v8310_v8, %v3016_v10  ;;  %v8316_v10 = vld [vmem:[#allocation50_spill] sm:$0xff] }
 0x74c   : > { %v7378_v31 = vmax.f32 %v8311_v3, %v3014_v59  ;;  %v5498_v51 = vpop.f32.mrb[144].mxu0 }
 0x74d   : > { %v2923_v40 = vadd.f32 %v5498_v51, %v8312_v23  ;;  %v2914_v47 = vpop.f32.mrb[145].mxu0  ;;  %v8317_v51 = vld [vmem:[#allocation51_spill] sm:$0xff] }
 0x74e   : > { %v2915_v2 = vadd.f32 %v2914_v47, %v8313_v35  ;;  %v5499_v21 = vpop.f32.mrb[146].mxu0 }
 0x74f   : > { %v3019_v56 = vmax.f32 %v2923_v40, 0.0  ;;  %v2926_v5 = vadd.f32 %v5499_v21, %v8314_v57  ;;  %v2917_v34 = vpop.f32.mrb[147].mxu0  ;;  %v8318_v21 = vld [vmem:[#allocation54_spill] sm:$0xff] }
 0x750   : > { %v3017_v11 = vmax.f32 %v2915_v2, 0.0  ;;  %v2918_v32 = vadd.f32 %v2917_v34, %v8315_v61  ;;  %v5580_v58 = vpop.f32.mrb[136].mxu1 }
 0x751   : > { %v7385_v8 = vmax.f32 %v8316_v10, %v3019_v56  ;;  %v3020_v59 = vmax.f32 %v2926_v5, 0.0  ;;  %v3332_v3 = vadd.f32 %v5580_v58, %v8299_v33  ;;  %v3323_v14 = vpop.f32.mrb[137].mxu1  ;;  %v8319_v56 = vld [vmem:[#allocation55_spill] sm:$0xff] }
 0x752   : > { %v7389_v26 = vmax.f32 %v8317_v51, %v3017_v11  ;;  %v3018_v47 = vmax.f32 %v2918_v32, 0.0  ;;  %v3324_v40 = vadd.f32 %v3323_v14, %v8300_v15  ;;  %v5581_v52 = vpop.f32.mrb[138].mxu1  ;;  %v8320_v51 = vld [vmem:[#allocation42_spill] sm:$0xff] }
 0x753   : > { %v7393_v45 = vmax.f32 %v8318_v21, %v3020_v59  ;;  %v3452_v2 = vmax.f32 %v3332_v3, 0.0  ;;  %v3335_v34 = vadd.f32 %v5581_v52, %v6494_v24  ;;  %v3326_v13 = vpop.f32.mrb[139].mxu1  ;;  %v8321_v3 = vld [vmem:[#allocation39_spill] sm:$0xff] }
 0x754   : > { %v7397_v10 = vmax.f32 %v8319_v56, %v3018_v47  ;;  %v3450_v5 = vmax.f32 %v3324_v40, 0.0  ;;  %v3327_v58 = vadd.f32 %v3326_v13, %v8301_v38  ;;  %v5502_v33 = vpop.f32.mrb[148].mxu0 }
 0x755   : > { %v7400_v11 = vmax.f32 %v3043_v62, %v3452_v2  ;;  %v3453_v32 = vmax.f32 %v3335_v34, 0.0  ;;  %v2939_v14 = vadd.f32 %v5502_v33, %v8320_v51  ;;  %v2930_v15 = vpop.f32.mrb[149].mxu0 }
 0x756   : > { %v7403_v28 = vmax.f32 %v3041_v39, %v3450_v5  ;;  %v3451_v59 = vmax.f32 %v3327_v58, 0.0  ;;  %v2931_v21 = vadd.f32 %v2930_v15, %v8321_v3  ;;  %v5503_v52 = vpop.f32.mrb[150].mxu0 }
 0x757   : > { %v7406_v24 = vmax.f32 %v3044_v54, %v3453_v32  ;;  %v3023_v47 = vmax.f32 %v2939_v14, 0.0  ;;  %v2942_v40 = vadd.f32 %v5503_v52, %v6549_v7  ;;  %v2933_v56 = vpop.f32.mrb[151].mxu0 }
 0x758   : > { %v7409_v13 = vmax.f32 %v3042_v9, %v3451_v59  ;;  %v3021_v62 = vmax.f32 %v2931_v21, 0.0  ;;  %v2934_v2 = vadd.f32 %v2933_v56, %v8241_v12  ;;  %v5584_v34 = vpop.f32.mrb[140].mxu1 }
 0x759   : > { %v7413_v33 = vmax.f32 %v7069_v37, %v3023_v47  ;;  %v3024_v39 = vmax.f32 %v2942_v40, 0.0  ;;  %v3348_v5 = vadd.f32 %v5584_v34, %v8304_v18  ;;  %v3339_v15 = vpop.f32.mrb[141].mxu1 }
 0x75a   : > { %v7417_v54 = vmax.f32 %v7073_v60, %v3021_v62  ;;  %v3022_v58 = vmax.f32 %v2934_v2, 0.0  ;;  %v3340_v32 = vadd.f32 %v3339_v15, %v8305_v0  ;;  %v5585_v14 = vpop.f32.mrb[142].mxu1  ;;  %v8322_v2 = vld [vmem:[#allocation52_spill] sm:$0xff] }
 0x75b   : > { %v7421_v9 = vmax.f32 %v7077_v29, %v3024_v39  ;;  %v3456_v59 = vmax.f32 %v3348_v5, 0.0  ;;  %v3351_v21 = vadd.f32 %v5585_v14, %v8306_v20  ;;  %v3342_v52 = vpop.f32.mrb[143].mxu1  ;;  %v8323_v5 = vld [vmem:[#allocation46_spill] sm:$0xff] }
 0x75c   : > { %v7425_v37 = vmax.f32 %v7081_v36, %v3022_v58  ;;  %v3454_v47 = vmax.f32 %v3340_v32, 0.0  ;;  %v3343_v40 = vadd.f32 %v3342_v52, %v8307_v44  ;;  %v5506_v56 = vpop.f32.mrb[152].mxu0 }
 0x75d   : > { %v7429_v60 = vmax.f32 %v7369_v1, %v3456_v59  ;;  %v3457_v62 = vmax.f32 %v3351_v21, 0.0  ;;  %v2955_v34 = vadd.f32 %v5506_v56, %v8322_v2  ;;  %v2946_v15 = vpop.f32.mrb[153].mxu0 }
 0x75e   : > { %v7433_v29 = vmax.f32 %v7372_v48, %v3454_v47  ;;  %v3455_v39 = vmax.f32 %v3343_v40, 0.0  ;;  %v2947_v14 = vadd.f32 %v2946_v15, %v8323_v5  ;;  %v5507_v20 = vpop.f32.mrb[154].mxu0 }
 0x75f   : > { %v7437_v36 = vmax.f32 %v7375_v46, %v3457_v62  ;;  %v3027_v58 = vmax.f32 %v2955_v34, 0.0  ;;  %v2958_v32 = vadd.f32 %v5507_v20, %v8251_v55  ;;  %v2949_v52 = vpop.f32.mrb[155].mxu0 }
 0x760   : > { %v7441_v1 = vmax.f32 %v7378_v31, %v3455_v39  ;;  %v3025_v59 = vmax.f32 %v2947_v14, 0.0  ;;  %v2950_v21 = vadd.f32 %v2949_v52, %v8253_v50  ;;  %v5588_v56 = vpop.f32.mrb[144].mxu1 }
 0x761   : > { %v7445_v48 = vmax.f32 %v7101_v42, %v3027_v58  ;;  %v3028_v47 = vmax.f32 %v2958_v32, 0.0  ;;  %v3364_v40 = vadd.f32 %v5588_v56, %v8312_v23  ;;  %v3355_v15 = vpop.f32.mrb[145].mxu1 }
 0x762   : > { %v7449_v46 = vmax.f32 %v7105_v22, %v3025_v59  ;;  %v3026_v62 = vmax.f32 %v2950_v21, 0.0  ;;  %v3356_v20 = vadd.f32 %v3355_v15, %v8313_v35  ;;  %v5589_v34 = vpop.f32.mrb[146].mxu1 }
 0x763   : > { %v7453_v31 = vmax.f32 %v7109_v49, %v3028_v47  ;;  %v3460_v39 = vmax.f32 %v3364_v40, 0.0  ;;  %v3367_v14 = vadd.f32 %v5589_v34, %v8314_v57  ;;  %v3358_v52 = vpop.f32.mrb[147].mxu1 }
 0x764   : > { %v7457_v42 = vmax.f32 %v7113_v27, %v3026_v62  ;;  %v3458_v58 = vmax.f32 %v3356_v20, 0.0  ;;  %v3359_v32 = vadd.f32 %v3358_v52, %v8315_v61  ;;  %v5510_v56 = vpop.f32.mrb[156].mxu0 }
 0x765   : > { %v7461_v22 = vmax.f32 %v7385_v8, %v3460_v39  ;;  %v3461_v59 = vmax.f32 %v3367_v14, 0.0  ;;  %v2971_v21 = vadd.f32 %v5510_v56, %v8259_v25  ;;  %v2962_v15 = vpop.f32.mrb[157].mxu0 }
 0x766   : > { %v7465_v49 = vmax.f32 %v7389_v26, %v3458_v58  ;;  %v3459_v47 = vmax.f32 %v3359_v32, 0.0  ;;  %v2963_v40 = vadd.f32 %v2962_v15, %v8261_v30  ;;  %v5511_v34 = vpop.f32.mrb[158].mxu0  ;;  %v8327_v26 = vld [vmem:[#allocation56_spill] sm:$0xff] }
 0x767   : > { %v7469_v27 = vmax.f32 %v7393_v45, %v3461_v59  ;;  %v3031_v62 = vmax.f32 %v2971_v21, 0.0  ;;  %v2974_v20 = vadd.f32 %v5511_v34, %v8263_v43  ;;  %v2965_v52 = vpop.f32.mrb[159].mxu0  ;;  %v8328_v45 = vld [vmem:[#allocation58_spill] sm:$0xff] }
 0x768   : > { %8324 = vst [vmem:[#allocation68_spill] sm:$0xff] %v7465_v49  ;;  %v7473_v8 = vmax.f32 %v7397_v10, %v3459_v47  ;;  %v3029_v39 = vmax.f32 %v2963_v40, 0.0  ;;  %v2966_v14 = vadd.f32 %v2965_v52, %v8265_v16  ;;  %v5592_v56 = vpop.f32.mrb[148].mxu1  ;;  %v8329_v10 = vld [vmem:[#allocation40_spill] sm:$0xff] }
 0x769   : > { %8325 = vst [vmem:[#allocation69_spill] sm:$0xff] %v7469_v27  ;;  %v7477_v58 = vmax.f32 %v8327_v26, %v3031_v62  ;;  %v3032_v32 = vmax.f32 %v2974_v20, 0.0  ;;  %v3380_v15 = vadd.f32 %v5592_v56, %v8320_v51  ;;  %v3371_v49 = vpop.f32.mrb[149].mxu1  ;;  %v8330_v62 = vld [vmem:[#allocation60_spill] sm:$0xff] }
 0x76a   : > { %8326 = vst [vmem:[#allocation71_spill] sm:$0xff] %v7473_v8  ;;  %v7481_v59 = vmax.f32 %v8328_v45, %v3029_v39  ;;  %v3030_v21 = vmax.f32 %v2966_v14, 0.0  ;;  %v3372_v34 = vadd.f32 %v3371_v49, %v8321_v3  ;;  %v5593_v27 = vpop.f32.mrb[150].mxu1 }
 0x76b   : > { %v7485_v47 = vmax.f32 %v8329_v10, %v3032_v32  ;;  %v3464_v40 = vmax.f32 %v3380_v15, 0.0  ;;  %v3383_v52 = vadd.f32 %v5593_v27, %v6549_v7  ;;  %v3374_v8 = vpop.f32.mrb[151].mxu1 }
 0x76c   : > { %v7489_v26 = vmax.f32 %v8330_v62, %v3030_v21  ;;  %v3462_v20 = vmax.f32 %v3372_v34, 0.0  ;;  %v3375_v56 = vadd.f32 %v3374_v8, %v8241_v12  ;;  %v5514_v51 = vpop.f32.mrb[160].mxu0 }
 0x76d   : > { %v7493_v39 = vmax.f32 %v7413_v33, %v3464_v40  ;;  %v3465_v14 = vmax.f32 %v3383_v52, 0.0  ;;  %v2987_v49 = vadd.f32 %v5514_v51, %v8270_v41  ;;  %v2978_v45 = vpop.f32.mrb[161].mxu0 }
 0x76e   : > { %v7497_v32 = vmax.f32 %v7417_v54, %v3462_v20  ;;  %v3463_v15 = vmax.f32 %v3375_v56, 0.0  ;;  %v2979_v27 = vadd.f32 %v2978_v45, %v6659_v63  ;;  %v5515_v10 = vpop.f32.mrb[162].mxu0 }
 0x76f   : > { %v7501_v21 = vmax.f32 %v7421_v9, %v3465_v14  ;;  %v3035_v34 = vmax.f32 %v2987_v49, 0.0  ;;  %v2990_v8 = vadd.f32 %v5515_v10, %v6693_v17  ;;  %v2981_v62 = vpop.f32.mrb[163].mxu0 }
 0x770   : > { %v7505_v33 = vmax.f32 %v7425_v37, %v3463_v15  ;;  %v3033_v40 = vmax.f32 %v2979_v27, 0.0  ;;  %v2982_v51 = vadd.f32 %v2981_v62, %v6668_v6  ;;  %v5596_v52 = vpop.f32.mrb[152].mxu1 }
 0x771   : > { %v7509_v54 = vmax.f32 %v7153_v19, %v3035_v34  ;;  %v3036_v20 = vmax.f32 %v2990_v8, 0.0  ;;  %v3396_v56 = vadd.f32 %v5596_v52, %v8322_v2  ;;  %v3387_v45 = vpop.f32.mrb[153].mxu1  ;;  %v8332_v19 = vld [vmem:[#allocation62_spill] sm:$0xff] }
 0x772   : > { %8331 = vst [vmem:[#allocation72_spill] sm:$0xff] %v7505_v33  ;;  %v7513_v9 = vmax.f32 %v7157_v4, %v3033_v40  ;;  %v3034_v14 = vmax.f32 %v2982_v51, 0.0  ;;  %v3388_v49 = vadd.f32 %v3387_v45, %v8323_v5  ;;  %v5597_v10 = vpop.f32.mrb[154].mxu1  ;;  %v8334_v51 = vld [vmem:[#allocation77_spill] sm:$0xff] }
 0x773   : > { %v7517_v37 = vmax.f32 %v7161_v53, %v3036_v20  ;;  %v3468_v15 = vmax.f32 %v3396_v56, 0.0  ;;  %v3399_v27 = vadd.f32 %v5597_v10, %v8251_v55  ;;  %v3390_v62 = vpop.f32.mrb[155].mxu1  ;;  %v8336_v56 = vld [vmem:[#allocation74_spill] sm:$0xff] }
 0x774   : > { %v7521_v34 = vmax.f32 %v8332_v19, %v3034_v14  ;;  %v3466_v8 = vmax.f32 %v3388_v49, 0.0  ;;  %v3391_v52 = vadd.f32 %v3390_v62, %v8253_v50  ;;  %v5518_v2 = vpop.f32.mrb[164].mxu0  ;;  %v8338_v62 = vld [vmem:[#allocation78_spill] sm:$0xff] }
 0x775   : > { %v7525_v4 = vmax.f32 %v7445_v48, %v3468_v15  ;;  %v3469_v40 = vmax.f32 %v3399_v27, 0.0  ;;  %v3003_v45 = vadd.f32 %v5518_v2, %v8334_v51  ;;  %v2994_v5 = vpop.f32.mrb[165].mxu0  ;;  %v8340_v2 = vld [vmem:[#allocation76_spill] sm:$0xff] }
 0x776   : > { %v7529_v53 = vmax.f32 %v7449_v46, %v3466_v8  ;;  %v3467_v20 = vmax.f32 %v3391_v52, 0.0  ;;  %v2995_v10 = vadd.f32 %v2994_v5, %v8336_v56  ;;  %v5519_v55 = vpop.f32.mrb[166].mxu0  ;;  %v8341_v46 = vld [vmem:[#allocation63_spill] sm:$0xff] }
 0x777   : > { %8333 = vst [vmem:[#allocation73_spill] sm:$0xff] %v7525_v4  ;;  %v7533_v14 = vmax.f32 %v7453_v31, %v3469_v40  ;;  %v3039_v49 = vmax.f32 %v3003_v45, 0.0  ;;  %v3006_v19 = vadd.f32 %v5519_v55, %v8338_v62  ;;  %v2997_v50 = vpop.f32.mrb[167].mxu0  ;;  %v8342_v31 = vld [vmem:[#allocation65_spill] sm:$0xff] }
 0x778   : > { %8335 = vst [vmem:[#allocation75_spill] sm:$0xff] %v7529_v53  ;;  %v7537_v48 = vmax.f32 %v7457_v42, %v3467_v20  ;;  %v3037_v15 = vmax.f32 %v2995_v10, 0.0  ;;  %v2998_v27 = vadd.f32 %v2997_v50, %v8340_v2  ;;  %v5600_v4 = vpop.f32.mrb[156].mxu1  ;;  %v8343_v42 = vld [vmem:[#allocation66_spill] sm:$0xff] }
 0x779   : > { %8337 = vst [vmem:[#allocation70_spill] sm:$0xff] %v7533_v14  ;;  %v7541_v8 = vmax.f32 %v8341_v46, %v3039_v49  ;;  %v3040_v52 = vmax.f32 %v3006_v19, 0.0  ;;  %v3412_v5 = vadd.f32 %v5600_v4, %v8259_v25  ;;  %v3403_v53 = vpop.f32.mrb[157].mxu1  ;;  %v8344_v49 = vld [vmem:[#allocation67_spill] sm:$0xff] }
 0x77a   : > { %8339 = vst [vmem:[#allocation79_spill] sm:$0xff] %v7537_v48  ;;  %v7545_v40 = vmax.f32 %v8342_v31, %v3037_v15  ;;  %v3038_v45 = vmax.f32 %v2998_v27, 0.0  ;;  %v3404_v55 = vadd.f32 %v3403_v53, %v8261_v30  ;;  %v5601_v14 = vpop.f32.mrb[158].mxu1  ;;  %v8346_v53 = vld [vmem:[#allocation4_spill] sm:$0xff] }
 0x77b   : > { %v7549_v20 = vmax.f32 %v8343_v42, %v3040_v52  ;;  %v3472_v10 = vmax.f32 %v3412_v5, 0.0  ;;  %v3415_v50 = vadd.f32 %v5601_v14, %v8263_v43  ;;  %v3406_v48 = vpop.f32.mrb[159].mxu1  ;;  %v8348_v14 = vld [vmem:[#allocation3_spill] sm:$0xff] }
 0x77c   : > { %v7553_v46 = vmax.f32 %v8344_v49, %v3038_v45  ;;  %v3470_v19 = vmax.f32 %v3404_v55, 0.0  ;;  %v3407_v4 = vadd.f32 %v3406_v48, %v8265_v16  ;;  %v5622_v25 = vpop.f32.mrb[168].mxu0  ;;  %v8350_v55 = vld [vmem:[#allocation6_spill] sm:$0xff] }
 0x77d   : > { %v7557_v15 = vmax.f32 %v7477_v58, %v3472_v10  ;;  %v3473_v27 = vmax.f32 %v3415_v50, 0.0  ;;  %v3575_v31 = vadd.f32 %v5622_v25, %v8346_v53  ;;  %v3566_v30 = vpop.f32.mrb[169].mxu0  ;;  %v8352_v50 = vld [vmem:[#allocation5_spill] sm:$0xff] }
 0x77e   : > { %v7561_v52 = vmax.f32 %v7481_v59, %v3470_v19  ;;  %v3471_v5 = vmax.f32 %v3407_v4, 0.0  ;;  %v3567_v42 = vadd.f32 %v3566_v30, %v8348_v14  ;;  %v5623_v43 = vpop.f32.mrb[170].mxu0 }
 0x77f   : > { %8345 = vst [vmem:[#allocation2_spill] sm:$0xff] %v7557_v15  ;;  %v7565_v45 = vmax.f32 %v7485_v47, %v3473_v27  ;;  %v3578_v48 = vadd.f32 %v5623_v43, %v8350_v55  ;;  %v3569_v49 = vpop.f32.mrb[171].mxu0  ;;  %v3599_v15 = vmax.f32 %v3575_v31, 0.0 }
 0x780   : > { %8347 = vst [vmem:[#allocation28_spill] sm:$0xff] %v7561_v52  ;;  %v7569_v58 = vmax.f32 %v7489_v26, %v3471_v5  ;;  %v5604_v10 = vpop.f32.mrb[160].mxu1  ;;  %v3570_v25 = vadd.f32 %v3569_v49, %v8352_v50  ;;  %v3597_v4 = vmax.f32 %v3567_v42, 0.0 }
 0x781   : > { %8349 = vst [vmem:[#allocation41_spill] sm:$0xff] %v7565_v45  ;;  %v3600_v16 = vmax.f32 %v3578_v48, 0.0  ;;  %v3428_v59 = vadd.f32 %v5604_v10, %v8270_v41  ;;  %v3419_v19 = vpop.f32.mrb[161].mxu1  ;;  %v8354_v10 = vld [vmem:[#allocation9_spill] sm:$0xff] }
 0x782   : > { %8351 = vst [vmem:[#allocation43_spill] sm:$0xff] %v7569_v58  ;;  %v3598_v30 = vmax.f32 %v3570_v25, 0.0  ;;  %v3420_v52 = vadd.f32 %v3419_v19, %v6659_v63  ;;  %v5605_v47 = vpop.f32.mrb[162].mxu1 }
 0x783   : > { %v3606_v27 = vpack.c.bf16 %v3600_v16, %v3599_v15  ;;  %v3476_v45 = vmax.f32 %v3428_v59, 0.0  ;;  %v3431_v43 = vadd.f32 %v5605_v47, %v6693_v17  ;;  %v3422_v33 = vpop.f32.mrb[163].mxu1  ;;  %v8356_v15 = vld [vmem:[#allocation7_spill] sm:$0xff] }
 0x784   : > { %v3605_v26 = vpack.c.bf16 %v3598_v30, %v3597_v4  ;;  %v3474_v5 = vmax.f32 %v3420_v52, 0.0  ;;  %v3423_v58 = vadd.f32 %v3422_v33, %v6668_v6  ;;  %v5626_v49 = vpop.f32.mrb[172].mxu0  ;;  %v8358_v33 = vld [vmem:[#allocation10_spill] sm:$0xff] }
 0x785   : > { %v7577_v31 = vmax.f32 %v7509_v54, %v3476_v45  ;;  %v3477_v48 = vmax.f32 %v3431_v43, 0.0  ;;  %v3591_v42 = vadd.f32 %v5626_v49, %v8354_v10  ;;  %v3582_v25 = vpop.f32.mrb[173].mxu0  ;;  %v8360_v43 = vld [vmem:[#allocation8_spill] sm:$0xff] }
 0x786   : > { %v7581_v19 = vmax.f32 %v7513_v9, %v3474_v5  ;;  %v3475_v16 = vmax.f32 %v3423_v58, 0.0  ;;  %v3583_v59 = vadd.f32 %v3582_v25, %v8356_v15  ;;  %v5627_v47 = vpop.f32.mrb[174].mxu0  ;;  %5628 = vmatprep.subr.bf16.mxu0 %v3605_v26 }
 0x787   : > { %8353 = vst [vmem:[#allocation33_spill] sm:$0xff] %v7577_v31  ;;  %v7585_v52 = vmax.f32 %v7517_v37, %v3477_v48  ;;  %v3594_v4 = vadd.f32 %v5627_v47, %v8358_v33  ;;  %v3585_v30 = vpop.f32.mrb[175].mxu0  ;;  %5629 = vmatpush3.bf16.msra.mxu0 %v3605_v26  ;;  %v3603_v9 = vmax.f32 %v3591_v42, 0.0 }
 0x788   : > { %8355 = vst [vmem:[#allocation31_spill] sm:$0xff] %v7581_v19  ;;  %v7589_v54 = vmax.f32 %v7521_v34, %v3475_v16  ;;  %v5608_v45 = vpop.f32.mrb[164].mxu1  ;;  %v3586_v49 = vadd.f32 %v3585_v30, %v8360_v43  ;;  %5630 = vmatprep.subr.bf16.mxu0 %v3606_v27  ;;  %v3601_v19 = vmax.f32 %v3583_v59, 0.0 }
 0x789   : > { %8357 = vst [vmem:[#allocation32_spill] sm:$0xff] %v7585_v52  ;;  %v3604_v58 = vmax.f32 %v3594_v4, 0.0  ;;  %v3444_v5 = vadd.f32 %v5608_v45, %v8334_v51  ;;  %v3435_v25 = vpop.f32.mrb[165].mxu1 }
 0x78a   : > { %8359 = vst [vmem:[#allocation44_spill] sm:$0xff] %v7589_v54  ;;  %v3602_v31 = vmax.f32 %v3586_v49, 0.0  ;;  %v3436_v37 = vadd.f32 %v3435_v25, %v8336_v56  ;;  %v5609_v48 = vpop.f32.mrb[166].mxu1 }
 0x78b   : > { %v3608_v47 = vpack.c.bf16 %v3604_v58, %v3603_v9  ;;  %v3480_v52 = vmax.f32 %v3444_v5, 0.0  ;;  %v3447_v26 = vadd.f32 %v5609_v48, %v8338_v62  ;;  %v3438_v34 = vpop.f32.mrb[167].mxu1  ;;  %5631 = vmatpush3.bf16.msra.mxu0 %v3606_v27 }
 0x78c   : > { %v3607_v16 = vpack.c.bf16 %v3602_v31, %v3601_v19  ;;  %v3478_v54 = vmax.f32 %v3436_v37, 0.0  ;;  %v3439_v30 = vadd.f32 %v3438_v34, %v8340_v2 }
 0x78d   : > { %v7597_v42 = vmax.f32 %v7541_v8, %v3480_v52  ;;  %v3481_v4 = vmax.f32 %v3447_v26, 0.0 }
 0x78e   : > { %v7600_v59 = vmax.f32 %v7545_v40, %v3478_v54  ;;  %v3479_v45 = vmax.f32 %v3439_v30, 0.0  ;;  %5632 = vmatprep.subr.bf16.mxu0 %v3607_v16 }
 0x78f   : > { %8361 = vst [vmem:[#allocation45_spill] sm:$0xff] %v7597_v42  ;;  %v7603_v49 = vmax.f32 %v7549_v20, %v3481_v4  ;;  %5633 = vmatpush3.bf16.msra.mxu0 %v3607_v16 }
 0x790   : > { %8362 = vst [vmem:[#allocation47_spill] sm:$0xff] %v7600_v59  ;;  %v7606_v9 = vmax.f32 %v7553_v46, %v3479_v45  ;;  %v5712_v27 = vpop.f32.mrb[168].mxu1  ;;  %5634 = vmatprep.subr.bf16.mxu0 %v3608_v47  ;;  %v5906_v46 = vld [vmem:[%s7981_s3 + $0x8] sm:$0xff]  }
 0x791   : > { %8363 = vst [vmem:[#allocation49_spill] sm:$0xff] %v7603_v49  ;;  %v4016_v31 = vadd.f32 %v5712_v27, %v8346_v53  ;;  %v4007_v19 = vpop.f32.mrb[169].mxu1 }
 0x792   : > { %8364 = vst [vmem:[#allocation37_spill] sm:$0xff] %v7606_v9  ;;  %v4008_v8 = vadd.f32 %v4007_v19, %v8348_v14  ;;  %v5713_v52 = vpop.f32.mrb[170].mxu1  ;;  %v5907_v14 = vld [vmem:[%s7981_s3 + $0x10] sm:$0xff]  }
 0x793   : > { %v4019_v40 = vadd.f32 %v5713_v52, %v8350_v55  ;;  %v4010_v54 = vpop.f32.mrb[171].mxu1  ;;  %5635 = vmatpush3.bf16.msra.mxu0 %v3608_v47  ;;  %v4040_v20 = vmax.f32 %v4016_v31, 0.0  ;;  %v5911_v52 = vld [vmem:[%s7981_s3 + $0x30] sm:$0xff]  }
 0x794   : > { %v4011_v58 = vadd.f32 %v4010_v54, %v8352_v50  ;;  %v4038_v25 = vmax.f32 %v4008_v8, 0.0  ;;  %v5910_v8 = vld [vmem:[%s7981_s3 + $0x28] sm:$0xff]   ;;  %v5913_v54 = vld [vmem:[%s7983_s5] sm:$0xff]  }
 0x795   : > { %v4041_v5 = vmax.f32 %v4019_v40, 0.0  ;;  %v5912_v40 = vld [vmem:[%s7981_s3 + $0x38] sm:$0xff]  }
 0x796   : > { %v4039_v37 = vmax.f32 %v4011_v58, 0.0  ;;  %5637 = vmatmul.mubr.msk.bf16.vlgmr.msra.gmra.mrb[176].mxu0 %vm650_vm3, %v5906_v46 }
 0x797   : > { %v4047_v53 = vpack.c.bf16 %v4041_v5, %v4040_v20  ;;  %5640 = vmatprep.mubr.msk.bf16.mxu0 %vm650_vm3, %v5907_v14  ;;  %v8365_v20 = vld [vmem:[#allocation13_spill] sm:$0xff] }
 0x798   : > { %v4046_v55 = vpack.c.bf16 %v4039_v37, %v4038_v25  ;;  %v5716_v48 = vpop.f32.mrb[172].mxu1  ;;  %v8366_v37 = vld [vmem:[#allocation11_spill] sm:$0xff] }
 0x799   : > { %v4032_v50 = vadd.f32 %v5716_v48, %v8354_v10  ;;  %v4023_v47 = vpop.f32.mrb[173].mxu1  ;;  %v5908_v10 = vld [vmem:[%s7981_s3 + $0x18] sm:$0xff]  }
 0x79a   : > { %v4024_v26 = vadd.f32 %v4023_v47, %v8356_v15  ;;  %v5717_v34 = vpop.f32.mrb[174].mxu1  ;;  %5718 = vmatprep.subr.bf16.mxu1 %v4046_v55 }
 0x79b   : > { %v4035_v16 = vadd.f32 %v5717_v34, %v8358_v33  ;;  %v4026_v30 = vpop.f32.mrb[175].mxu1  ;;  %5719 = vmatpush3.bf16.msra.mxu1 %v4046_v55  ;;  %v4044_v45 = vmax.f32 %v4032_v50, 0.0  ;;  %v5909_v33 = vld [vmem:[%s7981_s3 + $0x20] sm:$0xff]   ;;  %v8368_v50 = vld [vmem:[#allocation12_spill] sm:$0xff] }
 0x79c   : > { %v4027_v4 = vadd.f32 %v4026_v30, %v8360_v43  ;;  %5720 = vmatprep.subr.bf16.mxu1 %v4047_v53  ;;  %v4042_v31 = vmax.f32 %v4024_v26, 0.0 }
 0x79d   : > { %v4045_v27 = vmax.f32 %v4035_v16, 0.0 }
 0x79e   : > { %v4043_v19 = vmax.f32 %v4027_v4, 0.0  ;;  %5641 = vmatmul.mubr.msk.bf16.gmra.mrb[180].mxu0 %vm650_vm3, %v5908_v10 }
 0x79f   : > { %v4049_v15 = vpack.c.bf16 %v4045_v27, %v4044_v45  ;;  %5721 = vmatpush3.bf16.msra.mxu1 %v4047_v53  ;;  %5644 = vmatprep.mubr.msk.bf16.mxu0 %vm650_vm3, %v5909_v33 }
 0x7a0   : > { %v4048_v43 = vpack.c.bf16 %v4043_v19, %v4042_v31  ;;  %v8369_v31 = vld [vmem:[#allocation17_spill] sm:$0xff] }
 0x7a2   : > { %5722 = vmatprep.subr.bf16.mxu1 %v4048_v43 }
 0x7a3   : > { %5723 = vmatpush3.bf16.msra.mxu1 %v4048_v43 }
 0x7a4   : > { %5724 = vmatprep.subr.bf16.mxu1 %v4049_v15 }
 0x7a6   : > { %5645 = vmatmul.mubr.msk.bf16.gmra.mrb[184].mxu0 %vm650_vm3, %v5910_v8 }
 0x7a7   : > { %5725 = vmatpush3.bf16.msra.mxu1 %v4049_v15  ;;  %5648 = vmatprep.mubr.msk.bf16.mxu0 %vm650_vm3, %v5911_v52  ;;  %v8370_v15 = vld [vmem:[#allocation15_spill] sm:$0xff] }
 0x7aa   : > { %5727 = vmatmul.mubr.msk.bf16.vlgmr.msra.gmra.mrb[176].mxu1 %vm650_vm3, %v5906_v46 }
 0x7ab   : > { %5730 = vmatprep.mubr.msk.bf16.mxu1 %vm650_vm3, %v5907_v14  ;;  %v8367_v14 = vld [vmem:[#allocation14_spill] sm:$0xff] }
 0x7ae   : > { %5649 = vmatmul.mubr.msk.bf16.gmra.mrb[188].mxu0 %vm650_vm3, %v5912_v40 }
 0x7af   : > { %5668 = vmatprep.mubr.bf16.mxu0 %v5913_v54 }
 0x7b2   : > { %5731 = vmatmul.mubr.msk.bf16.gmra.mrb[180].mxu1 %vm650_vm3, %v5908_v10 }
 0x7b3   : > { %5734 = vmatprep.mubr.msk.bf16.mxu1 %vm650_vm3, %v5909_v33 }
 0x7ba   : > { %5735 = vmatmul.mubr.msk.bf16.gmra.mrb[184].mxu1 %vm650_vm3, %v5910_v8  ;;  %v8371_v8 = vld [vmem:[#allocation18_spill] sm:$0xff] }
 0x7bb   : > { %5738 = vmatprep.mubr.msk.bf16.mxu1 %vm650_vm3, %v5911_v52 }
 0x7c2   : > { %5739 = vmatmul.mubr.msk.bf16.gmra.mrb[188].mxu1 %vm650_vm3, %v5912_v40 }
 0x7c3   : > { %5758 = vmatprep.mubr.bf16.mxu1 %v5913_v54  ;;  %v8372_v54 = vld [vmem:[#allocation16_spill] sm:$0xff] }
 0x869   : > { %v5638_v58 = vpop.f32.mrb[176].mxu0 }
 0x86a   : > { %v3652_v5 = vadd.f32 %v5638_v58, %v8365_v20  ;;  %v3643_v25 = vpop.f32.mrb[177].mxu0 }
 0x86b   : > { %v3644_v46 = vadd.f32 %v3643_v25, %v8366_v37  ;;  %v5639_v53 = vpop.f32.mrb[178].mxu0 }
 0x86c   : > { %v3655_v55 = vadd.f32 %v5639_v53, %v8367_v14  ;;  %v3646_v48 = vpop.f32.mrb[179].mxu0  ;;  %v3708_v26 = vmax.f32 %v3652_v5, 0.0 }
 0x86d   : > { %v3647_v47 = vadd.f32 %v3646_v48, %v8368_v50  ;;  %v3706_v16 = vmax.f32 %v3644_v46, 0.0 }
 0x86e   : > { %v3709_v34 = vmax.f32 %v3655_v55, 0.0 }
 0x86f   : > { %v3707_v30 = vmax.f32 %v3647_v47, 0.0 }
 0x870   : > { %v3723_v4 = vpack.c.bf16 %v3709_v34, %v3708_v26  ;;  %v8373_v26 = vld [vmem:[#allocation21_spill] sm:$0xff] }
 0x871   : > { %v3722_v45 = vpack.c.bf16 %v3707_v30, %v3706_v16  ;;  %v5642_v27 = vpop.f32.mrb[180].mxu0  ;;  %v8374_v30 = vld [vmem:[#allocation19_spill] sm:$0xff] }
 0x872   : > { %v3668_v19 = vadd.f32 %v5642_v27, %v8369_v31  ;;  %v3659_v10 = vpop.f32.mrb[181].mxu0 }
 0x873   : > { %v3660_v33 = vadd.f32 %v3659_v10, %v8370_v15  ;;  %v5643_v43 = vpop.f32.mrb[182].mxu0  ;;  %5652 = vmatprep.subr.bf16.mxu0 %v3722_v45 }
 0x874   : > { %v3671_v52 = vadd.f32 %v5643_v43, %v8371_v8  ;;  %v3662_v40 = vpop.f32.mrb[183].mxu0  ;;  %5653 = vmatpush3.bf16.msra.mxu0 %v3722_v45  ;;  %v3712_v5 = vmax.f32 %v3668_v19, 0.0  ;;  %v8375_v43 = vld [vmem:[#allocation22_spill] sm:$0xff] }
 0x875   : > { %v3663_v58 = vadd.f32 %v3662_v40, %v8372_v54  ;;  %5654 = vmatprep.subr.bf16.mxu0 %v3723_v4  ;;  %v3710_v46 = vmax.f32 %v3660_v33, 0.0  ;;  %v8376_v40 = vld [vmem:[#allocation20_spill] sm:$0xff] }
 0x876   : > { %v3713_v25 = vmax.f32 %v3671_v52, 0.0 }
 0x877   : > { %v3711_v53 = vmax.f32 %v3663_v58, 0.0 }
 0x878   : > { %v3725_v55 = vpack.c.bf16 %v3713_v25, %v3712_v5  ;;  %5655 = vmatpush3.bf16.msra.mxu0 %v3723_v4 }
 0x879   : > { %v3724_v48 = vpack.c.bf16 %v3711_v53, %v3710_v46  ;;  %v5646_v47 = vpop.f32.mrb[184].mxu0 }
 0x87a   : > { %v3684_v34 = vadd.f32 %v5646_v47, %v8373_v26  ;;  %v3675_v16 = vpop.f32.mrb[185].mxu0 }
 0x87b   : > { %v3676_v27 = vadd.f32 %v3675_v16, %v8374_v30  ;;  %v5647_v10 = vpop.f32.mrb[186].mxu0  ;;  %5656 = vmatprep.subr.bf16.mxu0 %v3724_v48 }
 0x87c   : > { %v3687_v45 = vadd.f32 %v5647_v10, %v8375_v43  ;;  %v3678_v9 = vpop.f32.mrb[187].mxu0  ;;  %5657 = vmatpush3.bf16.msra.mxu0 %v3724_v48  ;;  %v3716_v33 = vmax.f32 %v3684_v34, 0.0 }
 0x87d   : > { %v3679_v19 = vadd.f32 %v3678_v9, %v8376_v40  ;;  %v5728_v52 = vpop.f32.mrb[176].mxu1  ;;  %5658 = vmatprep.subr.bf16.mxu0 %v3725_v55  ;;  %v3714_v25 = vmax.f32 %v3676_v27, 0.0 }
 0x87e   : > { %v3717_v58 = vmax.f32 %v3687_v45, 0.0  ;;  %v4093_v4 = vadd.f32 %v5728_v52, %v8365_v20  ;;  %v4084_v5 = vpop.f32.mrb[177].mxu1  ;;  %v8377_v45 = vld [vmem:[#allocation25_spill] sm:$0xff] }
 0x87f   : > { %v3715_v46 = vmax.f32 %v3679_v19, 0.0  ;;  %v4085_v53 = vadd.f32 %v4084_v5, %v8366_v37  ;;  %v5729_v47 = vpop.f32.mrb[178].mxu1  ;;  %v8378_v19 = vld [vmem:[#allocation23_spill] sm:$0xff] }
 0x880   : > { %v3727_v16 = vpack.c.bf16 %v3717_v58, %v3716_v33  ;;  %v4096_v49 = vadd.f32 %v5729_v47, %v8367_v14  ;;  %v4087_v10 = vpop.f32.mrb[179].mxu1  ;;  %5659 = vmatpush3.bf16.msra.mxu0 %v3725_v55  ;;  %v4149_v42 = vmax.f32 %v4093_v4, 0.0  ;;  %v8379_v58 = vld [vmem:[#allocation26_spill] sm:$0xff] }
 0x881   : > { %v3726_v48 = vpack.c.bf16 %v3715_v46, %v3714_v25  ;;  %v4088_v9 = vadd.f32 %v4087_v10, %v8368_v50  ;;  %v5650_v59 = vpop.f32.mrb[188].mxu0  ;;  %v4147_v52 = vmax.f32 %v4085_v53, 0.0  ;;  %v8380_v25 = vld [vmem:[#allocation24_spill] sm:$0xff] }
 0x882   : > { %v4150_v34 = vmax.f32 %v4096_v49, 0.0  ;;  %v3700_v2 = vadd.f32 %v5650_v59, %v8377_v45  ;;  %v3691_v20 = vpop.f32.mrb[189].mxu0 }
 0x883   : > { %v4148_v27 = vmax.f32 %v4088_v9, 0.0  ;;  %v3692_v62 = vadd.f32 %v3691_v20, %v8378_v19  ;;  %v5651_v37 = vpop.f32.mrb[190].mxu0  ;;  %5660 = vmatprep.subr.bf16.mxu0 %v3726_v48 }
 0x884   : > { %v4164_v33 = vpack.c.bf16 %v4150_v34, %v4149_v42  ;;  %v3703_v14 = vadd.f32 %v5651_v37, %v8379_v58  ;;  %v3694_v5 = vpop.f32.mrb[191].mxu0  ;;  %5661 = vmatpush3.bf16.msra.mxu0 %v3726_v48  ;;  %v3720_v49 = vmax.f32 %v3700_v2, 0.0 }
 0x885   : > { %v4163_v55 = vpack.c.bf16 %v4148_v27, %v4147_v52  ;;  %v3695_v50 = vadd.f32 %v3694_v5, %v8380_v25  ;;  %v5732_v46 = vpop.f32.mrb[180].mxu1  ;;  %5662 = vmatprep.subr.bf16.mxu0 %v3727_v16  ;;  %v3718_v47 = vmax.f32 %v3692_v62, 0.0 }
 0x886   : > { %v3721_v4 = vmax.f32 %v3703_v14, 0.0  ;;  %v4109_v59 = vadd.f32 %v5732_v46, %v8369_v31  ;;  %v4100_v53 = vpop.f32.mrb[181].mxu1 }
 0x887   : > { %v3719_v10 = vmax.f32 %v3695_v50, 0.0  ;;  %v4101_v9 = vadd.f32 %v4100_v53, %v8370_v15  ;;  %v5733_v20 = vpop.f32.mrb[182].mxu1  ;;  %5742 = vmatprep.subr.bf16.mxu1 %v4163_v55 }
 0x888   : > { %v3729_v42 = vpack.c.bf16 %v3721_v4, %v3720_v49  ;;  %v4112_v34 = vadd.f32 %v5733_v20, %v8371_v8  ;;  %v4103_v48 = vpop.f32.mrb[183].mxu1  ;;  %5743 = vmatpush3.bf16.msra.mxu1 %v4163_v55  ;;  %5663 = vmatpush3.bf16.msra.mxu0 %v3727_v16  ;;  %v4153_v2 = vmax.f32 %v4109_v59, 0.0 }
 0x889   : > { %v3728_v52 = vpack.c.bf16 %v3719_v10, %v3718_v47  ;;  %v4104_v27 = vadd.f32 %v4103_v48, %v8372_v54  ;;  %5744 = vmatprep.subr.bf16.mxu1 %v4164_v33  ;;  %v4151_v31 = vmax.f32 %v4101_v9, 0.0 }
 0x88a   : > { %v4154_v37 = vmax.f32 %v4112_v34, 0.0 }
 0x88b   : > { %v4152_v14 = vmax.f32 %v4104_v27, 0.0  ;;  %5664 = vmatprep.subr.bf16.mxu0 %v3728_v52 }
 0x88c   : > { %v4166_v62 = vpack.c.bf16 %v4154_v37, %v4153_v2  ;;  %5745 = vmatpush3.bf16.msra.mxu1 %v4164_v33  ;;  %5665 = vmatpush3.bf16.msra.mxu0 %v3728_v52 }
 0x88d   : > { %v4165_v15 = vpack.c.bf16 %v4152_v14, %v4151_v31  ;;  %v5736_v5 = vpop.f32.mrb[184].mxu1  ;;  %5666 = vmatprep.subr.bf16.mxu0 %v3729_v42 }
 0x88e   : > { %v4125_v8 = vadd.f32 %v5736_v5, %v8373_v26  ;;  %v4116_v50 = vpop.f32.mrb[185].mxu1  ;;  %v5914_v26 = vld [vmem:[%s7983_s5 + $0x8] sm:$0xff]   ;;  %v5921_v5 = vld [vmem:[%s7983_s5 + $0x40] sm:$0xff]  }
 0x88f   : > { %v4117_v16 = vadd.f32 %v4116_v50, %v8374_v30  ;;  %v5737_v55 = vpop.f32.mrb[186].mxu1  ;;  %5746 = vmatprep.subr.bf16.mxu1 %v4165_v15  ;;  %v5923_v50 = vld [vmem:[%s7983_s5 + $0x50] sm:$0xff]  }
 0x890   : > { %v4128_v54 = vadd.f32 %v5737_v55, %v8375_v43  ;;  %v4119_v46 = vpop.f32.mrb[187].mxu1  ;;  %5747 = vmatpush3.bf16.msra.mxu1 %v4165_v15  ;;  %5667 = vmatpush3.bf16.msra.mxu0 %v3729_v42  ;;  %v4157_v33 = vmax.f32 %v4125_v8, 0.0  ;;  %v5915_v43 = vld [vmem:[%s7983_s5 + $0x10] sm:$0xff]   ;;  %v5920_v15 = vld [vmem:[%s7983_s5 + $0x38] sm:$0xff]   ;;  %v5922_v8 = vld [vmem:[%s7983_s5 + $0x48] sm:$0xff]  }
 0x891   : > { %v4120_v49 = vadd.f32 %v4119_v46, %v8376_v40  ;;  %5748 = vmatprep.subr.bf16.mxu1 %v4166_v62  ;;  %v4155_v59 = vmax.f32 %v4117_v16, 0.0  ;;  %v5924_v16 = vld [vmem:[%s7983_s5 + $0x58] sm:$0xff]   ;;  %v5925_v55 = vld [vmem:[%s7983_s5 + $0x60] sm:$0xff]   ;;  %v5927_v46 = vld [vmem:[%s7983_s5 + $0x70] sm:$0xff]  }
 0x892   : > { %v4158_v4 = vmax.f32 %v4128_v54, 0.0  ;;  %v5926_v54 = vld [vmem:[%s7983_s5 + $0x68] sm:$0xff]  }
 0x893   : > { %v4156_v53 = vmax.f32 %v4120_v49, 0.0  ;;  %5669 = vmatmul.mubr.bf16.vlgmr.msra.gmra.mrb[192].mxu0 %v5914_v26  ;;  %v5928_v49 = vld [vmem:[%s7983_s5 + $0x78] sm:$0xff]  }
 0x894   : > { %v4168_v30 = vpack.c.bf16 %v4158_v4, %v4157_v33  ;;  %5749 = vmatpush3.bf16.msra.mxu1 %v4166_v62  ;;  %5672 = vmatprep.mubr.bf16.mxu0 %v5915_v43  ;;  %v5919_v62 = vld [vmem:[%s7983_s5 + $0x30] sm:$0xff]   ;;  %v8381_v4 = vld [vmem:[#allocation29_spill] sm:$0xff] }
 0x895   : > { %v4167_v47 = vpack.c.bf16 %v4156_v53, %v4155_v59  ;;  %v5740_v10 = vpop.f32.mrb[188].mxu1 }
 0x896   : > { %v4141_v40 = vadd.f32 %v5740_v10, %v8377_v45  ;;  %v4132_v9 = vpop.f32.mrb[189].mxu1  ;;  %v5916_v45 = vld [vmem:[%s7983_s5 + $0x18] sm:$0xff]   ;;  %v8383_v10 = vld [vmem:[#allocation30_spill] sm:$0xff] }
 0x897   : > { %v4133_v20 = vadd.f32 %v4132_v9, %v8378_v19  ;;  %v5741_v42 = vpop.f32.mrb[190].mxu1  ;;  %5750 = vmatprep.subr.bf16.mxu1 %v4167_v47  ;;  %v5917_v19 = vld [vmem:[%s7983_s5 + $0x20] sm:$0xff]  }
 0x898   : > { %v4144_v34 = vadd.f32 %v5741_v42, %v8379_v58  ;;  %v4135_v48 = vpop.f32.mrb[191].mxu1  ;;  %5751 = vmatpush3.bf16.msra.mxu1 %v4167_v47  ;;  %v4161_v27 = vmax.f32 %v4141_v40, 0.0 }
 0x899   : > { %v4136_v52 = vadd.f32 %v4135_v48, %v8380_v25  ;;  %5752 = vmatprep.subr.bf16.mxu1 %v4168_v30  ;;  %v4159_v37 = vmax.f32 %v4133_v20, 0.0  ;;  %v5918_v25 = vld [vmem:[%s7983_s5 + $0x28] sm:$0xff]  }
 0x89a   : > { %v4162_v2 = vmax.f32 %v4144_v34, 0.0 }
 0x89b   : > { %v4160_v31 = vmax.f32 %v4136_v52, 0.0  ;;  %5673 = vmatmul.mubr.bf16.gmra.mrb[196].mxu0 %v5916_v45 }
 0x89c   : > { %v4170_v14 = vpack.c.bf16 %v4162_v2, %v4161_v27  ;;  %5753 = vmatpush3.bf16.msra.mxu1 %v4168_v30  ;;  %5676 = vmatprep.mubr.bf16.mxu0 %v5917_v19 }
 0x89d   : > { %v4169_v58 = vpack.c.bf16 %v4160_v31, %v4159_v37 }
 0x89f   : > { %5754 = vmatprep.subr.bf16.mxu1 %v4169_v58 }
 0x8a0   : > { %5755 = vmatpush3.bf16.msra.mxu1 %v4169_v58 }
 0x8a1   : > { %5756 = vmatprep.subr.bf16.mxu1 %v4170_v14 }
 0x8a3   : > { %5677 = vmatmul.mubr.bf16.gmra.mrb[200].mxu0 %v5918_v25 }
 0x8a4   : > { %5757 = vmatpush3.bf16.msra.mxu1 %v4170_v14  ;;  %5680 = vmatprep.mubr.bf16.mxu0 %v5919_v62 }
 0x8a7   : > { %5759 = vmatmul.mubr.bf16.vlgmr.msra.gmra.mrb[192].mxu1 %v5914_v26  ;;  %v8382_v26 = vld [vmem:[#allocation27_spill] sm:$0xff] }
 0x8a8   : > { %5762 = vmatprep.mubr.bf16.mxu1 %v5915_v43 }
 0x8ab   : > { %5681 = vmatmul.mubr.bf16.gmra.mrb[204].mxu0 %v5920_v15 }
 0x8ac   : > { %5684 = vmatprep.mubr.bf16.mxu0 %v5921_v5 }
 0x8af   : > { %5763 = vmatmul.mubr.bf16.gmra.mrb[196].mxu1 %v5916_v45 }
 0x8b0   : > { %5766 = vmatprep.mubr.bf16.mxu1 %v5917_v19 }
 0x8b3   : > { %5685 = vmatmul.mubr.bf16.gmra.mrb[208].mxu0 %v5922_v8 }
 0x8b4   : > { %5688 = vmatprep.mubr.bf16.mxu0 %v5923_v50 }
 0x8b7   : > { %5767 = vmatmul.mubr.bf16.gmra.mrb[200].mxu1 %v5918_v25 }
 0x8b8   : > { %5770 = vmatprep.mubr.bf16.mxu1 %v5919_v62  ;;  %v8384_v62 = vld [vmem:[#allocation34_spill] sm:$0xff] }
 0x8bb   : > { %5689 = vmatmul.mubr.bf16.gmra.mrb[212].mxu0 %v5924_v16 }
 0x8bc   : > { %5692 = vmatprep.mubr.bf16.mxu0 %v5925_v55 }
 0x8bf   : > { %5771 = vmatmul.mubr.bf16.gmra.mrb[204].mxu1 %v5920_v15 }
 0x8c0   : > { %5774 = vmatprep.mubr.bf16.mxu1 %v5921_v5 }
 0x8c3   : > { %5693 = vmatmul.mubr.bf16.gmra.mrb[216].mxu0 %v5926_v54 }
 0x8c4   : > { %5696 = vmatprep.mubr.bf16.mxu0 %v5927_v46 }
 0x8c7   : > { %5775 = vmatmul.mubr.bf16.gmra.mrb[208].mxu1 %v5922_v8 }
 0x8c8   : > { %5778 = vmatprep.mubr.bf16.mxu1 %v5923_v50 }
 0x8cb   : > { %5697 = vmatmul.mubr.bf16.gmra.mrb[220].mxu0 %v5928_v49 }
 0x8cf   : > { %5779 = vmatmul.mubr.bf16.gmra.mrb[212].mxu1 %v5924_v16 }
 0x8d0   : > { %5782 = vmatprep.mubr.bf16.mxu1 %v5925_v55 }
 0x8d7   : > { %5783 = vmatmul.mubr.bf16.gmra.mrb[216].mxu1 %v5926_v54 }
 0x8d8   : > { %5786 = vmatprep.mubr.bf16.mxu1 %v5927_v46 }
 0x8df   : > { %5787 = vmatmul.mubr.bf16.gmra.mrb[220].mxu1 %v5928_v49 }
 0x966   : > { %v5670_v33 = vpop.f32.mrb[192].mxu0 }
 0x967   : > { %v3773_v59 = vadd.f32 %v5670_v33, %v8381_v4  ;;  %v3764_v53 = vpop.f32.mrb[193].mxu0 }
 0x968   : > { %v3765_v30 = vadd.f32 %v3764_v53, %v8382_v26  ;;  %v5671_v43 = vpop.f32.mrb[194].mxu0 }
 0x969   : > { %v3893_v47 = vmax.f32 %v3773_v59, 0.0  ;;  %v3776_v40 = vadd.f32 %v5671_v43, %v8383_v10  ;;  %v3767_v9 = vpop.f32.mrb[195].mxu0 }
 0x96a   : > { %v3891_v20 = vmax.f32 %v3765_v30, 0.0  ;;  %v3768_v42 = vadd.f32 %v3767_v9, %v8301_v38 }
 0x96b   : > { %v3925_v34 = vmax.f32 %v7400_v11, %v3893_v47  ;;  %v3894_v48 = vmax.f32 %v3776_v40, 0.0 }
 0x96c   : > { %v3923_v52 = vmax.f32 %v7403_v28, %v3891_v20  ;;  %v3892_v27 = vmax.f32 %v3768_v42, 0.0  ;;  %v8385_v20 = vld [vmem:[#allocation68_spill] sm:$0xff] }
 0x96d   : > { %v3926_v2 = vmax.f32 %v7406_v24, %v3894_v48 }
 0x96e   : > { %v3924_v37 = vmax.f32 %v7409_v13, %v3892_v27  ;;  %v5674_v31 = vpop.f32.mrb[196].mxu0 }
 0x96f   : > { %v3789_v45 = vadd.f32 %v5674_v31, %v8304_v18  ;;  %v3780_v14 = vpop.f32.mrb[197].mxu0 }
 0x970   : > { %v3781_v19 = vadd.f32 %v3780_v14, %v8305_v0  ;;  %v5675_v58 = vpop.f32.mrb[198].mxu0 }
 0x971   : > { %v3897_v25 = vmax.f32 %v3789_v45, 0.0  ;;  %v3792_v15 = vadd.f32 %v5675_v58, %v8384_v62  ;;  %v3783_v5 = vpop.f32.mrb[199].mxu0  ;;  %v8386_v45 = vld [vmem:[#allocation69_spill] sm:$0xff] }
 0x972   : > { %v3895_v11 = vmax.f32 %v3781_v19, 0.0  ;;  %v3784_v8 = vadd.f32 %v3783_v5, %v8307_v44 }
 0x973   : > { %v7744_v28 = vmax.f32 %v7429_v60, %v3897_v25  ;;  %v3898_v24 = vmax.f32 %v3792_v15, 0.0  ;;  %v8387_v25 = vld [vmem:[#allocation71_spill] sm:$0xff] }
 0x974   : > { %v7747_v13 = vmax.f32 %v7433_v29, %v3895_v11  ;;  %v3896_v50 = vmax.f32 %v3784_v8, 0.0 }
 0x975   : > { %v7750_v16 = vmax.f32 %v7437_v36, %v3898_v24  ;;  %v8388_v24 = vld [vmem:[#allocation42_spill] sm:$0xff] }
 0x976   : > { %v7753_v55 = vmax.f32 %v7441_v1, %v3896_v50  ;;  %v5678_v54 = vpop.f32.mrb[200].mxu0 }
 0x977   : > { %v3805_v46 = vadd.f32 %v5678_v54, %v8312_v23  ;;  %v3796_v49 = vpop.f32.mrb[201].mxu0 }
 0x978   : > { %v3797_v33 = vadd.f32 %v3796_v49, %v8313_v35  ;;  %v5679_v60 = vpop.f32.mrb[202].mxu0 }
 0x979   : > { %v3901_v59 = vmax.f32 %v3805_v46, 0.0  ;;  %v3808_v53 = vadd.f32 %v5679_v60, %v8314_v57  ;;  %v3799_v29 = vpop.f32.mrb[203].mxu0 }
 0x97a   : > { %v3899_v30 = vmax.f32 %v3797_v33, 0.0  ;;  %v3800_v43 = vadd.f32 %v3799_v29, %v8315_v61  ;;  %v5760_v47 = vpop.f32.mrb[192].mxu1 }
 0x97b   : > { %v7760_v36 = vmax.f32 %v7461_v22, %v3901_v59  ;;  %v3902_v1 = vmax.f32 %v3808_v53, 0.0  ;;  %v4214_v40 = vadd.f32 %v5760_v47, %v8381_v4  ;;  %v4205_v9 = vpop.f32.mrb[193].mxu1 }
 0x97c   : > { %v7765_v42 = vmax.f32 %v8385_v20, %v3899_v30  ;;  %v3900_v48 = vmax.f32 %v3800_v43, 0.0  ;;  %v4206_v27 = vadd.f32 %v4205_v9, %v8382_v26  ;;  %v5761_v31 = vpop.f32.mrb[194].mxu1 }
 0x97d   : > { %v7769_v14 = vmax.f32 %v8386_v45, %v3902_v1  ;;  %v4334_v19 = vmax.f32 %v4214_v40, 0.0  ;;  %v4217_v58 = vadd.f32 %v5761_v31, %v8383_v10  ;;  %v4208_v22 = vpop.f32.mrb[195].mxu1  ;;  %v8389_v45 = vld [vmem:[#allocation72_spill] sm:$0xff] }
 0x97e   : > { %v7773_v15 = vmax.f32 %v8387_v25, %v3900_v48  ;;  %v4332_v4 = vmax.f32 %v4206_v27, 0.0  ;;  %v4209_v26 = vadd.f32 %v4208_v22, %v8301_v38  ;;  %v5682_v5 = vpop.f32.mrb[204].mxu0  ;;  %v8390_v25 = vld [vmem:[#allocation52_spill] sm:$0xff] }
 0x97f   : > { %v4366_v11 = vmax.f32 %v3925_v34, %v4334_v19  ;;  %v4335_v8 = vmax.f32 %v4217_v58, 0.0  ;;  %v3821_v10 = vadd.f32 %v5682_v5, %v8388_v24  ;;  %v3812_v50 = vpop.f32.mrb[205].mxu0 }
 0x980   : > { %v4364_v54 = vmax.f32 %v3923_v52, %v4332_v4  ;;  %v4333_v46 = vmax.f32 %v4209_v26, 0.0  ;;  %v3813_v49 = vadd.f32 %v3812_v50, %v8321_v3  ;;  %v5683_v33 = vpop.f32.mrb[206].mxu0  ;;  %v8392_v50 = vld [vmem:[#allocation53_spill] sm:$0xff] }
 0x981   : > { %4399 = vst.msk [vmem:[%s7778_s14 + $0x10] sm:$0xff] %vm4396_vm4, %v4366_v11  ;;  %v4367_v60 = vmax.f32 %v3926_v2, %v4335_v8  ;;  %v3905_v59 = vmax.f32 %v3821_v10, 0.0  ;;  %v3824_v53 = vadd.f32 %v5683_v33, %v6549_v7  ;;  %v3815_v38 = vpop.f32.mrb[207].mxu0  ;;  %v8393_v33 = vld [vmem:[#allocation48_spill] sm:$0xff] }
 0x982   : > { %4397 = vst.msk [vmem:[%s7778_s14] sm:$0xff] %vm4396_vm4, %v4364_v54  ;;  %v4365_v34 = vmax.f32 %v3924_v37, %v4333_v46  ;;  %v3903_v29 = vmax.f32 %v3813_v49, 0.0  ;;  %v3816_v30 = vadd.f32 %v3815_v38, %v8241_v12  ;;  %v5764_v43 = vpop.f32.mrb[196].mxu1 }
 0x983   : > { %4400 = vst.msk [vmem:[%s7778_s14 + $0x18] sm:$0xff] %vm4396_vm4, %v4367_v60  ;;  %v7792_v52 = vmax.f32 %v7493_v39, %v3905_v59  ;;  %v3906_v47 = vmax.f32 %v3824_v53, 0.0  ;;  %v4230_v1 = vadd.f32 %v5764_v43, %v8304_v18  ;;  %v4221_v2 = vpop.f32.mrb[197].mxu1  ;;  %v8394_v59 = vld [vmem:[#allocation73_spill] sm:$0xff] }
 0x984   : > { %4398 = vst.msk [vmem:[%s7778_s14 + $0x8] sm:$0xff] %vm4396_vm4, %v4365_v34  ;;  %v7798_v40 = vmax.f32 %v7497_v32, %v3903_v29  ;;  %v3904_v9 = vmax.f32 %v3816_v30, 0.0  ;;  %v4222_v37 = vadd.f32 %v4221_v2, %v8305_v0  ;;  %v5765_v20 = vpop.f32.mrb[198].mxu1  ;;  %v8395_v29 = vld [vmem:[#allocation75_spill] sm:$0xff] }
 0x985   : > { %v7802_v48 = vmax.f32 %v7501_v21, %v3906_v47  ;;  %v4338_v27 = vmax.f32 %v4230_v1, 0.0  ;;  %v4233_v39 = vadd.f32 %v5765_v20, %v8384_v62  ;;  %v4224_v31 = vpop.f32.mrb[199].mxu1  ;;  %v8391_v62 = vld [vmem:[#allocation46_spill] sm:$0xff] }
 0x986   : > { %v7806_v18 = vmax.f32 %v8389_v45, %v3904_v9  ;;  %v4336_v19 = vmax.f32 %v4222_v37, 0.0  ;;  %v4225_v32 = vadd.f32 %v4224_v31, %v8307_v44  ;;  %v5686_v58 = vpop.f32.mrb[208].mxu0  ;;  %v8396_v1 = vld [vmem:[#allocation70_spill] sm:$0xff] }
 0x987   : > { %v4370_v22 = vmax.f32 %v7744_v28, %v4338_v27  ;;  %v4339_v0 = vmax.f32 %v4233_v39, 0.0  ;;  %v3837_v4 = vadd.f32 %v5686_v58, %v8390_v25  ;;  %v3828_v21 = vpop.f32.mrb[209].mxu0  ;;  %v8397_v27 = vld [vmem:[#allocation79_spill] sm:$0xff] }
 0x988   : > { %v4368_v26 = vmax.f32 %v7747_v13, %v4336_v19  ;;  %v4337_v5 = vmax.f32 %v4225_v32, 0.0  ;;  %v3829_v11 = vadd.f32 %v3828_v21, %v8391_v62  ;;  %v5687_v8 = vpop.f32.mrb[210].mxu0  ;;  %v8398_v32 = vld [vmem:[#allocation61_spill] sm:$0xff] }
 0x989   : > { %4403 = vst.msk [vmem:[%s7778_s14 + $0x30] sm:$0xff] %vm4396_vm4, %v4370_v22  ;;  %v4371_v10 = vmax.f32 %v7750_v16, %v4339_v0  ;;  %v3909_v44 = vmax.f32 %v3837_v4, 0.0  ;;  %v3840_v54 = vadd.f32 %v5687_v8, %v8392_v50  ;;  %v3831_v28 = vpop.f32.mrb[211].mxu0 }
 0x98a   : > { %4401 = vst.msk [vmem:[%s7778_s14 + $0x20] sm:$0xff] %vm4396_vm4, %v4368_v26  ;;  %v4369_v46 = vmax.f32 %v7753_v55, %v4337_v5  ;;  %v3907_v49 = vmax.f32 %v3829_v11, 0.0  ;;  %v3832_v13 = vadd.f32 %v3831_v28, %v8393_v33  ;;  %v5768_v60 = vpop.f32.mrb[200].mxu1  ;;  %v8400_v11 = vld [vmem:[#allocation64_spill] sm:$0xff] }
 0x98b   : > { %4404 = vst.msk [vmem:[%s7778_s14 + $0x38] sm:$0xff] %vm4396_vm4, %v4371_v10  ;;  %v7824_v53 = vmax.f32 %v8394_v59, %v3909_v44  ;;  %v3910_v38 = vmax.f32 %v3840_v54, 0.0  ;;  %v4246_v16 = vadd.f32 %v5768_v60, %v8312_v23  ;;  %v4237_v34 = vpop.f32.mrb[201].mxu1  ;;  %v8401_v54 = vld [vmem:[#allocation59_spill] sm:$0xff]  ;;  %v8403_v59 = vld [vmem:[#allocation28_spill] sm:$0xff] }
 0x98c   : > { %4402 = vst.msk [vmem:[%s7778_s14 + $0x28] sm:$0xff] %vm4396_vm4, %v4369_v46  ;;  %v7830_v30 = vmax.f32 %v8395_v29, %v3907_v49  ;;  %v3908_v43 = vmax.f32 %v3832_v13, 0.0  ;;  %v4238_v55 = vadd.f32 %v4237_v34, %v8313_v35  ;;  %v5769_v47 = vpop.f32.mrb[202].mxu1  ;;  %v8402_v46 = vld [vmem:[#allocation2_spill] sm:$0xff]  ;;  %v8404_v29 = vld [vmem:[#allocation41_spill] sm:$0xff] }
 0x98d   : > { %v7834_v2 = vmax.f32 %v8396_v1, %v3910_v38  ;;  %v4342_v9 = vmax.f32 %v4246_v16, 0.0  ;;  %v4249_v37 = vadd.f32 %v5769_v47, %v8314_v57  ;;  %v4240_v20 = vpop.f32.mrb[203].mxu1  ;;  %v8399_v57 = vld [vmem:[#allocation57_spill] sm:$0xff] }
 0x98e   : > { %v7838_v23 = vmax.f32 %v8397_v27, %v3908_v43  ;;  %v4340_v39 = vmax.f32 %v4238_v55, 0.0  ;;  %v4241_v31 = vadd.f32 %v4240_v20, %v8315_v61  ;;  %v5690_v45 = vpop.f32.mrb[212].mxu0 }
 0x98f   : > { %v4374_v19 = vmax.f32 %v7760_v36, %v4342_v9  ;;  %v4343_v35 = vmax.f32 %v4249_v37, 0.0  ;;  %v3853_v58 = vadd.f32 %v5690_v45, %v8398_v32  ;;  %v3844_v22 = vpop.f32.mrb[213].mxu0  ;;  %v8405_v9 = vld [vmem:[#allocation43_spill] sm:$0xff] }
 0x990   : > { %v4372_v0 = vmax.f32 %v7765_v42, %v4340_v39  ;;  %v4341_v4 = vmax.f32 %v4241_v31, 0.0  ;;  %v3845_v21 = vadd.f32 %v3844_v22, %v8399_v57  ;;  %v5691_v26 = vpop.f32.mrb[214].mxu0 }
 0x991   : > { %4407 = vst.msk [vmem:[%s7778_s14 + $0x50] sm:$0xff] %vm4396_vm4, %v4374_v19  ;;  %v4375_v5 = vmax.f32 %v7769_v14, %v4343_v35  ;;  %v3913_v61 = vmax.f32 %v3853_v58, 0.0  ;;  %v3856_v8 = vadd.f32 %v5691_v26, %v8400_v11  ;;  %v3847_v36 = vpop.f32.mrb[215].mxu0 }
 0x992   : > { %4405 = vst.msk [vmem:[%s7778_s14 + $0x40] sm:$0xff] %vm4396_vm4, %v4372_v0  ;;  %v4373_v10 = vmax.f32 %v7773_v15, %v4341_v4  ;;  %v3911_v44 = vmax.f32 %v3845_v21, 0.0  ;;  %v3848_v42 = vadd.f32 %v3847_v36, %v8401_v54  ;;  %v5772_v28 = vpop.f32.mrb[204].mxu1 }
 0x993   : > { %4408 = vst.msk [vmem:[%s7778_s14 + $0x58] sm:$0xff] %vm4396_vm4, %v4375_v5  ;;  %v7856_v49 = vmax.f32 %v8402_v46, %v3913_v61  ;;  %v3914_v13 = vmax.f32 %v3856_v8, 0.0  ;;  %v4262_v14 = vadd.f32 %v5772_v28, %v8388_v24  ;;  %v4253_v60 = vpop.f32.mrb[205].mxu1  ;;  %v8406_v5 = vld [vmem:[#allocation33_spill] sm:$0xff]  ;;  %v8408_v46 = vld [vmem:[#allocation32_spill] sm:$0xff] }
 0x994   : > { %4406 = vst.msk [vmem:[%s7778_s14 + $0x48] sm:$0xff] %vm4396_vm4, %v4373_v10  ;;  %v7862_v38 = vmax.f32 %v8403_v59, %v3911_v44  ;;  %v3912_v16 = vmax.f32 %v3848_v42, 0.0  ;;  %v4254_v15 = vadd.f32 %v4253_v60, %v8321_v3  ;;  %v5773_v34 = vpop.f32.mrb[206].mxu1  ;;  %v8407_v10 = vld [vmem:[#allocation31_spill] sm:$0xff] }
 0x995   : > { %v7866_v43 = vmax.f32 %v8404_v29, %v3914_v13  ;;  %v4346_v55 = vmax.f32 %v4262_v14, 0.0  ;;  %v4265_v47 = vadd.f32 %v5773_v34, %v6549_v7  ;;  %v4256_v1 = vpop.f32.mrb[207].mxu1 }
 0x996   : > { %v7870_v24 = vmax.f32 %v8405_v9, %v3912_v16  ;;  %v4344_v37 = vmax.f32 %v4254_v15, 0.0  ;;  %v4257_v20 = vadd.f32 %v4256_v1, %v8241_v12  ;;  %v5694_v27 = vpop.f32.mrb[216].mxu0  ;;  %v8409_v16 = vld [vmem:[#allocation44_spill] sm:$0xff] }
 0x997   : > { %v4378_v39 = vmax.f32 %v7792_v52, %v4346_v55  ;;  %v4347_v3 = vmax.f32 %v4265_v47, 0.0  ;;  %v3869_v31 = vadd.f32 %v5694_v27, %v8270_v41  ;;  %v3860_v45 = vpop.f32.mrb[217].mxu0 }
 0x998   : > { %v4376_v19 = vmax.f32 %v7798_v40, %v4344_v37  ;;  %v4345_v35 = vmax.f32 %v4257_v20, 0.0  ;;  %v3861_v7 = vadd.f32 %v3860_v45, %v6659_v63  ;;  %v5695_v58 = vpop.f32.mrb[218].mxu0 }
 0x999   : > { %4411 = vst.msk [vmem:[%s7778_s14 + $0x70] sm:$0xff] %vm4396_vm4, %v4378_v39  ;;  %v4379_v22 = vmax.f32 %v7802_v48, %v4347_v3  ;;  %v3917_v12 = vmax.f32 %v3869_v31, 0.0  ;;  %v3872_v0 = vadd.f32 %v5695_v58, %v6693_v17  ;;  %v3863_v52 = vpop.f32.mrb[219].mxu0  ;;  %v8410_v39 = vld [vmem:[#allocation78_spill] sm:$0xff] }
 0x99a   : > { %4409 = vst.msk [vmem:[%s7778_s14 + $0x60] sm:$0xff] %vm4396_vm4, %v4376_v19  ;;  %v4377_v4 = vmax.f32 %v7806_v18, %v4345_v35  ;;  %v3915_v21 = vmax.f32 %v3861_v7, 0.0  ;;  %v3864_v40 = vadd.f32 %v3863_v52, %v6668_v6  ;;  %v5776_v26 = vpop.f32.mrb[208].mxu1  ;;  %v8411_v19 = vld [vmem:[#allocation76_spill] sm:$0xff]  ;;  %v8412_v7 = vld [vmem:[#allocation45_spill] sm:$0xff] }
 0x99b   : > { %4412 = vst.msk [vmem:[%s7778_s14 + $0x78] sm:$0xff] %vm4396_vm4, %v4379_v22  ;;  %v7888_v61 = vmax.f32 %v8406_v5, %v3917_v12  ;;  %v3918_v8 = vmax.f32 %v3872_v0, 0.0  ;;  %v4278_v48 = vadd.f32 %v5776_v26, %v8390_v25  ;;  %v4269_v36 = vpop.f32.mrb[209].mxu1  ;;  %v8413_v0 = vld [vmem:[#allocation47_spill] sm:$0xff] }
 0x99c   : > { %4410 = vst.msk [vmem:[%s7778_s14 + $0x68] sm:$0xff] %vm4396_vm4, %v4377_v4  ;;  %v7894_v44 = vmax.f32 %v8407_v10, %v3915_v21  ;;  %v3916_v42 = vmax.f32 %v3864_v40, 0.0  ;;  %v4270_v18 = vadd.f32 %v4269_v36, %v8391_v62  ;;  %v5777_v28 = vpop.f32.mrb[210].mxu1  ;;  %v8414_v40 = vld [vmem:[#allocation49_spill] sm:$0xff] }
 0x99d   : > { %v7898_v13 = vmax.f32 %v8408_v46, %v3918_v8  ;;  %v4350_v14 = vmax.f32 %v4278_v48, 0.0  ;;  %v4281_v60 = vadd.f32 %v5777_v28, %v8392_v50  ;;  %v4272_v59 = vpop.f32.mrb[211].mxu1  ;;  %v8415_v36 = vld [vmem:[#allocation37_spill] sm:$0xff] }
 0x99e   : > { %v7902_v25 = vmax.f32 %v8409_v16, %v3916_v42  ;;  %v4348_v15 = vmax.f32 %v4270_v18, 0.0  ;;  %v4273_v34 = vadd.f32 %v4272_v59, %v8393_v33  ;;  %v5698_v29 = vpop.f32.mrb[220].mxu0 }
 0x99f   : > { %v4382_v55 = vmax.f32 %v7824_v53, %v4350_v14  ;;  %v4351_v62 = vmax.f32 %v4281_v60, 0.0  ;;  %v3885_v47 = vadd.f32 %v5698_v29, %v8334_v51  ;;  %v3876_v1 = vpop.f32.mrb[221].mxu0 }
 0x9a0   : > { %v4380_v9 = vmax.f32 %v7830_v30, %v4348_v15  ;;  %v4349_v37 = vmax.f32 %v4273_v34, 0.0  ;;  %v3877_v50 = vadd.f32 %v3876_v1, %v8336_v56  ;;  %v5699_v20 = vpop.f32.mrb[222].mxu0 }
 0x9a1   : > { %4415 = vst.msk [vmem:[%s7778_s14 + $0x90] sm:$0xff] %vm4396_vm4, %v4382_v55  ;;  %v4383_v27 = vmax.f32 %v7834_v2, %v4351_v62  ;;  %v3921_v33 = vmax.f32 %v3885_v47, 0.0  ;;  %v3888_v3 = vadd.f32 %v5699_v20, %v8410_v39  ;;  %v3879_v53 = vpop.f32.mrb[223].mxu0 }
 0x9a2   : > { %4413 = vst.msk [vmem:[%s7778_s14 + $0x80] sm:$0xff] %vm4396_vm4, %v4380_v9  ;;  %v4381_v31 = vmax.f32 %v7838_v23, %v4349_v37  ;;  %v3919_v45 = vmax.f32 %v3877_v50, 0.0  ;;  %v3880_v30 = vadd.f32 %v3879_v53, %v8411_v19  ;;  %v5780_v35 = vpop.f32.mrb[212].mxu1 }
 0x9a3   : > { %4416 = vst.msk [vmem:[%s7778_s14 + $0x98] sm:$0xff] %vm4396_vm4, %v4383_v27  ;;  %v3953_v58 = vmax.f32 %v8412_v7, %v3921_v33  ;;  %v3922_v22 = vmax.f32 %v3888_v3, 0.0  ;;  %v4294_v12 = vadd.f32 %v5780_v35, %v8398_v32  ;;  %v4285_v2 = vpop.f32.mrb[213].mxu1 }
 0x9a4   : > { %4414 = vst.msk [vmem:[%s7778_s14 + $0x88] sm:$0xff] %vm4396_vm4, %v4381_v31  ;;  %v3951_v52 = vmax.f32 %v8413_v0, %v3919_v45  ;;  %v3920_v4 = vmax.f32 %v3880_v30, 0.0  ;;  %v4286_v23 = vadd.f32 %v4285_v2, %v8399_v57  ;;  %v5781_v21 = vpop.f32.mrb[214].mxu1 }
 0x9a5   : > { %v3954_v26 = vmax.f32 %v8414_v40, %v3922_v22  ;;  %v4354_v5 = vmax.f32 %v4294_v12, 0.0  ;;  %v4297_v8 = vadd.f32 %v5781_v21, %v8400_v11  ;;  %v4288_v48 = vpop.f32.mrb[215].mxu1 }
 0x9a6   : > { %v3952_v32 = vmax.f32 %v8415_v36, %v3920_v4  ;;  %v4352_v10 = vmax.f32 %v4286_v23, 0.0  ;;  %v4289_v42 = vadd.f32 %v4288_v48, %v8401_v54 }
 0x9a7   : > { %v4386_v18 = vmax.f32 %v7856_v49, %v4354_v5  ;;  %v4355_v28 = vmax.f32 %v4297_v8, 0.0 }
 0x9a8   : > { %v4384_v46 = vmax.f32 %v7862_v38, %v4352_v10  ;;  %v4353_v57 = vmax.f32 %v4289_v42, 0.0 }
 0x9a9   : > { %4419 = vst.msk [vmem:[%s7778_s14 + $0xb0] sm:$0xff] %vm4396_vm4, %v4386_v18  ;;  %v4387_v14 = vmax.f32 %v7866_v43, %v4355_v28 }
 0x9aa   : > { %4417 = vst.msk [vmem:[%s7778_s14 + $0xa0] sm:$0xff] %vm4396_vm4, %v4384_v46  ;;  %v4385_v11 = vmax.f32 %v7870_v24, %v4353_v57  ;;  %v5784_v60 = vpop.f32.mrb[216].mxu1 }
 0x9ab   : > { %4420 = vst.msk [vmem:[%s7778_s14 + $0xb8] sm:$0xff] %vm4396_vm4, %v4387_v14  ;;  %v4310_v54 = vadd.f32 %v5784_v60, %v8270_v41  ;;  %v4301_v49 = vpop.f32.mrb[217].mxu1 }
 0x9ac   : > { %4418 = vst.msk [vmem:[%s7778_s14 + $0xa8] sm:$0xff] %vm4396_vm4, %v4385_v11  ;;  %v4302_v38 = vadd.f32 %v4301_v49, %v6659_v63  ;;  %v5785_v59 = vpop.f32.mrb[218].mxu1 }
 0x9ad   : > { %v4358_v16 = vmax.f32 %v4310_v54, 0.0  ;;  %v4313_v43 = vadd.f32 %v5785_v59, %v6693_v17  ;;  %v4304_v15 = vpop.f32.mrb[219].mxu1 }
 0x9ae   : > { %v4356_v24 = vmax.f32 %v4302_v38, 0.0  ;;  %v4305_v34 = vadd.f32 %v4304_v15, %v6668_v6 }
 0x9af   : > { %v4390_v29 = vmax.f32 %v7888_v61, %v4358_v16  ;;  %v4359_v55 = vmax.f32 %v4313_v43, 0.0 }
 0x9b0   : > { %v4388_v41 = vmax.f32 %v7894_v44, %v4356_v24  ;;  %v4357_v62 = vmax.f32 %v4305_v34, 0.0 }
 0x9b1   : > { %4423 = vst.msk [vmem:[%s7778_s14 + $0xd0] sm:$0xff] %vm4396_vm4, %v4390_v29  ;;  %v4391_v63 = vmax.f32 %v7898_v13, %v4359_v55 }
 0x9b2   : > { %4421 = vst.msk [vmem:[%s7778_s14 + $0xc0] sm:$0xff] %vm4396_vm4, %v4388_v41  ;;  %v4389_v47 = vmax.f32 %v7902_v25, %v4357_v62  ;;  %v5788_v17 = vpop.f32.mrb[220].mxu1 }
 0x9b3   : > { %4424 = vst.msk [vmem:[%s7778_s14 + $0xd8] sm:$0xff] %vm4396_vm4, %v4391_v63  ;;  %v4326_v6 = vadd.f32 %v5788_v17, %v8334_v51  ;;  %v4317_v61 = vpop.f32.mrb[221].mxu1 }
 0x9b4   : > { %4422 = vst.msk [vmem:[%s7778_s14 + $0xc8] sm:$0xff] %vm4396_vm4, %v4389_v47  ;;  %v4318_v44 = vadd.f32 %v4317_v61, %v8336_v56  ;;  %v5789_v1 = vpop.f32.mrb[222].mxu1 }
 0x9b5   : > { %v4362_v13 = vmax.f32 %v4326_v6, 0.0  ;;  %v4329_v9 = vadd.f32 %v5789_v1, %v8410_v39  ;;  %v4320_v37 = vpop.f32.mrb[223].mxu1 }
 0x9b6   : > { %v4360_v25 = vmax.f32 %v4318_v44, 0.0  ;;  %v4321_v50 = vadd.f32 %v4320_v37, %v8411_v19 }
 0x9b7   : > { %v4394_v20 = vmax.f32 %v3953_v58, %v4362_v13  ;;  %v4363_v27 = vmax.f32 %v4329_v9, 0.0 }
 0x9b8   : > { %v4392_v33 = vmax.f32 %v3951_v52, %v4360_v25  ;;  %v4361_v51 = vmax.f32 %v4321_v50, 0.0 }
 0x9b9   : > { %4427 = vst.msk [vmem:[%s7778_s14 + $0xf0] sm:$0xff] %vm4396_vm4, %v4394_v20  ;;  %v4395_v3 = vmax.f32 %v3954_v26, %v4363_v27 }
 0x9ba   : > { %4425 = vst.msk [vmem:[%s7778_s14 + $0xe0] sm:$0xff] %vm4396_vm4, %v4392_v33  ;;  %v4393_v53 = vmax.f32 %v3952_v32, %v4361_v51 }
 0x9bb   : > { %4428 = vst.msk [vmem:[%s7778_s14 + $0xf8] sm:$0xff] %vm4396_vm4, %v4395_v3 }
 0x9bc   : > { %4426 = vst.msk [vmem:[%s7778_s14 + $0xe8] sm:$0xff] %vm4396_vm4, %v4393_v53 }
 0x9bd PF: > { %s17_s26 = sadd.s32 1, %s5951_s26   ;;  %s8416_s24 = smov %s5947_s25 }
 0x9be   : > { %p14_p5 = scmp.ge.s32.totalorder %s17_s26, 4   ;;  %s8417_s25 = smov %s8419_s27 }
 0x9c0   :  { %16 = sbr.rel (!%p14_p5) target bundleno = 2 (0x2), region = 85 }

// kernel: model_forward.13
= control target key start
LH: loop header
LB: loop body
LE: loop exit
PB: predicated region body
PF: predicated region fallthrough
CT: control target
= control target key end

     0   :  { %s995_s18 = smov 0   ;;  %s997_s19 = smov 0   ;;  %s1158_s0 = inlined_call_operand.vmem [shape: f32[2,320,16], index: 0, kind: input, shape index: {}]   ;;  %s1159_s1 = inlined_call_operand.vmem [shape: bf16[64,320], index: 1, kind: input, shape index: {}]   ;;  %s1160_s2 = inlined_call_operand.vmem [shape: f32[64,1], index: 2, kind: input, shape index: {}]   ;;  %s1161_s3 = inlined_call_operand.vmem [shape: bf16[32,64], index: 3, kind: input, shape index: {}]   ;;  %s1162_s4 = inlined_call_operand.vmem [shape: f32[32,1], index: 4, kind: input, shape index: {}]   ;;  %s1163_s5 = inlined_call_operand.vmem [shape: f32[2,32,16], index: 5, kind: output, shape index: {}]  }
   0x1   :  { %s999_s20 = smov 0  }
   0x2 LB: > { %s27_s21 = sadd.s32 1, %s958_s19  ;;  %p785_p0 = scmp.ge.s32.totalorder %s962_s20, 1  ;;  %s962_s20 = sphi %s999_s20, %s15_s20   ;;  %s958_s19 = sphi %s997_s19, %s1165_s19   ;;  %s954_s18 = sphi %s995_s18, %s1164_s18  }
   0x3   : > { %p29_p1 = scmp.ge.s32.totalorder %s27_s21, 2  ;;  %p206_p2 = scmp.lt.s32.totalorder %s962_s20, 3 }
   0x5   : > { %s1167_s21 = smov (%p29_p1, %s27_s21), 0  ;;  %p207_p3 = pnand %p785_p0, %p206_p2 }
   0x6   : > { %p240_p4 = scmp.lt.s32.totalorder (!%p207_p3), %s954_s18, 1  ;;  %vm441_vm0 = vcmask (!%p207_p3), 523264   ;;  %v924_v0 = vld [vmem:[%s1159_s1 + $0x4] ss:$12 sps:$4 sm:$0xff] (!%p207_p3)   ;;  %v925_v1 = vld [vmem:[%s1159_s1 + $0x8] ss:$12 sps:$4 sm:$0xff] (!%p207_p3)  }
   0x7   : > { %210 = sbr.rel (%p207_p3) target bundleno = 526 (0x20e), region = 40  ;;  %486 = vmatprep.mubr.bf16.mxu0 (!%p207_p3), %v924_v0  ;;  %874 = vmatprep.mubr.msk.bf16.mxu1 (!%p207_p3), %vm441_vm0, %v925_v1  ;;  %v964_v2 = vmov (!%p207_p3), 0   ;;  %v313_v45 = vld [vmem:[%s1160_s2] sm:$0xff] (!%p207_p3)  ;;  %v315_v48 = vld [vmem:[%s1160_s2 + $0x10] sm:$0xff] (!%p207_p3)  ;;  %v314_v54 = vld [vmem:[%s1160_s2 + $0x8] sm:$0xff] (!%p207_p3)  ;;  %vm693_vm1 = vcmask (!%p207_p3), 130048  }
   0x8   : > { %920 = vset.pattern.permute.xlu0 (!%p207_p3), %v964_v2  ;;  %921 = vset.pattern.permute.xlu1 (!%p207_p3), %v964_v2  ;;  %v316_v55 = vld [vmem:[%s1160_s2 + $0x18] sm:$0xff] (!%p207_p3)  ;;  %v926_v60 = vld [vmem:[%s1159_s1 + $0x20] ss:$12 sps:$4 sm:$0xff] (!%p207_p3)  }
   0x9   : > { %343 = vperm.xlu0 (!%p207_p3), %920, %v313_v45   ;;  %353 = vperm.xlu1 (!%p207_p3), %921, %v315_v48   ;;  %v317_v63 = vld [vmem:[%s1160_s2 + $0x20] sm:$0xff] (!%p207_p3)  ;;  %v318_v1 = vld [vmem:[%s1160_s2 + $0x28] sm:$0xff] (!%p207_p3) }
   0xa   : > { %v933_v0 = vld [vmem:[%s1159_s1 + $0x38] ss:$12 sps:$4 sm:$0xff] (!%p207_p3)  }
   0xd   : > { %348 = vperm.xlu0 (!%p207_p3), %920, %v314_v54   ;;  %358 = vperm.xlu1 (!%p207_p3), %921, %v316_v55  }
   0xe   : > { %s1169_s18 = smov (!%p240_p4, %s954_s18), 1 }
   0xf   : > { %s894_s26 = smul.u32 320, %s1169_s18  ;;  %s811_s11 = sshll.u32 %s1169_s18, 5 }
  0x10   : > { %s255_s14 = scalar_lea.vmem %s1163_s5, %s811_s11 }
  0x11   : > { %s1026_s29 = scalar_lea.vmem %s1158_s0, %s894_s26  ;;  %363 = vperm.xlu0 %920, %v317_v63   ;;  %368 = vperm.xlu1 %921, %v318_v1  }
  0x12   : > { %v273_v3 = vld [vmem:[%s1026_s29 + $0x80] sm:$0xff]  ;;  %v274_v4 = vld [vmem:[%s1026_s29 + $0x88] sm:$0xff]  ;;  %v275_v8 = vld [vmem:[%s1026_s29 + $0x90] sm:$0xff] }
  0x13   : > { %v257_v5 = vld [vmem:[%s1026_s29] sm:$0xff]  ;;  %v329_v6 = vpack.c.bf16 %v274_v4, %v273_v3  ;;  %v258_v7 = vld [vmem:[%s1026_s29 + $0x8] sm:$0xff]  ;;  %v276_v9 = vld [vmem:[%s1026_s29 + $0x98] sm:$0xff] }
  0x14   : > { %v321_v10 = vpack.c.bf16 %v258_v7, %v257_v5  ;;  %v330_v11 = vpack.c.bf16 %v276_v9, %v275_v8  ;;  %v259_v12 = vld [vmem:[%s1026_s29 + $0x10] sm:$0xff]  ;;  %v260_v13 = vld [vmem:[%s1026_s29 + $0x18] sm:$0xff]  ;;  %v277_v14 = vld [vmem:[%s1026_s29 + $0xa0] sm:$0xff] }
  0x15   : > { %812 = vmatprep.subr.bf16.mxu0 %v329_v6  ;;  %v278_v15 = vld [vmem:[%s1026_s29 + $0xa8] sm:$0xff]  ;;  %v322_v16 = vpack.c.bf16 %v260_v13, %v259_v12  ;;  %v261_v18 = vld [vmem:[%s1026_s29 + $0x20] sm:$0xff]  ;;  %v279_v20 = vld [vmem:[%s1026_s29 + $0xb0] sm:$0xff] }
  0x16   : > { %813 = vmatpush3.bf16.msra.mxu0 %v321_v10  ;;  %v331_v17 = vpack.c.bf16 %v278_v15, %v277_v14  ;;  %v262_v19 = vld [vmem:[%s1026_s29 + $0x28] sm:$0xff]  ;;  %v280_v21 = vld [vmem:[%s1026_s29 + $0xb8] sm:$0xff]  ;;  %v289_v22 = vld [vmem:[%s1026_s29 + $0x100] sm:$0xff] }
  0x17   : > { %814 = vmatprep.subr.bf16.mxu0 %v330_v11  ;;  %v290_v23 = vld [vmem:[%s1026_s29 + $0x108] sm:$0xff]  ;;  %v323_v24 = vpack.c.bf16 %v262_v19, %v261_v18  ;;  %v263_v25 = vld [vmem:[%s1026_s29 + $0x30] sm:$0xff]  ;;  %v332_v27 = vpack.c.bf16 %v280_v21, %v279_v20  ;;  %v264_v28 = vld [vmem:[%s1026_s29 + $0x38] sm:$0xff] }
  0x18   : > { %v337_v26 = vpack.c.bf16 %v290_v23, %v289_v22  ;;  %v291_v29 = vld [vmem:[%s1026_s29 + $0x110] sm:$0xff]  ;;  %v292_v30 = vld [vmem:[%s1026_s29 + $0x118] sm:$0xff]  ;;  %v281_v31 = vld [vmem:[%s1026_s29 + $0xc0] sm:$0xff]  ;;  %v324_v37 = vpack.c.bf16 %v264_v28, %v263_v25 }
  0x19   : > { %v282_v32 = vld [vmem:[%s1026_s29 + $0xc8] sm:$0xff]  ;;  %v338_v33 = vpack.c.bf16 %v292_v30, %v291_v29  ;;  %v265_v34 = vld [vmem:[%s1026_s29 + $0x40] sm:$0xff]  ;;  %v283_v39 = vld [vmem:[%s1026_s29 + $0xd0] sm:$0xff] }
  0x1a   : > { %815 = vmatpush3.bf16.msra.mxu0 %v322_v16  ;;  %866 = vmatprep.subr.bf16.mxu1 %v337_v26  ;;  %v293_v35 = vld [vmem:[%s1026_s29 + $0x120] sm:$0xff]  ;;  %v294_v36 = vld [vmem:[%s1026_s29 + $0x128] sm:$0xff]  ;;  %v295_v41 = vld [vmem:[%s1026_s29 + $0x130] sm:$0xff]  ;;  %v333_v42 = vpack.c.bf16 %v282_v32, %v281_v31 }
  0x1b   : > { %816 = vmatprep.subr.bf16.mxu0 %v331_v17  ;;  %867 = vmatpush3.bf16.msra.mxu1 %v337_v26  ;;  %v266_v38 = vld [vmem:[%s1026_s29 + $0x48] sm:$0xff]  ;;  %v339_v40 = vpack.c.bf16 %v294_v36, %v293_v35  ;;  %v296_v43 = vld [vmem:[%s1026_s29 + $0x138] sm:$0xff]  ;;  %v267_v50 = vld [vmem:[%s1026_s29 + $0x50] sm:$0xff] }
  0x1c   : > { %868 = vmatprep.subr.bf16.mxu1 %v338_v33  ;;  %v284_v44 = vld [vmem:[%s1026_s29 + $0xd8] sm:$0xff]  ;;  %v325_v46 = vpack.c.bf16 %v266_v38, %v265_v34  ;;  %v340_v47 = vpack.c.bf16 %v296_v43, %v295_v41  ;;  %v285_v52 = vld [vmem:[%s1026_s29 + $0xe0] sm:$0xff]  ;;  %v286_v53 = vld [vmem:[%s1026_s29 + $0xe8] sm:$0xff] }
  0x1d   : > { %v334_v49 = vpack.c.bf16 %v284_v44, %v283_v39  ;;  %v268_v51 = vld [vmem:[%s1026_s29 + $0x58] sm:$0xff]  ;;  %v335_v57 = vpack.c.bf16 %v286_v53, %v285_v52  ;;  %v269_v58 = vld [vmem:[%s1026_s29 + $0x60] sm:$0xff]  ;;  %v270_v59 = vld [vmem:[%s1026_s29 + $0x68] sm:$0xff] }
  0x1e   : > { %817 = vmatpush3.bf16.msra.mxu0 %v323_v24  ;;  %v326_v56 = vpack.c.bf16 %v268_v51, %v267_v50  ;;  %v287_v61 = vld [vmem:[%s1026_s29 + $0xf0] sm:$0xff]  ;;  %v288_v62 = vld [vmem:[%s1026_s29 + $0xf8] sm:$0xff]  ;;  %v327_v2 = vpack.c.bf16 %v270_v59, %v269_v58  ;;  %v596_v10 = vld [vmem:[%s1162_s4] sm:$0xff] }
  0x1f   : > { %818 = vmatprep.subr.bf16.mxu0 %v332_v27  ;;  %869 = vmatpush3.bf16.msra.mxu1 %v338_v33  ;;  %v336_v3 = vpack.c.bf16 %v288_v62, %v287_v61  ;;  %v271_v4 = vld [vmem:[%s1026_s29 + $0x70] sm:$0xff]  ;;  %v272_v5 = vld [vmem:[%s1026_s29 + $0x78] sm:$0xff]  ;;  %v922_v11 = vld [vmem:[%s1159_s1] ss:$12 sps:$4 sm:$0xff]  }
  0x20   : > { %870 = vmatprep.subr.bf16.mxu1 %v339_v40  ;;  %v319_v6 = vld [vmem:[%s1160_s2 + $0x30] sm:$0xff]  ;;  %v320_v7 = vld [vmem:[%s1160_s2 + $0x38] sm:$0xff]  ;;  %v328_v8 = vpack.c.bf16 %v272_v5, %v271_v4  ;;  %v597_v12 = vld [vmem:[%s1162_s4 + $0x8] sm:$0xff] }
  0x21   : > { %373 = vperm.xlu0 %920, %v319_v6   ;;  %v934_v9 = vld [vmem:[%s1159_s1 + $0x50] ss:$12 sps:$4 sm:$0xff]   ;;  %378 = vperm.xlu1 %921, %v320_v7   ;;  %v929_v16 = vld [vmem:[%s1159_s1 + $0x18] ss:$12 sps:$4 sm:$0xff]   ;;  %v930_v17 = vld [vmem:[%s1159_s1 + $0x34] ss:$12 sps:$4 sm:$0xff]  }
  0x22   : > { %819 = vmatpush3.bf16.msra.mxu0 %v324_v37  ;;  %v927_v13 = vld [vmem:[%s1159_s1 + $0x1c] ss:$12 sps:$4 sm:$0xff]   ;;  %v598_v14 = vld [vmem:[%s1162_s4 + $0x10] sm:$0xff]  ;;  %v935_v19 = vld [vmem:[%s1159_s1 + $0x4c] ss:$12 sps:$4 sm:$0xff]  }
  0x23   : > { %820 = vmatprep.subr.bf16.mxu0 %v333_v42  ;;  %871 = vmatpush3.bf16.msra.mxu1 %v339_v40  ;;  %v599_v15 = vld [vmem:[%s1162_s4 + $0x18] sm:$0xff]  ;;  %v937_v20 = vld [vmem:[%s1159_s1 + $0x48] ss:$12 sps:$4 sm:$0xff]   ;;  %v938_v21 = vld [vmem:[%s1161_s3] sm:$0xff]  }
  0x24   : > { %872 = vmatprep.subr.bf16.mxu1 %v340_v47  ;;  %v932_v18 = vld [vmem:[%s1159_s1 + $0x30] ss:$12 sps:$4 sm:$0xff]  }
  0x25   : > { %606 = vperm.xlu0 %920, %v596_v10   ;;  %611 = vperm.xlu1 %921, %v597_v12  }
  0x26   : > { %821 = vmatpush3.bf16.msra.mxu0 %v325_v46 }
  0x27   : > { %822 = vmatprep.subr.bf16.mxu0 %v334_v49  ;;  %873 = vmatpush3.bf16.msra.mxu1 %v340_v47 }
  0x29   : > { %616 = vperm.xlu0 %920, %v598_v14   ;;  %621 = vperm.xlu1 %921, %v599_v15  }
  0x2a   : > { %823 = vmatpush3.bf16.msra.mxu0 %v326_v56  ;;  %875 = vmatmul.mubr.msk.bf16.vlgmr.msra.gmra.mrb[0].mxu1 %vm441_vm0, %v926_v60 }
  0x2b   : > { %824 = vmatprep.subr.bf16.mxu0 %v335_v57  ;;  %878 = vmatprep.mubr.msk.bf16.mxu1 %vm441_vm0, %v933_v0 }
  0x2e   : > { %825 = vmatpush3.bf16.msra.mxu0 %v327_v2 }
  0x2f   : > { %826 = vmatprep.subr.bf16.mxu0 %v336_v3 }
  0x32   : > { %827 = vmatpush3.bf16.msra.mxu0 %v328_v8  ;;  %879 = vmatmul.mubr.msk.bf16.gmra.mrb[4].mxu1 %vm441_vm0, %v934_v9 }
  0x33   : > { %890 = vmatprep.mubr.msk.bf16.mxu1 %vm441_vm0, %v938_v21 }
  0x35   : > { %487 = vmatmul.mubr.bf16.vlgmr.msra.gmra.mrb[0].mxu0 %v922_v11 }
  0x36   : > { %494 = vmatprep.mubr.bf16.mxu0 %v927_v13 }
  0x3d   : > { %495 = vmatmul.mubr.bf16.gmra.mrb[4].mxu0 %v929_v16 }
  0x3e   : > { %502 = vmatprep.mubr.bf16.mxu0 %v930_v17 }
  0x45   : > { %503 = vmatmul.mubr.bf16.gmra.mrb[8].mxu0 %v932_v18 }
  0x46   : > { %510 = vmatprep.mubr.bf16.mxu0 %v935_v19 }
  0x4d   : > { %511 = vmatmul.mubr.bf16.gmra.mrb[12].mxu0 %v937_v20 }
  0x88   : > { %v344_v26 = vpop.permute.xlu0 %343  ;;  %v354_v41 = vpop.permute.xlu1 %353 }
  0x8c   : > { %v349_v38 = vpop.permute.xlu0 %348  ;;  %v359_v53 = vpop.permute.xlu1 %358 }
  0x90   : > { %v364_v63 = vpop.permute.xlu0 %363  ;;  %v369_v4 = vpop.permute.xlu1 %368 }
  0xa0   : > { %v374_v14 = vpop.permute.xlu0 %373  ;;  %v379_v19 = vpop.permute.xlu1 %378 }
  0xfd   : > { %v876_v22 = vpop.f32.mrb[0].mxu1 }
  0xfe   : > { %v553_v23 = vpop.f32.mrb[1].mxu1 }
  0xff   : > { %v877_v24 = vpop.f32.mrb[2].mxu1 }
 0x100   : > { %v556_v25 = vpop.f32.mrb[3].mxu1 }
 0x105   : > { %v880_v27 = vpop.f32.mrb[4].mxu1 }
 0x106   : > { %v569_v29 = vpop.f32.mrb[5].mxu1 }
 0x107   : > { %v881_v31 = vpop.f32.mrb[6].mxu1 }
 0x108   : > { %v828_v28 = vpop.f32.mrb[0].mxu0  ;;  %v572_v34 = vpop.f32.mrb[7].mxu1 }
 0x109   : > { %v829_v30 = vpop.f32.mrb[1].mxu0 }
 0x10a   : > { %v830_v32 = vadd.f32 %v829_v30, %v828_v28  ;;  %v831_v33 = vpop.f32.mrb[2].mxu0  ;;  %v607_v28 = vpop.permute.xlu0 %606 }
 0x10b   : > { %v832_v35 = vpop.f32.mrb[3].mxu0 }
 0x10c   : > { %v833_v36 = vadd.f32 %v832_v35, %v831_v33  ;;  %v489_v37 = vadd.f32 %v830_v32, %v344_v26  ;;  %v939_v26 = vld [vmem:[%s1161_s3 + $0x8] sm:$0xff]  }
 0x10e   : > { %v554_v39 = vadd.f32 %v553_v23, %v489_v37  ;;  %v492_v40 = vadd.f32 %v833_v36, %v349_v38  ;;  %v617_v30 = vpop.permute.xlu0 %616 }
 0x110   : > { %v557_v42 = vadd.f32 %v556_v25, %v492_v40  ;;  %v834_v43 = vpop.f32.mrb[4].mxu0  ;;  %v584_v45 = vmax.f32 %v554_v39, 0.0 }
 0x111   : > { %v835_v44 = vpop.f32.mrb[5].mxu0 }
 0x112   : > { %v585_v46 = vmax.f32 %v557_v42, 0.0  ;;  %v836_v47 = vadd.f32 %v835_v44, %v834_v43  ;;  %v837_v48 = vpop.f32.mrb[6].mxu0 }
 0x113   : > { %v838_v49 = vpop.f32.mrb[7].mxu0 }
 0x114   : > { %v600_v50 = vpack.c.bf16 %v585_v46, %v584_v45  ;;  %v497_v51 = vadd.f32 %v836_v47, %v354_v41  ;;  %v839_v52 = vadd.f32 %v838_v49, %v837_v48 }
 0x116   : > { %v562_v54 = vadd.f32 %v876_v22, %v497_v51  ;;  %v500_v55 = vadd.f32 %v839_v52, %v359_v53  ;;  %882 = vmatprep.subr.bf16.mxu1 %v600_v50 }
 0x117   : > { %883 = vmatpush3.bf16.msra.mxu1 %v600_v50 }
 0x118   : > { %v565_v56 = vadd.f32 %v877_v24, %v500_v55  ;;  %v840_v57 = vpop.f32.mrb[8].mxu0  ;;  %v586_v59 = vmax.f32 %v562_v54, 0.0 }
 0x119   : > { %v841_v58 = vpop.f32.mrb[9].mxu0 }
 0x11a   : > { %v587_v60 = vmax.f32 %v565_v56, 0.0  ;;  %v842_v61 = vadd.f32 %v841_v58, %v840_v57  ;;  %v843_v62 = vpop.f32.mrb[10].mxu0 }
 0x11b   : > { %v844_v0 = vpop.f32.mrb[11].mxu0 }
 0x11c   : > { %v845_v1 = vadd.f32 %v844_v0, %v843_v62  ;;  %v505_v2 = vadd.f32 %v842_v61, %v364_v63  ;;  %v601_v3 = vpack.c.bf16 %v587_v60, %v586_v59 }
 0x11e   : > { %v570_v5 = vadd.f32 %v569_v29, %v505_v2  ;;  %884 = vmatprep.subr.bf16.mxu1 %v601_v3  ;;  %v508_v6 = vadd.f32 %v845_v1, %v369_v4  ;;  %v612_v29 = vpop.permute.xlu1 %611 }
 0x11f   : > { %885 = vmatpush3.bf16.msra.mxu1 %v601_v3 }
 0x120   : > { %v573_v7 = vadd.f32 %v572_v34, %v508_v6  ;;  %v846_v8 = vpop.f32.mrb[12].mxu0  ;;  %v588_v10 = vmax.f32 %v570_v5, 0.0 }
 0x121   : > { %v847_v9 = vpop.f32.mrb[13].mxu0 }
 0x122   : > { %v589_v11 = vmax.f32 %v573_v7, 0.0  ;;  %v848_v12 = vadd.f32 %v847_v9, %v846_v8  ;;  %v849_v13 = vpop.f32.mrb[14].mxu0  ;;  %v622_v34 = vpop.permute.xlu1 %621 }
 0x123   : > { %v850_v15 = vpop.f32.mrb[15].mxu0 }
 0x124   : > { %v602_v16 = vpack.c.bf16 %v589_v11, %v588_v10  ;;  %v513_v17 = vadd.f32 %v848_v12, %v374_v14  ;;  %v851_v18 = vadd.f32 %v850_v15, %v849_v13 }
 0x126   : > { %v578_v20 = vadd.f32 %v880_v27, %v513_v17  ;;  %v516_v21 = vadd.f32 %v851_v18, %v379_v19  ;;  %886 = vmatprep.subr.bf16.mxu1 %v602_v16 }
 0x127   : > { %887 = vmatpush3.bf16.msra.mxu1 %v602_v16 }
 0x128   : > { %v581_v22 = vadd.f32 %v881_v31, %v516_v21  ;;  %v590_v23 = vmax.f32 %v578_v20, 0.0 }
 0x12a   : > { %v591_v24 = vmax.f32 %v581_v22, 0.0 }
 0x12c   : > { %v603_v25 = vpack.c.bf16 %v591_v24, %v590_v23 }
 0x12e   : > { %888 = vmatprep.subr.bf16.mxu1 %v603_v25 }
 0x12f   : > { %889 = vmatpush3.bf16.msra.mxu1 %v603_v25 }
 0x132   : > { %891 = vmatmul.mubr.msk.bf16.vlgmr.msra.gmra.mrb[8].mxu1 %vm441_vm0, %v939_v26 }
 0x205   : > { %v892_v27 = vpop.f32.mrb[8].mxu1 }
 0x206   : > { %v683_v32 = vadd.f32 %v892_v27, %v617_v30  ;;  %v674_v33 = vpop.f32.mrb[9].mxu1 }
 0x207   : > { %v675_v31 = vadd.f32 %v674_v33, %v607_v28  ;;  %v893_v35 = vpop.f32.mrb[10].mxu1 }
 0x208   : > { %v691_v36 = vmax.f32 %v683_v32, 0.0  ;;  %v686_v37 = vadd.f32 %v893_v35, %v622_v34  ;;  %v677_v38 = vpop.f32.mrb[11].mxu1 }
 0x209   : > { %v689_v39 = vmax.f32 %v675_v31, 0.0  ;;  %v678_v40 = vadd.f32 %v677_v38, %v612_v29 }
 0x20a   : > { %696 = vst.msk [vmem:[%s255_s14 + $0x10] sm:$0xff] %vm693_vm1, %v691_v36  ;;  %v692_v41 = vmax.f32 %v686_v37, 0.0 }
 0x20b   : > { %694 = vst.msk [vmem:[%s255_s14] sm:$0xff] %vm693_vm1, %v689_v39  ;;  %v690_v42 = vmax.f32 %v678_v40, 0.0 }
 0x20c   : > { %697 = vst.msk [vmem:[%s255_s14 + $0x18] sm:$0xff] %vm693_vm1, %v692_v41 }
 0x20d   : > { %695 = vst.msk [vmem:[%s255_s14 + $0x8] sm:$0xff] %vm693_vm1, %v690_v42 }
 0x20e PF: > { %s15_s20 = sadd.s32 1, %s962_s20   ;;  %s1164_s18 = smov %s958_s19 }
 0x20f   : > { %p12_p5 = scmp.ge.s32.totalorder %s15_s20, 4   ;;  %s1165_s19 = smov %s1167_s21 }
 0x211   :  { %14 = sbr.rel (!%p12_p5) target bundleno = 2 (0x2), region = 70 }

// kernel: model_forward.14
= control target key start
LH: loop header
LB: loop body
LE: loop exit
PB: predicated region body
PF: predicated region fallthrough
CT: control target
= control target key end

     0   :  { %s678_s12 = smov 0   ;;  %s762_s0 = inlined_call_operand.vmem [shape: f32[2,32,16], index: 0, kind: input, shape index: {}]   ;;  %s763_s1 = inlined_call_operand.vmem [shape: bf16[64,32], index: 1, kind: input, shape index: {}]   ;;  %s764_s2 = inlined_call_operand.vmem [shape: bf16[32,64], index: 2, kind: input, shape index: {}]   ;;  %s765_s3 = inlined_call_operand.vmem [shape: f32[2,32,16], index: 3, kind: output, shape index: {}]  }
   0x1 LB: > { %s541_s13 = sadd.s32 4294967295, %s656_s12   ;;  %p545_p0 = scmp.ge.s32.totalorder %s656_s12, 1  ;;  %s656_s12 = sphi %s678_s12, %s13_s12  }
   0x2   : > { %p137_p1 = scmp.lt.s32.totalorder %s656_s12, 3 }
   0x4   : > { %p138_p2 = pnand %p545_p0, %p137_p1 }
   0x5   : > { %p161_p3 = scmp.lt.s32.totalorder (!%p138_p2), %s541_s13, 1  ;;  %v610_v0 = vld [vmem:[%s763_s1] sm:$0xff] (!%p138_p2)   ;;  %vm206_vm0 = vcmask (!%p138_p2), 261120   ;;  %v611_v7 = vld [vmem:[%s763_s1 + $0x8] sm:$0xff] (!%p138_p2)   ;;  %v612_v8 = vld [vmem:[%s763_s1 + $0x10] sm:$0xff] (!%p138_p2)   ;;  %vm284_vm1 = vcmask (!%p138_p2), 130048  }
   0x6   : > { %141 = sbr.rel (%p138_p2) target bundleno = 722 (0x2d2), region = 32  ;;  %582 = vmatprep.mubr.msk.bf16.mxu0 (!%p138_p2), %vm206_vm0, %v610_v0  ;;  %v613_v9 = vld [vmem:[%s763_s1 + $0x18] sm:$0xff] (!%p138_p2)   ;;  %vm426_vm2 = vcmask (!%p138_p2), 523264  }
   0xd   : > { %s767_s13 = smov (!%p161_p3, %s541_s13), 1 }
   0xe   : > { %s564_s16 = sshll.u32 %s767_s13, 5 }
   0xf   : > { %s165_s19 = scalar_lea.vmem %s762_s0, %s564_s16  ;;  %s170_s5 = scalar_lea.vmem %s765_s3, %s564_s16 }
  0x10   : > { %v180_v1 = vld [vmem:[%s165_s19] sm:$0xff]  ;;  %v181_v2 = vld [vmem:[%s165_s19 + $0x8] sm:$0xff]  ;;  %v182_v3 = vld [vmem:[%s165_s19 + $0x10] sm:$0xff] }
  0x11   : > { %v184_v4 = vpack.c.bf16 %v181_v2, %v180_v1  ;;  %v183_v5 = vld [vmem:[%s165_s19 + $0x18] sm:$0xff] }
  0x12   : > { %v185_v6 = vpack.c.bf16 %v183_v5, %v182_v3 }
  0x13   : > { %578 = vmatprep.subr.bf16.mxu0 %v184_v4 }
  0x14   : > { %579 = vmatpush3.bf16.msra.mxu0 %v184_v4 }
  0x15   : > { %580 = vmatprep.subr.bf16.mxu0 %v185_v6 }
  0x18   : > { %581 = vmatpush3.bf16.msra.mxu0 %v185_v6 }
  0x1b   : > { %583 = vmatmul.mubr.msk.bf16.vlgmr.msra.gmra.mrb[0].mxu0 %vm206_vm0, %v611_v7 }
  0x1c   : > { %586 = vmatprep.mubr.msk.bf16.mxu0 %vm206_vm0, %v612_v8 }
  0x23   : > { %587 = vmatmul.mubr.msk.bf16.gmra.mrb[4].mxu0 %vm206_vm0, %v613_v9 }
  0xee   : > { %v584_v10 = vpop.f32.mrb[0].mxu0 }
  0xef   : > { %v253_v11 = vpop.f32.mrb[1].mxu0  ;;  %v287_v15 = vsel %vm284_vm1, %v584_v10, -inf }
  0xf0   : > { %v585_v12 = vpop.f32.mrb[2].mxu0  ;;  %v285_v18 = vsel %vm284_vm1, %v253_v11, -inf }
  0xf1   : > { %v256_v13 = vpop.f32.mrb[3].mxu0  ;;  %v288_v22 = vsel %vm284_vm1, %v585_v12, -inf }
  0xf2   : > { %v286_v26 = vsel %vm284_vm1, %v256_v13, -inf }
  0xf6   : > { %v588_v14 = vpop.f32.mrb[4].mxu0 }
  0xf7   : > { %v293_v16 = vsel %vm284_vm1, %v588_v14, -inf  ;;  %v269_v17 = vpop.f32.mrb[5].mxu0 }
  0xf8   : > { %v294_v19 = vmax.f32 %v287_v15, %v293_v16  ;;  %v289_v20 = vsel %vm284_vm1, %v269_v17, -inf  ;;  %v589_v21 = vpop.f32.mrb[6].mxu0 }
  0xf9   : > { %v290_v23 = vmax.f32 %v285_v18, %v289_v20  ;;  %v295_v24 = vsel %vm284_vm1, %v589_v21, -inf  ;;  %v272_v25 = vpop.f32.mrb[7].mxu0 }
  0xfa   : > { %v296_v27 = vmax.f32 %v288_v22, %v295_v24  ;;  %v291_v28 = vsel %vm284_vm1, %v272_v25, -inf }
  0xfb   : > { %v292_v29 = vmax.f32 %v286_v26, %v291_v28 }
  0xfc   : > { %v298_v30 = vmax.f32 %v294_v19, %v296_v27 }
  0xfd   : > { %v297_v31 = vmax.f32 %v290_v23, %v292_v29 }
  0xff   : > { %v299_v32 = vmax.f32 %v297_v31, %v298_v30 }
 0x101   : > { %v300_v33 = vrot.slane %v299_v32, 4 }
 0x103   : > { %v301_v34 = vmax.f32 %v299_v32, %v300_v33 }
 0x105   : > { %v302_v35 = vrot.slane %v301_v34, 2 }
 0x107   : > { %v303_v36 = vmax.f32 %v301_v34, %v302_v35 }
 0x109   : > { %v304_v37 = vrot.slane %v303_v36, 1 }
 0x10b   : > { %v305_v38 = vmax.f32 %v303_v36, %v304_v37  ;;  %v614_v37 = vld [vmem:[%s764_s2] sm:$0xff]  }
 0x10c   : > { %598 = vmatprep.mubr.msk.bf16.mxu1 %vm426_vm2, %v614_v37 }
 0x10d   : > { %v311_v39 = vsub.f32 %v272_v25, %v305_v38  ;;  %v312_v40 = vsub.f32 %v588_v14, %v305_v38  ;;  %v313_v41 = vsub.f32 %v589_v21, %v305_v38  ;;  %v306_v42 = vsub.f32 %v253_v11, %v305_v38 }
 0x10e   : > { %v307_v43 = vsub.f32 %v256_v13, %v305_v38  ;;  %v308_v44 = vsub.f32 %v584_v10, %v305_v38  ;;  %v309_v45 = vsub.f32 %v585_v12, %v305_v38  ;;  %v310_v46 = vsub.f32 %v269_v17, %v305_v38 }
 0x10f   : > { %v314_v47 = vmul.f32 1.442695, %v306_v42  ;;  %v324_v52 = vmul.f32 1.442695, %v311_v39  ;;  %v326_v53 = vmul.f32 1.442695, %v312_v40 }
 0x110   : > { %v316_v48 = vmul.f32 1.442695, %v307_v43  ;;  %v318_v49 = vmul.f32 1.442695, %v308_v44  ;;  %v320_v50 = vmul.f32 1.442695, %v309_v45 }
 0x111   : > { %616 = vpow2.f32 %v314_v47  ;;  %v322_v51 = vmul.f32 1.442695, %v310_v46  ;;  %v328_v54 = vmul.f32 1.442695, %v313_v41 }
 0x112   : > { %618 = vpow2.f32 %v316_v48 }
 0x113   : > { %620 = vpow2.f32 %v318_v49 }
 0x114   : > { %622 = vpow2.f32 %v320_v50 }
 0x115   : > { %624 = vpow2.f32 %v322_v51 }
 0x116   : > { %626 = vpow2.f32 %v324_v52 }
 0x117   : > { %628 = vpow2.f32 %v326_v53 }
 0x118   : > { %630 = vpow2.f32 %v328_v54 }
 0x11b   : > { %v617_v55 = vpop.eup %616 }
 0x11c   : > { %v619_v56 = vpop.eup %618  ;;  %v330_v57 = vsel %vm284_vm1, %v617_v55, 0.0 }
 0x11d   : > { %v621_v58 = vpop.eup %620  ;;  %v331_v59 = vsel %vm284_vm1, %v619_v56, 0.0 }
 0x11e   : > { %v623_v60 = vpop.eup %622  ;;  %v332_v61 = vadd.f32 %v331_v59, %v330_v57  ;;  %v333_v62 = vsel %vm284_vm1, %v621_v58, 0.0 }
 0x11f   : > { %v625_v63 = vpop.eup %624  ;;  %v335_v1 = vsel %vm284_vm1, %v623_v60, 0.0 }
 0x120   : > { %v334_v0 = vadd.f32 %v333_v62, %v332_v61  ;;  %v627_v2 = vpop.eup %626  ;;  %v337_v4 = vsel %vm284_vm1, %v625_v63, 0.0 }
 0x121   : > { %v629_v5 = vpop.eup %628  ;;  %v339_v7 = vsel %vm284_vm1, %v627_v2, 0.0 }
 0x122   : > { %v336_v3 = vadd.f32 %v335_v1, %v334_v0  ;;  %v631_v8 = vpop.eup %630  ;;  %v341_v10 = vsel %vm284_vm1, %v629_v5, 0.0 }
 0x123   : > { %v343_v12 = vsel %vm284_vm1, %v631_v8, 0.0 }
 0x124   : > { %v338_v6 = vadd.f32 %v337_v4, %v336_v3 }
 0x126   : > { %v340_v9 = vadd.f32 %v339_v7, %v338_v6 }
 0x128   : > { %v342_v11 = vadd.f32 %v341_v10, %v340_v9  ;;  %v615_v10 = vld [vmem:[%s764_s2 + $0x8] sm:$0xff]  }
 0x12a   : > { %v344_v13 = vadd.f32 %v343_v12, %v342_v11 }
 0x12c   : > { %v345_v14 = vrot.slane %v344_v13, 4 }
 0x12e   : > { %v346_v15 = vadd.f32 %v345_v14, %v344_v13 }
 0x130   : > { %v347_v16 = vrot.slane %v346_v15, 2 }
 0x132   : > { %v348_v17 = vadd.f32 %v347_v16, %v346_v15 }
 0x134   : > { %v349_v18 = vrot.slane %v348_v17, 1 }
 0x136   : > { %v350_v19 = vadd.f32 %v349_v18, %v348_v17 }
 0x138   : > { %632 = vrcp.f32 %v350_v19 }
 0x142   : > { %v633_v20 = vpop.eup %632 }
 0x143   : > { %v354_v21 = vmul.f32 %v633_v20, %v621_v58  ;;  %v352_v22 = vmul.f32 %v633_v20, %v617_v55  ;;  %v355_v23 = vmul.f32 %v633_v20, %v623_v60  ;;  %v353_v24 = vmul.f32 %v633_v20, %v619_v56 }
 0x144   : > { %v357_v25 = vmul.f32 %v633_v20, %v627_v2  ;;  %v356_v26 = vmul.f32 %v633_v20, %v625_v63  ;;  %v726_v27 = vmul.f32 %v633_v20, %v631_v8  ;;  %v728_v28 = vmul.f32 %v633_v20, %v629_v5 }
 0x145   : > { %v366_v29 = vsel %vm284_vm1, %v354_v21, 0.0  ;;  %v360_v30 = vsel %vm284_vm1, %v352_v22, 0.0  ;;  %v369_v31 = vsel %vm284_vm1, %v355_v23, 0.0  ;;  %v363_v32 = vsel %vm284_vm1, %v353_v24, 0.0 }
 0x146   : > { %367 = vadd.xlane.f32.xlu1 %v366_v29  ;;  %361 = vadd.xlane.f32.xlu0 %v360_v30  ;;  %v375_v33 = vsel %vm284_vm1, %v357_v25, 0.0  ;;  %v372_v34 = vsel %vm284_vm1, %v356_v26, 0.0  ;;  %v381_v35 = vsel %vm284_vm1, %v726_v27, 0.0  ;;  %v378_v36 = vsel %vm284_vm1, %v728_v28, 0.0 }
 0x14a   : > { %370 = vadd.xlane.f32.xlu1 %v369_v31  ;;  %364 = vadd.xlane.f32.xlu0 %v363_v32 }
 0x14e   : > { %376 = vadd.xlane.f32.xlu1 %v375_v33  ;;  %373 = vadd.xlane.f32.xlu0 %v372_v34 }
 0x152   : > { %382 = vadd.xlane.f32.xlu1 %v381_v35  ;;  %379 = vadd.xlane.f32.xlu0 %v378_v36 }
 0x1d3   : > { %v368_v38 = vpop.xlane.xlu1 %367  ;;  %v362_v39 = vpop.xlane.xlu0 %361 }
 0x1d4   : > { %v386_v40 = vadd.f32 1e-09, %v368_v38  ;;  %v384_v41 = vadd.f32 1e-09, %v362_v39 }
 0x1d6   : > { %634 = vrcp.f32 %v386_v40 }
 0x1d7   : > { %v371_v42 = vpop.xlane.xlu1 %370  ;;  %v365_v43 = vpop.xlane.xlu0 %364  ;;  %636 = vrcp.f32 %v384_v41 }
 0x1d8   : > { %v387_v44 = vadd.f32 1e-09, %v371_v42  ;;  %v385_v45 = vadd.f32 1e-09, %v365_v43 }
 0x1da   : > { %638 = vrcp.f32 %v387_v44 }
 0x1db   : > { %640 = vrcp.f32 %v385_v45  ;;  %v377_v46 = vpop.xlane.xlu1 %376  ;;  %v374_v47 = vpop.xlane.xlu0 %373 }
 0x1dc   : > { %v389_v48 = vadd.f32 1e-09, %v377_v46  ;;  %v388_v49 = vadd.f32 1e-09, %v374_v47 }
 0x1de   : > { %642 = vrcp.f32 %v389_v48 }
 0x1df   : > { %644 = vrcp.f32 %v388_v49  ;;  %v383_v50 = vpop.xlane.xlu1 %382  ;;  %v380_v51 = vpop.xlane.xlu0 %379 }
 0x1e0   : > { %v391_v52 = vadd.f32 1e-09, %v383_v50  ;;  %v390_v53 = vadd.f32 1e-09, %v380_v51  ;;  %v635_v54 = vpop.eup %634 }
 0x1e1   : > { %v637_v55 = vpop.eup %636  ;;  %v397_v63 = vmul.f32 %v635_v54, %v354_v21 }
 0x1e2   : > { %646 = vrcp.f32 %v391_v52  ;;  %v393_v58 = vmul.f32 %v637_v55, %v352_v22 }
 0x1e3   : > { %648 = vrcp.f32 %v390_v53 }
 0x1e4   : > { %v639_v56 = vpop.eup %638 }
 0x1e5   : > { %v641_v57 = vpop.eup %640  ;;  %v399_v60 = vmul.f32 %v639_v56, %v355_v23 }
 0x1e6   : > { %v395_v59 = vmul.f32 %v641_v57, %v353_v24 }
 0x1e7   : > { %v413_v1 = vpack.c.bf16 %v399_v60, %v397_v63 }
 0x1e8   : > { %v643_v61 = vpop.eup %642  ;;  %v412_v62 = vpack.c.bf16 %v395_v59, %v393_v58 }
 0x1e9   : > { %v645_v0 = vpop.eup %644  ;;  %v403_v3 = vmul.f32 %v643_v61, %v357_v25 }
 0x1ea   : > { %590 = vmatprep.subr.bf16.mxu1 %v412_v62  ;;  %v401_v2 = vmul.f32 %v645_v0, %v356_v26 }
 0x1eb   : > { %591 = vmatpush3.bf16.msra.mxu1 %v412_v62 }
 0x1ec   : > { %v647_v4 = vpop.eup %646  ;;  %592 = vmatprep.subr.bf16.mxu1 %v413_v1  ;;  %v414_v6 = vpack.c.bf16 %v403_v3, %v401_v2 }
 0x1ed   : > { %v649_v5 = vpop.eup %648  ;;  %v407_v8 = vmul.f32 %v647_v4, %v726_v27 }
 0x1ee   : > { %v405_v7 = vmul.f32 %v649_v5, %v728_v28 }
 0x1ef   : > { %593 = vmatpush3.bf16.msra.mxu1 %v413_v1 }
 0x1f0   : > { %594 = vmatprep.subr.bf16.mxu1 %v414_v6  ;;  %v415_v9 = vpack.c.bf16 %v407_v8, %v405_v7 }
 0x1f3   : > { %595 = vmatpush3.bf16.msra.mxu1 %v414_v6 }
 0x1f4   : > { %596 = vmatprep.subr.bf16.mxu1 %v415_v9 }
 0x1f7   : > { %597 = vmatpush3.bf16.msra.mxu1 %v415_v9 }
 0x1fa   : > { %599 = vmatmul.mubr.msk.bf16.vlgmr.msra.gmra.mrb[0].mxu1 %vm426_vm2, %v615_v10 }
 0x2cd   : > { %v600_v11 = vpop.f32.mrb[0].mxu1 }
 0x2ce   : > { %484 = vst.msk [vmem:[%s170_s5 + $0x10] sm:$0xff] %vm284_vm1, %v600_v11  ;;  %v467_v12 = vpop.f32.mrb[1].mxu1 }
 0x2cf   : > { %482 = vst.msk [vmem:[%s170_s5] sm:$0xff] %vm284_vm1, %v467_v12  ;;  %v601_v13 = vpop.f32.mrb[2].mxu1 }
 0x2d0   : > { %485 = vst.msk [vmem:[%s170_s5 + $0x18] sm:$0xff] %vm284_vm1, %v601_v13  ;;  %v470_v14 = vpop.f32.mrb[3].mxu1 }
 0x2d1   : > { %483 = vst.msk [vmem:[%s170_s5 + $0x8] sm:$0xff] %vm284_vm1, %v470_v14 }
 0x2d2 PF: > { %s13_s12 = sadd.s32 1, %s656_s12  }
 0x2d3   : > { %p10_p4 = scmp.ge.s32.totalorder %s13_s12, 4  }
 0x2d5   :  { %12 = sbr.rel (!%p10_p4) target bundleno = 1 (0x1), region = 62 }

// kernel: model_forward.15
= control target key start
LH: loop header
LB: loop body
LE: loop exit
PB: predicated region body
PF: predicated region fallthrough
CT: control target
= control target key end

     0   :  { %s836_s24 = smov 0   ;;  %s838_s25 = smov 0   ;;  %s923_s0 = inlined_call_operand.vmem [shape: f32[2,34,64], index: 0, kind: input, shape index: {}]   ;;  %s924_s1 = inlined_call_operand.vmem [shape: bf16[32,34], index: 1, kind: input, shape index: {}]   ;;  %s925_s2 = inlined_call_operand.vmem [shape: f32[32,1], index: 2, kind: input, shape index: {}]   ;;  %s926_s3 = inlined_call_operand.vmem [shape: bf16[32,32], index: 3, kind: input, shape index: {}]   ;;  %s927_s4 = inlined_call_operand.vmem [shape: f32[32,1], index: 4, kind: input, shape index: {}]   ;;  %s928_s5 = inlined_call_operand.vmem [shape: bf16[16,32], index: 5, kind: input, shape index: {}]   ;;  %s929_s6 = inlined_call_operand.vmem [shape: f32[16,1], index: 6, kind: input, shape index: {}]   ;;  %s930_s7 = inlined_call_operand.vmem [shape: f32[2,16,64], index: 7, kind: output, shape index: {}]  }
   0x1   :  { %s840_s26 = smov 0  }
   0x2 LB: > { %s29_s27 = sadd.s32 1, %s787_s25  ;;  %p678_p0 = scmp.ge.s32.totalorder %s791_s26, 1  ;;  %s791_s26 = sphi %s840_s26, %s17_s26   ;;  %s787_s25 = sphi %s838_s25, %s932_s25   ;;  %s783_s24 = sphi %s836_s24, %s931_s24  }
   0x3   : > { %p31_p1 = scmp.ge.s32.totalorder %s29_s27, 2  ;;  %p256_p2 = scmp.lt.s32.totalorder %s791_s26, 3 }
   0x5   : > { %s934_s27 = smov (%p31_p1, %s29_s27), 0  ;;  %p257_p3 = pnand %p678_p0, %p256_p2 }
   0x6   : > { %p294_p4 = scmp.lt.s32.totalorder (!%p257_p3), %s783_s24, 1  ;;  %v764_v0 = vld [vmem:[%s924_s1] sm:$0xff] (!%p257_p3)   ;;  %vm357_vm0 = vcmask (!%p257_p3), 277504   ;;  %v322_v2 = vld [vmem:[%s925_s2 + $0x10] sm:$0xff] (!%p257_p3)  ;;  %v793_v3 = vmov (!%p257_p3), 0   ;;  %v321_v4 = vld [vmem:[%s925_s2 + $0x8] sm:$0xff] (!%p257_p3) }
   0x7   : > { %260 = sbr.rel (%p257_p3) target bundleno = 709 (0x2c5), region = 48  ;;  %v320_v1 = vld [vmem:[%s925_s2] sm:$0xff] (!%p257_p3)  ;;  %713 = vmatprep.mubr.msk.bf16.mxu0 (!%p257_p3), %vm357_vm0, %v764_v0  ;;  %762 = vset.pattern.permute.xlu0 (!%p257_p3), %v793_v3  ;;  %v323_v5 = vld [vmem:[%s925_s2 + $0x18] sm:$0xff] (!%p257_p3)  ;;  %v426_v14 = vld [vmem:[%s927_s4 + $0x8] sm:$0xff] (!%p257_p3)  ;;  %vm364_vm1 = vcmask (!%p257_p3), 1040384   ;;  %vm461_vm2 = vcmask (!%p257_p3), 261120  }
   0x8   : > { %329 = vperm.xlu0 (!%p257_p3), %762, %v320_v1   ;;  %763 = vset.pattern.permute.xlu1 (!%p257_p3), %v793_v3  ;;  %v425_v13 = vld [vmem:[%s927_s4] sm:$0xff] (!%p257_p3)  ;;  %v427_v16 = vld [vmem:[%s927_s4 + $0x10] sm:$0xff] (!%p257_p3)  ;;  %v428_v17 = vld [vmem:[%s927_s4 + $0x18] sm:$0xff] (!%p257_p3)  ;;  %v794_v42 = vmov (!%p257_p3), 0.0   ;;  %vm795_vm3 = vmmov (!%p257_p3), 0   ;;  %vm588_vm4 = vcmask (!%p257_p3), 523264  }
   0x9   : > { %339 = vperm.xlu1 (!%p257_p3), %763, %v322_v2   ;;  %v523_v19 = vld [vmem:[%s929_s6] sm:$0xff] (!%p257_p3)  ;;  %v765_v20 = vld [vmem:[%s924_s1 + $0x8] sm:$0xff] (!%p257_p3)  }
   0xa   : > { %v524_v21 = vld [vmem:[%s929_s6 + $0x8] sm:$0xff] (!%p257_p3)  ;;  %v766_v22 = vld [vmem:[%s926_s3] sm:$0xff] (!%p257_p3)  }
   0xb   : > { %721 = vmatprep.mubr.msk.bf16.mxu1 (!%p257_p3), %vm461_vm2, %v766_v22  ;;  %v767_v41 = vld [vmem:[%s926_s3 + $0x8] sm:$0xff] (!%p257_p3)   ;;  %v768_v61 = vld [vmem:[%s928_s5] sm:$0xff] (!%p257_p3)  }
   0xc   : > { %334 = vperm.xlu0 (!%p257_p3), %762, %v321_v4  }
   0xd   : > { %344 = vperm.xlu1 (!%p257_p3), %763, %v323_v5  }
   0xe   : > { %s936_s24 = smov (!%p294_p4, %s783_s24), 1 }
   0xf   : > { %s734_s11 = smul.u32 40, %s936_s24  ;;  %s694_s20 = sshll.u32 %s936_s24, 4 }
  0x10   : > { %433 = vperm.xlu0 %762, %v425_v13   ;;  %s309_s23 = scalar_lea.vmem %s930_s7, %s694_s20 }
  0x11   : > { %s301_s18 = scalar_lea.vmem %s923_s0, %s734_s11  ;;  %438 = vperm.xlu1 %763, %v426_v14  }
  0x12   : > { %v311_v6 = vld [vmem:[%s301_s18] sm:$0xff]  ;;  %v312_v7 = vld [vmem:[%s301_s18 + $0x8] sm:$0xff]  ;;  %v313_v8 = vld [vmem:[%s301_s18 + $0x10] sm:$0xff] }
  0x13   : > { %v324_v9 = vpack.c.bf16 %v312_v7, %v311_v6  ;;  %v314_v10 = vld [vmem:[%s301_s18 + $0x18] sm:$0xff]  ;;  %v315_v12 = vld [vmem:[%s301_s18 + $0x20] sm:$0x3] }
  0x14   : > { %v325_v11 = vpack.c.bf16 %v314_v10, %v313_v8  ;;  %v326_v15 = vpack.c.bf16 %v315_v12, %v315_v12  ;;  %443 = vperm.xlu0 %762, %v427_v16  }
  0x15   : > { %707 = vmatprep.subr.bf16.mxu0 %v324_v9  ;;  %448 = vperm.xlu1 %763, %v428_v17  }
  0x16   : > { %708 = vmatpush3.bf16.msra.mxu0 %v324_v9  ;;  %v366_v18 = vsel %vm364_vm1, %v326_v15, 0 }
  0x17   : > { %709 = vmatprep.subr.bf16.mxu0 %v325_v11 }
  0x18   : > { %529 = vperm.xlu0 %762, %v523_v19  }
  0x19   : > { %534 = vperm.xlu1 %763, %v524_v21  }
  0x1a   : > { %710 = vmatpush3.bf16.msra.mxu0 %v325_v11 }
  0x1b   : > { %733 = vmatprep.subr.msk.bf16.mxu0 %vm364_vm1, %v326_v15 }
  0x1e   : > { %712 = vmatpush3.bf16.msra.mxu0 %v366_v18 }
  0x21   : > { %714 = vmatmul.mubr.msk.bf16.vlgmr.msra.gmra.mrb[0].mxu0 %vm357_vm0, %v765_v20 }
  0x87   : > { %v330_v24 = vpop.permute.xlu0 %329 }
  0x88   : > { %v340_v23 = vpop.permute.xlu1 %339 }
  0x8b   : > { %v335_v31 = vpop.permute.xlu0 %334 }
  0x8c   : > { %v345_v28 = vpop.permute.xlu1 %344 }
  0x8f   : > { %v434_v43 = vpop.permute.xlu0 %433 }
  0x90   : > { %v439_v44 = vpop.permute.xlu1 %438 }
  0x93   : > { %v444_v45 = vpop.permute.xlu0 %443 }
  0x94   : > { %v449_v49 = vpop.permute.xlu1 %448 }
  0x97   : > { %v530_v62 = vpop.permute.xlu0 %529 }
  0x98   : > { %v535_v2 = vpop.permute.xlu1 %534 }
  0xf4   : > { %v715_v25 = vpop.f32.mrb[0].mxu0 }
  0xf5   : > { %v411_v26 = vadd.f32 %v715_v25, %v340_v23  ;;  %v402_v27 = vpop.f32.mrb[1].mxu0 }
  0xf6   : > { %v403_v29 = vadd.f32 %v402_v27, %v330_v24  ;;  %v716_v30 = vpop.f32.mrb[2].mxu0 }
  0xf7   : > { %v414_v32 = vadd.f32 %v716_v30, %v345_v28  ;;  %v405_v33 = vpop.f32.mrb[3].mxu0  ;;  %v419_v35 = vmax.f32 %v411_v26, 0.0 }
  0xf8   : > { %v406_v34 = vadd.f32 %v405_v33, %v335_v31  ;;  %v417_v37 = vmax.f32 %v403_v29, 0.0 }
  0xf9   : > { %v420_v36 = vmax.f32 %v414_v32, 0.0 }
  0xfa   : > { %v418_v38 = vmax.f32 %v406_v34, 0.0 }
  0xfb   : > { %v430_v39 = vpack.c.bf16 %v420_v36, %v419_v35 }
  0xfc   : > { %v429_v40 = vpack.c.bf16 %v418_v38, %v417_v37 }
  0xfe   : > { %717 = vmatprep.subr.bf16.mxu1 %v429_v40 }
  0xff   : > { %718 = vmatpush3.bf16.msra.mxu1 %v429_v40 }
 0x100   : > { %719 = vmatprep.subr.bf16.mxu1 %v430_v39 }
 0x103   : > { %720 = vmatpush3.bf16.msra.mxu1 %v430_v39 }
 0x104   : > { %725 = vmatprep.subr.bf16.mxu1 %v794_v42 }
 0x106   : > { %722 = vmatmul.mubr.msk.bf16.vlgmr.msra.gmra.mrb[0].mxu1 %vm461_vm2, %v767_v41 }
 0x107   : > { %729 = vmatprep.mubr.msk.bf16.mxu1 %vm795_vm3, %v794_v42 }
 0x1d9   : > { %v723_v46 = vpop.f32.mrb[0].mxu1 }
 0x1da   : > { %v511_v47 = vadd.f32 %v723_v46, %v444_v45  ;;  %v502_v48 = vpop.f32.mrb[1].mxu1 }
 0x1db   : > { %v503_v50 = vadd.f32 %v502_v48, %v434_v43  ;;  %v724_v51 = vpop.f32.mrb[2].mxu1 }
 0x1dc   : > { %v514_v52 = vadd.f32 %v724_v51, %v449_v49  ;;  %v505_v53 = vpop.f32.mrb[3].mxu1  ;;  %v519_v55 = vmax.f32 %v511_v47, 0.0 }
 0x1dd   : > { %v506_v54 = vadd.f32 %v505_v53, %v439_v44  ;;  %v517_v57 = vmax.f32 %v503_v50, 0.0 }
 0x1de   : > { %v520_v56 = vmax.f32 %v514_v52, 0.0 }
 0x1df   : > { %v518_v58 = vmax.f32 %v506_v54, 0.0 }
 0x1e0   : > { %v526_v59 = vpack.c.bf16 %v520_v56, %v519_v55 }
 0x1e1   : > { %v525_v60 = vpack.c.bf16 %v518_v58, %v517_v57 }
 0x1e3   : > { %726 = vmatpush3.bf16.msra.mxu1 %v525_v60 }
 0x1e4   : > { %727 = vmatprep.subr.bf16.mxu1 %v794_v42 }
 0x1e7   : > { %728 = vmatpush3.bf16.msra.mxu1 %v526_v59 }
 0x1ea   : > { %730 = vmatmul.mubr.msk.bf16.vlgmr.msra.gmra.mrb[4].mxu1 %vm461_vm2, %v768_v61 }
 0x2bd   : > { %v579_v63 = vpop.f32.mrb[4].mxu1 }
 0x2be   : > { %v580_v0 = vadd.f32 %v579_v63, %v530_v62  ;;  %v731_v1 = vpop.f32.mrb[5].mxu1 }
 0x2bf   : > { %v582_v3 = vpop.f32.mrb[6].mxu1 }
 0x2c0   : > { %v586_v4 = vmax.f32 %v580_v0, 0.0  ;;  %v583_v5 = vadd.f32 %v582_v3, %v535_v2  ;;  %v732_v6 = vpop.f32.mrb[7].mxu1 }
 0x2c2   : > { %589 = vst.msk [vmem:[%s309_s23] sm:$0xff] %vm588_vm4, %v586_v4  ;;  %v587_v7 = vmax.f32 %v583_v5, 0.0 }
 0x2c4   : > { %590 = vst.msk [vmem:[%s309_s23 + $0x8] sm:$0xff] %vm588_vm4, %v587_v7 }
 0x2c5 PF: > { %s17_s26 = sadd.s32 1, %s791_s26   ;;  %s931_s24 = smov %s787_s25 }
 0x2c6   : > { %p14_p5 = scmp.ge.s32.totalorder %s17_s26, 4   ;;  %s932_s25 = smov %s934_s27 }
 0x2c8   :  { %16 = sbr.rel (!%p14_p5) target bundleno = 2 (0x2), region = 78 }

// kernel: model_forward.16
= control target key start
LH: loop header
LB: loop body
LE: loop exit
PB: predicated region body
PF: predicated region fallthrough
CT: control target
= control target key end

     0   :  { %s651_s12 = smov 0   ;;  %s733_s0 = inlined_call_operand.vmem [shape: f32[2,16,64], index: 0, kind: input, shape index: {}]   ;;  %s734_s1 = inlined_call_operand.vmem [shape: bf16[64,16], index: 1, kind: input, shape index: {}]   ;;  %s735_s2 = inlined_call_operand.vmem [shape: bf16[16,64], index: 2, kind: input, shape index: {}]   ;;  %s736_s3 = inlined_call_operand.vmem [shape: f32[2,16,64], index: 3, kind: output, shape index: {}]  }
   0x1 LB: > { %s517_s13 = sadd.s32 4294967295, %s627_s12   ;;  %p521_p0 = scmp.ge.s32.totalorder %s627_s12, 1  ;;  %s627_s12 = sphi %s651_s12, %s13_s12  }
   0x2   : > { %p137_p1 = scmp.lt.s32.totalorder %s627_s12, 3 }
   0x4   : > { %p138_p2 = pnand %p521_p0, %p137_p1 }
   0x5   : > { %p161_p3 = scmp.lt.s32.totalorder (!%p138_p2), %s517_s13, 1  ;;  %v582_v0 = vld [vmem:[%s734_s1] sm:$0xff] (!%p138_p2)   ;;  %vm203_vm0 = vcmask (!%p138_p2), 130048   ;;  %v583_v4 = vld [vmem:[%s734_s1 + $0x8] sm:$0xff] (!%p138_p2)   ;;  %v584_v5 = vld [vmem:[%s734_s1 + $0x10] sm:$0xff] (!%p138_p2)   ;;  %vm281_vm1 = vcmask (!%p138_p2), 523264  }
   0x6   : > { %141 = sbr.rel (%p138_p2) target bundleno = 716 (0x2cc), region = 32  ;;  %552 = vmatprep.mubr.msk.bf16.mxu0 (!%p138_p2), %vm203_vm0, %v582_v0  ;;  %v585_v6 = vld [vmem:[%s734_s1 + $0x18] sm:$0xff] (!%p138_p2)   ;;  %vm630_vm2 = vmmov (!%p138_p2), 0  }
   0xd   : > { %s738_s13 = smov (!%p161_p3, %s517_s13), 1 }
   0xe   : > { %s538_s16 = sshll.u32 %s738_s13, 4 }
   0xf   : > { %s165_s19 = scalar_lea.vmem %s733_s0, %s538_s16  ;;  %s170_s30 = scalar_lea.vmem %s736_s3, %s538_s16 }
  0x10   : > { %v180_v1 = vld [vmem:[%s165_s19] sm:$0xff]  ;;  %v181_v2 = vld [vmem:[%s165_s19 + $0x8] sm:$0xff] }
  0x11   : > { %v182_v3 = vpack.c.bf16 %v181_v2, %v180_v1 }
  0x13   : > { %550 = vmatprep.subr.bf16.mxu0 %v182_v3 }
  0x14   : > { %551 = vmatpush3.bf16.msra.mxu0 %v182_v3 }
  0x17   : > { %553 = vmatmul.mubr.msk.bf16.vlgmr.msra.gmra.mrb[0].mxu0 %vm203_vm0, %v583_v4 }
  0x18   : > { %556 = vmatprep.mubr.msk.bf16.mxu0 %vm203_vm0, %v584_v5 }
  0x1f   : > { %557 = vmatmul.mubr.msk.bf16.gmra.mrb[4].mxu0 %vm203_vm0, %v585_v6 }
  0xea   : > { %v554_v7 = vpop.f32.mrb[0].mxu0 }
  0xeb   : > { %v250_v8 = vpop.f32.mrb[1].mxu0  ;;  %v284_v12 = vsel %vm281_vm1, %v554_v7, -inf }
  0xec   : > { %v555_v9 = vpop.f32.mrb[2].mxu0  ;;  %v282_v15 = vsel %vm281_vm1, %v250_v8, -inf }
  0xed   : > { %v253_v10 = vpop.f32.mrb[3].mxu0  ;;  %v285_v19 = vsel %vm281_vm1, %v555_v9, -inf }
  0xee   : > { %v283_v23 = vsel %vm281_vm1, %v253_v10, -inf }
  0xf2   : > { %v558_v11 = vpop.f32.mrb[4].mxu0 }
  0xf3   : > { %v290_v13 = vsel %vm281_vm1, %v558_v11, -inf  ;;  %v266_v14 = vpop.f32.mrb[5].mxu0 }
  0xf4   : > { %v291_v16 = vmax.f32 %v284_v12, %v290_v13  ;;  %v286_v17 = vsel %vm281_vm1, %v266_v14, -inf  ;;  %v559_v18 = vpop.f32.mrb[6].mxu0 }
  0xf5   : > { %v287_v20 = vmax.f32 %v282_v15, %v286_v17  ;;  %v292_v21 = vsel %vm281_vm1, %v559_v18, -inf  ;;  %v269_v22 = vpop.f32.mrb[7].mxu0 }
  0xf6   : > { %v293_v24 = vmax.f32 %v285_v19, %v292_v21  ;;  %v288_v25 = vsel %vm281_vm1, %v269_v22, -inf }
  0xf7   : > { %v289_v26 = vmax.f32 %v283_v23, %v288_v25 }
  0xf8   : > { %v295_v27 = vmax.f32 %v291_v16, %v293_v24 }
  0xf9   : > { %v294_v28 = vmax.f32 %v287_v20, %v289_v26 }
  0xfb   : > { %v296_v29 = vmax.f32 %v294_v28, %v295_v27 }
  0xfd   : > { %v297_v30 = vrot.slane %v296_v29, 4 }
  0xff   : > { %v298_v31 = vmax.f32 %v296_v29, %v297_v30 }
 0x101   : > { %v299_v32 = vrot.slane %v298_v31, 2 }
 0x103   : > { %v300_v33 = vmax.f32 %v298_v31, %v299_v32 }
 0x105   : > { %v301_v34 = vrot.slane %v300_v33, 1 }
 0x107   : > { %v302_v35 = vmax.f32 %v300_v33, %v301_v34  ;;  %v629_v34 = vmov 0.0  }
 0x108   : > { %560 = vmatprep.subr.bf16.mxu1 %v629_v34  ;;  %568 = vmatprep.mubr.msk.bf16.mxu1 %vm630_vm2, %v629_v34 }
 0x109   : > { %v308_v36 = vsub.f32 %v269_v22, %v302_v35  ;;  %v309_v37 = vsub.f32 %v558_v11, %v302_v35  ;;  %v310_v38 = vsub.f32 %v559_v18, %v302_v35  ;;  %v303_v39 = vsub.f32 %v250_v8, %v302_v35 }
 0x10a   : > { %v304_v40 = vsub.f32 %v253_v10, %v302_v35  ;;  %v305_v41 = vsub.f32 %v554_v7, %v302_v35  ;;  %v306_v42 = vsub.f32 %v555_v9, %v302_v35  ;;  %v307_v43 = vsub.f32 %v266_v14, %v302_v35 }
 0x10b   : > { %v311_v44 = vmul.f32 1.442695, %v303_v39  ;;  %v321_v49 = vmul.f32 1.442695, %v308_v36  ;;  %v323_v50 = vmul.f32 1.442695, %v309_v37 }
 0x10c   : > { %v313_v45 = vmul.f32 1.442695, %v304_v40  ;;  %v315_v46 = vmul.f32 1.442695, %v305_v41  ;;  %v317_v47 = vmul.f32 1.442695, %v306_v42 }
 0x10d   : > { %587 = vpow2.f32 %v311_v44  ;;  %v319_v48 = vmul.f32 1.442695, %v307_v43  ;;  %v325_v51 = vmul.f32 1.442695, %v310_v38 }
 0x10e   : > { %589 = vpow2.f32 %v313_v45 }
 0x10f   : > { %591 = vpow2.f32 %v315_v46 }
 0x110   : > { %593 = vpow2.f32 %v317_v47 }
 0x111   : > { %595 = vpow2.f32 %v319_v48 }
 0x112   : > { %597 = vpow2.f32 %v321_v49 }
 0x113   : > { %599 = vpow2.f32 %v323_v50 }
 0x114   : > { %601 = vpow2.f32 %v325_v51 }
 0x117   : > { %v588_v52 = vpop.eup %587 }
 0x118   : > { %v590_v53 = vpop.eup %589  ;;  %v327_v54 = vsel %vm281_vm1, %v588_v52, 0.0 }
 0x119   : > { %v592_v55 = vpop.eup %591  ;;  %v328_v56 = vsel %vm281_vm1, %v590_v53, 0.0 }
 0x11a   : > { %v594_v57 = vpop.eup %593  ;;  %v329_v58 = vadd.f32 %v328_v56, %v327_v54  ;;  %v330_v59 = vsel %vm281_vm1, %v592_v55, 0.0 }
 0x11b   : > { %v596_v60 = vpop.eup %595  ;;  %v332_v62 = vsel %vm281_vm1, %v594_v57, 0.0 }
 0x11c   : > { %v331_v61 = vadd.f32 %v330_v59, %v329_v58  ;;  %v598_v63 = vpop.eup %597  ;;  %v334_v1 = vsel %vm281_vm1, %v596_v60, 0.0 }
 0x11d   : > { %v600_v2 = vpop.eup %599  ;;  %v336_v4 = vsel %vm281_vm1, %v598_v63, 0.0 }
 0x11e   : > { %v333_v0 = vadd.f32 %v332_v62, %v331_v61  ;;  %v602_v5 = vpop.eup %601  ;;  %v338_v7 = vsel %vm281_vm1, %v600_v2, 0.0 }
 0x11f   : > { %v340_v9 = vsel %vm281_vm1, %v602_v5, 0.0 }
 0x120   : > { %v335_v3 = vadd.f32 %v334_v1, %v333_v0 }
 0x122   : > { %v337_v6 = vadd.f32 %v336_v4, %v335_v3 }
 0x124   : > { %v339_v8 = vadd.f32 %v338_v7, %v337_v6  ;;  %v586_v7 = vld [vmem:[%s735_s2] sm:$0xff]  }
 0x126   : > { %v341_v10 = vadd.f32 %v340_v9, %v339_v8 }
 0x128   : > { %v342_v11 = vrot.slane %v341_v10, 4 }
 0x12a   : > { %v343_v12 = vadd.f32 %v342_v11, %v341_v10 }
 0x12c   : > { %v344_v13 = vrot.slane %v343_v12, 2 }
 0x12e   : > { %v345_v14 = vadd.f32 %v344_v13, %v343_v12 }
 0x130   : > { %v346_v15 = vrot.slane %v345_v14, 1 }
 0x132   : > { %v347_v16 = vadd.f32 %v346_v15, %v345_v14 }
 0x134   : > { %603 = vrcp.f32 %v347_v16 }
 0x13e   : > { %v604_v17 = vpop.eup %603 }
 0x13f   : > { %v695_v18 = vmul.f32 %v604_v17, %v592_v55  ;;  %v349_v19 = vmul.f32 %v604_v17, %v588_v52  ;;  %v352_v20 = vmul.f32 %v604_v17, %v594_v57  ;;  %v350_v21 = vmul.f32 %v604_v17, %v590_v53 }
 0x140   : > { %v697_v22 = vmul.f32 %v604_v17, %v598_v63  ;;  %v353_v23 = vmul.f32 %v604_v17, %v596_v60  ;;  %v699_v24 = vmul.f32 %v604_v17, %v602_v5  ;;  %v701_v25 = vmul.f32 %v604_v17, %v600_v2 }
 0x141   : > { %v363_v26 = vsel %vm281_vm1, %v695_v18, 0.0  ;;  %v357_v27 = vsel %vm281_vm1, %v349_v19, 0.0  ;;  %v366_v28 = vsel %vm281_vm1, %v352_v20, 0.0  ;;  %v360_v29 = vsel %vm281_vm1, %v350_v21, 0.0 }
 0x142   : > { %364 = vadd.xlane.f32.xlu1 %v363_v26  ;;  %358 = vadd.xlane.f32.xlu0 %v357_v27  ;;  %v372_v30 = vsel %vm281_vm1, %v697_v22, 0.0  ;;  %v369_v31 = vsel %vm281_vm1, %v353_v23, 0.0  ;;  %v378_v32 = vsel %vm281_vm1, %v699_v24, 0.0  ;;  %v375_v33 = vsel %vm281_vm1, %v701_v25, 0.0 }
 0x146   : > { %367 = vadd.xlane.f32.xlu1 %v366_v28  ;;  %361 = vadd.xlane.f32.xlu0 %v360_v29 }
 0x14a   : > { %373 = vadd.xlane.f32.xlu1 %v372_v30  ;;  %370 = vadd.xlane.f32.xlu0 %v369_v31 }
 0x14e   : > { %379 = vadd.xlane.f32.xlu1 %v378_v32  ;;  %376 = vadd.xlane.f32.xlu0 %v375_v33 }
 0x1cf   : > { %v365_v35 = vpop.xlane.xlu1 %364  ;;  %v359_v36 = vpop.xlane.xlu0 %358 }
 0x1d0   : > { %v381_v37 = vadd.f32 1e-09, %v359_v36  ;;  %v383_v42 = vadd.f32 1e-09, %v365_v35 }
 0x1d2   : > { %605 = vrcp.f32 %v381_v37 }
 0x1d3   : > { %v368_v38 = vpop.xlane.xlu1 %367  ;;  %v362_v39 = vpop.xlane.xlu0 %361 }
 0x1d4   : > { %v384_v40 = vadd.f32 1e-09, %v368_v38  ;;  %v382_v41 = vadd.f32 1e-09, %v362_v39 }
 0x1d6   : > { %607 = vrcp.f32 %v384_v40 }
 0x1d7   : > { %609 = vrcp.f32 %v382_v41  ;;  %v374_v43 = vpop.xlane.xlu1 %373  ;;  %v371_v44 = vpop.xlane.xlu0 %370 }
 0x1d8   : > { %v386_v45 = vadd.f32 1e-09, %v374_v43  ;;  %v385_v46 = vadd.f32 1e-09, %v371_v44  ;;  %611 = vrcp.f32 %v383_v42 }
 0x1da   : > { %613 = vrcp.f32 %v386_v45 }
 0x1db   : > { %615 = vrcp.f32 %v385_v46  ;;  %v380_v47 = vpop.xlane.xlu1 %379  ;;  %v377_v48 = vpop.xlane.xlu0 %376 }
 0x1dc   : > { %v388_v49 = vadd.f32 1e-09, %v380_v47  ;;  %v387_v50 = vadd.f32 1e-09, %v377_v48  ;;  %v606_v51 = vpop.eup %605 }
 0x1dd   : > { %v390_v54 = vmul.f32 %v606_v51, %v349_v19 }
 0x1de   : > { %617 = vrcp.f32 %v388_v49 }
 0x1df   : > { %619 = vrcp.f32 %v387_v50 }
 0x1e0   : > { %v608_v52 = vpop.eup %607 }
 0x1e1   : > { %v610_v53 = vpop.eup %609  ;;  %v396_v59 = vmul.f32 %v608_v52, %v352_v20 }
 0x1e2   : > { %v392_v55 = vmul.f32 %v610_v53, %v350_v21  ;;  %v612_v56 = vpop.eup %611 }
 0x1e3   : > { %v394_v61 = vmul.f32 %v612_v56, %v695_v18 }
 0x1e4   : > { %v614_v57 = vpop.eup %613  ;;  %v407_v58 = vpack.c.bf16 %v392_v55, %v390_v54 }
 0x1e5   : > { %v616_v60 = vpop.eup %615  ;;  %v408_v63 = vpack.c.bf16 %v396_v59, %v394_v61  ;;  %v400_v1 = vmul.f32 %v614_v57, %v697_v22 }
 0x1e6   : > { %561 = vmatpush3.bf16.msra.mxu1 %v407_v58  ;;  %v398_v0 = vmul.f32 %v616_v60, %v353_v23 }
 0x1e7   : > { %562 = vmatprep.subr.bf16.mxu1 %v629_v34 }
 0x1e8   : > { %v618_v62 = vpop.eup %617  ;;  %v409_v3 = vpack.c.bf16 %v400_v1, %v398_v0 }
 0x1e9   : > { %v620_v2 = vpop.eup %619  ;;  %v404_v5 = vmul.f32 %v618_v62, %v699_v24 }
 0x1ea   : > { %563 = vmatpush3.bf16.msra.mxu1 %v408_v63  ;;  %v402_v4 = vmul.f32 %v620_v2, %v701_v25 }
 0x1eb   : > { %564 = vmatprep.subr.bf16.mxu1 %v629_v34 }
 0x1ec   : > { %v410_v6 = vpack.c.bf16 %v404_v5, %v402_v4 }
 0x1ee   : > { %565 = vmatpush3.bf16.msra.mxu1 %v409_v3 }
 0x1ef   : > { %566 = vmatprep.subr.bf16.mxu1 %v629_v34 }
 0x1f2   : > { %567 = vmatpush3.bf16.msra.mxu1 %v410_v6 }
 0x1f5   : > { %569 = vmatmul.mubr.msk.bf16.vlgmr.msra.gmra.mrb[0].mxu1 %vm281_vm1, %v586_v7 }
 0x2c8   : > { %v453_v8 = vpop.f32.mrb[0].mxu1 }
 0x2c9   : > { %460 = vst.msk [vmem:[%s170_s30] sm:$0xff] %vm281_vm1, %v453_v8  ;;  %v570_v9 = vpop.f32.mrb[1].mxu1 }
 0x2ca   : > { %v456_v10 = vpop.f32.mrb[2].mxu1 }
 0x2cb   : > { %461 = vst.msk [vmem:[%s170_s30 + $0x8] sm:$0xff] %vm281_vm1, %v456_v10  ;;  %v571_v11 = vpop.f32.mrb[3].mxu1 }
 0x2cc PF: > { %s13_s12 = sadd.s32 1, %s627_s12  }
 0x2cd   : > { %p10_p4 = scmp.ge.s32.totalorder %s13_s12, 4  }
 0x2cf   :  { %12 = sbr.rel (!%p10_p4) target bundleno = 1 (0x1), region = 62 }

// kernel: model_forward.17
= control target key start
LH: loop header
LB: loop body
LE: loop exit
PB: predicated region body
PF: predicated region fallthrough
CT: control target
= control target key end

     0   :  { %s953_s13 = smov 0   ;;  %s955_s14 = smov 0   ;;  %s1035_s0 = inlined_call_operand.vmem [shape: f32[2,16,64], index: 0, kind: input, shape index: {}]   ;;  %s1036_s1 = inlined_call_operand.vmem [shape: bf16[16,16], index: 1, kind: input, shape index: {}]   ;;  %s1037_s2 = inlined_call_operand.vmem [shape: f32[16,1], index: 2, kind: input, shape index: {}]   ;;  %s1038_s3 = inlined_call_operand.vmem [shape: bf16[5,16], index: 3, kind: input, shape index: {}]   ;;  %s1039_s4 = inlined_call_operand.vmem [shape: f32[5,1], index: 4, kind: input, shape index: {}]   ;;  %s1040_s5 = inlined_call_operand.vmem [shape: bf16[16,16], index: 5, kind: input, shape index: {}]   ;;  %s1041_s6 = inlined_call_operand.vmem [shape: f32[16,1], index: 6, kind: input, shape index: {}]   ;;  %s1042_s7 = inlined_call_operand.vmem [shape: bf16[5,16], index: 7, kind: input, shape index: {}]   ;;  %s1043_s8 = inlined_call_operand.vmem [shape: f32[5,1], index: 8, kind: input, shape index: {}]   ;;  %s1044_s9 = inlined_call_operand.vmem [shape: f32[2,5,64], index: 9, kind: output, shape index: {0}]   ;;  %s1045_s10 = inlined_call_operand.vmem [shape: f32[2,5,64], index: 10, kind: output, shape index: {1}]  }
   0x1   :  { %s957_s15 = smov 0  }
   0x2 LB: > { %s33_s16 = sadd.s32 1, %s889_s14  ;;  %p790_p0 = scmp.ge.s32.totalorder %s893_s15, 1  ;;  %s893_s15 = sphi %s957_s15, %s21_s15   ;;  %s889_s14 = sphi %s955_s14, %s1047_s14   ;;  %s885_s13 = sphi %s953_s13, %s1046_s13  }
   0x3   : > { %p35_p1 = scmp.ge.s32.totalorder %s33_s16, 2  ;;  %p336_p2 = scmp.lt.s32.totalorder %s893_s15, 3 }
   0x5   : > { %s1049_s16 = smov (%p35_p1, %s33_s16), 0  ;;  %p337_p3 = pnand %p790_p0, %p336_p2 }
   0x6   : > { %p386_p4 = scmp.lt.s32.totalorder (!%p337_p3), %s885_s13, 1  ;;  %v895_v0 = vmov (!%p337_p3), 0.0   ;;  %vm896_vm0 = vmmov (!%p337_p3), 0   ;;  %v414_v1 = vld [vmem:[%s1037_s2] sm:$0xff] (!%p337_p3)  ;;  %v897_v2 = vmov (!%p337_p3), 0   ;;  %v415_v4 = vld [vmem:[%s1037_s2 + $0x8] sm:$0xff] (!%p337_p3) }
   0x7   : > { %340 = sbr.rel (%p337_p3) target bundleno = 517 (0x205), region = 56  ;;  %812 = vmatprep.subr.bf16.mxu0 (!%p337_p3), %v895_v0  ;;  %814 = vmatprep.mubr.msk.bf16.mxu0 (!%p337_p3), %vm896_vm0, %v895_v0  ;;  %v553_v3 = vld [vmem:[%s1041_s6] sm:$0xff] (!%p337_p3)  ;;  %v554_v5 = vld [vmem:[%s1041_s6 + $0x8] sm:$0xff] (!%p337_p3)  ;;  %vm431_vm1 = vcmask (!%p337_p3), 130048   ;;  %vm529_vm2 = vcmask (!%p337_p3), 520192  }
   0x8   : > { %818 = vmatprep.subr.bf16.mxu1 (!%p337_p3), %v895_v0  ;;  %820 = vmatprep.mubr.msk.bf16.mxu1 (!%p337_p3), %vm896_vm0, %v895_v0  ;;  %v865_v9 = vld [vmem:[%s1036_s1] sm:$0xff] (!%p337_p3)  }
   0x9   : > { %863 = vset.pattern.permute.xlu0 (!%p337_p3), %v897_v2  ;;  %864 = vset.pattern.permute.xlu1 (!%p337_p3), %v897_v2  ;;  %v480_v10 = vld [vmem:[%s1039_s4] sm:$0x1f] (!%p337_p3) }
   0xa   : > { %418 = vperm.xlu0 (!%p337_p3), %863, %v414_v1   ;;  %557 = vperm.xlu1 (!%p337_p3), %864, %v553_v3   ;;  %v618_v11 = vld [vmem:[%s1043_s8] sm:$0x1f] (!%p337_p3) }
   0xb   : > { %v866_v12 = vld [vmem:[%s1040_s5] sm:$0xff] (!%p337_p3)  }
   0xc   : > { %v478_v29 = vld [vmem:[%s1038_s3] sm:$0x7] (!%p337_p3) }
   0xd   : > { %v616_v36 = vld [vmem:[%s1042_s7] sm:$0x7] (!%p337_p3) }
   0xe   : > { %s1051_s13 = smov (!%p386_p4, %s885_s13), 1  ;;  %423 = vperm.xlu0 %863, %v415_v4   ;;  %562 = vperm.xlu1 %864, %v554_v5  }
   0xf   : > { %s803_s21 = sshll.u32 %s1051_s13, 4  ;;  %s793_s25 = sshll.u32 %s1051_s13, 3 }
  0x10   : > { %s393_s24 = scalar_lea.vmem %s1035_s0, %s803_s21  ;;  %s407_s28 = scalar_lea.vmem %s1045_s10, %s793_s25 }
  0x11   : > { %v409_v6 = vld [vmem:[%s393_s24] sm:$0xff]  ;;  %v410_v7 = vld [vmem:[%s393_s24 + $0x8] sm:$0xff]  ;;  %s400_s30 = scalar_lea.vmem %s1044_s9, %s793_s25 }
  0x12   : > { %v411_v8 = vpack.c.bf16 %v410_v7, %v409_v6  ;;  %483 = vperm.xlu0 %863, %v480_v10   ;;  %621 = vperm.xlu1 %864, %v618_v11  }
  0x14   : > { %813 = vmatpush3.bf16.msra.mxu0 %v411_v8 }
  0x15   : > { %824 = vmatprep.subr.bf16.mxu0 %v895_v0 }
  0x17   : > { %815 = vmatmul.mubr.msk.bf16.vlgmr.msra.gmra.mrb[0].mxu0 %vm431_vm1, %v865_v9 }
  0x18   : > { %825 = vmatpush3.bf16.msra.mxu0 %v411_v8  ;;  %826 = vmatprep.mubr.msk.bf16.mxu0 %vm896_vm0, %v895_v0 }
  0x1f   : > { %827 = vmatmul.mubr.msk.bf16.vlgmr.msra.gmra.mrb[4].mxu0 %vm431_vm1, %v866_v12 }
  0x89   : > { %v419_v13 = vpop.permute.xlu0 %418  ;;  %v558_v17 = vpop.permute.xlu1 %557 }
  0x8d   : > { %v424_v18 = vpop.permute.xlu0 %423  ;;  %v563_v26 = vpop.permute.xlu1 %562 }
  0x91   : > { %v484_v37 = vpop.permute.xlu0 %483  ;;  %v622_v46 = vpop.permute.xlu1 %621 }
  0xea   : > { %v469_v14 = vpop.f32.mrb[0].mxu0 }
  0xeb   : > { %v470_v15 = vadd.f32 %v469_v14, %v419_v13  ;;  %v816_v16 = vpop.f32.mrb[1].mxu0 }
  0xec   : > { %v472_v19 = vpop.f32.mrb[2].mxu0 }
  0xed   : > { %v473_v20 = vadd.f32 %v472_v19, %v424_v18  ;;  %v817_v21 = vpop.f32.mrb[3].mxu0  ;;  %v476_v22 = vmax.f32 %v470_v15, 0.0 }
  0xef   : > { %v477_v23 = vmax.f32 %v473_v20, 0.0 }
  0xf1   : > { %v479_v24 = vpack.c.bf16 %v477_v23, %v476_v22 }
  0xf2   : > { %v607_v25 = vpop.f32.mrb[4].mxu0 }
  0xf3   : > { %v608_v27 = vadd.f32 %v607_v25, %v558_v17  ;;  %819 = vmatpush3.bf16.msra.mxu1 %v479_v24  ;;  %v828_v28 = vpop.f32.mrb[5].mxu0 }
  0xf4   : > { %v610_v30 = vpop.f32.mrb[6].mxu0  ;;  %830 = vmatprep.subr.bf16.mxu1 %v895_v0 }
  0xf5   : > { %v614_v31 = vmax.f32 %v608_v27, 0.0  ;;  %v611_v32 = vadd.f32 %v610_v30, %v563_v26  ;;  %v829_v33 = vpop.f32.mrb[7].mxu0 }
  0xf6   : > { %821 = vmatmul.mubr.msk.bf16.vlgmr.msra.gmra.mrb[0].mxu1 %vm431_vm1, %v478_v29 }
  0xf7   : > { %v615_v34 = vmax.f32 %v611_v32, 0.0  ;;  %832 = vmatprep.mubr.msk.bf16.mxu1 %vm896_vm0, %v895_v0 }
  0xf9   : > { %v617_v35 = vpack.c.bf16 %v615_v34, %v614_v31 }
  0xfb   : > { %831 = vmatpush3.bf16.msra.mxu1 %v617_v35 }
  0xfe   : > { %833 = vmatmul.mubr.msk.bf16.vlgmr.msra.gmra.mrb[4].mxu1 %vm431_vm1, %v616_v36 }
 0x1c9   : > { %v523_v38 = vpop.f32.mrb[0].mxu1 }
 0x1ca   : > { %v524_v39 = vadd.f32 %v523_v38, %v484_v37  ;;  %v822_v40 = vpop.f32.mrb[1].mxu1 }
 0x1cb   : > { %v526_v41 = vpop.f32.mrb[2].mxu1 }
 0x1cc   : > { %v530_v42 = vsel %vm529_vm2, %v524_v39, -inf  ;;  %v823_v43 = vpop.f32.mrb[3].mxu1 }
 0x1cd   : > { %v531_v44 = vrot.slane %v530_v42, 4 }
 0x1cf   : > { %v532_v45 = vmax.f32 %v530_v42, %v531_v44 }
 0x1d1   : > { %v533_v47 = vrot.slane %v532_v45, 2  ;;  %v661_v48 = vpop.f32.mrb[4].mxu1 }
 0x1d2   : > { %v662_v49 = vadd.f32 %v661_v48, %v622_v46  ;;  %v834_v50 = vpop.f32.mrb[5].mxu1 }
 0x1d3   : > { %v534_v51 = vmax.f32 %v532_v45, %v533_v47  ;;  %v664_v52 = vpop.f32.mrb[6].mxu1 }
 0x1d4   : > { %667 = vst.msk [vmem:[%s407_s28] sm:$0x1f] %vm529_vm2, %v662_v49  ;;  %v835_v53 = vpop.f32.mrb[7].mxu1 }
 0x1d5   : > { %v535_v54 = vrot.slane %v534_v51, 1 }
 0x1d7   : > { %v536_v55 = vmax.f32 %v534_v51, %v535_v54 }
 0x1d9   : > { %v537_v56 = vsub.f32 %v524_v39, %v536_v55 }
 0x1db   : > { %v538_v57 = vmul.f32 1.442695, %v537_v56 }
 0x1dd   : > { %867 = vpow2.f32 %v538_v57 }
 0x1e7   : > { %v868_v58 = vpop.eup %867 }
 0x1e8   : > { %v540_v59 = vsel %vm529_vm2, %v868_v58, 0.0 }
 0x1e9   : > { %v541_v60 = vrot.slane %v540_v59, 4 }
 0x1eb   : > { %v542_v61 = vadd.f32 %v541_v60, %v540_v59 }
 0x1ed   : > { %v543_v62 = vrot.slane %v542_v61, 2 }
 0x1ef   : > { %v544_v63 = vadd.f32 %v543_v62, %v542_v61 }
 0x1f1   : > { %v545_v0 = vrot.slane %v544_v63, 1 }
 0x1f3   : > { %v546_v1 = vadd.f32 %v545_v0, %v544_v63 }
 0x1f5   : > { %869 = vlog2.f32 %v546_v1 }
 0x1ff   : > { %v870_v2 = vpop.eup %869 }
 0x200   : > { %v548_v3 = vmul.f32 0.6931472, %v870_v2 }
 0x202   : > { %v549_v4 = vsub.f32 %v537_v56, %v548_v3 }
 0x204   : > { %550 = vst.msk [vmem:[%s400_s30] sm:$0x1f] %vm529_vm2, %v549_v4 }
 0x205 PF: > { %s21_s15 = sadd.s32 1, %s893_s15   ;;  %s1046_s13 = smov %s889_s14 }
 0x206   : > { %p18_p5 = scmp.ge.s32.totalorder %s21_s15, 4   ;;  %s1047_s14 = smov %s1049_s16 }
 0x208   :  { %20 = sbr.rel (!%p18_p5) target bundleno = 2 (0x2), region = 98 }

</bundles_post_ra>
